<compile_context>
chip_gen: v7x
topology: tpu7x:2x2x1
jax: 0.10.0
libtpu: 0.0.40
codegen_flags: <defaults>
</compile_context>

<pallas_src>
import functools

import jax
import jax.numpy as jnp
import numpy as np
from jax.experimental import pallas as pl
from jax.experimental.pallas import tpu as pltpu

NEG_SLOPE = 0.01                    # nn.LeakyReLU default


def _round_up(v, m):
    return ((v + m - 1) // m) * m


def _select_budgets():
    """VMEM limit / grid_sample output tile per TPU generation.

    v5e/v6e have 128 MiB physical VMEM -> raise the scoped limit and use
    bigger output tiles; v7x (64 MiB) stays at 32 MiB / 512."""
    cap = 64 * 1024 * 1024
    try:
        cap = int(pltpu.get_tpu_info().vmem_capacity_bytes)
    except Exception:
        pass
    if cap >= 96 * 1024 * 1024:          # v5e / v6e
        return 64 * 1024 * 1024, 1024
    return 32 * 1024 * 1024, 512         # v7x (and conservative fallback)


VMEM_LIMIT, TILE_OUT = _select_budgets()


# ---------------------------------------------------------------------------
# Kernel 1: Conv2d(KxK, valid) + MaxPool2d(2) + LeakyReLU, B_TILE images/step.
# ---------------------------------------------------------------------------
def _conv_pool_lrelu_kernel(x_ref, w_ref, b_ref, o_ref, ca_ref,
                            *, k, ci, ho, wo, hp, wp, fused):
    bt = x_ref.shape[0]
    co = o_ref.shape[-1]
    x = x_ref[...]                                        # (BT, H, W, Ci) f32

    if fused:
        # in-kernel im2col: one concat/relayout per step, then a single MXU
        # matmul with K = k*k*Ci -> ~k*k x fewer vmatmul pushes, no partial
        # f32 VPU accumulate-adds, single bf16 cast.
        taps = [x[:, kh:kh + ho, kw:kw + wo, :]
                for kh in range(k) for kw in range(k)]
        patches = jnp.concatenate(taps, axis=-1)          # (BT, Ho, Wo, k*k*Ci)
        patches = patches.reshape(bt * ho * wo, k * k * ci)
        conv = jnp.dot(patches.astype(jnp.bfloat16), w_ref[...],
                       preferred_element_type=jnp.float32)
    else:
        # safety-net path (per-tap dots), used only if the fused kernel fails
        # to lower on an older Mosaic.
        conv = jnp.zeros((bt * ho * wo, co), jnp.float32)
        for kh in range(k):
            for kw in range(k):
                tap = x[:, kh:kh + ho, kw:kw + wo, :].reshape(bt * ho * wo, ci)
                conv = conv + jnp.dot(tap.astype(jnp.bfloat16),
                                      w_ref[kh * k + kw],
                                      preferred_element_type=jnp.float32)

    conv = conv + b_ref[...]                              # (BT*Ho*Wo, Co)
    ca_ref[...] = conv.reshape(bt, ho, wo, co)

    # 2x2 / stride-2 max pool: row pairs via strided reads on the (untiled)
    # H axis, intermediate written back into the SAME scratch (no second
    # scratch buffer), then column pairs via sublane-strided reads.
    r0 = ca_ref[:, pl.ds(0, hp, 2), :, :]
    r1 = ca_ref[:, pl.ds(1, hp, 2), :, :]
    ca_ref[:, pl.ds(0, hp), :, :] = jnp.maximum(r0, r1)
    c0 = ca_ref[:, pl.ds(0, hp), pl.ds(0, wp, 2), :]
    c1 = ca_ref[:, pl.ds(0, hp), pl.ds(1, wp, 2), :]
    pooled = jnp.maximum(c0, c1)                          # (BT, Hp, Wp, Co)

    o_ref[...] = jnp.where(pooled > 0, pooled, NEG_SLOPE * pooled)


def _pick_batch_tile(n, per_item_bytes, budget=8 * 1024 * 1024):
    # biggest divisor of n that fits the VMEM budget while keeping >=2 grid
    # steps (v7x megacore needs >=2 parallel steps).
    cap = max(1, budget // max(per_item_bytes, 1))
    best = 1
    for d in range(1, n + 1):
        if n % d == 0 and d <= cap and n // d >= 2:
            best = d
    return best


def conv_pool_lrelu(x_nhwc, w, b):
    n, h, wdt, ci = x_nhwc.shape
    co, _, k, _ = w.shape
    ho, wo = h - k + 1, wdt - k + 1
    hp, wp = ho // 2, wo // 2

    w_kkc = jnp.transpose(w, (2, 3, 1, 0))                    # (k, k, Ci, Co)
    w_mat = w_kkc.reshape(k * k * ci, co).astype(jnp.bfloat16)
    w_taps = w_kkc.reshape(k * k, ci, co).astype(jnp.bfloat16)
    bias = b.reshape(1, co).astype(jnp.float32)

    per_item = 4 * (2 * h * wdt * ci + ho * wo * co + 2 * hp * wp * co)
    bt = _pick_batch_tile(n, per_item)
    cost = pl.CostEstimate(
        flops=2 * n * ho * wo * k * k * ci * co,
        transcendentals=0,
        bytes_accessed=4 * (x_nhwc.size + n * hp * wp * co) + 2 * w_mat.size)

    def call(fused):
        w_arg = w_mat if fused else w_taps
        w_map = (lambda i: (0, 0)) if fused else (lambda i: (0, 0, 0))
        kernel = functools.partial(_conv_pool_lrelu_kernel, k=k, ci=ci,
                                   ho=ho, wo=wo, hp=hp, wp=wp, fused=fused)
        return pl.pallas_call(
            kernel,
            out_shape=jax.ShapeDtypeStruct((n, hp, wp, co), jnp.float32),
            grid=(n // bt,),
            in_specs=[
                pl.BlockSpec((bt, h, wdt, ci), lambda i: (i, 0, 0, 0)),
                pl.BlockSpec(w_arg.shape, w_map),
                pl.BlockSpec(bias.shape, lambda i: (0, 0)),
            ],
            out_specs=pl.BlockSpec((bt, hp, wp, co), lambda i: (i, 0, 0, 0)),
            scratch_shapes=[pltpu.VMEM((bt, ho, wo, co), jnp.float32)],
            compiler_params=pltpu.CompilerParams(
                dimension_semantics=("parallel",),
                vmem_limit_bytes=VMEM_LIMIT),
            cost_estimate=cost,
        )(x_nhwc, w_arg, bias)

    try:
        return call(True)
    except Exception:
        return call(False)


# ---------------------------------------------------------------------------
# Kernel 2: the localizer FC head (Linear -> LeakyReLU -> Linear).  Tiny; kept
# in f32 for exact parity of theta with the reference module.
# ---------------------------------------------------------------------------
def _fc_kernel(x_ref, w1_ref, b1_ref, w2_ref, b2_ref, o_ref):
    h = jnp.dot(x_ref[...], w1_ref[...],
                preferred_element_type=jnp.float32) + b1_ref[...]
    h = jnp.where(h > 0, h, NEG_SLOPE * h)
    o_ref[...] = jnp.dot(h, w2_ref[...],
                         preferred_element_type=jnp.float32) + b2_ref[...]


def fc_head(feat, w1t, b1, w2t, b2):
    n = feat.shape[0]
    return pl.pallas_call(
        _fc_kernel,
        out_shape=jax.ShapeDtypeStruct((n, w2t.shape[1]), jnp.float32),
        in_specs=[pl.BlockSpec(memory_space=pltpu.MemorySpace.VMEM)
                  for _ in range(5)],
        out_specs=pl.BlockSpec(memory_space=pltpu.MemorySpace.VMEM),
        compiler_params=pltpu.CompilerParams(vmem_limit_bytes=VMEM_LIMIT),
    )(feat, w1t, b1, w2t, b2)


# ---------------------------------------------------------------------------
# Kernel 3: perspective grid generation + F.grid_sample
#           (bilinear, align_corners=False, padding_mode='zeros')
# Separable formulation: y[c,p] = sum_{a,b} x[c,a,b] * Wa[a,p] * Wb[b,p]
#   stage 1: (C*A_pad, B) @ Wb(B, TILE) on the MXU (bf16 -> f32 acc),
#            contracting the LARGER spatial axis for better MXU depth fill
#   stage 2: vectorized weighted sublane reduction over A_pad (f32, VPU/XLU),
#            one lane-dense (C, TILE) store
# Out-of-range corners never hit real data -> exact 'zeros' padding.
# ---------------------------------------------------------------------------
def _perspective_sample_kernel(theta_ref, x_ref, o_ref,
                               *, c, hin, win, hout, wout, tile, a_pad, swap):
    b = pl.program_id(0)
    t = pl.program_id(1)

    # flat output-pixel index of this tile, row-major over (hout, wout)
    p = (t * tile
         + jax.lax.broadcasted_iota(jnp.int32, (1, tile), 1)).astype(jnp.float32)
    oh = jnp.floor(p / wout)
    ow = p - oh * wout
    xs = (2.0 * ow - (wout - 1)) / wout          # linspace(-1,1,w) * (w-1)/w
    ys = (2.0 * oh - (hout - 1)) / hout

    t00 = theta_ref[b, 0]; t01 = theta_ref[b, 1]; t02 = theta_ref[b, 2]
    t10 = theta_ref[b, 3]; t11 = theta_ref[b, 4]; t12 = theta_ref[b, 5]
    t20 = theta_ref[b, 6]; t21 = theta_ref[b, 7]; t22 = theta_ref[b, 8]

    gx = t00 * xs + t01 * ys + t02
    gy = t10 * xs + t11 * ys + t12
    gz = t20 * xs + t21 * ys + t22
    eps = 1e-8                                   # guard the homogeneous divide
    gz = jnp.where(jnp.abs(gz) < eps, jnp.where(gz < 0.0, -eps, eps), gz)
    # NOTE: full-precision divide on purpose; approx reciprocal perturbs the
    # sample coordinates (and thus the bilinear weights) beyond torch parity.
    inv = 1.0 / gz
    gx = gx * inv
    gy = gy * inv

    # un-normalize (align_corners=False): ((coord + 1) * size - 1) / 2
    ix = ((gx + 1.0) * win - 1.0) * 0.5
    iy = ((gy + 1.0) * hin - 1.0) * 0.5
    ix0f = jnp.floor(ix)
    iy0f = jnp.floor(iy)
    fx = ix - ix0f
    fy = iy - iy0f
    # clamp before the int32 cast; clamped-out corners only ever hit zero rows
    ix0 = jnp.clip(ix0f, -2.0, win + 1.0).astype(jnp.int32)
    iy0 = jnp.clip(iy0f, -2.0, hin + 1.0).astype(jnp.int32)

    if swap:      # contract over the (larger) H axis on the MXU
        b_size, b_i0, b_f = hin, iy0, fy
        a_i0, a_f = ix0, fx
    else:         # contract over the W axis
        b_size, b_i0, b_f = win, ix0, fx
        a_i0, a_f = iy0, fy

    qb = jax.lax.broadcasted_iota(jnp.int32, (b_size, tile), 0)
    wb = (jnp.where(qb == b_i0, 1.0 - b_f, 0.0)
          + jnp.where(qb == b_i0 + 1, b_f, 0.0))            # (B, TILE)
    qa = jax.lax.broadcasted_iota(jnp.int32, (a_pad, tile), 0)
    wa = (jnp.where(qa == a_i0, 1.0 - a_f, 0.0)
          + jnp.where(qa == a_i0 + 1, a_f, 0.0))            # (A_pad, TILE)

    # stage 1: MXU contraction (image pre-cast to bf16 in HBM, f32 accumulate)
    tm = jnp.dot(x_ref[0], wb.astype(jnp.bfloat16),
                 preferred_element_type=jnp.float32)        # (C*A_pad, TILE)
    # stage 2: vectorized weighted reduction over A_pad (kept f32), single
    # lane-dense (C, TILE) store; A_pad % 8 == 0 so the reshape is free.
    tm = tm.reshape(c, a_pad, tile)
    o_ref[0] = jnp.sum(tm * wa[None, :, :], axis=1)


def perspective_grid_sample(x, theta, out_size, tile_out=None):
    n, c, hin, win = x.shape
    hout, wout = out_size
    hw_out = hout * wout
    tile = min(TILE_OUT if tile_out is None else tile_out,
               _round_up(hw_out, 128))
    n_tiles = pl.cdiv(hw_out, tile)
    hw_pad = n_tiles * tile

    # contract the larger spatial axis on the MXU; pad the other to a sublane
    # multiple (zero rows -> still exact 'zeros' padding) and cast the
    # grid-invariant image to bf16 once in HBM (halves DMA & VMEM residency).
    swap = hin > win
    ximg = jnp.transpose(x, (0, 1, 3, 2)) if swap else x     # (n, c, A, B)
    a_size, b_size = ximg.shape[2], ximg.shape[3]
    a_pad = _round_up(a_size, 8)
    if a_pad != a_size:
        ximg = jnp.pad(ximg, ((0, 0), (0, 0), (0, a_pad - a_size), (0, 0)))
    x_rows = ximg.reshape(n, c * a_pad, b_size).astype(jnp.bfloat16)
    theta_flat = theta.reshape(n, 9).astype(jnp.float32)

    kernel = functools.partial(_perspective_sample_kernel, c=c, hin=hin,
                               win=win, hout=hout, wout=wout, tile=tile,
                               a_pad=a_pad, swap=swap)
    cost = pl.CostEstimate(
        flops=2 * n * hw_pad * c * a_pad * (b_size + 2),
        transcendentals=n * hw_pad,
        bytes_accessed=2 * x_rows.size + 4 * n * c * hw_pad
        + 4 * theta_flat.size)
    y_pad = pl.pallas_call(
        kernel,
        out_shape=jax.ShapeDtypeStruct((n, c, hw_pad), jnp.float32),
        grid=(n, n_tiles),
        in_specs=[
            pl.BlockSpec(memory_space=pltpu.MemorySpace.SMEM),       # theta
            pl.BlockSpec((1, c * a_pad, b_size), lambda b, t: (b, 0, 0)),
        ],
        out_specs=pl.BlockSpec((1, c, tile), lambda b, t: (b, 0, t)),
        compiler_params=pltpu.CompilerParams(
            dimension_semantics=("parallel", "parallel"),
            vmem_limit_bytes=VMEM_LIMIT),
        cost_estimate=cost,
    )(theta_flat, x_rows)
    # padded tail pixels of the last tile are sliced off here (wrapper-side)
    return y_pad[:, :, :hw_out].reshape(n, c, hout, wout)


# ---------------------------------------------------------------------------
# Plain-JAX glue: layer layout, parameter setup, forward pass
# ---------------------------------------------------------------------------
def localizer_layout(in_channels, in_size, kernel_size=5, out_channels_incr=6,
                     scaling=2):
    c = in_channels
    n, m = min(in_size), max(in_size)
    convs = []
    while n >= scaling + kernel_size - 1:
        convs.append((c, c + out_channels_incr))
        n = (n - (kernel_size - 1)) // scaling
        m = (m - (kernel_size - 1)) // scaling
        c += out_channels_incr
    return convs, c, n, m


def init_params(key, in_channels, in_size, kernel_size=5, matrix_size=(3, 3)):
    convs, c, n, m = localizer_layout(in_channels, in_size, kernel_size)
    params = {"convs": []}
    for (ci, co) in convs:
        key, kw_, kb_ = jax.random.split(key, 3)
        w = jax.random.normal(kw_, (co, ci, kernel_size, kernel_size),
                              jnp.float32) * 0.05
        b = jax.random.normal(kb_, (co,), jnp.float32) * 0.05
        params["convs"].append((w, b))
    area = matrix_size[0] * matrix_size[1]
    key, k1, k2 = jax.random.split(key, 3)
    params["fc1_w"] = jax.random.normal(k1, (4 * area, c * n * m),
                                        jnp.float32) * 0.05
    params["fc1_b"] = jax.random.normal(k2, (4 * area,), jnp.float32) * 0.05
    # Localizer.__init__: final Linear weight zeroed, bias = 2 * eye(3).view(-1)
    params["fc2_w"] = jnp.zeros((area, 4 * area), jnp.float32)
    params["fc2_b"] = (2.0 * jnp.eye(*matrix_size, dtype=jnp.float32)).reshape(-1)
    return params


def spatial_projector_forward(x, params, out_size=None, include_theta=False):
    assert x.ndim == 4
    n = x.shape[0]
    h_in, w_in = x.shape[2], x.shape[3]

    # Localizer body: Conv2d -> MaxPool2d(2) -> LeakyReLU blocks (NHWC)
    cur = jnp.transpose(x, (0, 2, 3, 1))
    for (w, b) in params["convs"]:
        cur = conv_pool_lrelu(cur, w, b)                  # (N, Hp, Wp, Co)

    # Localizer FC head (torch Flatten runs over (C, H, W))
    feat = jnp.transpose(cur, (0, 3, 1, 2)).reshape(n, -1)
    theta_flat = fc_head(feat,
                         params["fc1_w"].T, params["fc1_b"].reshape(1, -1),
                         params["fc2_w"].T, params["fc2_b"].reshape(1, -1))
    theta = theta_flat.reshape(n, 3, 3)

    # perspective grid + grid_sample
    hw = out_size if out_size is not None else (h_in, w_in)
    y = perspective_grid_sample(x, theta, hw)
    if include_theta:
        return y, theta
    return y


# TODO(synk): SpatialProjector.get_matrix (host-side torch.linalg.solve of an
# 8x8 system) is not used in forward() and is not translated to Pallas.

if __name__ == "__main__":
    key = jax.random.PRNGKey(0)
    k_x, k_p = jax.random.split(key)
    in_channels, in_size = 4, (16, 16)
    x = jax.random.normal(k_x, (2, in_channels) + in_size, jnp.float32)
    params = init_params(k_p, in_channels, in_size)

    y, theta = spatial_projector_forward(x, params, include_theta=True)
    y = jax.block_until_ready(y)

    assert y.shape == x.shape
    # With the reference init (zeroed final FC weight, bias = 2*I), theta is
    # exactly 2*I, which after the homogeneous divide is an identity warp, so
    # grid_sample must reproduce the input (up to bf16 rounding of the image).
    np.testing.assert_allclose(np.asarray(theta),
                               np.tile(2.0 * np.eye(3, dtype=np.float32),
                                       (2, 1, 1)), atol=1e-5)
    np.testing.assert_allclose(np.asarray(y), np.asarray(x),
                               atol=1e-2, rtol=1e-2)
    print("KERNEL_OK")
</pallas_src>

<mosaic_0001>
module attributes {stable_mosaic.version = 11 : i64} {
  func.func @_conv_pool_lrelu_kernel(%arg0: i32, %arg1: memref<1x16x16x4xf32, #tpu.memory_space<vmem>>, %arg2: memref<100x10xbf16, #tpu.memory_space<vmem>>, %arg3: memref<1x10xf32, #tpu.memory_space<vmem>>, %arg4: memref<1x6x6x10xf32, #tpu.memory_space<vmem>>, %arg5: memref<1x12x12x10xf32, #tpu.memory_space<vmem>>) attributes {dimension_semantics = [#tpu.dimension_semantics<parallel>], iteration_bounds = array<i64: 2>, scalar_prefetch = 0 : i64, scratch_operands = 1 : i64, tpu.core_type = #tpu.core_type<tc>, window_params = [{transform_indices = @transform_0, window_bounds = array<i64: 1, 16, 16, 4>}, {pipeline_mode = #tpu.pipeline_mode<synchronous>, transform_indices = @transform_1, window_bounds = array<i64: 100, 10>}, {pipeline_mode = #tpu.pipeline_mode<synchronous>, transform_indices = @transform_2, window_bounds = array<i64: 1, 10>}, {transform_indices = @transform_3, window_bounds = array<i64: 1, 6, 6, 10>}]} {
    %c0 = arith.constant 0 : index
    %c0_0 = arith.constant 0 : index
    %c0_1 = arith.constant 0 : index
    %c0_2 = arith.constant 0 : index
    %0 = vector.load %arg1[%c0, %c0_0, %c0_1, %c0_2] : memref<1x16x16x4xf32, #tpu.memory_space<vmem>>, vector<1x16x16x4xf32>
    %1 = vector.extract_strided_slice %0 {offsets = [0, 0, 0, 0], sizes = [1, 12, 12, 4], strides = [1, 1, 1, 1]} : vector<1x16x16x4xf32> to vector<1x12x12x4xf32>
    %2 = vector.extract_strided_slice %0 {offsets = [0, 0, 1, 0], sizes = [1, 12, 12, 4], strides = [1, 1, 1, 1]} : vector<1x16x16x4xf32> to vector<1x12x12x4xf32>
    %3 = vector.extract_strided_slice %0 {offsets = [0, 0, 2, 0], sizes = [1, 12, 12, 4], strides = [1, 1, 1, 1]} : vector<1x16x16x4xf32> to vector<1x12x12x4xf32>
    %4 = vector.extract_strided_slice %0 {offsets = [0, 0, 3, 0], sizes = [1, 12, 12, 4], strides = [1, 1, 1, 1]} : vector<1x16x16x4xf32> to vector<1x12x12x4xf32>
    %5 = vector.extract_strided_slice %0 {offsets = [0, 0, 4, 0], sizes = [1, 12, 12, 4], strides = [1, 1, 1, 1]} : vector<1x16x16x4xf32> to vector<1x12x12x4xf32>
    %6 = vector.extract_strided_slice %0 {offsets = [0, 1, 0, 0], sizes = [1, 12, 12, 4], strides = [1, 1, 1, 1]} : vector<1x16x16x4xf32> to vector<1x12x12x4xf32>
    %7 = vector.extract_strided_slice %0 {offsets = [0, 1, 1, 0], sizes = [1, 12, 12, 4], strides = [1, 1, 1, 1]} : vector<1x16x16x4xf32> to vector<1x12x12x4xf32>
    %8 = vector.extract_strided_slice %0 {offsets = [0, 1, 2, 0], sizes = [1, 12, 12, 4], strides = [1, 1, 1, 1]} : vector<1x16x16x4xf32> to vector<1x12x12x4xf32>
    %9 = vector.extract_strided_slice %0 {offsets = [0, 1, 3, 0], sizes = [1, 12, 12, 4], strides = [1, 1, 1, 1]} : vector<1x16x16x4xf32> to vector<1x12x12x4xf32>
    %10 = vector.extract_strided_slice %0 {offsets = [0, 1, 4, 0], sizes = [1, 12, 12, 4], strides = [1, 1, 1, 1]} : vector<1x16x16x4xf32> to vector<1x12x12x4xf32>
    %11 = vector.extract_strided_slice %0 {offsets = [0, 2, 0, 0], sizes = [1, 12, 12, 4], strides = [1, 1, 1, 1]} : vector<1x16x16x4xf32> to vector<1x12x12x4xf32>
    %12 = vector.extract_strided_slice %0 {offsets = [0, 2, 1, 0], sizes = [1, 12, 12, 4], strides = [1, 1, 1, 1]} : vector<1x16x16x4xf32> to vector<1x12x12x4xf32>
    %13 = vector.extract_strided_slice %0 {offsets = [0, 2, 2, 0], sizes = [1, 12, 12, 4], strides = [1, 1, 1, 1]} : vector<1x16x16x4xf32> to vector<1x12x12x4xf32>
    %14 = vector.extract_strided_slice %0 {offsets = [0, 2, 3, 0], sizes = [1, 12, 12, 4], strides = [1, 1, 1, 1]} : vector<1x16x16x4xf32> to vector<1x12x12x4xf32>
    %15 = vector.extract_strided_slice %0 {offsets = [0, 2, 4, 0], sizes = [1, 12, 12, 4], strides = [1, 1, 1, 1]} : vector<1x16x16x4xf32> to vector<1x12x12x4xf32>
    %16 = vector.extract_strided_slice %0 {offsets = [0, 3, 0, 0], sizes = [1, 12, 12, 4], strides = [1, 1, 1, 1]} : vector<1x16x16x4xf32> to vector<1x12x12x4xf32>
    %17 = vector.extract_strided_slice %0 {offsets = [0, 3, 1, 0], sizes = [1, 12, 12, 4], strides = [1, 1, 1, 1]} : vector<1x16x16x4xf32> to vector<1x12x12x4xf32>
    %18 = vector.extract_strided_slice %0 {offsets = [0, 3, 2, 0], sizes = [1, 12, 12, 4], strides = [1, 1, 1, 1]} : vector<1x16x16x4xf32> to vector<1x12x12x4xf32>
    %19 = vector.extract_strided_slice %0 {offsets = [0, 3, 3, 0], sizes = [1, 12, 12, 4], strides = [1, 1, 1, 1]} : vector<1x16x16x4xf32> to vector<1x12x12x4xf32>
    %20 = vector.extract_strided_slice %0 {offsets = [0, 3, 4, 0], sizes = [1, 12, 12, 4], strides = [1, 1, 1, 1]} : vector<1x16x16x4xf32> to vector<1x12x12x4xf32>
    %21 = vector.extract_strided_slice %0 {offsets = [0, 4, 0, 0], sizes = [1, 12, 12, 4], strides = [1, 1, 1, 1]} : vector<1x16x16x4xf32> to vector<1x12x12x4xf32>
    %22 = vector.extract_strided_slice %0 {offsets = [0, 4, 1, 0], sizes = [1, 12, 12, 4], strides = [1, 1, 1, 1]} : vector<1x16x16x4xf32> to vector<1x12x12x4xf32>
    %23 = vector.extract_strided_slice %0 {offsets = [0, 4, 2, 0], sizes = [1, 12, 12, 4], strides = [1, 1, 1, 1]} : vector<1x16x16x4xf32> to vector<1x12x12x4xf32>
    %24 = vector.extract_strided_slice %0 {offsets = [0, 4, 3, 0], sizes = [1, 12, 12, 4], strides = [1, 1, 1, 1]} : vector<1x16x16x4xf32> to vector<1x12x12x4xf32>
    %25 = vector.extract_strided_slice %0 {offsets = [0, 4, 4, 0], sizes = [1, 12, 12, 4], strides = [1, 1, 1, 1]} : vector<1x16x16x4xf32> to vector<1x12x12x4xf32>
    %26 = tpu.concatenate %1, %2, %3, %4, %5, %6, %7, %8, %9, %10, %11, %12, %13, %14, %15, %16 in 3 : vector<1x12x12x4xf32>, vector<1x12x12x4xf32>, vector<1x12x12x4xf32>, vector<1x12x12x4xf32>, vector<1x12x12x4xf32>, vector<1x12x12x4xf32>, vector<1x12x12x4xf32>, vector<1x12x12x4xf32>, vector<1x12x12x4xf32>, vector<1x12x12x4xf32>, vector<1x12x12x4xf32>, vector<1x12x12x4xf32>, vector<1x12x12x4xf32>, vector<1x12x12x4xf32>, vector<1x12x12x4xf32>, vector<1x12x12x4xf32> -> vector<1x12x12x64xf32>
    %27 = tpu.concatenate %17, %18, %19, %20, %21, %22, %23, %24, %25 in 3 : vector<1x12x12x4xf32>, vector<1x12x12x4xf32>, vector<1x12x12x4xf32>, vector<1x12x12x4xf32>, vector<1x12x12x4xf32>, vector<1x12x12x4xf32>, vector<1x12x12x4xf32>, vector<1x12x12x4xf32>, vector<1x12x12x4xf32> -> vector<1x12x12x36xf32>
    %28 = tpu.concatenate %26, %27 in 3 : vector<1x12x12x64xf32>, vector<1x12x12x36xf32> -> vector<1x12x12x100xf32>
    %29 = vector.shape_cast %28 : vector<1x12x12x100xf32> to vector<144x100xf32>
    %30 = arith.truncf %29 : vector<144x100xf32> to vector<144x100xbf16>
    %c0_3 = arith.constant 0 : index
    %c0_4 = arith.constant 0 : index
    %31 = vector.load %arg2[%c0_3, %c0_4] : memref<100x10xbf16, #tpu.memory_space<vmem>>, vector<100x10xbf16>
    %cst = arith.constant dense<0.000000e+00> : vector<144x10xf32>
    %32 = tpu.matmul %30, %31, %cst {dimension_numbers = #tpu.dot_dimension_numbers<[1], [0], [0], [1], [0, 0, 1, 1], [], []>} : vector<144x100xbf16>, vector<100x10xbf16>, vector<144x10xf32> -> vector<144x10xf32>
    %c0_5 = arith.constant 0 : index
    %c0_6 = arith.constant 0 : index
    %33 = vector.load %arg3[%c0_5, %c0_6] : memref<1x10xf32, #tpu.memory_space<vmem>>, vector<1x10xf32>
    %34 = vector.broadcast %33 : vector<1x10xf32> to vector<144x10xf32>
    %35 = arith.addf %32, %34 : vector<144x10xf32>
    %36 = vector.shape_cast %35 : vector<144x10xf32> to vector<1x12x12x10xf32>
    %c0_7 = arith.constant 0 : index
    %c0_8 = arith.constant 0 : index
    %c0_9 = arith.constant 0 : index
    %c0_10 = arith.constant 0 : index
    %37 = vector.load %arg5[%c0_7, %c0_8, %c0_9, %c0_10] : memref<1x12x12x10xf32, #tpu.memory_space<vmem>>, vector<1x12x12x10xf32>
    tpu.vector_store %arg5[%c0_7, %c0_8, %c0_9, %c0_10], %36 {strides = array<i32>} : memref<1x12x12x10xf32, #tpu.memory_space<vmem>>, vector<1x12x12x10xf32>,
    %c0_11 = arith.constant 0 : index
    %c0_12 = arith.constant 0 : index
    %c0_13 = arith.constant 0 : index
    %c0_14 = arith.constant 0 : index
    %38 = tpu.strided_load %arg5[%c0_11, %c0_12, %c0_13, %c0_14] {strides = array<i32: 1, 2, 1, 1>} : memref<1x12x12x10xf32, #tpu.memory_space<vmem>>, vector<1x6x12x10xf32>
    %c0_15 = arith.constant 0 : index
    %c1 = arith.constant 1 : index
    %c0_16 = arith.constant 0 : index
    %c0_17 = arith.constant 0 : index
    %39 = tpu.strided_load %arg5[%c0_15, %c1, %c0_16, %c0_17] {strides = array<i32: 1, 2, 1, 1>} : memref<1x12x12x10xf32, #tpu.memory_space<vmem>>, vector<1x6x12x10xf32>
    %40 = arith.maximumf %38, %39 : vector<1x6x12x10xf32>
    %c0_18 = arith.constant 0 : index
    %c0_19 = arith.constant 0 : index
    %c0_20 = arith.constant 0 : index
    %c0_21 = arith.constant 0 : index
    %41 = vector.load %arg5[%c0_18, %c0_19, %c0_20, %c0_21] : memref<1x12x12x10xf32, #tpu.memory_space<vmem>>, vector<1x6x12x10xf32>
    tpu.vector_store %arg5[%c0_18, %c0_19, %c0_20, %c0_21], %40 {strides = array<i32>} : memref<1x12x12x10xf32, #tpu.memory_space<vmem>>, vector<1x6x12x10xf32>,
    %c0_22 = arith.constant 0 : index
    %c0_23 = arith.constant 0 : index
    %c0_24 = arith.constant 0 : index
    %c0_25 = arith.constant 0 : index
    %42 = tpu.strided_load %arg5[%c0_22, %c0_23, %c0_24, %c0_25] {strides = array<i32: 1, 1, 2, 1>} : memref<1x12x12x10xf32, #tpu.memory_space<vmem>>, vector<1x6x6x10xf32>
    %c0_26 = arith.constant 0 : index
    %c0_27 = arith.constant 0 : index
    %c1_28 = arith.constant 1 : index
    %c0_29 = arith.constant 0 : index
    %43 = tpu.strided_load %arg5[%c0_26, %c0_27, %c1_28, %c0_29] {strides = array<i32: 1, 1, 2, 1>} : memref<1x12x12x10xf32, #tpu.memory_space<vmem>>, vector<1x6x6x10xf32>
    %44 = arith.maximumf %42, %43 : vector<1x6x6x10xf32>
    %cst_30 = arith.constant 0.000000e+00 : f32
    %45 = vector.broadcast %cst_30 : f32 to vector<1x6x6x10xf32>
    %46 = arith.cmpf ogt, %44, %45 : vector<1x6x6x10xf32>
    %cst_31 = arith.constant 0.00999999977 : f32
    %47 = vector.broadcast %cst_31 : f32 to vector<1x6x6x10xf32>
    %48 = arith.mulf %47, %44 : vector<1x6x6x10xf32>
    %49 = arith.select %46, %44, %48 : vector<1x6x6x10xi1>, vector<1x6x6x10xf32>
    %c0_32 = arith.constant 0 : index
    %c0_33 = arith.constant 0 : index
    %c0_34 = arith.constant 0 : index
    %c0_35 = arith.constant 0 : index
    %50 = vector.load %arg4[%c0_32, %c0_33, %c0_34, %c0_35] : memref<1x6x6x10xf32, #tpu.memory_space<vmem>>, vector<1x6x6x10xf32>
    tpu.vector_store %arg4[%c0_32, %c0_33, %c0_34, %c0_35], %49 {strides = array<i32>} : memref<1x6x6x10xf32, #tpu.memory_space<vmem>>, vector<1x6x6x10xf32>,
    return
  }
  func.func @transform_0(%arg0: i32) -> (i32, i32, i32, i32) {
    %c0_i32 = arith.constant 0 : i32
    %c0_i32_0 = arith.constant 0 : i32
    %c0_i32_1 = arith.constant 0 : i32
    %c0_i32_2 = arith.constant 0 : i32
    return %arg0, %c0_i32, %c0_i32_0, %c0_i32_1 : i32, i32, i32, i32
  }
  func.func @transform_1(%arg0: i32) -> (i32, i32) {
    %c0_i32 = arith.constant 0 : i32
    %c0_i32_0 = arith.constant 0 : i32
    %c0_i32_1 = arith.constant 0 : i32
    return %c0_i32, %c0_i32_0 : i32, i32
  }
  func.func @transform_2(%arg0: i32) -> (i32, i32) {
    %c0_i32 = arith.constant 0 : i32
    %c0_i32_0 = arith.constant 0 : i32
    %c0_i32_1 = arith.constant 0 : i32
    return %c0_i32, %c0_i32_0 : i32, i32
  }
  func.func @transform_3(%arg0: i32) -> (i32, i32, i32, i32) {
    %c0_i32 = arith.constant 0 : i32
    %c0_i32_0 = arith.constant 0 : i32
    %c0_i32_1 = arith.constant 0 : i32
    %c0_i32_2 = arith.constant 0 : i32
    return %arg0, %c0_i32, %c0_i32_0, %c0_i32_1 : i32, i32, i32, i32
  }
}

module attributes {stable_mosaic.version = 11 : i64} {
  func.func @_conv_pool_lrelu_kernel(%arg0: i32, %arg1: memref<1x16x16x4xf32, #tpu.memory_space<vmem>>, %arg2: memref<25x4x10xbf16, #tpu.memory_space<vmem>>, %arg3: memref<1x10xf32, #tpu.memory_space<vmem>>, %arg4: memref<1x6x6x10xf32, #tpu.memory_space<vmem>>, %arg5: memref<1x12x12x10xf32, #tpu.memory_space<vmem>>) attributes {dimension_semantics = [#tpu.dimension_semantics<parallel>], iteration_bounds = array<i64: 2>, scalar_prefetch = 0 : i64, scratch_operands = 1 : i64, tpu.core_type = #tpu.core_type<tc>, window_params = [{transform_indices = @transform_0, window_bounds = array<i64: 1, 16, 16, 4>}, {pipeline_mode = #tpu.pipeline_mode<synchronous>, transform_indices = @transform_1, window_bounds = array<i64: 25, 4, 10>}, {pipeline_mode = #tpu.pipeline_mode<synchronous>, transform_indices = @transform_2, window_bounds = array<i64: 1, 10>}, {transform_indices = @transform_3, window_bounds = array<i64: 1, 6, 6, 10>}]} {
    %c0 = arith.constant 0 : index
    %c0_0 = arith.constant 0 : index
    %c0_1 = arith.constant 0 : index
    %c0_2 = arith.constant 0 : index
    %0 = vector.load %arg1[%c0, %c0_0, %c0_1, %c0_2] : memref<1x16x16x4xf32, #tpu.memory_space<vmem>>, vector<1x16x16x4xf32>
    %cst = arith.constant 0.000000e+00 : f32
    %1 = vector.broadcast %cst : f32 to vector<144x10xf32>
    %2 = vector.extract_strided_slice %0 {offsets = [0, 0, 0, 0], sizes = [1, 12, 12, 4], strides = [1, 1, 1, 1]} : vector<1x16x16x4xf32> to vector<1x12x12x4xf32>
    %3 = vector.shape_cast %2 : vector<1x12x12x4xf32> to vector<144x4xf32>
    %4 = arith.truncf %3 : vector<144x4xf32> to vector<144x4xbf16>
    %c0_3 = arith.constant 0 : index
    %c0_4 = arith.constant 0 : index
    %c0_5 = arith.constant 0 : index
    %5 = vector.load %arg2[%c0_3, %c0_4, %c0_5] : memref<25x4x10xbf16, #tpu.memory_space<vmem>>, vector<1x4x10xbf16>
    %6 = vector.shape_cast %5 : vector<1x4x10xbf16> to vector<4x10xbf16>
    %cst_6 = arith.constant dense<0.000000e+00> : vector<144x10xf32>
    %7 = tpu.matmul %4, %6, %cst_6 {dimension_numbers = #tpu.dot_dimension_numbers<[1], [0], [0], [1], [0, 0, 1, 1], [], []>} : vector<144x4xbf16>, vector<4x10xbf16>, vector<144x10xf32> -> vector<144x10xf32>
    %8 = arith.addf %1, %7 : vector<144x10xf32>
    %9 = vector.extract_strided_slice %0 {offsets = [0, 0, 1, 0], sizes = [1, 12, 12, 4], strides = [1, 1, 1, 1]} : vector<1x16x16x4xf32> to vector<1x12x12x4xf32>
    %10 = vector.shape_cast %9 : vector<1x12x12x4xf32> to vector<144x4xf32>
    %11 = arith.truncf %10 : vector<144x4xf32> to vector<144x4xbf16>
    %c1 = arith.constant 1 : index
    %c0_7 = arith.constant 0 : index
    %c0_8 = arith.constant 0 : index
    %12 = vector.load %arg2[%c1, %c0_7, %c0_8] : memref<25x4x10xbf16, #tpu.memory_space<vmem>>, vector<1x4x10xbf16>
    %13 = vector.shape_cast %12 : vector<1x4x10xbf16> to vector<4x10xbf16>
    %cst_9 = arith.constant dense<0.000000e+00> : vector<144x10xf32>
    %14 = tpu.matmul %11, %13, %cst_9 {dimension_numbers = #tpu.dot_dimension_numbers<[1], [0], [0], [1], [0, 0, 1, 1], [], []>} : vector<144x4xbf16>, vector<4x10xbf16>, vector<144x10xf32> -> vector<144x10xf32>
    %15 = arith.addf %8, %14 : vector<144x10xf32>
    %16 = vector.extract_strided_slice %0 {offsets = [0, 0, 2, 0], sizes = [1, 12, 12, 4], strides = [1, 1, 1, 1]} : vector<1x16x16x4xf32> to vector<1x12x12x4xf32>
    %17 = vector.shape_cast %16 : vector<1x12x12x4xf32> to vector<144x4xf32>
    %18 = arith.truncf %17 : vector<144x4xf32> to vector<144x4xbf16>
    %c2 = arith.constant 2 : index
    %c0_10 = arith.constant 0 : index
    %c0_11 = arith.constant 0 : index
    %19 = vector.load %arg2[%c2, %c0_10, %c0_11] : memref<25x4x10xbf16, #tpu.memory_space<vmem>>, vector<1x4x10xbf16>
    %20 = vector.shape_cast %19 : vector<1x4x10xbf16> to vector<4x10xbf16>
    %cst_12 = arith.constant dense<0.000000e+00> : vector<144x10xf32>
    %21 = tpu.matmul %18, %20, %cst_12 {dimension_numbers = #tpu.dot_dimension_numbers<[1], [0], [0], [1], [0, 0, 1, 1], [], []>} : vector<144x4xbf16>, vector<4x10xbf16>, vector<144x10xf32> -> vector<144x10xf32>
    %22 = arith.addf %15, %21 : vector<144x10xf32>
    %23 = vector.extract_strided_slice %0 {offsets = [0, 0, 3, 0], sizes = [1, 12, 12, 4], strides = [1, 1, 1, 1]} : vector<1x16x16x4xf32> to vector<1x12x12x4xf32>
    %24 = vector.shape_cast %23 : vector<1x12x12x4xf32> to vector<144x4xf32>
    %25 = arith.truncf %24 : vector<144x4xf32> to vector<144x4xbf16>
    %c3 = arith.constant 3 : index
    %c0_13 = arith.constant 0 : index
    %c0_14 = arith.constant 0 : index
    %26 = vector.load %arg2[%c3, %c0_13, %c0_14] : memref<25x4x10xbf16, #tpu.memory_space<vmem>>, vector<1x4x10xbf16>
    %27 = vector.shape_cast %26 : vector<1x4x10xbf16> to vector<4x10xbf16>
    %cst_15 = arith.constant dense<0.000000e+00> : vector<144x10xf32>
    %28 = tpu.matmul %25, %27, %cst_15 {dimension_numbers = #tpu.dot_dimension_numbers<[1], [0], [0], [1], [0, 0, 1, 1], [], []>} : vector<144x4xbf16>, vector<4x10xbf16>, vector<144x10xf32> -> vector<144x10xf32>
    %29 = arith.addf %22, %28 : vector<144x10xf32>
    %30 = vector.extract_strided_slice %0 {offsets = [0, 0, 4, 0], sizes = [1, 12, 12, 4], strides = [1, 1, 1, 1]} : vector<1x16x16x4xf32> to vector<1x12x12x4xf32>
    %31 = vector.shape_cast %30 : vector<1x12x12x4xf32> to vector<144x4xf32>
    %32 = arith.truncf %31 : vector<144x4xf32> to vector<144x4xbf16>
    %c4 = arith.constant 4 : index
    %c0_16 = arith.constant 0 : index
    %c0_17 = arith.constant 0 : index
    %33 = vector.load %arg2[%c4, %c0_16, %c0_17] : memref<25x4x10xbf16, #tpu.memory_space<vmem>>, vector<1x4x10xbf16>
    %34 = vector.shape_cast %33 : vector<1x4x10xbf16> to vector<4x10xbf16>
    %cst_18 = arith.constant dense<0.000000e+00> : vector<144x10xf32>
    %35 = tpu.matmul %32, %34, %cst_18 {dimension_numbers = #tpu.dot_dimension_numbers<[1], [0], [0], [1], [0, 0, 1, 1], [], []>} : vector<144x4xbf16>, vector<4x10xbf16>, vector<144x10xf32> -> vector<144x10xf32>
    %36 = arith.addf %29, %35 : vector<144x10xf32>
    %37 = vector.extract_strided_slice %0 {offsets = [0, 1, 0, 0], sizes = [1, 12, 12, 4], strides = [1, 1, 1, 1]} : vector<1x16x16x4xf32> to vector<1x12x12x4xf32>
    %38 = vector.shape_cast %37 : vector<1x12x12x4xf32> to vector<144x4xf32>
    %39 = arith.truncf %38 : vector<144x4xf32> to vector<144x4xbf16>
    %c5 = arith.constant 5 : index
    %c0_19 = arith.constant 0 : index
    %c0_20 = arith.constant 0 : index
    %40 = vector.load %arg2[%c5, %c0_19, %c0_20] : memref<25x4x10xbf16, #tpu.memory_space<vmem>>, vector<1x4x10xbf16>
    %41 = vector.shape_cast %40 : vector<1x4x10xbf16> to vector<4x10xbf16>
    %cst_21 = arith.constant dense<0.000000e+00> : vector<144x10xf32>
    %42 = tpu.matmul %39, %41, %cst_21 {dimension_numbers = #tpu.dot_dimension_numbers<[1], [0], [0], [1], [0, 0, 1, 1], [], []>} : vector<144x4xbf16>, vector<4x10xbf16>, vector<144x10xf32> -> vector<144x10xf32>
    %43 = arith.addf %36, %42 : vector<144x10xf32>
    %44 = vector.extract_strided_slice %0 {offsets = [0, 1, 1, 0], sizes = [1, 12, 12, 4], strides = [1, 1, 1, 1]} : vector<1x16x16x4xf32> to vector<1x12x12x4xf32>
    %45 = vector.shape_cast %44 : vector<1x12x12x4xf32> to vector<144x4xf32>
    %46 = arith.truncf %45 : vector<144x4xf32> to vector<144x4xbf16>
    %c6 = arith.constant 6 : index
    %c0_22 = arith.constant 0 : index
    %c0_23 = arith.constant 0 : index
    %47 = vector.load %arg2[%c6, %c0_22, %c0_23] : memref<25x4x10xbf16, #tpu.memory_space<vmem>>, vector<1x4x10xbf16>
    %48 = vector.shape_cast %47 : vector<1x4x10xbf16> to vector<4x10xbf16>
    %cst_24 = arith.constant dense<0.000000e+00> : vector<144x10xf32>
    %49 = tpu.matmul %46, %48, %cst_24 {dimension_numbers = #tpu.dot_dimension_numbers<[1], [0], [0], [1], [0, 0, 1, 1], [], []>} : vector<144x4xbf16>, vector<4x10xbf16>, vector<144x10xf32> -> vector<144x10xf32>
    %50 = arith.addf %43, %49 : vector<144x10xf32>
    %51 = vector.extract_strided_slice %0 {offsets = [0, 1, 2, 0], sizes = [1, 12, 12, 4], strides = [1, 1, 1, 1]} : vector<1x16x16x4xf32> to vector<1x12x12x4xf32>
    %52 = vector.shape_cast %51 : vector<1x12x12x4xf32> to vector<144x4xf32>
    %53 = arith.truncf %52 : vector<144x4xf32> to vector<144x4xbf16>
    %c7 = arith.constant 7 : index
    %c0_25 = arith.constant 0 : index
    %c0_26 = arith.constant 0 : index
    %54 = vector.load %arg2[%c7, %c0_25, %c0_26] : memref<25x4x10xbf16, #tpu.memory_space<vmem>>, vector<1x4x10xbf16>
    %55 = vector.shape_cast %54 : vector<1x4x10xbf16> to vector<4x10xbf16>
    %cst_27 = arith.constant dense<0.000000e+00> : vector<144x10xf32>
    %56 = tpu.matmul %53, %55, %cst_27 {dimension_numbers = #tpu.dot_dimension_numbers<[1], [0], [0], [1], [0, 0, 1, 1], [], []>} : vector<144x4xbf16>, vector<4x10xbf16>, vector<144x10xf32> -> vector<144x10xf32>
    %57 = arith.addf %50, %56 : vector<144x10xf32>
    %58 = vector.extract_strided_slice %0 {offsets = [0, 1, 3, 0], sizes = [1, 12, 12, 4], strides = [1, 1, 1, 1]} : vector<1x16x16x4xf32> to vector<1x12x12x4xf32>
    %59 = vector.shape_cast %58 : vector<1x12x12x4xf32> to vector<144x4xf32>
    %60 = arith.truncf %59 : vector<144x4xf32> to vector<144x4xbf16>
    %c8 = arith.constant 8 : index
    %c0_28 = arith.constant 0 : index
    %c0_29 = arith.constant 0 : index
    %61 = vector.load %arg2[%c8, %c0_28, %c0_29] : memref<25x4x10xbf16, #tpu.memory_space<vmem>>, vector<1x4x10xbf16>
    %62 = vector.shape_cast %61 : vector<1x4x10xbf16> to vector<4x10xbf16>
    %cst_30 = arith.constant dense<0.000000e+00> : vector<144x10xf32>
    %63 = tpu.matmul %60, %62, %cst_30 {dimension_numbers = #tpu.dot_dimension_numbers<[1], [0], [0], [1], [0, 0, 1, 1], [], []>} : vector<144x4xbf16>, vector<4x10xbf16>, vector<144x10xf32> -> vector<144x10xf32>
    %64 = arith.addf %57, %63 : vector<144x10xf32>
    %65 = vector.extract_strided_slice %0 {offsets = [0, 1, 4, 0], sizes = [1, 12, 12, 4], strides = [1, 1, 1, 1]} : vector<1x16x16x4xf32> to vector<1x12x12x4xf32>
    %66 = vector.shape_cast %65 : vector<1x12x12x4xf32> to vector<144x4xf32>
    %67 = arith.truncf %66 : vector<144x4xf32> to vector<144x4xbf16>
    %c9 = arith.constant 9 : index
    %c0_31 = arith.constant 0 : index
    %c0_32 = arith.constant 0 : index
    %68 = vector.load %arg2[%c9, %c0_31, %c0_32] : memref<25x4x10xbf16, #tpu.memory_space<vmem>>, vector<1x4x10xbf16>
    %69 = vector.shape_cast %68 : vector<1x4x10xbf16> to vector<4x10xbf16>
    %cst_33 = arith.constant dense<0.000000e+00> : vector<144x10xf32>
    %70 = tpu.matmul %67, %69, %cst_33 {dimension_numbers = #tpu.dot_dimension_numbers<[1], [0], [0], [1], [0, 0, 1, 1], [], []>} : vector<144x4xbf16>, vector<4x10xbf16>, vector<144x10xf32> -> vector<144x10xf32>
    %71 = arith.addf %64, %70 : vector<144x10xf32>
    %72 = vector.extract_strided_slice %0 {offsets = [0, 2, 0, 0], sizes = [1, 12, 12, 4], strides = [1, 1, 1, 1]} : vector<1x16x16x4xf32> to vector<1x12x12x4xf32>
    %73 = vector.shape_cast %72 : vector<1x12x12x4xf32> to vector<144x4xf32>
    %74 = arith.truncf %73 : vector<144x4xf32> to vector<144x4xbf16>
    %c10 = arith.constant 10 : index
    %c0_34 = arith.constant 0 : index
    %c0_35 = arith.constant 0 : index
    %75 = vector.load %arg2[%c10, %c0_34, %c0_35] : memref<25x4x10xbf16, #tpu.memory_space<vmem>>, vector<1x4x10xbf16>
    %76 = vector.shape_cast %75 : vector<1x4x10xbf16> to vector<4x10xbf16>
    %cst_36 = arith.constant dense<0.000000e+00> : vector<144x10xf32>
    %77 = tpu.matmul %74, %76, %cst_36 {dimension_numbers = #tpu.dot_dimension_numbers<[1], [0], [0], [1], [0, 0, 1, 1], [], []>} : vector<144x4xbf16>, vector<4x10xbf16>, vector<144x10xf32> -> vector<144x10xf32>
    %78 = arith.addf %71, %77 : vector<144x10xf32>
    %79 = vector.extract_strided_slice %0 {offsets = [0, 2, 1, 0], sizes = [1, 12, 12, 4], strides = [1, 1, 1, 1]} : vector<1x16x16x4xf32> to vector<1x12x12x4xf32>
    %80 = vector.shape_cast %79 : vector<1x12x12x4xf32> to vector<144x4xf32>
    %81 = arith.truncf %80 : vector<144x4xf32> to vector<144x4xbf16>
    %c11 = arith.constant 11 : index
    %c0_37 = arith.constant 0 : index
    %c0_38 = arith.constant 0 : index
    %82 = vector.load %arg2[%c11, %c0_37, %c0_38] : memref<25x4x10xbf16, #tpu.memory_space<vmem>>, vector<1x4x10xbf16>
    %83 = vector.shape_cast %82 : vector<1x4x10xbf16> to vector<4x10xbf16>
    %cst_39 = arith.constant dense<0.000000e+00> : vector<144x10xf32>
    %84 = tpu.matmul %81, %83, %cst_39 {dimension_numbers = #tpu.dot_dimension_numbers<[1], [0], [0], [1], [0, 0, 1, 1], [], []>} : vector<144x4xbf16>, vector<4x10xbf16>, vector<144x10xf32> -> vector<144x10xf32>
    %85 = arith.addf %78, %84 : vector<144x10xf32>
    %86 = vector.extract_strided_slice %0 {offsets = [0, 2, 2, 0], sizes = [1, 12, 12, 4], strides = [1, 1, 1, 1]} : vector<1x16x16x4xf32> to vector<1x12x12x4xf32>
    %87 = vector.shape_cast %86 : vector<1x12x12x4xf32> to vector<144x4xf32>
    %88 = arith.truncf %87 : vector<144x4xf32> to vector<144x4xbf16>
    %c12 = arith.constant 12 : index
    %c0_40 = arith.constant 0 : index
    %c0_41 = arith.constant 0 : index
    %89 = vector.load %arg2[%c12, %c0_40, %c0_41] : memref<25x4x10xbf16, #tpu.memory_space<vmem>>, vector<1x4x10xbf16>
    %90 = vector.shape_cast %89 : vector<1x4x10xbf16> to vector<4x10xbf16>
    %cst_42 = arith.constant dense<0.000000e+00> : vector<144x10xf32>
    %91 = tpu.matmul %88, %90, %cst_42 {dimension_numbers = #tpu.dot_dimension_numbers<[1], [0], [0], [1], [0, 0, 1, 1], [], []>} : vector<144x4xbf16>, vector<4x10xbf16>, vector<144x10xf32> -> vector<144x10xf32>
    %92 = arith.addf %85, %91 : vector<144x10xf32>
    %93 = vector.extract_strided_slice %0 {offsets = [0, 2, 3, 0], sizes = [1, 12, 12, 4], strides = [1, 1, 1, 1]} : vector<1x16x16x4xf32> to vector<1x12x12x4xf32>
    %94 = vector.shape_cast %93 : vector<1x12x12x4xf32> to vector<144x4xf32>
    %95 = arith.truncf %94 : vector<144x4xf32> to vector<144x4xbf16>
    %c13 = arith.constant 13 : index
    %c0_43 = arith.constant 0 : index
    %c0_44 = arith.constant 0 : index
    %96 = vector.load %arg2[%c13, %c0_43, %c0_44] : memref<25x4x10xbf16, #tpu.memory_space<vmem>>, vector<1x4x10xbf16>
    %97 = vector.shape_cast %96 : vector<1x4x10xbf16> to vector<4x10xbf16>
    %cst_45 = arith.constant dense<0.000000e+00> : vector<144x10xf32>
    %98 = tpu.matmul %95, %97, %cst_45 {dimension_numbers = #tpu.dot_dimension_numbers<[1], [0], [0], [1], [0, 0, 1, 1], [], []>} : vector<144x4xbf16>, vector<4x10xbf16>, vector<144x10xf32> -> vector<144x10xf32>
    %99 = arith.addf %92, %98 : vector<144x10xf32>
    %100 = vector.extract_strided_slice %0 {offsets = [0, 2, 4, 0], sizes = [1, 12, 12, 4], strides = [1, 1, 1, 1]} : vector<1x16x16x4xf32> to vector<1x12x12x4xf32>
    %101 = vector.shape_cast %100 : vector<1x12x12x4xf32> to vector<144x4xf32>
    %102 = arith.truncf %101 : vector<144x4xf32> to vector<144x4xbf16>
    %c14 = arith.constant 14 : index
    %c0_46 = arith.constant 0 : index
    %c0_47 = arith.constant 0 : index
    %103 = vector.load %arg2[%c14, %c0_46, %c0_47] : memref<25x4x10xbf16, #tpu.memory_space<vmem>>, vector<1x4x10xbf16>
    %104 = vector.shape_cast %103 : vector<1x4x10xbf16> to vector<4x10xbf16>
    %cst_48 = arith.constant dense<0.000000e+00> : vector<144x10xf32>
    %105 = tpu.matmul %102, %104, %cst_48 {dimension_numbers = #tpu.dot_dimension_numbers<[1], [0], [0], [1], [0, 0, 1, 1], [], []>} : vector<144x4xbf16>, vector<4x10xbf16>, vector<144x10xf32> -> vector<144x10xf32>
    %106 = arith.addf %99, %105 : vector<144x10xf32>
    %107 = vector.extract_strided_slice %0 {offsets = [0, 3, 0, 0], sizes = [1, 12, 12, 4], strides = [1, 1, 1, 1]} : vector<1x16x16x4xf32> to vector<1x12x12x4xf32>
    %108 = vector.shape_cast %107 : vector<1x12x12x4xf32> to vector<144x4xf32>
    %109 = arith.truncf %108 : vector<144x4xf32> to vector<144x4xbf16>
    %c15 = arith.constant 15 : index
    %c0_49 = arith.constant 0 : index
    %c0_50 = arith.constant 0 : index
    %110 = vector.load %arg2[%c15, %c0_49, %c0_50] : memref<25x4x10xbf16, #tpu.memory_space<vmem>>, vector<1x4x10xbf16>
    %111 = vector.shape_cast %110 : vector<1x4x10xbf16> to vector<4x10xbf16>
    %cst_51 = arith.constant dense<0.000000e+00> : vector<144x10xf32>
    %112 = tpu.matmul %109, %111, %cst_51 {dimension_numbers = #tpu.dot_dimension_numbers<[1], [0], [0], [1], [0, 0, 1, 1], [], []>} : vector<144x4xbf16>, vector<4x10xbf16>, vector<144x10xf32> -> vector<144x10xf32>
    %113 = arith.addf %106, %112 : vector<144x10xf32>
    %114 = vector.extract_strided_slice %0 {offsets = [0, 3, 1, 0], sizes = [1, 12, 12, 4], strides = [1, 1, 1, 1]} : vector<1x16x16x4xf32> to vector<1x12x12x4xf32>
    %115 = vector.shape_cast %114 : vector<1x12x12x4xf32> to vector<144x4xf32>
    %116 = arith.truncf %115 : vector<144x4xf32> to vector<144x4xbf16>
    %c16 = arith.constant 16 : index
    %c0_52 = arith.constant 0 : index
    %c0_53 = arith.constant 0 : index
    %117 = vector.load %arg2[%c16, %c0_52, %c0_53] : memref<25x4x10xbf16, #tpu.memory_space<vmem>>, vector<1x4x10xbf16>
    %118 = vector.shape_cast %117 : vector<1x4x10xbf16> to vector<4x10xbf16>
    %cst_54 = arith.constant dense<0.000000e+00> : vector<144x10xf32>
    %119 = tpu.matmul %116, %118, %cst_54 {dimension_numbers = #tpu.dot_dimension_numbers<[1], [0], [0], [1], [0, 0, 1, 1], [], []>} : vector<144x4xbf16>, vector<4x10xbf16>, vector<144x10xf32> -> vector<144x10xf32>
    %120 = arith.addf %113, %119 : vector<144x10xf32>
    %121 = vector.extract_strided_slice %0 {offsets = [0, 3, 2, 0], sizes = [1, 12, 12, 4], strides = [1, 1, 1, 1]} : vector<1x16x16x4xf32> to vector<1x12x12x4xf32>
    %122 = vector.shape_cast %121 : vector<1x12x12x4xf32> to vector<144x4xf32>
    %123 = arith.truncf %122 : vector<144x4xf32> to vector<144x4xbf16>
    %c17 = arith.constant 17 : index
    %c0_55 = arith.constant 0 : index
    %c0_56 = arith.constant 0 : index
    %124 = vector.load %arg2[%c17, %c0_55, %c0_56] : memref<25x4x10xbf16, #tpu.memory_space<vmem>>, vector<1x4x10xbf16>
    %125 = vector.shape_cast %124 : vector<1x4x10xbf16> to vector<4x10xbf16>
    %cst_57 = arith.constant dense<0.000000e+00> : vector<144x10xf32>
    %126 = tpu.matmul %123, %125, %cst_57 {dimension_numbers = #tpu.dot_dimension_numbers<[1], [0], [0], [1], [0, 0, 1, 1], [], []>} : vector<144x4xbf16>, vector<4x10xbf16>, vector<144x10xf32> -> vector<144x10xf32>
    %127 = arith.addf %120, %126 : vector<144x10xf32>
    %128 = vector.extract_strided_slice %0 {offsets = [0, 3, 3, 0], sizes = [1, 12, 12, 4], strides = [1, 1, 1, 1]} : vector<1x16x16x4xf32> to vector<1x12x12x4xf32>
    %129 = vector.shape_cast %128 : vector<1x12x12x4xf32> to vector<144x4xf32>
    %130 = arith.truncf %129 : vector<144x4xf32> to vector<144x4xbf16>
    %c18 = arith.constant 18 : index
    %c0_58 = arith.constant 0 : index
    %c0_59 = arith.constant 0 : index
    %131 = vector.load %arg2[%c18, %c0_58, %c0_59] : memref<25x4x10xbf16, #tpu.memory_space<vmem>>, vector<1x4x10xbf16>
    %132 = vector.shape_cast %131 : vector<1x4x10xbf16> to vector<4x10xbf16>
    %cst_60 = arith.constant dense<0.000000e+00> : vector<144x10xf32>
    %133 = tpu.matmul %130, %132, %cst_60 {dimension_numbers = #tpu.dot_dimension_numbers<[1], [0], [0], [1], [0, 0, 1, 1], [], []>} : vector<144x4xbf16>, vector<4x10xbf16>, vector<144x10xf32> -> vector<144x10xf32>
    %134 = arith.addf %127, %133 : vector<144x10xf32>
    %135 = vector.extract_strided_slice %0 {offsets = [0, 3, 4, 0], sizes = [1, 12, 12, 4], strides = [1, 1, 1, 1]} : vector<1x16x16x4xf32> to vector<1x12x12x4xf32>
    %136 = vector.shape_cast %135 : vector<1x12x12x4xf32> to vector<144x4xf32>
    %137 = arith.truncf %136 : vector<144x4xf32> to vector<144x4xbf16>
    %c19 = arith.constant 19 : index
    %c0_61 = arith.constant 0 : index
    %c0_62 = arith.constant 0 : index
    %138 = vector.load %arg2[%c19, %c0_61, %c0_62] : memref<25x4x10xbf16, #tpu.memory_space<vmem>>, vector<1x4x10xbf16>
    %139 = vector.shape_cast %138 : vector<1x4x10xbf16> to vector<4x10xbf16>
    %cst_63 = arith.constant dense<0.000000e+00> : vector<144x10xf32>
    %140 = tpu.matmul %137, %139, %cst_63 {dimension_numbers = #tpu.dot_dimension_numbers<[1], [0], [0], [1], [0, 0, 1, 1], [], []>} : vector<144x4xbf16>, vector<4x10xbf16>, vector<144x10xf32> -> vector<144x10xf32>
    %141 = arith.addf %134, %140 : vector<144x10xf32>
    %142 = vector.extract_strided_slice %0 {offsets = [0, 4, 0, 0], sizes = [1, 12, 12, 4], strides = [1, 1, 1, 1]} : vector<1x16x16x4xf32> to vector<1x12x12x4xf32>
    %143 = vector.shape_cast %142 : vector<1x12x12x4xf32> to vector<144x4xf32>
    %144 = arith.truncf %143 : vector<144x4xf32> to vector<144x4xbf16>
    %c20 = arith.constant 20 : index
    %c0_64 = arith.constant 0 : index
    %c0_65 = arith.constant 0 : index
    %145 = vector.load %arg2[%c20, %c0_64, %c0_65] : memref<25x4x10xbf16, #tpu.memory_space<vmem>>, vector<1x4x10xbf16>
    %146 = vector.shape_cast %145 : vector<1x4x10xbf16> to vector<4x10xbf16>
    %cst_66 = arith.constant dense<0.000000e+00> : vector<144x10xf32>
    %147 = tpu.matmul %144, %146, %cst_66 {dimension_numbers = #tpu.dot_dimension_numbers<[1], [0], [0], [1], [0, 0, 1, 1], [], []>} : vector<144x4xbf16>, vector<4x10xbf16>, vector<144x10xf32> -> vector<144x10xf32>
    %148 = arith.addf %141, %147 : vector<144x10xf32>
    %149 = vector.extract_strided_slice %0 {offsets = [0, 4, 1, 0], sizes = [1, 12, 12, 4], strides = [1, 1, 1, 1]} : vector<1x16x16x4xf32> to vector<1x12x12x4xf32>
    %150 = vector.shape_cast %149 : vector<1x12x12x4xf32> to vector<144x4xf32>
    %151 = arith.truncf %150 : vector<144x4xf32> to vector<144x4xbf16>
    %c21 = arith.constant 21 : index
    %c0_67 = arith.constant 0 : index
    %c0_68 = arith.constant 0 : index
    %152 = vector.load %arg2[%c21, %c0_67, %c0_68] : memref<25x4x10xbf16, #tpu.memory_space<vmem>>, vector<1x4x10xbf16>
    %153 = vector.shape_cast %152 : vector<1x4x10xbf16> to vector<4x10xbf16>
    %cst_69 = arith.constant dense<0.000000e+00> : vector<144x10xf32>
    %154 = tpu.matmul %151, %153, %cst_69 {dimension_numbers = #tpu.dot_dimension_numbers<[1], [0], [0], [1], [0, 0, 1, 1], [], []>} : vector<144x4xbf16>, vector<4x10xbf16>, vector<144x10xf32> -> vector<144x10xf32>
    %155 = arith.addf %148, %154 : vector<144x10xf32>
    %156 = vector.extract_strided_slice %0 {offsets = [0, 4, 2, 0], sizes = [1, 12, 12, 4], strides = [1, 1, 1, 1]} : vector<1x16x16x4xf32> to vector<1x12x12x4xf32>
    %157 = vector.shape_cast %156 : vector<1x12x12x4xf32> to vector<144x4xf32>
    %158 = arith.truncf %157 : vector<144x4xf32> to vector<144x4xbf16>
    %c22 = arith.constant 22 : index
    %c0_70 = arith.constant 0 : index
    %c0_71 = arith.constant 0 : index
    %159 = vector.load %arg2[%c22, %c0_70, %c0_71] : memref<25x4x10xbf16, #tpu.memory_space<vmem>>, vector<1x4x10xbf16>
    %160 = vector.shape_cast %159 : vector<1x4x10xbf16> to vector<4x10xbf16>
    %cst_72 = arith.constant dense<0.000000e+00> : vector<144x10xf32>
    %161 = tpu.matmul %158, %160, %cst_72 {dimension_numbers = #tpu.dot_dimension_numbers<[1], [0], [0], [1], [0, 0, 1, 1], [], []>} : vector<144x4xbf16>, vector<4x10xbf16>, vector<144x10xf32> -> vector<144x10xf32>
    %162 = arith.addf %155, %161 : vector<144x10xf32>
    %163 = vector.extract_strided_slice %0 {offsets = [0, 4, 3, 0], sizes = [1, 12, 12, 4], strides = [1, 1, 1, 1]} : vector<1x16x16x4xf32> to vector<1x12x12x4xf32>
    %164 = vector.shape_cast %163 : vector<1x12x12x4xf32> to vector<144x4xf32>
    %165 = arith.truncf %164 : vector<144x4xf32> to vector<144x4xbf16>
    %c23 = arith.constant 23 : index
    %c0_73 = arith.constant 0 : index
    %c0_74 = arith.constant 0 : index
    %166 = vector.load %arg2[%c23, %c0_73, %c0_74] : memref<25x4x10xbf16, #tpu.memory_space<vmem>>, vector<1x4x10xbf16>
    %167 = vector.shape_cast %166 : vector<1x4x10xbf16> to vector<4x10xbf16>
    %cst_75 = arith.constant dense<0.000000e+00> : vector<144x10xf32>
    %168 = tpu.matmul %165, %167, %cst_75 {dimension_numbers = #tpu.dot_dimension_numbers<[1], [0], [0], [1], [0, 0, 1, 1], [], []>} : vector<144x4xbf16>, vector<4x10xbf16>, vector<144x10xf32> -> vector<144x10xf32>
    %169 = arith.addf %162, %168 : vector<144x10xf32>
    %170 = vector.extract_strided_slice %0 {offsets = [0, 4, 4, 0], sizes = [1, 12, 12, 4], strides = [1, 1, 1, 1]} : vector<1x16x16x4xf32> to vector<1x12x12x4xf32>
    %171 = vector.shape_cast %170 : vector<1x12x12x4xf32> to vector<144x4xf32>
    %172 = arith.truncf %171 : vector<144x4xf32> to vector<144x4xbf16>
    %c24 = arith.constant 24 : index
    %c0_76 = arith.constant 0 : index
    %c0_77 = arith.constant 0 : index
    %173 = vector.load %arg2[%c24, %c0_76, %c0_77] : memref<25x4x10xbf16, #tpu.memory_space<vmem>>, vector<1x4x10xbf16>
    %174 = vector.shape_cast %173 : vector<1x4x10xbf16> to vector<4x10xbf16>
    %cst_78 = arith.constant dense<0.000000e+00> : vector<144x10xf32>
    %175 = tpu.matmul %172, %174, %cst_78 {dimension_numbers = #tpu.dot_dimension_numbers<[1], [0], [0], [1], [0, 0, 1, 1], [], []>} : vector<144x4xbf16>, vector<4x10xbf16>, vector<144x10xf32> -> vector<144x10xf32>
    %176 = arith.addf %169, %175 : vector<144x10xf32>
    %c0_79 = arith.constant 0 : index
    %c0_80 = arith.constant 0 : index
    %177 = vector.load %arg3[%c0_79, %c0_80] : memref<1x10xf32, #tpu.memory_space<vmem>>, vector<1x10xf32>
    %178 = vector.broadcast %177 : vector<1x10xf32> to vector<144x10xf32>
    %179 = arith.addf %176, %178 : vector<144x10xf32>
    %180 = vector.shape_cast %179 : vector<144x10xf32> to vector<1x12x12x10xf32>
    %c0_81 = arith.constant 0 : index
    %c0_82 = arith.constant 0 : index
    %c0_83 = arith.constant 0 : index
    %c0_84 = arith.constant 0 : index
    %181 = vector.load %arg5[%c0_81, %c0_82, %c0_83, %c0_84] : memref<1x12x12x10xf32, #tpu.memory_space<vmem>>, vector<1x12x12x10xf32>
    tpu.vector_store %arg5[%c0_81, %c0_82, %c0_83, %c0_84], %180 {strides = array<i32>} : memref<1x12x12x10xf32, #tpu.memory_space<vmem>>, vector<1x12x12x10xf32>,
    %c0_85 = arith.constant 0 : index
    %c0_86 = arith.constant 0 : index
    %c0_87 = arith.constant 0 : index
    %c0_88 = arith.constant 0 : index
    %182 = tpu.strided_load %arg5[%c0_85, %c0_86, %c0_87, %c0_88] {strides = array<i32: 1, 2, 1, 1>} : memref<1x12x12x10xf32, #tpu.memory_space<vmem>>, vector<1x6x12x10xf32>
    %c0_89 = arith.constant 0 : index
    %c1_90 = arith.constant 1 : index
    %c0_91 = arith.constant 0 : index
    %c0_92 = arith.constant 0 : index
    %183 = tpu.strided_load %arg5[%c0_89, %c1_90, %c0_91, %c0_92] {strides = array<i32: 1, 2, 1, 1>} : memref<1x12x12x10xf32, #tpu.memory_space<vmem>>, vector<1x6x12x10xf32>
    %184 = arith.maximumf %182, %183 : vector<1x6x12x10xf32>
    %c0_93 = arith.constant 0 : index
    %c0_94 = arith.constant 0 : index
    %c0_95 = arith.constant 0 : index
    %c0_96 = arith.constant 0 : index
    %185 = vector.load %arg5[%c0_93, %c0_94, %c0_95, %c0_96] : memref<1x12x12x10xf32, #tpu.memory_space<vmem>>, vector<1x6x12x10xf32>
    tpu.vector_store %arg5[%c0_93, %c0_94, %c0_95, %c0_96], %184 {strides = array<i32>} : memref<1x12x12x10xf32, #tpu.memory_space<vmem>>, vector<1x6x12x10xf32>,
    %c0_97 = arith.constant 0 : index
    %c0_98 = arith.constant 0 : index
    %c0_99 = arith.constant 0 : index
    %c0_100 = arith.constant 0 : index
    %186 = tpu.strided_load %arg5[%c0_97, %c0_98, %c0_99, %c0_100] {strides = array<i32: 1, 1, 2, 1>} : memref<1x12x12x10xf32, #tpu.memory_space<vmem>>, vector<1x6x6x10xf32>
    %c0_101 = arith.constant 0 : index
    %c0_102 = arith.constant 0 : index
    %c1_103 = arith.constant 1 : index
    %c0_104 = arith.constant 0 : index
    %187 = tpu.strided_load %arg5[%c0_101, %c0_102, %c1_103, %c0_104] {strides = array<i32: 1, 1, 2, 1>} : memref<1x12x12x10xf32, #tpu.memory_space<vmem>>, vector<1x6x6x10xf32>
    %188 = arith.maximumf %186, %187 : vector<1x6x6x10xf32>
    %cst_105 = arith.constant 0.000000e+00 : f32
    %189 = vector.broadcast %cst_105 : f32 to vector<1x6x6x10xf32>
    %190 = arith.cmpf ogt, %188, %189 : vector<1x6x6x10xf32>
    %cst_106 = arith.constant 0.00999999977 : f32
    %191 = vector.broadcast %cst_106 : f32 to vector<1x6x6x10xf32>
    %192 = arith.mulf %191, %188 : vector<1x6x6x10xf32>
    %193 = arith.select %190, %188, %192 : vector<1x6x6x10xi1>, vector<1x6x6x10xf32>
    %c0_107 = arith.constant 0 : index
    %c0_108 = arith.constant 0 : index
    %c0_109 = arith.constant 0 : index
    %c0_110 = arith.constant 0 : index
    %194 = vector.load %arg4[%c0_107, %c0_108, %c0_109, %c0_110] : memref<1x6x6x10xf32, #tpu.memory_space<vmem>>, vector<1x6x6x10xf32>
    tpu.vector_store %arg4[%c0_107, %c0_108, %c0_109, %c0_110], %193 {strides = array<i32>} : memref<1x6x6x10xf32, #tpu.memory_space<vmem>>, vector<1x6x6x10xf32>,
    return
  }
  func.func @transform_0(%arg0: i32) -> (i32, i32, i32, i32) {
    %c0_i32 = arith.constant 0 : i32
    %c0_i32_0 = arith.constant 0 : i32
    %c0_i32_1 = arith.constant 0 : i32
    %c0_i32_2 = arith.constant 0 : i32
    return %arg0, %c0_i32, %c0_i32_0, %c0_i32_1 : i32, i32, i32, i32
  }
  func.func @transform_1(%arg0: i32) -> (i32, i32, i32) {
    %c0_i32 = arith.constant 0 : i32
    %c0_i32_0 = arith.constant 0 : i32
    %c0_i32_1 = arith.constant 0 : i32
    %c0_i32_2 = arith.constant 0 : i32
    return %c0_i32, %c0_i32_0, %c0_i32_1 : i32, i32, i32
  }
  func.func @transform_2(%arg0: i32) -> (i32, i32) {
    %c0_i32 = arith.constant 0 : i32
    %c0_i32_0 = arith.constant 0 : i32
    %c0_i32_1 = arith.constant 0 : i32
    return %c0_i32, %c0_i32_0 : i32, i32
  }
  func.func @transform_3(%arg0: i32) -> (i32, i32, i32, i32) {
    %c0_i32 = arith.constant 0 : i32
    %c0_i32_0 = arith.constant 0 : i32
    %c0_i32_1 = arith.constant 0 : i32
    %c0_i32_2 = arith.constant 0 : i32
    return %arg0, %c0_i32, %c0_i32_0, %c0_i32_1 : i32, i32, i32, i32
  }
}

</mosaic_0001>

<bundles_post_ra>
// kernel: tpu_custom_call.1
= control target key start
LH: loop header
LB: loop body
LE: loop exit
PB: predicated region body
PF: predicated region fallthrough
CT: control target
= control target key end

     0   :  { %s3174_s12 = smov 0   ;;  %s6683_s0 = inlined_call_operand.vmem [shape: f32[2,16,16,4], index: 0, kind: input, shape index: {}]   ;;  %s6684_s1 = inlined_call_operand.vmem [shape: bf16[100,10], index: 1, kind: input, shape index: {}]   ;;  %s6685_s2 = inlined_call_operand.vmem [shape: f32[1,10], index: 2, kind: input, shape index: {}]   ;;  %s6686_s3 = inlined_call_operand.vmem [shape: f32[2,6,6,10], index: 3, kind: output, shape index: {}]  }
   0x1 LB: > { %s2938_s13 = sadd.s32 4294967295, %s3134_s12   ;;  %p2942_p0 = scmp.ge.s32.totalorder %s3134_s12, 1  ;;  %s3134_s12 = sphi %s3174_s12, %s13_s12  }
   0x2   : > { %p137_p1 = scmp.lt.s32.totalorder %s3134_s12, 3 }
   0x4   : > { %p138_p2 = pnand %p2942_p0, %p137_p1 }
   0x6   : > { %141 = sbr.rel (%p138_p2) target bundleno = 1283 (0x503), region = 32 }
   0xd   : > { %p161_p3 = scmp.lt.s32.totalorder %s2938_s13, 1  ;;  %vm6914_vm0 = vcmask 1046528   ;;  %s3136_s18 = smov 4   ;;  %vm337_vm1 = vcmask 1045504   ;;  %vm446_vm2 = vcmask 1044480   ;;  %vm6906_vm3 = vcmask 1043456  }
   0xe   : > { %s3137_s19 = smov 8   ;;  %s3138_s20 = smov 12   ;;  %vm1926_vm4 = vcmask 1040384   ;;  %vm1486_vm5 = vcmask 31744   ;;  %vm6916_vm6 = vcmask 64512   ;;  %vm6915_vm7 = vcmask 97280  }
   0xf   : > { %s7783_s13 = smov (!%p161_p3, %s2938_s13), 1  ;;  %s3139_s21 = smov 16   ;;  %vm1561_vm8 = vcmask 130048   ;;  %vm1586_vm9 = vcmask 162816   ;;  %vm6909_vm10 = vcmask 195584   ;;  %vm1636_vm11 = vcmask 228352  }
  0x10   : > { %s2965_s14 = sshll.u32 %s7783_s13, 8  ;;  %s3140_s22 = smov 20   ;;  %vm1661_vm12 = vcmask 261120   ;;  %vm1686_vm13 = vcmask 293888   ;;  %vm1711_vm14 = vcmask 326656   ;;  %vm2579_vm15 = vcmask 1041408  }
  0x11   : > { %s3188_s17 = scalar_lea.vmem %s6683_s0, %s2965_s14  ;;  %s3141_s23 = smov 24  }
  0x12   : > { %v3191_v0 = vld [vmem:[%s3188_s17 + $0x18] sm:$0xff]  ;;  %v3194_v1 = vld [vmem:[%s3188_s17 + $0x8] sm:$0xff]  ;;  %v3204_v5 = vld [vmem:[%s3188_s17] sm:$0xff]  ;;  %s3142_s24 = smov 28   ;;  %s3143_s25 = smov 32  }
  0x13   : > { %v3197_v2 = vld [vmem:[%s3188_s17 + $0x28] sm:$0xff]  ;;  %v3200_v3 = vrot.slane %v3191_v0, 1  ;;  %v230_v4 = vrot.slane %v3194_v1, 1  ;;  %v3207_v6 = vld [vmem:[%s3188_s17 + $0x10] sm:$0xff]  ;;  %v3210_v7 = vld [vmem:[%s3188_s17 + $0x20] sm:$0xff]  ;;  %v229_v8 = vrot.slane %v3204_v5, 1 }
  0x14   : > { %v3217_v9 = vrot.slane %v3197_v2, 1  ;;  %v232_v11 = vrot.slane %v3207_v6, 1  ;;  %v235_v12 = vrot.slane %v3210_v7, 1  ;;  %v3223_v13 = vld [vmem:[%s3188_s17 + $0x38] sm:$0xff]  ;;  %v3226_v14 = vld [vmem:[%s3188_s17 + $0x30] sm:$0xff]  ;;  %v3244_v19 = vld [vmem:[%s3188_s17 + $0x48] sm:$0xff] }
  0x15   : > { %271 = vrot.lane.b32.xlu1 %v3200_v3, %s3136_s18  ;;  %267 = vrot.lane.b32.xlu0 %v230_v4, %s3136_s18  ;;  %v231_v10 = vsel %vm6914_vm0, %v229_v8, %v230_v4  ;;  %v3240_v17 = vrot.slane %v3223_v13, 1  ;;  %v238_v18 = vrot.slane %v3226_v14, 1  ;;  %v3247_v20 = vld [vmem:[%s3188_s17 + $0x40] sm:$0xff]  ;;  %v3258_v22 = vrot.slane %v3244_v19, 1  ;;  %v3262_v24 = vld [vmem:[%s3188_s17 + $0x58] sm:$0xff]  ;;  %s3144_s26 = smov 36  }
  0x16   : > { %v3233_v15 = vsel %vm6914_vm0, %v232_v11, %v3200_v3  ;;  %v3237_v16 = vsel %vm6914_vm0, %v235_v12, %v3217_v9  ;;  %v241_v23 = vrot.slane %v3247_v20, 1  ;;  %v3265_v25 = vld [vmem:[%s3188_s17 + $0x50] sm:$0xff]  ;;  %v3276_v27 = vrot.slane %v3262_v24, 1  ;;  %v3280_v29 = vld [vmem:[%s3188_s17 + $0x68] sm:$0xff]  ;;  %v3283_v30 = vld [vmem:[%s3188_s17 + $0x60] sm:$0xff]  ;;  %s3145_s27 = smov 40  }
  0x17   : > { %v3255_v21 = vsel %vm6914_vm0, %v238_v18, %v3240_v17  ;;  %v244_v28 = vrot.slane %v3265_v25, 1  ;;  %v3294_v32 = vrot.slane %v3280_v29, 1  ;;  %v247_v33 = vrot.slane %v3283_v30, 1  ;;  %v3298_v34 = vld [vmem:[%s3188_s17 + $0x78] sm:$0xff]  ;;  %v3301_v35 = vld [vmem:[%s3188_s17 + $0x70] sm:$0xff]  ;;  %v3316_v39 = vld [vmem:[%s3188_s17 + $0x88] sm:$0xff] }
  0x18   : > { %v3273_v26 = vsel %vm6914_vm0, %v241_v23, %v3258_v22  ;;  %6917 = vst [vmem:[#allocation3_spill] sm:$0xff] %v3276_v27  ;;  %v3312_v37 = vrot.slane %v3298_v34, 1  ;;  %v250_v38 = vrot.slane %v3301_v35, 1  ;;  %v3319_v40 = vld [vmem:[%s3188_s17 + $0x80] sm:$0xff]  ;;  %v3330_v42 = vrot.slane %v3316_v39, 1  ;;  %v3334_v44 = vld [vmem:[%s3188_s17 + $0x98] sm:$0xff] }
  0x19   : > { %275 = vrot.lane.b32.xlu1 %v3217_v9, %s3136_s18  ;;  %265 = vrot.lane.b32.xlu0 %v231_v10, %s3136_s18  ;;  %v3291_v31 = vsel %vm6914_vm0, %v244_v28, %v3276_v27  ;;  %6918 = vst [vmem:[#allocation4_spill] sm:$0xff] %v3294_v32  ;;  %v3309_v36 = vsel %vm6914_vm0, %v247_v33, %v3294_v32  ;;  %v253_v43 = vrot.slane %v3319_v40, 1  ;;  %v3337_v45 = vld [vmem:[%s3188_s17 + $0x90] sm:$0xff]  ;;  %v3348_v47 = vrot.slane %v3334_v44, 1  ;;  %v3352_v49 = vld [vmem:[%s3188_s17 + $0xa8] sm:$0xff]  ;;  %s3146_s28 = smov 44  }
  0x1a   : > { %6919 = vst [vmem:[#allocation5_spill] sm:$0xff] %v3309_v36  ;;  %6920 = vst [vmem:[#allocation6_spill] sm:$0xff] %v3312_v37  ;;  %v3327_v41 = vsel %vm6914_vm0, %v250_v38, %v3312_v37  ;;  %v256_v48 = vrot.slane %v3337_v45, 1  ;;  %v3355_v50 = vld [vmem:[%s3188_s17 + $0xa0] sm:$0xff]  ;;  %v3366_v52 = vrot.slane %v3352_v49, 1  ;;  %v3370_v54 = vld [vmem:[%s3188_s17 + $0xb8] sm:$0xff] }
  0x1b   : > { %6921 = vst [vmem:[#allocation7_spill] sm:$0xff] %v3327_v41  ;;  %6922 = vst [vmem:[#allocation8_spill] sm:$0xff] %v3330_v42  ;;  %v3345_v46 = vsel %vm6914_vm0, %v253_v43, %v3330_v42  ;;  %v259_v53 = vrot.slane %v3355_v50, 1  ;;  %v3373_v55 = vld [vmem:[%s3188_s17 + $0xb0] sm:$0xff]  ;;  %v3384_v57 = vrot.slane %v3370_v54, 1  ;;  %v339_v60 = vrot.slane %v3194_v1, 2 }
  0x1c   : > { %6923 = vst [vmem:[#allocation9_spill] sm:$0xff] %v3345_v46  ;;  %6924 = vst [vmem:[#allocation10_spill] sm:$0xff] %v3348_v47  ;;  %v3363_v51 = vsel %vm6914_vm0, %v256_v48, %v3348_v47  ;;  %v262_v58 = vrot.slane %v3373_v55, 1  ;;  %v338_v61 = vrot.slane %v3204_v5, 2  ;;  %v3403_v63 = vrot.slane %v3191_v0, 2  ;;  %s3148_s8 = smov 48  }
  0x1d   : > { %269 = vrot.lane.b32.xlu1 %v3233_v15, %s3136_s18  ;;  %273 = vrot.lane.b32.xlu0 %v3237_v16, %s3136_s18  ;;  %6925 = vst [vmem:[#allocation11_spill] sm:$0xff] %v3363_v51  ;;  %6926 = vst [vmem:[#allocation12_spill] sm:$0xff] %v3366_v52  ;;  %v3381_v56 = vsel %vm6914_vm0, %v259_v53, %v3366_v52  ;;  %v341_v4 = vrot.slane %v3207_v6, 2  ;;  %v3413_v10 = vrot.slane %v3197_v2, 2  ;;  %v344_v11 = vrot.slane %v3210_v7, 2  ;;  %s3149_s11 = smov 52  }
  0x1e   : > { %6927 = vst [vmem:[#allocation13_spill] sm:$0xff] %v3381_v56  ;;  %6928 = vst [vmem:[#allocation14_spill] sm:$0xff] %v3384_v57  ;;  %v3393_v59 = vsel %vm6914_vm0, %v262_v58, %v3384_v57  ;;  %v340_v62 = vsel %vm337_vm1, %v338_v61, %v339_v60  ;;  %v3425_v18 = vrot.slane %v3223_v13, 2  ;;  %v347_v23 = vrot.slane %v3226_v14, 2  ;;  %s3150_s16 = smov 56  }
  0x1f   : > { %6929 = vst [vmem:[#allocation15_spill] sm:$0xff] %v3393_v59  ;;  %v3410_v8 = vsel %vm337_vm1, %v341_v4, %v3403_v63  ;;  %6930 = vst [vmem:[#allocation16_spill] sm:$0xff] %v3413_v10  ;;  %v3422_v12 = vsel %vm337_vm1, %v344_v11, %v3413_v10  ;;  %v3437_v33 = vrot.slane %v3244_v19, 2  ;;  %v350_v38 = vrot.slane %v3247_v20, 2 }
  0x20   : > { %6931 = vst [vmem:[#allocation17_spill] sm:$0xff] %v3422_v12  ;;  %6932 = vst [vmem:[#allocation18_spill] sm:$0xff] %v3425_v18  ;;  %v3434_v28 = vsel %vm337_vm1, %v347_v23, %v3425_v18  ;;  %v3449_v48 = vrot.slane %v3262_v24, 2  ;;  %v353_v53 = vrot.slane %v3265_v25, 2  ;;  %v356_v61 = vrot.slane %v3283_v30, 2 }
  0x21   : > { %279 = vrot.lane.b32.xlu1 %v3240_v17, %s3136_s18  ;;  %277 = vrot.lane.b32.xlu0 %v3255_v21, %s3136_s18  ;;  %6933 = vst [vmem:[#allocation19_spill] sm:$0xff] %v3434_v28  ;;  %6934 = vst [vmem:[#allocation20_spill] sm:$0xff] %v3437_v33  ;;  %v3446_v43 = vsel %vm337_vm1, %v350_v38, %v3437_v33  ;;  %v3473_v4 = vrot.slane %v3298_v34, 2  ;;  %v359_v11 = vrot.slane %v3301_v35, 2  ;;  %v3485_v38 = vrot.slane %v3316_v39, 2 }
  0x22   : > { %6935 = vst [vmem:[#allocation21_spill] sm:$0xff] %v3446_v43  ;;  %6936 = vst [vmem:[#allocation22_spill] sm:$0xff] %v3449_v48  ;;  %v3458_v58 = vsel %vm337_vm1, %v353_v53, %v3449_v48  ;;  %v362_v53 = vrot.slane %v3319_v40, 2 }
  0x23   : > { %6937 = vst [vmem:[#allocation23_spill] sm:$0xff] %v3458_v58  ;;  %6940 = vst [vmem:[#allocation26_spill] sm:$0xff] %v3473_v4  ;;  %v3482_v23 = vsel %vm337_vm1, %v359_v11, %v3473_v4  ;;  %v365_v11 = vrot.slane %v3337_v45, 2 }
  0x24   : > { %6941 = vst [vmem:[#allocation27_spill] sm:$0xff] %v3482_v23  ;;  %6942 = vst [vmem:[#allocation28_spill] sm:$0xff] %v3485_v38 }
  0x25   : > { %283 = vrot.lane.b32.xlu1 %v3258_v22, %s3136_s18  ;;  %281 = vrot.lane.b32.xlu0 %v3273_v26, %s3136_s18 }
  0x29   : > { %287 = vrot.lane.b32.xlu1 %v3276_v27, %s3136_s18  ;;  %285 = vrot.lane.b32.xlu0 %v3291_v31, %s3136_s18 }
  0x2d   : > { %291 = vrot.lane.b32.xlu1 %v3294_v32, %s3136_s18  ;;  %289 = vrot.lane.b32.xlu0 %v3309_v36, %s3136_s18 }
  0x31   : > { %295 = vrot.lane.b32.xlu1 %v3312_v37, %s3136_s18  ;;  %293 = vrot.lane.b32.xlu0 %v3327_v41, %s3136_s18 }
  0x35   : > { %299 = vrot.lane.b32.xlu1 %v3330_v42, %s3136_s18  ;;  %297 = vrot.lane.b32.xlu0 %v3345_v46, %s3136_s18 }
  0x39   : > { %303 = vrot.lane.b32.xlu1 %v3348_v47, %s3136_s18  ;;  %301 = vrot.lane.b32.xlu0 %v3363_v51, %s3136_s18 }
  0x3d   : > { %307 = vrot.lane.b32.xlu1 %v3366_v52, %s3136_s18  ;;  %305 = vrot.lane.b32.xlu0 %v3381_v56, %s3136_s18 }
  0x41   : > { %311 = vrot.lane.b32.xlu1 %v3384_v57, %s3136_s18  ;;  %309 = vrot.lane.b32.xlu0 %v3393_v59, %s3136_s18 }
  0x45   : > { %376 = vrot.lane.b32.xlu1 %v339_v60, %s3137_s19  ;;  %374 = vrot.lane.b32.xlu0 %v340_v62, %s3137_s19  ;;  %v3461_v60 = vrot.slane %v3280_v29, 2 }
  0x47   : > { %6938 = vst [vmem:[#allocation24_spill] sm:$0xff] %v3461_v60  ;;  %v3470_v62 = vsel %vm337_vm1, %v356_v61, %v3461_v60  ;;  %v3494_v61 = vsel %vm337_vm1, %v362_v53, %v3485_v38  ;;  %v368_v53 = vrot.slane %v3355_v50, 2 }
  0x48   : > { %6939 = vst [vmem:[#allocation25_spill] sm:$0xff] %v3470_v62  ;;  %6943 = vst [vmem:[#allocation29_spill] sm:$0xff] %v3494_v61 }
  0x49   : > { %380 = vrot.lane.b32.xlu1 %v3403_v63, %s3137_s19  ;;  %378 = vrot.lane.b32.xlu0 %v3410_v8, %s3137_s19 }
  0x4d   : > { %384 = vrot.lane.b32.xlu1 %v3413_v10, %s3137_s19  ;;  %382 = vrot.lane.b32.xlu0 %v3422_v12, %s3137_s19 }
  0x51   : > { %388 = vrot.lane.b32.xlu1 %v3425_v18, %s3137_s19  ;;  %386 = vrot.lane.b32.xlu0 %v3434_v28, %s3137_s19 }
  0x55   : > { %392 = vrot.lane.b32.xlu1 %v3437_v33, %s3137_s19  ;;  %390 = vrot.lane.b32.xlu0 %v3446_v43, %s3137_s19 }
  0x59   : > { %396 = vrot.lane.b32.xlu1 %v3449_v48, %s3137_s19  ;;  %394 = vrot.lane.b32.xlu0 %v3458_v58, %s3137_s19 }
  0x5d   : > { %400 = vrot.lane.b32.xlu1 %v3461_v60, %s3137_s19  ;;  %398 = vrot.lane.b32.xlu0 %v3470_v62, %s3137_s19  ;;  %v3497_v62 = vrot.slane %v3334_v44, 2  ;;  %v3540_v60 = vrot.slane %v3191_v0, 3 }
  0x5f   : > { %6944 = vst [vmem:[#allocation30_spill] sm:$0xff] %v3497_v62  ;;  %6950 = vst [vmem:[#allocation36_spill] sm:$0xff] %v3540_v60 }
  0x61   : > { %404 = vrot.lane.b32.xlu1 %v3473_v4, %s3137_s19  ;;  %402 = vrot.lane.b32.xlu0 %v3482_v23, %s3137_s19  ;;  %v3506_v4 = vsel %vm337_vm1, %v365_v11, %v3497_v62  ;;  %v3509_v23 = vrot.slane %v3352_v49, 2  ;;  %v371_v11 = vrot.slane %v3373_v55, 2 }
  0x62   : > { %6945 = vst [vmem:[#allocation31_spill] sm:$0xff] %v3506_v4 }
  0x63   : > { %6946 = vst [vmem:[#allocation32_spill] sm:$0xff] %v3509_v23 }
  0x65   : > { %408 = vrot.lane.b32.xlu1 %v3485_v38, %s3137_s19  ;;  %406 = vrot.lane.b32.xlu0 %v3494_v61, %s3137_s19  ;;  %v3518_v38 = vsel %vm337_vm1, %v368_v53, %v3509_v23  ;;  %v3521_v61 = vrot.slane %v3370_v54, 2  ;;  %v447_v53 = vrot.slane %v3204_v5, 3 }
  0x66   : > { %6947 = vst [vmem:[#allocation33_spill] sm:$0xff] %v3518_v38 }
  0x67   : > { %6948 = vst [vmem:[#allocation34_spill] sm:$0xff] %v3521_v61 }
  0x69   : > { %412 = vrot.lane.b32.xlu1 %v3497_v62, %s3137_s19  ;;  %410 = vrot.lane.b32.xlu0 %v3506_v4, %s3137_s19  ;;  %v3530_v62 = vsel %vm337_vm1, %v371_v11, %v3521_v61  ;;  %v448_v4 = vrot.slane %v3194_v1, 3 }
  0x6a   : > { %6949 = vst [vmem:[#allocation35_spill] sm:$0xff] %v3530_v62 }
  0x6d   : > { %416 = vrot.lane.b32.xlu1 %v3509_v23, %s3137_s19  ;;  %414 = vrot.lane.b32.xlu0 %v3518_v38, %s3137_s19  ;;  %v449_v23 = vsel %vm446_vm2, %v447_v53, %v448_v4  ;;  %v450_v38 = vrot.slane %v3207_v6, 3 }
  0x6f   : > { %v3547_v11 = vsel %vm446_vm2, %v450_v38, %v3540_v60  ;;  %v456_v38 = vrot.slane %v3226_v14, 3 }
  0x70   : > { %6951 = vst [vmem:[#allocation37_spill] sm:$0xff] %v3547_v11 }
  0x71   : > { %420 = vrot.lane.b32.xlu1 %v3521_v61, %s3137_s19  ;;  %418 = vrot.lane.b32.xlu0 %v3530_v62, %s3137_s19  ;;  %v3550_v61 = vrot.slane %v3197_v2, 3  ;;  %v453_v62 = vrot.slane %v3210_v7, 3 }
  0x73   : > { %6952 = vst [vmem:[#allocation38_spill] sm:$0xff] %v3550_v61 }
  0x75   : > { %485 = vrot.lane.b32.xlu1 %v448_v4, %s3138_s20  ;;  %483 = vrot.lane.b32.xlu0 %v449_v23, %s3138_s20  ;;  %v3559_v4 = vsel %vm446_vm2, %v453_v62, %v3550_v61  ;;  %v3562_v23 = vrot.slane %v3223_v13, 3  ;;  %v459_v62 = vrot.slane %v3247_v20, 3 }
  0x76   : > { %6953 = vst [vmem:[#allocation39_spill] sm:$0xff] %v3559_v4 }
  0x77   : > { %6954 = vst [vmem:[#allocation40_spill] sm:$0xff] %v3562_v23  ;;  %v3571_v53 = vsel %vm446_vm2, %v456_v38, %v3562_v23  ;;  %v462_v38 = vrot.slane %v3265_v25, 3 }
  0x78   : > { %6955 = vst [vmem:[#allocation41_spill] sm:$0xff] %v3571_v53 }
  0x79   : > { %489 = vrot.lane.b32.xlu1 %v3540_v60, %s3138_s20  ;;  %487 = vrot.lane.b32.xlu0 %v3547_v11, %s3138_s20  ;;  %v3574_v11 = vrot.slane %v3244_v19, 3 }
  0x7b   : > { %6956 = vst [vmem:[#allocation42_spill] sm:$0xff] %v3574_v11 }
  0x7d   : > { %493 = vrot.lane.b32.xlu1 %v3550_v61, %s3138_s20  ;;  %491 = vrot.lane.b32.xlu0 %v3559_v4, %s3138_s20  ;;  %v3583_v61 = vsel %vm446_vm2, %v459_v62, %v3574_v11  ;;  %v3586_v4 = vrot.slane %v3262_v24, 3  ;;  %v465_v62 = vrot.slane %v3283_v30, 3 }
  0x7e   : > { %6957 = vst [vmem:[#allocation43_spill] sm:$0xff] %v3583_v61 }
  0x7f   : > { %6958 = vst [vmem:[#allocation44_spill] sm:$0xff] %v3586_v4 }
  0x81   : > { %497 = vrot.lane.b32.xlu1 %v3562_v23, %s3138_s20  ;;  %495 = vrot.lane.b32.xlu0 %v3571_v53, %s3138_s20  ;;  %v3595_v23 = vsel %vm446_vm2, %v462_v38, %v3586_v4  ;;  %v3598_v53 = vrot.slane %v3280_v29, 3  ;;  %v3614_v38 = vrot.slane %v3298_v34, 3 }
  0x82   : > { %6959 = vst [vmem:[#allocation45_spill] sm:$0xff] %v3595_v23 }
  0x83   : > { %6960 = vst [vmem:[#allocation46_spill] sm:$0xff] %v3598_v53  ;;  %6964 = vst [vmem:[#allocation50_spill] sm:$0xff] %v3614_v38 }
  0x85   : > { %501 = vrot.lane.b32.xlu1 %v3574_v11, %s3138_s20  ;;  %499 = vrot.lane.b32.xlu0 %v3583_v61, %s3138_s20  ;;  %v3611_v61 = vsel %vm446_vm2, %v465_v62, %v3598_v53  ;;  %v468_v11 = vrot.slane %v3301_v35, 3  ;;  %v3630_v62 = vrot.slane %v3316_v39, 3 }
  0x86   : > { %6963 = vst [vmem:[#allocation49_spill] sm:$0xff] %v3611_v61 }
  0x87   : > { %v3601_v60 = vpop.permute.xlu1 %271  ;;  %v3603_v58 = vpop.permute.xlu0 %267  ;;  %6968 = vst [vmem:[#allocation54_spill] sm:$0xff] %v3630_v62 }
  0x88   : > { %6961 = vst [vmem:[#allocation47_spill] sm:$0xff] %v3601_v60  ;;  %6962 = vst [vmem:[#allocation48_spill] sm:$0xff] %v3603_v58  ;;  %v3627_v58 = vsel %vm446_vm2, %v468_v11, %v3614_v38  ;;  %v3646_v11 = vrot.slane %v3334_v44, 3 }
  0x89   : > { %505 = vrot.lane.b32.xlu1 %v3586_v4, %s3138_s20  ;;  %503 = vrot.lane.b32.xlu0 %v3595_v23, %s3138_s20  ;;  %6967 = vst [vmem:[#allocation53_spill] sm:$0xff] %v3627_v58  ;;  %v471_v23 = vrot.slane %v3319_v40, 3 }
  0x8a   : > { %6972 = vst [vmem:[#allocation58_spill] sm:$0xff] %v3646_v11 }
  0x8b   : > { %v3617_v48 = vpop.permute.xlu1 %275  ;;  %v3619_v60 = vpop.permute.xlu0 %265 }
  0x8c   : > { %6965 = vst [vmem:[#allocation51_spill] sm:$0xff] %v3617_v48  ;;  %6966 = vst [vmem:[#allocation52_spill] sm:$0xff] %v3619_v60  ;;  %v3643_v60 = vsel %vm446_vm2, %v471_v23, %v3630_v62  ;;  %v3662_v23 = vrot.slane %v3352_v49, 3 }
  0x8d   : > { %509 = vrot.lane.b32.xlu1 %v3598_v53, %s3138_s20  ;;  %507 = vrot.lane.b32.xlu0 %v3611_v61, %s3138_s20  ;;  %6971 = vst [vmem:[#allocation57_spill] sm:$0xff] %v3643_v60  ;;  %v474_v61 = vrot.slane %v3337_v45, 3 }
  0x8e   : > { %6976 = vst [vmem:[#allocation62_spill] sm:$0xff] %v3662_v23 }
  0x8f   : > { %v3633_v4 = vpop.permute.xlu1 %269  ;;  %v3635_v48 = vpop.permute.xlu0 %273 }
  0x90   : > { %6969 = vst [vmem:[#allocation55_spill] sm:$0xff] %v3633_v4  ;;  %6970 = vst [vmem:[#allocation56_spill] sm:$0xff] %v3635_v48  ;;  %v3659_v48 = vsel %vm446_vm2, %v474_v61, %v3646_v11  ;;  %v3678_v61 = vrot.slane %v3370_v54, 3 }
  0x91   : > { %513 = vrot.lane.b32.xlu1 %v3614_v38, %s3138_s20  ;;  %511 = vrot.lane.b32.xlu0 %v3627_v58, %s3138_s20  ;;  %6975 = vst [vmem:[#allocation61_spill] sm:$0xff] %v3659_v48  ;;  %v477_v58 = vrot.slane %v3355_v50, 3 }
  0x92   : > { %6980 = vst [vmem:[#allocation66_spill] sm:$0xff] %v3678_v61 }
  0x93   : > { %v3649_v53 = vpop.permute.xlu1 %279  ;;  %v3651_v4 = vpop.permute.xlu0 %277 }
  0x94   : > { %6973 = vst [vmem:[#allocation59_spill] sm:$0xff] %v3649_v53  ;;  %6974 = vst [vmem:[#allocation60_spill] sm:$0xff] %v3651_v4  ;;  %v3675_v4 = vsel %vm446_vm2, %v477_v58, %v3662_v23  ;;  %v557_v58 = vrot.slane %v3194_v1, 4  ;;  %v559_v1 = vrot.slane %v3207_v6, 4 }
  0x95   : > { %517 = vrot.lane.b32.xlu1 %v3630_v62, %s3138_s20  ;;  %515 = vrot.lane.b32.xlu0 %v3643_v60, %s3138_s20  ;;  %6979 = vst [vmem:[#allocation65_spill] sm:$0xff] %v3675_v4  ;;  %v480_v60 = vrot.slane %v3373_v55, 3 }
  0x97   : > { %v3665_v38 = vpop.permute.xlu1 %283  ;;  %v3667_v53 = vpop.permute.xlu0 %281 }
  0x98   : > { %6977 = vst [vmem:[#allocation63_spill] sm:$0xff] %v3665_v38  ;;  %6978 = vst [vmem:[#allocation64_spill] sm:$0xff] %v3667_v53  ;;  %v3691_v53 = vsel %vm446_vm2, %v480_v60, %v3678_v61  ;;  %v3705_v60 = vrot.slane %v3191_v0, 4 }
  0x99   : > { %521 = vrot.lane.b32.xlu1 %v3646_v11, %s3138_s20  ;;  %519 = vrot.lane.b32.xlu0 %v3659_v48, %s3138_s20  ;;  %6983 = vst [vmem:[#allocation69_spill] sm:$0xff] %v3691_v53  ;;  %v556_v48 = vrot.slane %v3204_v5, 4 }
  0x9b   : > { %v3681_v62 = vpop.permute.xlu1 %287  ;;  %v3683_v38 = vpop.permute.xlu0 %285 }
  0x9c   : > { %6981 = vst [vmem:[#allocation67_spill] sm:$0xff] %v3681_v62  ;;  %6982 = vst [vmem:[#allocation68_spill] sm:$0xff] %v3683_v38  ;;  %v558_v38 = vsel %vm6906_vm3, %v556_v48, %v557_v58  ;;  %v3719_v48 = vrot.slane %v3197_v2, 4 }
  0x9d   : > { %525 = vrot.lane.b32.xlu1 %v3662_v23, %s3138_s20  ;;  %523 = vrot.lane.b32.xlu0 %v3675_v4, %s3138_s20 }
  0x9e   : > { %6989 = vst [vmem:[#allocation75_spill] sm:$0xff] %v3719_v48 }
  0x9f   : > { %v3695_v11 = vpop.permute.xlu1 %291  ;;  %v3697_v43 = vpop.permute.xlu0 %289 }
  0xa0   : > { %6984 = vst [vmem:[#allocation70_spill] sm:$0xff] %v3695_v11  ;;  %6985 = vst [vmem:[#allocation71_spill] sm:$0xff] %v3697_v43  ;;  %v3716_v11 = vsel %vm6906_vm3, %v559_v1, %v3705_v60  ;;  %v562_v43 = vrot.slane %v3210_v7, 4  ;;  %v565_v1 = vrot.slane %v3226_v14, 4 }
  0xa1   : > { %529 = vrot.lane.b32.xlu1 %v3678_v61, %s3138_s20  ;;  %527 = vrot.lane.b32.xlu0 %v3691_v53, %s3138_s20  ;;  %6988 = vst [vmem:[#allocation74_spill] sm:$0xff] %v3716_v11 }
  0xa3   : > { %v3708_v62 = vpop.permute.xlu1 %295  ;;  %v3710_v5 = vpop.permute.xlu0 %293 }
  0xa4   : > { %6986 = vst [vmem:[#allocation72_spill] sm:$0xff] %v3708_v62  ;;  %6987 = vst [vmem:[#allocation73_spill] sm:$0xff] %v3710_v5 }
  0xa5   : > { %594 = vrot.lane.b32.xlu1 %v557_v58, %s3139_s21  ;;  %592 = vrot.lane.b32.xlu0 %v558_v38, %s3139_s21  ;;  %v3732_v38 = vsel %vm6906_vm3, %v562_v43, %v3719_v48  ;;  %v3735_v58 = vrot.slane %v3223_v13, 4  ;;  %v3751_v43 = vrot.slane %v3244_v19, 4 }
  0xa6   : > { %6992 = vst [vmem:[#allocation78_spill] sm:$0xff] %v3732_v38 }
  0xa7   : > { %v3722_v53 = vpop.permute.xlu1 %299  ;;  %v3724_v61 = vpop.permute.xlu0 %297  ;;  %6993 = vst [vmem:[#allocation79_spill] sm:$0xff] %v3735_v58  ;;  %6997 = vst [vmem:[#allocation83_spill] sm:$0xff] %v3751_v43 }
  0xa8   : > { %6990 = vst [vmem:[#allocation76_spill] sm:$0xff] %v3722_v53  ;;  %6991 = vst [vmem:[#allocation77_spill] sm:$0xff] %v3724_v61  ;;  %v3748_v61 = vsel %vm6906_vm3, %v565_v1, %v3735_v58  ;;  %v568_v53 = vrot.slane %v3247_v20, 4  ;;  %v3767_v1 = vrot.slane %v3262_v24, 4 }
  0xa9   : > { %598 = vrot.lane.b32.xlu1 %v3705_v60, %s3139_s21  ;;  %596 = vrot.lane.b32.xlu0 %v3716_v11, %s3139_s21  ;;  %6996 = vst [vmem:[#allocation82_spill] sm:$0xff] %v3748_v61 }
  0xaa   : > { %7001 = vst [vmem:[#allocation87_spill] sm:$0xff] %v3767_v1 }
  0xab   : > { %v3738_v5 = vpop.permute.xlu1 %303  ;;  %v3740_v62 = vpop.permute.xlu0 %301 }
  0xac   : > { %6994 = vst [vmem:[#allocation80_spill] sm:$0xff] %v3738_v5  ;;  %6995 = vst [vmem:[#allocation81_spill] sm:$0xff] %v3740_v62  ;;  %v3764_v62 = vsel %vm6906_vm3, %v568_v53, %v3751_v43  ;;  %v3783_v53 = vrot.slane %v3280_v29, 4 }
  0xad   : > { %602 = vrot.lane.b32.xlu1 %v3719_v48, %s3139_s21  ;;  %600 = vrot.lane.b32.xlu0 %v3732_v38, %s3139_s21  ;;  %7000 = vst [vmem:[#allocation86_spill] sm:$0xff] %v3764_v62  ;;  %v571_v38 = vrot.slane %v3265_v25, 4 }
  0xae   : > { %7005 = vst [vmem:[#allocation91_spill] sm:$0xff] %v3783_v53 }
  0xaf   : > { %v3754_v11 = vpop.permute.xlu1 %307  ;;  %v3756_v5 = vpop.permute.xlu0 %305 }
  0xb0   : > { %6998 = vst [vmem:[#allocation84_spill] sm:$0xff] %v3754_v11  ;;  %6999 = vst [vmem:[#allocation85_spill] sm:$0xff] %v3756_v5  ;;  %v3780_v5 = vsel %vm6906_vm3, %v571_v38, %v3767_v1  ;;  %v3799_v38 = vrot.slane %v3298_v34, 4 }
  0xb1   : > { %606 = vrot.lane.b32.xlu1 %v3735_v58, %s3139_s21  ;;  %604 = vrot.lane.b32.xlu0 %v3748_v61, %s3139_s21  ;;  %7004 = vst [vmem:[#allocation90_spill] sm:$0xff] %v3780_v5  ;;  %v574_v61 = vrot.slane %v3283_v30, 4 }
  0xb2   : > { %7009 = vst [vmem:[#allocation95_spill] sm:$0xff] %v3799_v38 }
  0xb3   : > { %v3770_v48 = vpop.permute.xlu1 %311  ;;  %v3772_v11 = vpop.permute.xlu0 %309 }
  0xb4   : > { %7002 = vst [vmem:[#allocation88_spill] sm:$0xff] %v3770_v48  ;;  %7003 = vst [vmem:[#allocation89_spill] sm:$0xff] %v3772_v11  ;;  %v3796_v11 = vsel %vm6906_vm3, %v574_v61, %v3783_v53  ;;  %v3815_v61 = vrot.slane %v3316_v39, 4 }
  0xb5   : > { %610 = vrot.lane.b32.xlu1 %v3751_v43, %s3139_s21  ;;  %608 = vrot.lane.b32.xlu0 %v3764_v62, %s3139_s21  ;;  %7008 = vst [vmem:[#allocation94_spill] sm:$0xff] %v3796_v11  ;;  %v577_v62 = vrot.slane %v3301_v35, 4 }
  0xb6   : > { %7013 = vst [vmem:[#allocation99_spill] sm:$0xff] %v3815_v61 }
  0xb7   : > { %v3786_v58 = vpop.permute.xlu1 %376  ;;  %v3788_v48 = vpop.permute.xlu0 %374 }
  0xb8   : > { %7006 = vst [vmem:[#allocation92_spill] sm:$0xff] %v3786_v58  ;;  %7007 = vst [vmem:[#allocation93_spill] sm:$0xff] %v3788_v48  ;;  %v3812_v48 = vsel %vm6906_vm3, %v577_v62, %v3799_v38  ;;  %v3831_v62 = vrot.slane %v3334_v44, 4 }
  0xb9   : > { %614 = vrot.lane.b32.xlu1 %v3767_v1, %s3139_s21  ;;  %612 = vrot.lane.b32.xlu0 %v3780_v5, %s3139_s21  ;;  %7012 = vst [vmem:[#allocation98_spill] sm:$0xff] %v3812_v48  ;;  %v580_v5 = vrot.slane %v3319_v40, 4 }
  0xba   : > { %7017 = vst [vmem:[#allocation103_spill] sm:$0xff] %v3831_v62 }
  0xbb   : > { %v3802_v43 = vpop.permute.xlu1 %380  ;;  %v3804_v58 = vpop.permute.xlu0 %378 }
  0xbc   : > { %7010 = vst [vmem:[#allocation96_spill] sm:$0xff] %v3802_v43  ;;  %7011 = vst [vmem:[#allocation97_spill] sm:$0xff] %v3804_v58  ;;  %v3828_v58 = vsel %vm6906_vm3, %v580_v5, %v3815_v61  ;;  %v3847_v5 = vrot.slane %v3352_v49, 4 }
  0xbd   : > { %618 = vrot.lane.b32.xlu1 %v3783_v53, %s3139_s21  ;;  %616 = vrot.lane.b32.xlu0 %v3796_v11, %s3139_s21  ;;  %7016 = vst [vmem:[#allocation102_spill] sm:$0xff] %v3828_v58  ;;  %v583_v11 = vrot.slane %v3337_v45, 4 }
  0xbe   : > { %7021 = vst [vmem:[#allocation107_spill] sm:$0xff] %v3847_v5 }
  0xbf   : > { %v3818_v1 = vpop.permute.xlu1 %384  ;;  %v3820_v43 = vpop.permute.xlu0 %382 }
  0xc0   : > { %7014 = vst [vmem:[#allocation100_spill] sm:$0xff] %v3818_v1  ;;  %7015 = vst [vmem:[#allocation101_spill] sm:$0xff] %v3820_v43  ;;  %v3844_v43 = vsel %vm6906_vm3, %v583_v11, %v3831_v62  ;;  %v3863_v11 = vrot.slane %v3370_v54, 4 }
  0xc1   : > { %622 = vrot.lane.b32.xlu1 %v3799_v38, %s3139_s21  ;;  %620 = vrot.lane.b32.xlu0 %v3812_v48, %s3139_s21  ;;  %7020 = vst [vmem:[#allocation106_spill] sm:$0xff] %v3844_v43  ;;  %v586_v48 = vrot.slane %v3355_v50, 4 }
  0xc2   : > { %7025 = vst [vmem:[#allocation111_spill] sm:$0xff] %v3863_v11 }
  0xc3   : > { %v3834_v53 = vpop.permute.xlu1 %388  ;;  %v3836_v1 = vpop.permute.xlu0 %386 }
  0xc4   : > { %7018 = vst [vmem:[#allocation104_spill] sm:$0xff] %v3834_v53  ;;  %7019 = vst [vmem:[#allocation105_spill] sm:$0xff] %v3836_v1  ;;  %v3860_v1 = vsel %vm6906_vm3, %v586_v48, %v3847_v5 }
  0xc5   : > { %626 = vrot.lane.b32.xlu1 %v3815_v61, %s3139_s21  ;;  %624 = vrot.lane.b32.xlu0 %v3828_v58, %s3139_s21  ;;  %7024 = vst [vmem:[#allocation110_spill] sm:$0xff] %v3860_v1  ;;  %v589_v58 = vrot.slane %v3373_v55, 4 }
  0xc7   : > { %v3850_v38 = vpop.permute.xlu1 %392  ;;  %v3852_v53 = vpop.permute.xlu0 %390 }
  0xc8   : > { %7022 = vst [vmem:[#allocation108_spill] sm:$0xff] %v3850_v38  ;;  %7023 = vst [vmem:[#allocation109_spill] sm:$0xff] %v3852_v53  ;;  %v3876_v53 = vsel %vm6906_vm3, %v589_v58, %v3863_v11 }
  0xc9   : > { %630 = vrot.lane.b32.xlu1 %v3831_v62, %s3139_s21  ;;  %628 = vrot.lane.b32.xlu0 %v3844_v43, %s3139_s21  ;;  %7028 = vst [vmem:[#allocation114_spill] sm:$0xff] %v3876_v53 }
  0xcb   : > { %v3866_v61 = vpop.permute.xlu1 %396  ;;  %v3868_v38 = vpop.permute.xlu0 %394 }
  0xcc   : > { %7026 = vst [vmem:[#allocation112_spill] sm:$0xff] %v3866_v61  ;;  %7027 = vst [vmem:[#allocation113_spill] sm:$0xff] %v3868_v38 }
  0xcd   : > { %634 = vrot.lane.b32.xlu1 %v3847_v5, %s3139_s21  ;;  %632 = vrot.lane.b32.xlu0 %v3860_v1, %s3139_s21 }
  0xcf   : > { %v3878_v48 = vpop.permute.xlu1 %400  ;;  %v3880_v43 = vpop.permute.xlu0 %398 }
  0xd0   : > { %7029 = vst [vmem:[#allocation115_spill] sm:$0xff] %v3878_v48 }
  0xd1   : > { %638 = vrot.lane.b32.xlu1 %v3863_v11, %s3139_s21  ;;  %636 = vrot.lane.b32.xlu0 %v3876_v53, %s3139_s21 }
  0xd3   : > { %v3886_v38 = vpop.permute.xlu1 %404  ;;  %v3888_v61 = vpop.permute.xlu0 %402 }
  0xd4   : > { %7030 = vst [vmem:[#allocation116_spill] sm:$0xff] %v3886_v38  ;;  %7031 = vst [vmem:[#allocation117_spill] sm:$0xff] %v3888_v61 }
  0xd5   : > { %668 = vrot.lane.b32.xlu1 %v3191_v0, %s3140_s22  ;;  %666 = vrot.lane.b32.xlu0 %v3207_v6, %s3140_s22 }
  0xd7   : > { %v3894_v58 = vpop.permute.xlu1 %408  ;;  %v3896_v48 = vpop.permute.xlu0 %406 }
  0xd8   : > { %7032 = vst [vmem:[#allocation118_spill] sm:$0xff] %v3894_v58  ;;  %7033 = vst [vmem:[#allocation119_spill] sm:$0xff] %v3896_v48 }
  0xd9   : > { %672 = vrot.lane.b32.xlu1 %v3197_v2, %s3140_s22  ;;  %670 = vrot.lane.b32.xlu0 %v3210_v7, %s3140_s22 }
  0xdb   : > { %v3902_v38 = vpop.permute.xlu1 %412  ;;  %v3904_v61 = vpop.permute.xlu0 %410 }
  0xdc   : > { %7034 = vst [vmem:[#allocation120_spill] sm:$0xff] %v3902_v38  ;;  %7035 = vst [vmem:[#allocation121_spill] sm:$0xff] %v3904_v61  ;;  %v7154_v61 = vld [vmem:[#allocation78_spill] sm:$0xff]  ;;  %v7157_v38 = vld [vmem:[#allocation79_spill] sm:$0xff] }
  0xdd   : > { %676 = vrot.lane.b32.xlu1 %v3223_v13, %s3140_s22  ;;  %674 = vrot.lane.b32.xlu0 %v3226_v14, %s3140_s22 }
  0xdf   : > { %v3910_v0 = vpop.permute.xlu1 %416  ;;  %v3912_v6 = vpop.permute.xlu0 %414 }
  0xe0   : > { %7036 = vst [vmem:[#allocation122_spill] sm:$0xff] %v3910_v0  ;;  %7037 = vst [vmem:[#allocation123_spill] sm:$0xff] %v3912_v6  ;;  %v7153_v0 = vld [vmem:[#allocation75_spill] sm:$0xff] }
  0xe1   : > { %680 = vrot.lane.b32.xlu1 %v3244_v19, %s3140_s22  ;;  %678 = vrot.lane.b32.xlu0 %v3247_v20, %s3140_s22 }
  0xe3   : > { %v3918_v2 = vpop.permute.xlu1 %420  ;;  %v3920_v7 = vpop.permute.xlu0 %418 }
  0xe4   : > { %7038 = vst [vmem:[#allocation124_spill] sm:$0xff] %v3918_v2  ;;  %7039 = vst [vmem:[#allocation125_spill] sm:$0xff] %v3920_v7  ;;  %v7144_v7 = vld [vmem:[#allocation69_spill] sm:$0xff] }
  0xe5   : > { %684 = vrot.lane.b32.xlu1 %v3262_v24, %s3140_s22  ;;  %682 = vrot.lane.b32.xlu0 %v3265_v25, %s3140_s22 }
  0xe7   : > { %v3926_v13 = vpop.permute.xlu1 %485  ;;  %v3928_v14 = vpop.permute.xlu0 %483 }
  0xe8   : > { %7040 = vst [vmem:[#allocation126_spill] sm:$0xff] %v3926_v13  ;;  %7041 = vst [vmem:[#allocation127_spill] sm:$0xff] %v3928_v14 }
  0xe9   : > { %688 = vrot.lane.b32.xlu1 %v3280_v29, %s3140_s22  ;;  %686 = vrot.lane.b32.xlu0 %v3283_v30, %s3140_s22 }
  0xeb   : > { %v3934_v19 = vpop.permute.xlu1 %489  ;;  %v3936_v20 = vpop.permute.xlu0 %487 }
  0xec   : > { %7042 = vst [vmem:[#allocation128_spill] sm:$0xff] %v3934_v19  ;;  %7043 = vst [vmem:[#allocation129_spill] sm:$0xff] %v3936_v20 }
  0xed   : > { %692 = vrot.lane.b32.xlu1 %v3298_v34, %s3140_s22  ;;  %690 = vrot.lane.b32.xlu0 %v3301_v35, %s3140_s22 }
  0xef   : > { %v3942_v24 = vpop.permute.xlu1 %493  ;;  %v3944_v25 = vpop.permute.xlu0 %491 }
  0xf0   : > { %7044 = vst [vmem:[#allocation130_spill] sm:$0xff] %v3944_v25 }
  0xf1   : > { %696 = vrot.lane.b32.xlu1 %v3316_v39, %s3140_s22  ;;  %694 = vrot.lane.b32.xlu0 %v3319_v40, %s3140_s22 }
  0xf3   : > { %v3950_v29 = vpop.permute.xlu1 %497  ;;  %v3952_v30 = vpop.permute.xlu0 %495 }
  0xf5   : > { %700 = vrot.lane.b32.xlu1 %v3334_v44, %s3140_s22  ;;  %698 = vrot.lane.b32.xlu0 %v3337_v45, %s3140_s22  ;;  %v3975_v44 = vld [vmem:[%s3188_s17 + $0xc8] sm:$0xff]  ;;  %v3978_v45 = vld [vmem:[%s3188_s17 + $0xc0] sm:$0xff] }
  0xf7   : > { %v3958_v34 = vpop.permute.xlu1 %501  ;;  %v3960_v35 = vpop.permute.xlu0 %499 }
  0xf9   : > { %704 = vrot.lane.b32.xlu1 %v3352_v49, %s3140_s22  ;;  %702 = vrot.lane.b32.xlu0 %v3355_v50, %s3140_s22 }
  0xfb   : > { %v3966_v39 = vpop.permute.xlu1 %505  ;;  %v3968_v40 = vpop.permute.xlu0 %503 }
  0xfd   : > { %708 = vrot.lane.b32.xlu1 %v3370_v54, %s3140_s22  ;;  %706 = vrot.lane.b32.xlu0 %v3373_v55, %s3140_s22 }
  0xff   : > { %v3980_v25 = vpop.permute.xlu1 %509  ;;  %v3982_v49 = vpop.permute.xlu0 %507 }
 0x100   : > { %7045 = vst [vmem:[#allocation131_spill] sm:$0xff] %v3980_v25 }
 0x101   : > { %712 = vrot.lane.b32.xlu1 %v3975_v44, %s3140_s22  ;;  %710 = vrot.lane.b32.xlu0 %v3978_v45, %s3140_s22 }
 0x103   : > { %v3988_v50 = vpop.permute.xlu1 %513  ;;  %v3990_v54 = vpop.permute.xlu0 %511 }
 0x104   : > { %7046 = vst [vmem:[#allocation132_spill] sm:$0xff] %v3988_v50  ;;  %7047 = vst [vmem:[#allocation133_spill] sm:$0xff] %v3990_v54 }
 0x105   : > { %743 = vrot.lane.b32.xlu1 %v3200_v3, %s3141_s23  ;;  %741 = vrot.lane.b32.xlu0 %v3233_v15, %s3141_s23 }
 0x107   : > { %v3996_v55 = vpop.permute.xlu1 %517  ;;  %v3998_v19 = vpop.permute.xlu0 %515 }
 0x108   : > { %7048 = vst [vmem:[#allocation134_spill] sm:$0xff] %v3996_v55  ;;  %7049 = vst [vmem:[#allocation135_spill] sm:$0xff] %v3998_v19  ;;  %v7115_v19 = vld [vmem:[#allocation40_spill] sm:$0xff] }
 0x109   : > { %747 = vrot.lane.b32.xlu1 %v3217_v9, %s3141_s23  ;;  %745 = vrot.lane.b32.xlu0 %v3237_v16, %s3141_s23 }
 0x10b   : > { %v4004_v50 = vpop.permute.xlu1 %521  ;;  %v4006_v54 = vpop.permute.xlu0 %519 }
 0x10c   : > { %7050 = vst [vmem:[#allocation136_spill] sm:$0xff] %v4004_v50  ;;  %7051 = vst [vmem:[#allocation137_spill] sm:$0xff] %v4006_v54  ;;  %v7111_v54 = vld [vmem:[#allocation38_spill] sm:$0xff]  ;;  %v7112_v50 = vld [vmem:[#allocation39_spill] sm:$0xff] }
 0x10d   : > { %751 = vrot.lane.b32.xlu1 %v3240_v17, %s3141_s23  ;;  %749 = vrot.lane.b32.xlu0 %v3255_v21, %s3141_s23 }
 0x10f   : > { %v4012_v3 = vpop.permute.xlu1 %525  ;;  %v4014_v15 = vpop.permute.xlu0 %523 }
 0x110   : > { %7052 = vst [vmem:[#allocation138_spill] sm:$0xff] %v4012_v3  ;;  %7053 = vst [vmem:[#allocation139_spill] sm:$0xff] %v4014_v15 }
 0x111   : > { %755 = vrot.lane.b32.xlu1 %v3258_v22, %s3141_s23  ;;  %753 = vrot.lane.b32.xlu0 %v3273_v26, %s3141_s23 }
 0x113   : > { %v4020_v20 = vpop.permute.xlu1 %529  ;;  %v4022_v13 = vpop.permute.xlu0 %527 }
 0x114   : > { %7054 = vst [vmem:[#allocation140_spill] sm:$0xff] %v4020_v20  ;;  %7055 = vst [vmem:[#allocation141_spill] sm:$0xff] %v4022_v13  ;;  %v7101_v13 = vld [vmem:[#allocation35_spill] sm:$0xff] }
 0x115   : > { %759 = vrot.lane.b32.xlu1 %v3276_v27, %s3141_s23  ;;  %757 = vrot.lane.b32.xlu0 %v3291_v31, %s3141_s23 }
 0x117   : > { %v4028_v14 = vpop.permute.xlu1 %594  ;;  %v4030_v25 = vpop.permute.xlu0 %592 }
 0x118   : > { %7056 = vst [vmem:[#allocation142_spill] sm:$0xff] %v4028_v14  ;;  %7057 = vst [vmem:[#allocation143_spill] sm:$0xff] %v4030_v25 }
 0x119   : > { %763 = vrot.lane.b32.xlu1 %v3294_v32, %s3141_s23  ;;  %761 = vrot.lane.b32.xlu0 %v3309_v36, %s3141_s23 }
 0x11b   : > { %v4036_v15 = vpop.permute.xlu1 %598  ;;  %v4038_v20 = vpop.permute.xlu0 %596 }
 0x11c   : > { %7058 = vst [vmem:[#allocation144_spill] sm:$0xff] %v4036_v15  ;;  %7059 = vst [vmem:[#allocation145_spill] sm:$0xff] %v4038_v20 }
 0x11d   : > { %767 = vrot.lane.b32.xlu1 %v3312_v37, %s3141_s23  ;;  %765 = vrot.lane.b32.xlu0 %v3327_v41, %s3141_s23 }
 0x11f   : > { %v4044_v27 = vpop.permute.xlu1 %602  ;;  %v4046_v14 = vpop.permute.xlu0 %600 }
 0x120   : > { %7060 = vst [vmem:[#allocation146_spill] sm:$0xff] %v4046_v14  ;;  %v738_v14 = vrot.slane %v3978_v45, 1 }
 0x121   : > { %771 = vrot.lane.b32.xlu1 %v3330_v42, %s3141_s23  ;;  %769 = vrot.lane.b32.xlu0 %v3345_v46, %s3141_s23  ;;  %v4069_v46 = vrot.slane %v3975_v44, 1 }
 0x123   : > { %v4052_v32 = vpop.permute.xlu1 %606  ;;  %v4054_v15 = vpop.permute.xlu0 %604  ;;  %7061 = vst [vmem:[#allocation147_spill] sm:$0xff] %v4069_v46  ;;  %v4082_v25 = vsel %vm6914_vm0, %v738_v14, %v4069_v46 }
 0x124   : > { %7064 = vst [vmem:[#allocation150_spill] sm:$0xff] %v4082_v25 }
 0x125   : > { %775 = vrot.lane.b32.xlu1 %v3348_v47, %s3141_s23  ;;  %773 = vrot.lane.b32.xlu0 %v3363_v51, %s3141_s23 }
 0x127   : > { %v4060_v37 = vpop.permute.xlu1 %610  ;;  %v4062_v41 = vpop.permute.xlu0 %608 }
 0x129   : > { %779 = vrot.lane.b32.xlu1 %v3366_v52, %s3141_s23  ;;  %777 = vrot.lane.b32.xlu0 %v3381_v56, %s3141_s23 }
 0x12b   : > { %v4072_v36 = vpop.permute.xlu1 %614  ;;  %v4074_v20 = vpop.permute.xlu0 %612 }
 0x12c   : > { %7062 = vst [vmem:[#allocation148_spill] sm:$0xff] %v4072_v36  ;;  %7063 = vst [vmem:[#allocation149_spill] sm:$0xff] %v4074_v20 }
 0x12d   : > { %783 = vrot.lane.b32.xlu1 %v3384_v57, %s3141_s23  ;;  %781 = vrot.lane.b32.xlu0 %v3393_v59, %s3141_s23  ;;  %v7075_v59 = vld [vmem:[#allocation21_spill] sm:$0xff] }
 0x12f   : > { %v4084_v52 = vpop.permute.xlu1 %618  ;;  %v4086_v56 = vpop.permute.xlu0 %616 }
 0x130   : > { %7065 = vst [vmem:[#allocation151_spill] sm:$0xff] %v4084_v52  ;;  %7066 = vst [vmem:[#allocation152_spill] sm:$0xff] %v4086_v56 }
 0x131   : > { %787 = vrot.lane.b32.xlu1 %v4069_v46, %s3141_s23  ;;  %785 = vrot.lane.b32.xlu0 %v4082_v25, %s3141_s23 }
 0x133   : > { %v4092_v47 = vpop.permute.xlu1 %622  ;;  %v4094_v57 = vpop.permute.xlu0 %620 }
 0x134   : > { %7067 = vst [vmem:[#allocation153_spill] sm:$0xff] %v4092_v47  ;;  %7068 = vst [vmem:[#allocation154_spill] sm:$0xff] %v4094_v57 }
 0x135   : > { %818 = vrot.lane.b32.xlu1 %v3403_v63, %s3142_s24  ;;  %816 = vrot.lane.b32.xlu0 %v3410_v8, %s3142_s24 }
 0x137   : > { %v4100_v14 = vpop.permute.xlu1 %626  ;;  %v4102_v52 = vpop.permute.xlu0 %624 }
 0x138   : > { %7069 = vst [vmem:[#allocation155_spill] sm:$0xff] %v4100_v14  ;;  %7070 = vst [vmem:[#allocation156_spill] sm:$0xff] %v4102_v52 }
 0x139   : > { %822 = vrot.lane.b32.xlu1 %v3413_v10, %s3142_s24  ;;  %820 = vrot.lane.b32.xlu0 %v3422_v12, %s3142_s24  ;;  %v7078_v10 = vld [vmem:[#allocation22_spill] sm:$0xff] }
 0x13b   : > { %v4108_v47 = vpop.permute.xlu1 %630  ;;  %v4110_v57 = vpop.permute.xlu0 %628 }
 0x13c   : > { %7071 = vst [vmem:[#allocation157_spill] sm:$0xff] %v4108_v47  ;;  %7072 = vst [vmem:[#allocation158_spill] sm:$0xff] %v4110_v57  ;;  %v813_v57 = vrot.slane %v3978_v45, 2 }
 0x13d   : > { %826 = vrot.lane.b32.xlu1 %v3425_v18, %s3142_s24  ;;  %824 = vrot.lane.b32.xlu0 %v3434_v28, %s3142_s24  ;;  %v7079_v18 = vld [vmem:[#allocation23_spill] sm:$0xff] }
 0x13f   : > { %v4116_v63 = vpop.permute.xlu1 %634  ;;  %v4118_v8 = vpop.permute.xlu0 %632 }
 0x140   : > { %7073 = vst [vmem:[#allocation159_spill] sm:$0xff] %v4116_v63  ;;  %7074 = vst [vmem:[#allocation160_spill] sm:$0xff] %v4118_v8  ;;  %v7082_v8 = vld [vmem:[#allocation24_spill] sm:$0xff] }
 0x141   : > { %830 = vrot.lane.b32.xlu1 %v3437_v33, %s3142_s24  ;;  %828 = vrot.lane.b32.xlu0 %v7075_v59, %s3142_s24  ;;  %v7083_v33 = vld [vmem:[#allocation25_spill] sm:$0xff] }
 0x143   : > { %v4124_v42 = vpop.permute.xlu1 %638  ;;  %v4126_v51 = vpop.permute.xlu0 %636 }
 0x144   : > { %7076 = vst [vmem:[#allocation161_spill] sm:$0xff] %v4124_v42  ;;  %7077 = vst [vmem:[#allocation162_spill] sm:$0xff] %v4126_v51  ;;  %v7086_v51 = vld [vmem:[#allocation26_spill] sm:$0xff] }
 0x145   : > { %834 = vrot.lane.b32.xlu1 %v7078_v10, %s3142_s24  ;;  %832 = vrot.lane.b32.xlu0 %v7079_v18, %s3142_s24  ;;  %v7087_v10 = vld [vmem:[#allocation27_spill] sm:$0xff] }
 0x147   : > { %v4132_v28 = vpop.permute.xlu1 %668  ;;  %v4134_v12 = vpop.permute.xlu0 %666 }
 0x148   : > { %7080 = vst [vmem:[#allocation163_spill] sm:$0xff] %v4132_v28  ;;  %7081 = vst [vmem:[#allocation164_spill] sm:$0xff] %v4134_v12  ;;  %v7089_v12 = vld [vmem:[#allocation28_spill] sm:$0xff] }
 0x149   : > { %838 = vrot.lane.b32.xlu1 %v7082_v8, %s3142_s24  ;;  %836 = vrot.lane.b32.xlu0 %v7083_v33, %s3142_s24  ;;  %v7090_v8 = vld [vmem:[#allocation29_spill] sm:$0xff] }
 0x14b   : > { %v4140_v59 = vpop.permute.xlu1 %672  ;;  %v4142_v42 = vpop.permute.xlu0 %670 }
 0x14c   : > { %7084 = vst [vmem:[#allocation165_spill] sm:$0xff] %v4140_v59  ;;  %7085 = vst [vmem:[#allocation166_spill] sm:$0xff] %v4142_v42  ;;  %v7091_v42 = vld [vmem:[#allocation30_spill] sm:$0xff] }
 0x14d   : > { %842 = vrot.lane.b32.xlu1 %v7086_v51, %s3142_s24  ;;  %840 = vrot.lane.b32.xlu0 %v7087_v10, %s3142_s24  ;;  %v7092_v51 = vld [vmem:[#allocation31_spill] sm:$0xff] }
 0x14f   : > { %v4148_v18 = vpop.permute.xlu1 %676  ;;  %v4150_v28 = vpop.permute.xlu0 %674 }
 0x150   : > { %7088 = vst [vmem:[#allocation167_spill] sm:$0xff] %v4150_v28  ;;  %v7095_v28 = vld [vmem:[#allocation32_spill] sm:$0xff] }
 0x151   : > { %846 = vrot.lane.b32.xlu1 %v7089_v12, %s3142_s24  ;;  %844 = vrot.lane.b32.xlu0 %v7090_v8, %s3142_s24  ;;  %v7096_v12 = vld [vmem:[#allocation33_spill] sm:$0xff]  ;;  %v4173_v8 = vrot.slane %v3975_v44, 2 }
 0x153   : > { %v4156_v33 = vpop.permute.xlu1 %680  ;;  %v4158_v59 = vpop.permute.xlu0 %678  ;;  %7097 = vst [vmem:[#allocation170_spill] sm:$0xff] %v4173_v8 }
 0x155   : > { %850 = vrot.lane.b32.xlu1 %v7091_v42, %s3142_s24  ;;  %848 = vrot.lane.b32.xlu0 %v7092_v51, %s3142_s24  ;;  %v7100_v51 = vld [vmem:[#allocation34_spill] sm:$0xff] }
 0x157   : > { %v4164_v10 = vpop.permute.xlu1 %684  ;;  %v4166_v63 = vpop.permute.xlu0 %682 }
 0x158   : > { %7093 = vst [vmem:[#allocation168_spill] sm:$0xff] %v4164_v10  ;;  %7094 = vst [vmem:[#allocation169_spill] sm:$0xff] %v4166_v63  ;;  %v4537_v63 = vld [vmem:[%s3188_s17 + $0xb0] sm:$0xff] }
 0x159   : > { %854 = vrot.lane.b32.xlu1 %v7095_v28, %s3142_s24  ;;  %852 = vrot.lane.b32.xlu0 %v7096_v12, %s3142_s24  ;;  %v4186_v28 = vsel %vm337_vm1, %v813_v57, %v4173_v8  ;;  %v7108_v57 = vld [vmem:[#allocation37_spill] sm:$0xff] }
 0x15a   : > { %7102 = vst [vmem:[#allocation173_spill] sm:$0xff] %v4186_v28 }
 0x15b   : > { %v4176_v47 = vpop.permute.xlu1 %688  ;;  %v4178_v42 = vpop.permute.xlu0 %686 }
 0x15c   : > { %7098 = vst [vmem:[#allocation171_spill] sm:$0xff] %v4176_v47  ;;  %7099 = vst [vmem:[#allocation172_spill] sm:$0xff] %v4178_v42 }
 0x15d   : > { %858 = vrot.lane.b32.xlu1 %v7100_v51, %s3142_s24  ;;  %856 = vrot.lane.b32.xlu0 %v7101_v13, %s3142_s24  ;;  %v7107_v13 = vld [vmem:[#allocation36_spill] sm:$0xff] }
 0x15f   : > { %v4188_v12 = vpop.permute.xlu1 %692  ;;  %v4190_v52 = vpop.permute.xlu0 %690 }
 0x160   : > { %7103 = vst [vmem:[#allocation174_spill] sm:$0xff] %v4188_v12  ;;  %7104 = vst [vmem:[#allocation175_spill] sm:$0xff] %v4190_v52 }
 0x161   : > { %862 = vrot.lane.b32.xlu1 %v4173_v8, %s3142_s24  ;;  %860 = vrot.lane.b32.xlu0 %v4186_v28, %s3142_s24 }
 0x163   : > { %v4196_v14 = vpop.permute.xlu1 %696  ;;  %v4198_v51 = vpop.permute.xlu0 %694 }
 0x164   : > { %7105 = vst [vmem:[#allocation176_spill] sm:$0xff] %v4196_v14  ;;  %7106 = vst [vmem:[#allocation177_spill] sm:$0xff] %v4198_v51 }
 0x165   : > { %893 = vrot.lane.b32.xlu1 %v7107_v13, %s3143_s25  ;;  %891 = vrot.lane.b32.xlu0 %v7108_v57, %s3143_s25  ;;  %v7116_v13 = vld [vmem:[#allocation41_spill] sm:$0xff] }
 0x167   : > { %v4204_v12 = vpop.permute.xlu1 %700  ;;  %v4206_v3 = vpop.permute.xlu0 %698 }
 0x168   : > { %7109 = vst [vmem:[#allocation36_spill] sm:$0xff] %v4204_v12  ;;  %7110 = vst [vmem:[#allocation37_spill] sm:$0xff] %v4206_v3  ;;  %v7119_v3 = vld [vmem:[#allocation42_spill] sm:$0xff] }
 0x169   : > { %897 = vrot.lane.b32.xlu1 %v7111_v54, %s3143_s25  ;;  %895 = vrot.lane.b32.xlu0 %v7112_v50, %s3143_s25  ;;  %v7120_v54 = vld [vmem:[#allocation43_spill] sm:$0xff] }
 0x16b   : > { %v4212_v14 = vpop.permute.xlu1 %704  ;;  %v4214_v51 = vpop.permute.xlu0 %702 }
 0x16c   : > { %7113 = vst [vmem:[#allocation178_spill] sm:$0xff] %v4212_v14  ;;  %7114 = vst [vmem:[#allocation179_spill] sm:$0xff] %v4214_v51  ;;  %v7123_v51 = vld [vmem:[#allocation44_spill] sm:$0xff] }
 0x16d   : > { %901 = vrot.lane.b32.xlu1 %v7115_v19, %s3143_s25  ;;  %899 = vrot.lane.b32.xlu0 %v7116_v13, %s3143_s25  ;;  %v7124_v19 = vld [vmem:[#allocation45_spill] sm:$0xff] }
 0x16f   : > { %v4220_v57 = vpop.permute.xlu1 %708  ;;  %v4222_v12 = vpop.permute.xlu0 %706 }
 0x170   : > { %7117 = vst [vmem:[#allocation180_spill] sm:$0xff] %v4220_v57  ;;  %7118 = vst [vmem:[#allocation181_spill] sm:$0xff] %v4222_v12  ;;  %v7127_v12 = vld [vmem:[#allocation46_spill] sm:$0xff] }
 0x171   : > { %905 = vrot.lane.b32.xlu1 %v7119_v3, %s3143_s25  ;;  %903 = vrot.lane.b32.xlu0 %v7120_v54, %s3143_s25  ;;  %v7128_v3 = vld [vmem:[#allocation49_spill] sm:$0xff] }
 0x173   : > { %v4228_v50 = vpop.permute.xlu1 %712  ;;  %v4230_v14 = vpop.permute.xlu0 %710 }
 0x174   : > { %7121 = vst [vmem:[#allocation182_spill] sm:$0xff] %v4228_v50  ;;  %7122 = vst [vmem:[#allocation183_spill] sm:$0xff] %v4230_v14  ;;  %v7131_v14 = vld [vmem:[#allocation50_spill] sm:$0xff] }
 0x175   : > { %909 = vrot.lane.b32.xlu1 %v7123_v51, %s3143_s25  ;;  %907 = vrot.lane.b32.xlu0 %v7124_v19, %s3143_s25  ;;  %v7132_v51 = vld [vmem:[#allocation53_spill] sm:$0xff] }
 0x177   : > { %v4236_v13 = vpop.permute.xlu1 %743  ;;  %v4238_v57 = vpop.permute.xlu0 %741 }
 0x178   : > { %7125 = vst [vmem:[#allocation184_spill] sm:$0xff] %v4236_v13  ;;  %7126 = vst [vmem:[#allocation185_spill] sm:$0xff] %v4238_v57  ;;  %v7134_v57 = vld [vmem:[#allocation54_spill] sm:$0xff] }
 0x179   : > { %913 = vrot.lane.b32.xlu1 %v7127_v12, %s3143_s25  ;;  %911 = vrot.lane.b32.xlu0 %v7128_v3, %s3143_s25  ;;  %v7135_v12 = vld [vmem:[#allocation57_spill] sm:$0xff] }
 0x17b   : > { %v4244_v54 = vpop.permute.xlu1 %747  ;;  %v4246_v50 = vpop.permute.xlu0 %745 }
 0x17c   : > { %7129 = vst [vmem:[#allocation186_spill] sm:$0xff] %v4244_v54  ;;  %7130 = vst [vmem:[#allocation187_spill] sm:$0xff] %v4246_v50  ;;  %v7136_v50 = vld [vmem:[#allocation58_spill] sm:$0xff] }
 0x17d   : > { %917 = vrot.lane.b32.xlu1 %v7131_v14, %s3143_s25  ;;  %915 = vrot.lane.b32.xlu0 %v7132_v51, %s3143_s25  ;;  %v7137_v14 = vld [vmem:[#allocation61_spill] sm:$0xff] }
 0x17f   : > { %v4252_v19 = vpop.permute.xlu1 %751  ;;  %v4254_v13 = vpop.permute.xlu0 %749 }
 0x180   : > { %7133 = vst [vmem:[#allocation188_spill] sm:$0xff] %v4254_v13  ;;  %v888_v13 = vrot.slane %v3978_v45, 3 }
 0x181   : > { %921 = vrot.lane.b32.xlu1 %v7134_v57, %s3143_s25  ;;  %919 = vrot.lane.b32.xlu0 %v7135_v12, %s3143_s25  ;;  %v4277_v12 = vrot.slane %v3975_v44, 3 }
 0x183   : > { %v4260_v3 = vpop.permute.xlu1 %755  ;;  %v4262_v54 = vpop.permute.xlu0 %753  ;;  %7140 = vst [vmem:[#allocation191_spill] sm:$0xff] %v4277_v12 }
 0x185   : > { %925 = vrot.lane.b32.xlu1 %v7136_v50, %s3143_s25  ;;  %923 = vrot.lane.b32.xlu0 %v7137_v14, %s3143_s25  ;;  %v7143_v14 = vld [vmem:[#allocation66_spill] sm:$0xff] }
 0x187   : > { %v4268_v51 = vpop.permute.xlu1 %759  ;;  %v4270_v55 = vpop.permute.xlu0 %757 }
 0x188   : > { %7138 = vst [vmem:[#allocation189_spill] sm:$0xff] %v4268_v51  ;;  %7139 = vst [vmem:[#allocation190_spill] sm:$0xff] %v4270_v55  ;;  %v4532_v51 = vld [vmem:[%s3188_s17 + $0xb8] sm:$0xff] }
 0x189   : > { %929 = vrot.lane.b32.xlu1 %v3662_v23, %s3143_s25  ;;  %927 = vrot.lane.b32.xlu0 %v3675_v4, %s3143_s25  ;;  %v4290_v23 = vsel %vm446_vm2, %v888_v13, %v4277_v12  ;;  %v7150_v13 = vld [vmem:[#allocation74_spill] sm:$0xff] }
 0x18a   : > { %7145 = vst [vmem:[#allocation194_spill] sm:$0xff] %v4290_v23 }
 0x18b   : > { %v4280_v57 = vpop.permute.xlu1 %763  ;;  %v4282_v50 = vpop.permute.xlu0 %761 }
 0x18c   : > { %7141 = vst [vmem:[#allocation192_spill] sm:$0xff] %v4280_v57  ;;  %7142 = vst [vmem:[#allocation193_spill] sm:$0xff] %v4282_v50 }
 0x18d   : > { %933 = vrot.lane.b32.xlu1 %v7143_v14, %s3143_s25  ;;  %931 = vrot.lane.b32.xlu0 %v7144_v7, %s3143_s25 }
 0x18f   : > { %v4292_v4 = vpop.permute.xlu1 %767  ;;  %v4294_v2 = vpop.permute.xlu0 %765 }
 0x190   : > { %7146 = vst [vmem:[#allocation195_spill] sm:$0xff] %v4292_v4  ;;  %7147 = vst [vmem:[#allocation196_spill] sm:$0xff] %v4294_v2 }
 0x191   : > { %937 = vrot.lane.b32.xlu1 %v4277_v12, %s3143_s25  ;;  %935 = vrot.lane.b32.xlu0 %v4290_v23, %s3143_s25 }
 0x193   : > { %v4300_v6 = vpop.permute.xlu1 %771  ;;  %v4302_v14 = vpop.permute.xlu0 %769 }
 0x194   : > { %7148 = vst [vmem:[#allocation197_spill] sm:$0xff] %v4300_v6  ;;  %7149 = vst [vmem:[#allocation198_spill] sm:$0xff] %v4302_v14 }
 0x195   : > { %968 = vrot.lane.b32.xlu1 %v3705_v60, %s3144_s26  ;;  %966 = vrot.lane.b32.xlu0 %v7150_v13, %s3144_s26  ;;  %v7158_v60 = vld [vmem:[#allocation82_spill] sm:$0xff] }
 0x197   : > { %v4308_v7 = vpop.permute.xlu1 %775  ;;  %v4310_v4 = vpop.permute.xlu0 %773 }
 0x198   : > { %7151 = vst [vmem:[#allocation74_spill] sm:$0xff] %v4308_v7  ;;  %7152 = vst [vmem:[#allocation199_spill] sm:$0xff] %v4310_v4  ;;  %v7161_v4 = vld [vmem:[#allocation83_spill] sm:$0xff] }
 0x199   : > { %972 = vrot.lane.b32.xlu1 %v7153_v0, %s3144_s26  ;;  %970 = vrot.lane.b32.xlu0 %v7154_v61, %s3144_s26  ;;  %v7162_v0 = vld [vmem:[#allocation86_spill] sm:$0xff] }
 0x19b   : > { %v4316_v6 = vpop.permute.xlu1 %779  ;;  %v4318_v14 = vpop.permute.xlu0 %777 }
 0x19c   : > { %7155 = vst [vmem:[#allocation200_spill] sm:$0xff] %v4316_v6  ;;  %7156 = vst [vmem:[#allocation201_spill] sm:$0xff] %v4318_v14  ;;  %v7165_v14 = vld [vmem:[#allocation87_spill] sm:$0xff] }
 0x19d   : > { %976 = vrot.lane.b32.xlu1 %v7157_v38, %s3144_s26  ;;  %974 = vrot.lane.b32.xlu0 %v7158_v60, %s3144_s26  ;;  %v7166_v38 = vld [vmem:[#allocation90_spill] sm:$0xff] }
 0x19f   : > { %v4324_v13 = vpop.permute.xlu1 %783  ;;  %v4326_v7 = vpop.permute.xlu0 %781 }
 0x1a0   : > { %7159 = vst [vmem:[#allocation202_spill] sm:$0xff] %v4324_v13  ;;  %7160 = vst [vmem:[#allocation203_spill] sm:$0xff] %v4326_v7  ;;  %v7169_v7 = vld [vmem:[#allocation91_spill] sm:$0xff] }
 0x1a1   : > { %980 = vrot.lane.b32.xlu1 %v7161_v4, %s3144_s26  ;;  %978 = vrot.lane.b32.xlu0 %v7162_v0, %s3144_s26  ;;  %v7170_v4 = vld [vmem:[#allocation94_spill] sm:$0xff] }
 0x1a3   : > { %v4332_v61 = vpop.permute.xlu1 %787  ;;  %v4334_v6 = vpop.permute.xlu0 %785 }
 0x1a4   : > { %7163 = vst [vmem:[#allocation204_spill] sm:$0xff] %v4332_v61  ;;  %7164 = vst [vmem:[#allocation205_spill] sm:$0xff] %v4334_v6  ;;  %v7173_v6 = vld [vmem:[#allocation95_spill] sm:$0xff] }
 0x1a5   : > { %984 = vrot.lane.b32.xlu1 %v7165_v14, %s3144_s26  ;;  %982 = vrot.lane.b32.xlu0 %v7166_v38, %s3144_s26  ;;  %v7174_v14 = vld [vmem:[#allocation98_spill] sm:$0xff] }
 0x1a7   : > { %v4340_v60 = vpop.permute.xlu1 %818  ;;  %v4342_v13 = vpop.permute.xlu0 %816 }
 0x1a8   : > { %7167 = vst [vmem:[#allocation206_spill] sm:$0xff] %v4340_v60  ;;  %7168 = vst [vmem:[#allocation207_spill] sm:$0xff] %v4342_v13  ;;  %v7176_v13 = vld [vmem:[#allocation99_spill] sm:$0xff] }
 0x1a9   : > { %988 = vrot.lane.b32.xlu1 %v7169_v7, %s3144_s26  ;;  %986 = vrot.lane.b32.xlu0 %v7170_v4, %s3144_s26  ;;  %v7177_v7 = vld [vmem:[#allocation102_spill] sm:$0xff] }
 0x1ab   : > { %v4348_v0 = vpop.permute.xlu1 %822  ;;  %v4350_v61 = vpop.permute.xlu0 %820 }
 0x1ac   : > { %7171 = vst [vmem:[#allocation208_spill] sm:$0xff] %v4348_v0  ;;  %7172 = vst [vmem:[#allocation209_spill] sm:$0xff] %v4350_v61 }
 0x1ad   : > { %992 = vrot.lane.b32.xlu1 %v7173_v6, %s3144_s26  ;;  %990 = vrot.lane.b32.xlu0 %v7174_v14, %s3144_s26  ;;  %v7179_v6 = vld [vmem:[#allocation106_spill] sm:$0xff] }
 0x1af   : > { %v4356_v38 = vpop.permute.xlu1 %826  ;;  %v4358_v60 = vpop.permute.xlu0 %824 }
 0x1b0   : > { %7175 = vst [vmem:[#allocation210_spill] sm:$0xff] %v4358_v60  ;;  %v963_v60 = vrot.slane %v3978_v45, 4 }
 0x1b1   : > { %996 = vrot.lane.b32.xlu1 %v7176_v13, %s3144_s26  ;;  %994 = vrot.lane.b32.xlu0 %v7177_v7, %s3144_s26  ;;  %v4381_v7 = vrot.slane %v3975_v44, 4 }
 0x1b3   : > { %v4364_v4 = vpop.permute.xlu1 %830  ;;  %v4366_v0 = vpop.permute.xlu0 %828  ;;  %7182 = vst [vmem:[#allocation214_spill] sm:$0xff] %v4381_v7 }
 0x1b4   : > { %7178 = vst [vmem:[#allocation211_spill] sm:$0xff] %v4366_v0 }
 0x1b5   : > { %1000 = vrot.lane.b32.xlu1 %v3831_v62, %s3144_s26  ;;  %998 = vrot.lane.b32.xlu0 %v7179_v6, %s3144_s26 }
 0x1b7   : > { %v4372_v14 = vpop.permute.xlu1 %834  ;;  %v4374_v61 = vpop.permute.xlu0 %832 }
 0x1b8   : > { %7180 = vst [vmem:[#allocation212_spill] sm:$0xff] %v4372_v14  ;;  %7181 = vst [vmem:[#allocation213_spill] sm:$0xff] %v4374_v61  ;;  %v4518_v61 = vld [vmem:[%s3188_s17 + $0xa8] sm:$0xff] }
 0x1b9   : > { %1004 = vrot.lane.b32.xlu1 %v3847_v5, %s3144_s26  ;;  %1002 = vrot.lane.b32.xlu0 %v3860_v1, %s3144_s26  ;;  %v4394_v5 = vsel %vm6906_vm3, %v963_v60, %v4381_v7  ;;  %v3081_v60 = vld [vmem:[%s3188_s17 + $0x20] sm:$0xff]  ;;  %vm6912_vm3 = vcmask 457728  }
 0x1ba   : > { %7185 = vst [vmem:[#allocation217_spill] sm:$0xff] %v4394_v5 }
 0x1bb   : > { %v4384_v62 = vpop.permute.xlu1 %838  ;;  %v4386_v13 = vpop.permute.xlu0 %836 }
 0x1bc   : > { %7183 = vst [vmem:[#allocation215_spill] sm:$0xff] %v4384_v62  ;;  %7184 = vst [vmem:[#allocation216_spill] sm:$0xff] %v4386_v13 }
 0x1bd   : > { %1008 = vrot.lane.b32.xlu1 %v3863_v11, %s3144_s26  ;;  %1006 = vrot.lane.b32.xlu0 %v3876_v53, %s3144_s26  ;;  %v4409_v53 = vld [vmem:[%s3188_s17 + $0x28] sm:$0xff] }
 0x1bf   : > { %v4396_v1 = vpop.permute.xlu1 %842  ;;  %v4398_v6 = vpop.permute.xlu0 %840 }
 0x1c0   : > { %7186 = vst [vmem:[#allocation218_spill] sm:$0xff] %v4396_v1  ;;  %7187 = vst [vmem:[#allocation219_spill] sm:$0xff] %v4398_v6  ;;  %v4420_v1 = vld [vmem:[%s3188_s17 + $0x38] sm:$0xff] }
 0x1c1   : > { %1012 = vrot.lane.b32.xlu1 %v4381_v7, %s3144_s26  ;;  %1010 = vrot.lane.b32.xlu0 %v4394_v5, %s3144_s26 }
 0x1c3   : > { %v4404_v11 = vpop.permute.xlu1 %846  ;;  %v4406_v2 = vpop.permute.xlu0 %844 }
 0x1c4   : > { %7188 = vst [vmem:[#allocation220_spill] sm:$0xff] %v4404_v11  ;;  %7189 = vst [vmem:[#allocation221_spill] sm:$0xff] %v4406_v2  ;;  %v4425_v2 = vld [vmem:[%s3188_s17 + $0x30] sm:$0xff] }
 0x1c5   : > { %1042 = vrot.lane.b32.xlu1 %v4409_v53, %s3145_s27  ;;  %1040 = vrot.lane.b32.xlu0 %v3081_v60, %s3145_s27  ;;  %7192 = vst [vmem:[#allocation224_spill] sm:$0xff] %v4425_v2 }
 0x1c7   : > { %v4415_v7 = vpop.permute.xlu1 %850  ;;  %v4417_v5 = vpop.permute.xlu0 %848 }
 0x1c8   : > { %7190 = vst [vmem:[#allocation222_spill] sm:$0xff] %v4415_v7  ;;  %7191 = vst [vmem:[#allocation223_spill] sm:$0xff] %v4417_v5  ;;  %v4434_v7 = vld [vmem:[%s3188_s17 + $0x48] sm:$0xff]  ;;  %v4439_v5 = vld [vmem:[%s3188_s17 + $0x40] sm:$0xff] }
 0x1c9   : > { %1046 = vrot.lane.b32.xlu1 %v4420_v1, %s3145_s27  ;;  %1044 = vrot.lane.b32.xlu0 %v4425_v2, %s3145_s27 }
 0x1cb   : > { %v4429_v11 = vpop.permute.xlu1 %854  ;;  %v4431_v60 = vpop.permute.xlu0 %852 }
 0x1cc   : > { %7193 = vst [vmem:[#allocation225_spill] sm:$0xff] %v4429_v11  ;;  %7194 = vst [vmem:[#allocation226_spill] sm:$0xff] %v4431_v60  ;;  %v4448_v11 = vld [vmem:[%s3188_s17 + $0x58] sm:$0xff]  ;;  %v4453_v60 = vld [vmem:[%s3188_s17 + $0x50] sm:$0xff] }
 0x1cd   : > { %1050 = vrot.lane.b32.xlu1 %v4434_v7, %s3145_s27  ;;  %1048 = vrot.lane.b32.xlu0 %v4439_v5, %s3145_s27 }
 0x1cf   : > { %v4443_v6 = vpop.permute.xlu1 %858  ;;  %v4445_v48 = vpop.permute.xlu0 %856 }
 0x1d0   : > { %7195 = vst [vmem:[#allocation227_spill] sm:$0xff] %v4443_v6  ;;  %7196 = vst [vmem:[#allocation228_spill] sm:$0xff] %v4445_v48  ;;  %v4462_v6 = vld [vmem:[%s3188_s17 + $0x68] sm:$0xff]  ;;  %v4467_v48 = vld [vmem:[%s3188_s17 + $0x60] sm:$0xff] }
 0x1d1   : > { %1054 = vrot.lane.b32.xlu1 %v4448_v11, %s3145_s27  ;;  %1052 = vrot.lane.b32.xlu0 %v4453_v60, %s3145_s27 }
 0x1d3   : > { %v4457_v52 = vpop.permute.xlu1 %862  ;;  %v4459_v58 = vpop.permute.xlu0 %860 }
 0x1d4   : > { %7197 = vst [vmem:[#allocation229_spill] sm:$0xff] %v4457_v52  ;;  %7198 = vst [vmem:[#allocation230_spill] sm:$0xff] %v4459_v58  ;;  %v4476_v52 = vld [vmem:[%s3188_s17 + $0x78] sm:$0xff]  ;;  %v4481_v58 = vld [vmem:[%s3188_s17 + $0x70] sm:$0xff] }
 0x1d5   : > { %1058 = vrot.lane.b32.xlu1 %v4462_v6, %s3145_s27  ;;  %1056 = vrot.lane.b32.xlu0 %v4467_v48, %s3145_s27 }
 0x1d7   : > { %v4471_v13 = vpop.permute.xlu1 %893  ;;  %v4473_v62 = vpop.permute.xlu0 %891 }
 0x1d8   : > { %7199 = vst [vmem:[#allocation231_spill] sm:$0xff] %v4471_v13  ;;  %7200 = vst [vmem:[#allocation232_spill] sm:$0xff] %v4473_v62  ;;  %v4490_v13 = vld [vmem:[%s3188_s17 + $0x88] sm:$0xff]  ;;  %v4495_v62 = vld [vmem:[%s3188_s17 + $0x80] sm:$0xff] }
 0x1d9   : > { %1062 = vrot.lane.b32.xlu1 %v4476_v52, %s3145_s27  ;;  %1060 = vrot.lane.b32.xlu0 %v4481_v58, %s3145_s27 }
 0x1db   : > { %v4485_v50 = vpop.permute.xlu1 %897  ;;  %v4487_v57 = vpop.permute.xlu0 %895 }
 0x1dc   : > { %7201 = vst [vmem:[#allocation233_spill] sm:$0xff] %v4485_v50  ;;  %7202 = vst [vmem:[#allocation234_spill] sm:$0xff] %v4487_v57  ;;  %v4504_v50 = vld [vmem:[%s3188_s17 + $0x98] sm:$0xff]  ;;  %v4509_v57 = vld [vmem:[%s3188_s17 + $0x90] sm:$0xff] }
 0x1dd   : > { %1066 = vrot.lane.b32.xlu1 %v4490_v13, %s3145_s27  ;;  %1064 = vrot.lane.b32.xlu0 %v4495_v62, %s3145_s27 }
 0x1df   : > { %v4499_v42 = vpop.permute.xlu1 %901  ;;  %v4501_v47 = vpop.permute.xlu0 %899 }
 0x1e0   : > { %7203 = vst [vmem:[#allocation235_spill] sm:$0xff] %v4501_v47  ;;  %v4523_v47 = vld [vmem:[%s3188_s17 + $0xa0] sm:$0xff] }
 0x1e1   : > { %1070 = vrot.lane.b32.xlu1 %v4504_v50, %s3145_s27  ;;  %1068 = vrot.lane.b32.xlu0 %v4509_v57, %s3145_s27  ;;  %7206 = vst [vmem:[#allocation238_spill] sm:$0xff] %v4523_v47 }
 0x1e3   : > { %v4513_v56 = vpop.permute.xlu1 %905  ;;  %v4515_v20 = vpop.permute.xlu0 %903 }
 0x1e4   : > { %7204 = vst [vmem:[#allocation236_spill] sm:$0xff] %v4513_v56  ;;  %7205 = vst [vmem:[#allocation237_spill] sm:$0xff] %v4515_v20 }
 0x1e5   : > { %1074 = vrot.lane.b32.xlu1 %v4518_v61, %s3145_s27  ;;  %1072 = vrot.lane.b32.xlu0 %v4523_v47, %s3145_s27 }
 0x1e7   : > { %v4527_v14 = vpop.permute.xlu1 %909  ;;  %v4529_v55 = vpop.permute.xlu0 %907 }
 0x1e8   : > { %7207 = vst [vmem:[#allocation239_spill] sm:$0xff] %v4527_v14  ;;  %7208 = vst [vmem:[#allocation240_spill] sm:$0xff] %v4529_v55  ;;  %v4550_v55 = vld [vmem:[%s3188_s17 + $0xd8] sm:$0xff]  ;;  %v4553_v14 = vld [vmem:[%s3188_s17 + $0xd0] sm:$0xff] }
 0x1e9   : > { %1078 = vrot.lane.b32.xlu1 %v4532_v51, %s3145_s27  ;;  %1076 = vrot.lane.b32.xlu0 %v4537_v63, %s3145_s27 }
 0x1eb   : > { %v4541_v10 = vpop.permute.xlu1 %913  ;;  %v4543_v20 = vpop.permute.xlu0 %911 }
 0x1ec   : > { %7209 = vst [vmem:[#allocation241_spill] sm:$0xff] %v4541_v10  ;;  %7210 = vst [vmem:[#allocation242_spill] sm:$0xff] %v4543_v20 }
 0x1ed   : > { %1082 = vrot.lane.b32.xlu1 %v3975_v44, %s3145_s27  ;;  %1080 = vrot.lane.b32.xlu0 %v3978_v45, %s3145_s27 }
 0x1ef   : > { %v4555_v56 = vpop.permute.xlu1 %917  ;;  %v4557_v36 = vpop.permute.xlu0 %915 }
 0x1f0   : > { %7211 = vst [vmem:[#allocation243_spill] sm:$0xff] %v4555_v56  ;;  %7212 = vst [vmem:[#allocation244_spill] sm:$0xff] %v4557_v36 }
 0x1f1   : > { %1086 = vrot.lane.b32.xlu1 %v4550_v55, %s3145_s27  ;;  %1084 = vrot.lane.b32.xlu0 %v4553_v14, %s3145_s27 }
 0x1f3   : > { %v4563_v20 = vpop.permute.xlu1 %921  ;;  %v4565_v10 = vpop.permute.xlu0 %919 }
 0x1f4   : > { %7213 = vst [vmem:[#allocation245_spill] sm:$0xff] %v4563_v20  ;;  %7214 = vst [vmem:[#allocation246_spill] sm:$0xff] %v4565_v10 }
 0x1f5   : > { %1117 = vrot.lane.b32.xlu1 %v3217_v9, %s3146_s28  ;;  %1115 = vrot.lane.b32.xlu0 %v3237_v16, %s3146_s28  ;;  %v1927_v9 = vrot.slane %v4439_v5, 7  ;;  %v1928_v16 = vrot.slane %v4434_v7, 7 }
 0x1f7   : > { %v4571_v56 = vpop.permute.xlu1 %925  ;;  %v4573_v36 = vpop.permute.xlu0 %923 }
 0x1f8   : > { %7215 = vst [vmem:[#allocation247_spill] sm:$0xff] %v4571_v56  ;;  %7216 = vst [vmem:[#allocation248_spill] sm:$0xff] %v4573_v36 }
 0x1f9   : > { %1121 = vrot.lane.b32.xlu1 %v3240_v17, %s3146_s28  ;;  %1119 = vrot.lane.b32.xlu0 %v3255_v21, %s3146_s28  ;;  %v1930_v21 = vrot.slane %v4453_v60, 7 }
 0x1fb   : > { %v4579_v20 = vpop.permute.xlu1 %929  ;;  %v4581_v10 = vpop.permute.xlu0 %927 }
 0x1fc   : > { %7217 = vst [vmem:[#allocation249_spill] sm:$0xff] %v4579_v20  ;;  %7218 = vst [vmem:[#allocation250_spill] sm:$0xff] %v4581_v10 }
 0x1fd   : > { %1125 = vrot.lane.b32.xlu1 %v3258_v22, %s3146_s28  ;;  %1123 = vrot.lane.b32.xlu0 %v3273_v26, %s3146_s28  ;;  %v1929_v22 = vsel %vm1926_vm4, %v1927_v9, %v1928_v16  ;;  %v1931_v26 = vrot.slane %v4448_v11, 7 }
 0x1ff   : > { %v4589_v36 = vpop.permute.xlu1 %933  ;;  %v4591_v17 = vpop.permute.xlu0 %931 }
 0x200   : > { %7219 = vst [vmem:[#allocation251_spill] sm:$0xff] %v4589_v36  ;;  %7220 = vst [vmem:[#allocation252_spill] sm:$0xff] %v4591_v17  ;;  %v1933_v17 = vrot.slane %v4467_v48, 7  ;;  %v1932_v36 = vsel %vm1926_vm4, %v1930_v21, %v1931_v26 }
 0x201   : > { %1963 = vrot.lane.b32.xlu1 %v1927_v9, %s3139_s21  ;;  %1127 = vrot.lane.b32.xlu0 %v3291_v31, %s3146_s28  ;;  %v1934_v31 = vrot.slane %v4462_v6, 7  ;;  %v1948_v9 = vrot.slane %v4537_v63, 7 }
 0x203   : > { %v4599_v10 = vpop.permute.xlu1 %937  ;;  %v4601_v20 = vpop.permute.xlu0 %935  ;;  %v1935_v16 = vsel %vm1926_vm4, %v1933_v17, %v1934_v31  ;;  %v1936_v31 = vrot.slane %v4481_v58, 7 }
 0x204   : > { %7221 = vst [vmem:[#allocation253_spill] sm:$0xff] %v4599_v10  ;;  %7222 = vst [vmem:[#allocation254_spill] sm:$0xff] %v4601_v20  ;;  %v1946_v20 = vrot.slane %v4518_v61, 7 }
 0x205   : > { %1967 = vrot.lane.b32.xlu1 %v1930_v21, %s3139_s21  ;;  %1965 = vrot.lane.b32.xlu0 %v1929_v22, %s3139_s21  ;;  %v6880_v22 = vrot.slane %v4523_v47, 7  ;;  %v1949_v21 = vrot.slane %v4532_v51, 7 }
 0x207   : > { %v4608_v56 = vpop.permute.xlu1 %968  ;;  %v4610_v0 = vpop.permute.xlu0 %966 }
 0x208   : > { %7223 = vst [vmem:[#allocation255_spill] sm:$0xff] %v4608_v56  ;;  %7224 = vst [vmem:[#allocation256_spill] sm:$0xff] %v4610_v0  ;;  %v1937_v56 = vrot.slane %v4476_v52, 7 }
 0x209   : > { %1971 = vrot.lane.b32.xlu1 %v1933_v17, %s3139_s21  ;;  %1969 = vrot.lane.b32.xlu0 %v1932_v36, %s3139_s21  ;;  %v1947_v36 = vsel %vm1926_vm4, %v6880_v22, %v1946_v20  ;;  %v1950_v17 = vsel %vm1926_vm4, %v1948_v9, %v1949_v21  ;;  %v1952_v20 = vrot.slane %v3975_v44, 7  ;;  %v1954_v44 = vrot.slane %v4553_v14, 7 }
 0x20b   : > { %v4619_v26 = vpop.permute.xlu1 %972  ;;  %v4621_v6 = vpop.permute.xlu0 %970 }
 0x20c   : > { %7225 = vst [vmem:[#allocation257_spill] sm:$0xff] %v4619_v26  ;;  %7226 = vst [vmem:[#allocation258_spill] sm:$0xff] %v4621_v6 }
 0x20d   : > { %1991 = vrot.lane.b32.xlu1 %v1948_v9, %s3139_s21  ;;  %1973 = vrot.lane.b32.xlu0 %v1935_v16, %s3139_s21  ;;  %v1938_v16 = vsel %vm1926_vm4, %v1936_v31, %v1937_v56  ;;  %v1951_v56 = vrot.slane %v3978_v45, 7  ;;  %v1955_v45 = vrot.slane %v4550_v55, 7 }
 0x20f   : > { %v4631_v0 = vpop.permute.xlu1 %976  ;;  %v4633_v10 = vpop.permute.xlu0 %974 }
 0x210   : > { %7227 = vst [vmem:[#allocation259_spill] sm:$0xff] %v4633_v10  ;;  %v7242_v10 = vld [vmem:[#allocation60_spill] sm:$0xff] }
 0x211   : > { %1989 = vrot.lane.b32.xlu1 %v1947_v36, %s3139_s21  ;;  %1993 = vrot.lane.b32.xlu0 %v1950_v17, %s3139_s21  ;;  %v1953_v36 = vsel %vm1926_vm4, %v1951_v56, %v1952_v20  ;;  %v1956_v20 = vsel %vm1926_vm4, %v1954_v44, %v1955_v45 }
 0x213   : > { %v4638_v26 = vpop.permute.xlu1 %980  ;;  %v4640_v6 = vpop.permute.xlu0 %978 }
 0x215   : > { %1977 = vrot.lane.b32.xlu1 %v1938_v16, %s3139_s21  ;;  %1975 = vrot.lane.b32.xlu0 %v1936_v31, %s3139_s21 }
 0x217   : > { %v4644_v58 = vpop.permute.xlu1 %984  ;;  %v4646_v52 = vpop.permute.xlu0 %982 }
 0x219   : > { %1866 = vrot.lane.b32.xlu1 %v4069_v46, %s3136_s18  ;;  %1864 = vrot.lane.b32.xlu0 %v4082_v25, %s3136_s18  ;;  %v1112_v46 = vrot.slane %v4553_v14, 1  ;;  %v4720_v25 = vrot.slane %v4550_v55, 2 }
 0x21b   : > { %v4654_v9 = vpop.permute.xlu1 %988  ;;  %v4656_v21 = vpop.permute.xlu0 %986 }
 0x21d   : > { %1887 = vrot.lane.b32.xlu1 %v4173_v8, %s3137_s19  ;;  %1885 = vrot.lane.b32.xlu0 %v4186_v28, %s3137_s19  ;;  %v1493_v28 = vsel %vm1486_vm5, %v4425_v2, %v7242_v10 }
 0x21f   : > { %v4663_v17 = vpop.permute.xlu1 %992  ;;  %v4665_v31 = vpop.permute.xlu0 %990 }
 0x220   : > { %7228 = vst [vmem:[#allocation260_spill] sm:$0xff] %v4663_v17  ;;  %7229 = vst [vmem:[#allocation261_spill] sm:$0xff] %v4665_v31  ;;  %v7265_v31 = vld [vmem:[#allocation105_spill] sm:$0xff] }
 0x221   : > { %1997 = vrot.lane.b32.xlu1 %v1953_v36, %s3139_s21  ;;  %1995 = vrot.lane.b32.xlu0 %v1951_v56, %s3139_s21  ;;  %v4687_v56 = vrot.slane %v4550_v55, 1 }
 0x223   : > { %v4671_v16 = vpop.permute.xlu1 %996  ;;  %v4673_v22 = vpop.permute.xlu0 %994  ;;  %7234 = vst [vmem:[#allocation266_spill] sm:$0xff] %v4687_v56  ;;  %v4700_v45 = vsel %vm6914_vm0, %v1112_v46, %v4687_v56 }
 0x224   : > { %7230 = vst [vmem:[#allocation262_spill] sm:$0xff] %v4671_v16  ;;  %7231 = vst [vmem:[#allocation263_spill] sm:$0xff] %v4673_v22  ;;  %v7240_v16 = vld [vmem:[#allocation51_spill] sm:$0xff] }
 0x225   : > { %1908 = vrot.lane.b32.xlu1 %v4277_v12, %s3138_s20  ;;  %1906 = vrot.lane.b32.xlu0 %v4290_v23, %s3138_s20  ;;  %7237 = vst [vmem:[#allocation269_spill] sm:$0xff] %v4700_v45  ;;  %v1492_v17 = vsel %vm1486_vm5, %v4409_v53, %v7240_v16  ;;  %v7241_v23 = vld [vmem:[#allocation59_spill] sm:$0xff]  ;;  %7243 = vst [vmem:[#allocation51_spill] sm:$0xff] %v4720_v25  ;;  %v1187_v53 = vrot.slane %v4553_v14, 2 }
 0x226   : > { %v1494_v46 = vsel %vm1486_vm5, %v4420_v1, %v7241_v23  ;;  %v7244_v16 = vld [vmem:[#allocation63_spill] sm:$0xff]  ;;  %v7247_v1 = vld [vmem:[#allocation68_spill] sm:$0xff] }
 0x227   : > { %v4680_v8 = vpop.permute.xlu1 %1000  ;;  %v4682_v36 = vpop.permute.xlu0 %998  ;;  %v1497_v10 = vsel %vm1486_vm5, %v4453_v60, %v7247_v1  ;;  %v7254_v1 = vld [vmem:[#allocation81_spill] sm:$0xff] }
 0x228   : > { %7232 = vst [vmem:[#allocation264_spill] sm:$0xff] %v4680_v8  ;;  %7233 = vst [vmem:[#allocation265_spill] sm:$0xff] %v4682_v36  ;;  %v7250_v8 = vld [vmem:[#allocation71_spill] sm:$0xff] }
 0x229   : > { %2001 = vrot.lane.b32.xlu1 %v1956_v20, %s3139_s21  ;;  %1999 = vrot.lane.b32.xlu0 %v1954_v44, %s3139_s21 }
 0x22b   : > { %v4690_v22 = vpop.permute.xlu1 %1004  ;;  %v4692_v12 = vpop.permute.xlu0 %1002 }
 0x22c   : > { %7235 = vst [vmem:[#allocation267_spill] sm:$0xff] %v4690_v22  ;;  %7236 = vst [vmem:[#allocation268_spill] sm:$0xff] %v4692_v12  ;;  %v7246_v22 = vld [vmem:[#allocation67_spill] sm:$0xff] }
 0x22d   : > { %2037 = vrot.lane.b32.xlu1 %v4550_v55, %s3140_s22  ;;  %2035 = vrot.lane.b32.xlu0 %v4553_v14, %s3140_s22  ;;  %v1498_v23 = vsel %vm1486_vm5, %v4448_v11, %v7246_v22  ;;  %v7253_v22 = vld [vmem:[#allocation80_spill] sm:$0xff] }
 0x22e   : > { %v4755_v60 = vsel %vm1486_vm5, %v4504_v50, %v7253_v22  ;;  %v7258_v22 = vld [vmem:[#allocation88_spill] sm:$0xff] }
 0x22f   : > { %v4702_v44 = vpop.permute.xlu1 %1008  ;;  %v4704_v20 = vpop.permute.xlu0 %1006 }
 0x230   : > { %7238 = vst [vmem:[#allocation270_spill] sm:$0xff] %v4702_v44  ;;  %7239 = vst [vmem:[#allocation271_spill] sm:$0xff] %v4704_v20  ;;  %v1496_v20 = vsel %vm1486_vm5, %v4434_v7, %v7244_v16  ;;  %v7245_v44 = vld [vmem:[#allocation64_spill] sm:$0xff]  ;;  %v1499_v7 = vsel %vm1486_vm5, %v4467_v48, %v7250_v8 }
 0x231   : > { %2058 = vrot.lane.b32.xlu1 %v4687_v56, %s3141_s23  ;;  %2056 = vrot.lane.b32.xlu0 %v4700_v45, %s3141_s23  ;;  %v1495_v12 = vsel %vm1486_vm5, %v4439_v5, %v7245_v44  ;;  %v7251_v16 = vld [vmem:[#allocation76_spill] sm:$0xff]  ;;  %v7252_v44 = vld [vmem:[#allocation77_spill] sm:$0xff] }
 0x232   : > { %v4745_v5 = vsel %vm1486_vm5, %v4490_v13, %v7251_v16  ;;  %v4750_v11 = vsel %vm1486_vm5, %v4495_v62, %v7252_v44  ;;  %v7255_v48 = vld [vmem:[#allocation84_spill] sm:$0xff]  ;;  %v7256_v16 = vld [vmem:[#allocation85_spill] sm:$0xff] }
 0x233   : > { %v4735_v2 = vpop.permute.xlu1 %1012  ;;  %v4737_v36 = vpop.permute.xlu0 %1010  ;;  %v4765_v8 = vsel %vm1486_vm5, %v4518_v61, %v7255_v48  ;;  %v4770_v44 = vsel %vm1486_vm5, %v4523_v47, %v7256_v16  ;;  %v7262_v48 = vld [vmem:[#allocation100_spill] sm:$0xff]  ;;  %v4790_v47 = vsel %vm337_vm1, %v1187_v53, %v4720_v25 }
 0x234   : > { %7248 = vst [vmem:[#allocation59_spill] sm:$0xff] %v4735_v2  ;;  %7249 = vst [vmem:[#allocation60_spill] sm:$0xff] %v4737_v36  ;;  %v4760_v36 = vsel %vm1486_vm5, %v4509_v57, %v7254_v1  ;;  %v4779_v1 = vsel %vm1486_vm5, %v4532_v51, %v7258_v22  ;;  %v7260_v2 = vld [vmem:[#allocation89_spill] sm:$0xff]  ;;  %v1517_v16 = vsel %vm6916_vm6, %v1492_v17, %v7262_v48  ;;  %v7266_v51 = vld [vmem:[#allocation108_spill] sm:$0xff] }
 0x235   : > { %7257 = vst [vmem:[#allocation63_spill] sm:$0xff] %v4770_v44  ;;  %1870 = vrot.lane.b32.xlu1 %v4687_v56, %s3136_s18  ;;  %1868 = vrot.lane.b32.xlu0 %v4700_v45, %s3136_s18  ;;  %7259 = vst [vmem:[#allocation64_spill] sm:$0xff] %v4779_v1  ;;  %v4784_v61 = vsel %vm1486_vm5, %v4537_v63, %v7260_v2  ;;  %v7264_v56 = vld [vmem:[#allocation104_spill] sm:$0xff]  ;;  %v1518_v44 = vsel %vm6916_vm6, %v1493_v28, %v7265_v31  ;;  %v7269_v63 = vld [vmem:[#allocation109_spill] sm:$0xff] }
 0x236   : > { %7261 = vst [vmem:[#allocation67_spill] sm:$0xff] %v4784_v61  ;;  %7263 = vst [vmem:[#allocation68_spill] sm:$0xff] %v4790_v47  ;;  %v1519_v45 = vsel %vm6916_vm6, %v1494_v46, %v7264_v56  ;;  %v1521_v22 = vsel %vm6916_vm6, %v1496_v20, %v7266_v51  ;;  %v1520_v17 = vsel %vm6916_vm6, %v1495_v12, %v7269_v63  ;;  %v7270_v48 = vld [vmem:[#allocation112_spill] sm:$0xff]  ;;  %v7271_v61 = vld [vmem:[#allocation113_spill] sm:$0xff] }
 0x237   : > { %v4798_v1 = vpop.permute.xlu1 %1042  ;;  %v4800_v2 = vpop.permute.xlu0 %1040  ;;  %v1523_v53 = vsel %vm6916_vm6, %v1498_v23, %v7270_v48  ;;  %v1522_v56 = vsel %vm6916_vm6, %v1497_v10, %v7271_v61  ;;  %v1524_v28 = vsel %vm6916_vm6, %v1499_v7, %v3880_v43  ;;  %v1542_v31 = vsel %vm6915_vm7, %v1517_v16, %v3942_v24  ;;  %v7280_v48 = vld [vmem:[#allocation236_spill] sm:$0xff] }
 0x238   : > { %7267 = vst [vmem:[#allocation71_spill] sm:$0xff] %v4798_v1  ;;  %7268 = vst [vmem:[#allocation76_spill] sm:$0xff] %v4800_v2  ;;  %v4814_v20 = vsel %vm6915_vm7, %v1519_v45, %v3950_v29  ;;  %v4818_v46 = vsel %vm6915_vm7, %v1518_v44, %v3952_v30  ;;  %v4826_v12 = vsel %vm6915_vm7, %v1521_v22, %v3958_v34  ;;  %v1939_v24 = vrot.slane %v4495_v62, 7  ;;  %v7278_v22 = vld [vmem:[#allocation211_spill] sm:$0xff]  ;;  %v7356_v1 = vld [vmem:[#allocation264_spill] sm:$0xff] }
 0x239   : > { %2079 = vrot.lane.b32.xlu1 %v4720_v25, %s3142_s24  ;;  %2077 = vrot.lane.b32.xlu0 %v4790_v47, %s3142_s24  ;;  %v1567_v43 = vsel %vm1561_vm8, %v1542_v31, %v4044_v27  ;;  %v1940_v29 = vrot.slane %v4490_v13, 7  ;;  %v4834_v30 = vsel %vm6915_vm7, %v1520_v17, %v3960_v35  ;;  %v4838_v45 = vsel %vm6915_vm7, %v1523_v53, %v3966_v39  ;;  %v7283_v31 = vld [vmem:[#allocation168_spill] sm:$0xff] }
 0x23a   : > { %v4842_v23 = vsel %vm6915_vm7, %v1522_v56, %v3968_v40  ;;  %v1592_v34 = vsel %vm1586_vm9, %v1567_v43, %v4148_v18  ;;  %v4852_v13 = vsel %vm6915_vm7, %v1524_v28, %v3982_v49  ;;  %v1569_v35 = vsel %vm1561_vm8, %v4814_v20, %v4052_v32  ;;  %v7281_v56 = vld [vmem:[#allocation237_spill] sm:$0xff] }
 0x23b   : > { %v4846_v27 = vpop.permute.xlu1 %1046  ;;  %v4848_v62 = vpop.permute.xlu0 %1044  ;;  %7274 = vst [vmem:[#allocation81_spill] sm:$0xff] %v4852_v13  ;;  %v1617_v39 = vsel %vm6909_vm10, %v1592_v34, %v4252_v19  ;;  %v1568_v18 = vsel %vm1561_vm8, %v4818_v46, %v4054_v15  ;;  %v1941_v19 = vsel %vm1926_vm4, %v1939_v24, %v1940_v29  ;;  %v4872_v49 = vrot.slane %v4550_v55, 3  ;;  %v7284_v29 = vld [vmem:[#allocation169_spill] sm:$0xff] }
 0x23c   : > { %7272 = vst [vmem:[#allocation77_spill] sm:$0xff] %v4846_v27  ;;  %7273 = vst [vmem:[#allocation80_spill] sm:$0xff] %v4848_v62  ;;  %v1642_v40 = vsel %vm1636_vm11, %v1617_v39, %v4356_v38  ;;  %v1262_v15 = vrot.slane %v4553_v14, 3  ;;  %v1594_v38 = vsel %vm1586_vm9, %v1569_v35, %v4156_v33  ;;  %v1593_v10 = vsel %vm1586_vm9, %v1568_v18, %v4158_v59  ;;  %v7326_v27 = vld [vmem:[#allocation135_spill] sm:$0xff] }
 0x23d   : > { %1891 = vrot.lane.b32.xlu1 %v4720_v25, %s3137_s19  ;;  %1889 = vrot.lane.b32.xlu0 %v4790_v47, %s3137_s19  ;;  %v1667_v32 = vsel %vm1661_vm12, %v1642_v40, %v4499_v42  ;;  %7275 = vst [vmem:[#allocation84_spill] sm:$0xff] %v4872_v49  ;;  %v1571_v42 = vsel %vm1561_vm8, %v4826_v12, %v4060_v37  ;;  %v7279_v37 = vld [vmem:[#allocation148_spill] sm:$0xff]  ;;  %v7285_v40 = vld [vmem:[#allocation189_spill] sm:$0xff] }
 0x23e   : > { %v1692_v7 = vsel %vm1686_vm13, %v1667_v32, %v4631_v0  ;;  %v1619_v55 = vsel %vm6909_vm10, %v1594_v38, %v4260_v3  ;;  %v1618_v14 = vsel %vm6909_vm10, %v1593_v10, %v4262_v54  ;;  %v1570_v0 = vsel %vm1561_vm8, %v4834_v30, %v4062_v41 }
 0x23f   : > { %v1051_v44 = vpop.permute.xlu1 %1050  ;;  %v4881_v61 = vpop.permute.xlu0 %1048  ;;  %v1644_v51 = vsel %vm1636_vm11, %v1619_v55, %v4364_v4  ;;  %v1643_v63 = vsel %vm1636_vm11, %v1618_v14, %v7278_v22  ;;  %v1573_v17 = vsel %vm1561_vm8, %v4838_v45, %v7279_v37  ;;  %v4911_v28 = vsel %vm446_vm2, %v1262_v15, %v4872_v49  ;;  %v7291_v14 = vld [vmem:[#allocation149_spill] sm:$0xff]  ;;  %v7293_v37 = vld [vmem:[#allocation239_spill] sm:$0xff] }
 0x240   : > { %7276 = vst [vmem:[#allocation85_spill] sm:$0xff] %v4881_v61  ;;  %v4891_v16 = vsel %vm1711_vm14, %v1692_v7, %v1051_v44  ;;  %v1669_v53 = vsel %vm1661_vm12, %v1644_v51, %v7280_v48  ;;  %v1668_v41 = vsel %vm1661_vm12, %v1643_v63, %v7281_v56  ;;  %7282 = vst [vmem:[#allocation89_spill] sm:$0xff] %v4911_v28  ;;  %v7289_v7 = vld [vmem:[#allocation212_spill] sm:$0xff]  ;;  %v7290_v44 = vld [vmem:[#allocation213_spill] sm:$0xff]  ;;  %v1943_v55 = vrot.slane %v4504_v50, 7 }
 0x241   : > { %7277 = vst [vmem:[#allocation88_spill] sm:$0xff] %v4891_v16  ;;  %1981 = vrot.lane.b32.xlu1 %v1941_v19, %s3139_s21  ;;  %1979 = vrot.lane.b32.xlu0 %v1939_v24, %s3139_s21  ;;  %v1596_v43 = vsel %vm1586_vm9, %v1571_v42, %v7283_v31  ;;  %v1595_v24 = vsel %vm1586_vm9, %v1570_v0, %v7284_v29  ;;  %v7286_v19 = vld [vmem:[#allocation190_spill] sm:$0xff]  ;;  %v1942_v42 = vrot.slane %v4509_v57, 7  ;;  %v7292_v51 = vld [vmem:[#allocation152_spill] sm:$0xff] }
 0x242   : > { %v1694_v34 = vsel %vm1686_vm13, %v1669_v53, %v4638_v26  ;;  %v1693_v35 = vsel %vm1686_vm13, %v1668_v41, %v4640_v6  ;;  %v1621_v32 = vsel %vm6909_vm10, %v1596_v43, %v7285_v40  ;;  %v1620_v15 = vsel %vm6909_vm10, %v1595_v24, %v7286_v19  ;;  %v7294_v41 = vld [vmem:[#allocation240_spill] sm:$0xff]  ;;  %v7295_v24 = vld [vmem:[#allocation171_spill] sm:$0xff] }
 0x243   : > { %v1055_v39 = vpop.permute.xlu1 %1054  ;;  %v1053_v18 = vpop.permute.xlu0 %1052  ;;  %v1646_v26 = vsel %vm1636_vm11, %v1621_v32, %v7289_v7  ;;  %v1645_v6 = vsel %vm1636_vm11, %v1620_v15, %v7290_v44  ;;  %v1572_v0 = vsel %vm1561_vm8, %v4842_v23, %v7291_v14  ;;  %v1574_v63 = vsel %vm1561_vm8, %v4852_v13, %v7292_v51  ;;  %v7296_v57 = vld [vmem:[#allocation172_spill] sm:$0xff]  ;;  %v4960_v15 = vld [vmem:[%s3188_s17 + $0xe0] sm:$0xff]  ;;  %v7298_v51 = vld [vmem:[#allocation193_spill] sm:$0xff] }
 0x244   : > { %v4926_v38 = vsel %vm1711_vm14, %v1694_v34, %v1055_v39  ;;  %v4929_v10 = vsel %vm1711_vm14, %v1693_v35, %v1053_v18  ;;  %v1671_v53 = vsel %vm1661_vm12, %v1646_v26, %v7293_v37  ;;  %v1670_v43 = vsel %vm1661_vm12, %v1645_v6, %v7294_v41  ;;  %v4963_v26 = vld [vmem:[%s3188_s17 + $0xe8] sm:$0xff]  ;;  %v7370_v13 = vld [vmem:[#allocation202_spill] sm:$0xff] }
 0x245   : > { %7287 = vst [vmem:[#allocation100_spill] sm:$0xff] %v4926_v38  ;;  %7288 = vst [vmem:[#allocation104_spill] sm:$0xff] %v4929_v10  ;;  %2100 = vrot.lane.b32.xlu1 %v4872_v49, %s3143_s25  ;;  %2098 = vrot.lane.b32.xlu0 %v4911_v28, %s3143_s25  ;;  %v1598_v34 = vsel %vm1586_vm9, %v1573_v17, %v7295_v24  ;;  %v1597_v50 = vsel %vm1586_vm9, %v1572_v0, %v7296_v57  ;;  %v7297_v14 = vld [vmem:[#allocation192_spill] sm:$0xff] }
 0x246   : > { %v1696_v35 = vsel %vm1686_vm13, %v1671_v53, %v4644_v58  ;;  %v1695_v39 = vsel %vm1686_vm13, %v1670_v43, %v4646_v52  ;;  %v1623_v6 = vsel %vm6909_vm10, %v1598_v34, %v7297_v14  ;;  %v1622_v17 = vsel %vm6909_vm10, %v1597_v50, %v7298_v51  ;;  %v7301_v53 = vld [vmem:[#allocation215_spill] sm:$0xff]  ;;  %v7302_v43 = vld [vmem:[#allocation216_spill] sm:$0xff]  ;;  %v7303_v50 = vld [vmem:[#allocation241_spill] sm:$0xff] }
 0x247   : > { %v1059_v18 = vpop.permute.xlu1 %1058  ;;  %v1057_v32 = vpop.permute.xlu0 %1056  ;;  %v1648_v52 = vsel %vm1636_vm11, %v1623_v6, %v7301_v53  ;;  %v1647_v38 = vsel %vm1636_vm11, %v1622_v17, %v7302_v43  ;;  %v1944_v34 = vsel %vm1926_vm4, %v1942_v42, %v1943_v55  ;;  %v1958_v6 = vrot.slane %v4963_v26, 7  ;;  %v7328_v61 = vld [vmem:[#allocation136_spill] sm:$0xff] }
 0x248   : > { %v4970_v0 = vsel %vm1711_vm14, %v1696_v35, %v1059_v18  ;;  %v4973_v58 = vsel %vm1711_vm14, %v1695_v39, %v1057_v32  ;;  %v1673_v35 = vsel %vm1661_vm12, %v1648_v52, %v7303_v50  ;;  %v7304_v18 = vld [vmem:[#allocation242_spill] sm:$0xff]  ;;  %v1957_v32 = vrot.slane %v4960_v15, 7 }
 0x249   : > { %7299 = vst [vmem:[#allocation105_spill] sm:$0xff] %v4970_v0  ;;  %7300 = vst [vmem:[#allocation108_spill] sm:$0xff] %v4973_v58  ;;  %1912 = vrot.lane.b32.xlu1 %v4872_v49, %s3138_s20  ;;  %1910 = vrot.lane.b32.xlu0 %v4911_v28, %s3138_s20  ;;  %v1672_v39 = vsel %vm1661_vm12, %v1647_v38, %v7304_v18  ;;  %v7305_v0 = vld [vmem:[#allocation118_spill] sm:$0xff]  ;;  %v7306_v58 = vld [vmem:[#allocation175_spill] sm:$0xff]  ;;  %v1698_v55 = vsel %vm1686_vm13, %v1673_v35, %v4654_v9 }
 0x24a   : > { %v1529_v17 = vsel %vm6916_vm6, %v4745_v5, %v7305_v0  ;;  %v1599_v49 = vsel %vm1586_vm9, %v1574_v63, %v7306_v58  ;;  %v1697_v52 = vsel %vm1686_vm13, %v1672_v39, %v4656_v21  ;;  %v7307_v38 = vld [vmem:[#allocation119_spill] sm:$0xff]  ;;  %v7308_v28 = vld [vmem:[#allocation196_spill] sm:$0xff]  ;;  %v7312_v21 = vld [vmem:[#allocation121_spill] sm:$0xff] }
 0x24b   : > { %v1063_v10 = vpop.permute.xlu1 %1062  ;;  %v1061_v16 = vpop.permute.xlu0 %1060  ;;  %v1528_v25 = vsel %vm6916_vm6, %v4750_v11, %v7307_v38  ;;  %v1624_v47 = vsel %vm6909_vm10, %v1599_v49, %v7308_v28  ;;  %v7311_v0 = vld [vmem:[#allocation120_spill] sm:$0xff]  ;;  %v1530_v35 = vsel %vm6916_vm6, %v4760_v36, %v7312_v21  ;;  %v7313_v39 = vld [vmem:[#allocation219_spill] sm:$0xff]  ;;  %v7314_v49 = vld [vmem:[#allocation122_spill] sm:$0xff]  ;;  %v1959_v36 = vsel %vm1926_vm4, %v1957_v32, %v1958_v6 }
 0x24c   : > { %v5005_v5 = vsel %vm1711_vm14, %v1698_v55, %v1063_v10  ;;  %v5008_v63 = vsel %vm1711_vm14, %v1697_v52, %v1061_v16  ;;  %v1531_v9 = vsel %vm6916_vm6, %v4755_v60, %v7311_v0  ;;  %v1649_v11 = vsel %vm1636_vm11, %v1624_v47, %v7313_v39  ;;  %v7315_v10 = vld [vmem:[#allocation123_spill] sm:$0xff]  ;;  %v7317_v60 = vld [vmem:[#allocation244_spill] sm:$0xff] }
 0x24d   : > { %7309 = vst [vmem:[#allocation109_spill] sm:$0xff] %v5005_v5  ;;  %7310 = vst [vmem:[#allocation112_spill] sm:$0xff] %v5008_v63  ;;  %1985 = vrot.lane.b32.xlu1 %v1944_v34, %s3139_s21  ;;  %1983 = vrot.lane.b32.xlu0 %v1942_v42, %s3139_s21  ;;  %v1533_v16 = vsel %vm6916_vm6, %v4765_v8, %v7314_v49  ;;  %v7316_v55 = vld [vmem:[#allocation63_spill] sm:$0xff]  ;;  %v1674_v38 = vsel %vm1661_vm12, %v1649_v11, %v7317_v60  ;;  %v7318_v0 = vld [vmem:[#allocation124_spill] sm:$0xff] }
 0x24e   : > { %v1532_v52 = vsel %vm6916_vm6, %v7316_v55, %v7315_v10  ;;  %v7319_v21 = vld [vmem:[#allocation64_spill] sm:$0xff]  ;;  %v7320_v34 = vld [vmem:[#allocation125_spill] sm:$0xff]  ;;  %v7321_v5 = vld [vmem:[#allocation67_spill] sm:$0xff]  ;;  %v5045_v6 = vsel %vm6915_vm7, %v1528_v25, %v7326_v27 }
 0x24f   : > { %v1535_v47 = vsel %vm6916_vm6, %v7319_v21, %v7318_v0  ;;  %v1534_v42 = vsel %vm6916_vm6, %v7321_v5, %v7320_v34  ;;  %v7322_v63 = vld [vmem:[#allocation134_spill] sm:$0xff]  ;;  %v7324_v49 = vld [vmem:[#allocation261_spill] sm:$0xff]  ;;  %v5041_v55 = vpop.permute.xlu1 %1066  ;;  %v1065_v11 = vpop.permute.xlu0 %1064  ;;  %7327 = vst [vmem:[#allocation148_spill] sm:$0xff] %v5045_v6  ;;  %v5049_v0 = vsel %vm6915_vm7, %v1531_v9, %v7328_v61  ;;  %v7333_v34 = vld [vmem:[#allocation139_spill] sm:$0xff] }
 0x250   : > { %v5037_v8 = vsel %vm6915_vm7, %v1529_v17, %v7322_v63  ;;  %v1699_v10 = vsel %vm1686_vm13, %v1674_v38, %v7324_v49  ;;  %7325 = vst [vmem:[#allocation211_spill] sm:$0xff] %v5041_v55  ;;  %v7329_v21 = vld [vmem:[#allocation137_spill] sm:$0xff]  ;;  %v7332_v63 = vld [vmem:[#allocation138_spill] sm:$0xff]  ;;  %v5064_v49 = vsel %vm6915_vm7, %v1532_v52, %v7333_v34  ;;  %v7334_v25 = vld [vmem:[#allocation140_spill] sm:$0xff]  ;;  %v1861_v52 = vrot.slane %v4960_v15, 1 }
 0x251   : > { %7323 = vst [vmem:[#allocation113_spill] sm:$0xff] %v5037_v8  ;;  %v5053_v5 = vsel %vm6915_vm7, %v1530_v35, %v7329_v21  ;;  %v5056_v17 = vsel %vm1711_vm14, %v1699_v10, %v1065_v11  ;;  %v5060_v38 = vsel %vm6915_vm7, %v1533_v16, %v7332_v63  ;;  %v5068_v27 = vsel %vm6915_vm7, %v1535_v47, %v7334_v25  ;;  %v7336_v61 = vld [vmem:[#allocation155_spill] sm:$0xff]  ;;  %v7337_v35 = vld [vmem:[#allocation156_spill] sm:$0xff]  ;;  %v7338_v11 = vld [vmem:[#allocation141_spill] sm:$0xff] }
 0x252   : > { %7330 = vst [vmem:[#allocation236_spill] sm:$0xff] %v5053_v5  ;;  %7331 = vst [vmem:[#allocation237_spill] sm:$0xff] %v5056_v17  ;;  %2005 = vrot.lane.b32.xlu1 %v1959_v36, %s3139_s21  ;;  %2003 = vrot.lane.b32.xlu0 %v1957_v32, %s3139_s21  ;;  %v1579_v9 = vsel %vm1561_vm8, %v5037_v8, %v7336_v61  ;;  %v1578_v16 = vsel %vm1561_vm8, %v5045_v6, %v7337_v35  ;;  %v5079_v10 = vrot.slane %v4963_v26, 1  ;;  %v7340_v36 = vld [vmem:[#allocation157_spill] sm:$0xff]  ;;  %v7341_v21 = vld [vmem:[#allocation36_spill] sm:$0xff] }
 0x253   : > { %7335 = vst [vmem:[#allocation168_spill] sm:$0xff] %v5068_v27  ;;  %v5084_v47 = vsel %vm6915_vm7, %v1534_v42, %v7338_v11  ;;  %v1581_v32 = vsel %vm1561_vm8, %v5049_v0, %v7340_v36  ;;  %v1604_v63 = vsel %vm1586_vm9, %v1579_v9, %v7341_v21  ;;  %v7342_v34 = vld [vmem:[#allocation37_spill] sm:$0xff]  ;;  %v5093_v61 = vpop.permute.xlu1 %1070  ;;  %v5095_v35 = vpop.permute.xlu0 %1068  ;;  %v7345_v17 = vld [vmem:[#allocation158_spill] sm:$0xff]  ;;  %v7346_v42 = vld [vmem:[#allocation159_spill] sm:$0xff] }
 0x254   : > { %7339 = vst [vmem:[#allocation169_spill] sm:$0xff] %v5084_v47  ;;  %v1603_v25 = vsel %vm1586_vm9, %v1578_v16, %v7342_v34  ;;  %7343 = vst [vmem:[#allocation189_spill] sm:$0xff] %v5093_v61  ;;  %v1580_v55 = vsel %vm1561_vm8, %v5053_v5, %v7345_v17  ;;  %v1583_v11 = vsel %vm1561_vm8, %v5060_v38, %v7346_v42  ;;  %v7347_v8 = vld [vmem:[#allocation74_spill] sm:$0xff]  ;;  %v7348_v6 = vld [vmem:[#allocation199_spill] sm:$0xff]  ;;  %v5116_v17 = vrot.slane %v4963_v26, 2 }
 0x255   : > { %7344 = vst [vmem:[#allocation190_spill] sm:$0xff] %v5095_v35  ;;  %v1629_v36 = vsel %vm6909_vm10, %v1604_v63, %v7347_v8  ;;  %v1628_v9 = vsel %vm6909_vm10, %v1603_v25, %v7348_v6  ;;  %v7349_v21 = vld [vmem:[#allocation222_spill] sm:$0xff]  ;;  %v7350_v61 = vld [vmem:[#allocation223_spill] sm:$0xff]  ;;  %v1882_v63 = vrot.slane %v4960_v15, 2  ;;  %v7351_v42 = vld [vmem:[#allocation160_spill] sm:$0xff] }
 0x256   : > { %v1654_v16 = vsel %vm1636_vm11, %v1629_v36, %v7349_v21  ;;  %v1653_v35 = vsel %vm1636_vm11, %v1628_v9, %v7350_v61  ;;  %2041 = vrot.lane.b32.xlu1 %v4963_v26, %s3140_s22  ;;  %2039 = vrot.lane.b32.xlu0 %v4960_v15, %s3140_s22  ;;  %v1582_v25 = vsel %vm1561_vm8, %v5064_v49, %v7351_v42  ;;  %v7352_v5 = vld [vmem:[#allocation247_spill] sm:$0xff]  ;;  %v7353_v21 = vld [vmem:[#allocation248_spill] sm:$0xff]  ;;  %v7354_v8 = vld [vmem:[#allocation178_spill] sm:$0xff] }
 0x257   : > { %v1679_v36 = vsel %vm1661_vm12, %v1654_v16, %v7352_v5  ;;  %v1678_v9 = vsel %vm1661_vm12, %v1653_v35, %v7353_v21  ;;  %v1863_v61 = vsel %vm6914_vm0, %v1861_v52, %v5079_v10  ;;  %v1606_v6 = vsel %vm1586_vm9, %v1581_v32, %v7354_v8  ;;  %v7355_v34 = vld [vmem:[#allocation179_spill] sm:$0xff]  ;;  %v7357_v60 = vld [vmem:[#allocation265_spill] sm:$0xff]  ;;  %v1075_v39 = vpop.permute.xlu1 %1074  ;;  %v1073_v16 = vpop.permute.xlu0 %1072  ;;  %v7358_v5 = vld [vmem:[#allocation200_spill] sm:$0xff] }
 0x258   : > { %v1605_v62 = vsel %vm1586_vm9, %v1580_v55, %v7355_v34  ;;  %v1704_v2 = vsel %vm1686_vm13, %v1679_v36, %v7356_v1  ;;  %v1703_v42 = vsel %vm1686_vm13, %v1678_v9, %v7357_v60  ;;  %v1631_v35 = vsel %vm6909_vm10, %v1606_v6, %v7358_v5  ;;  %v7359_v21 = vld [vmem:[#allocation201_spill] sm:$0xff]  ;;  %v7363_v36 = vld [vmem:[#allocation226_spill] sm:$0xff]  ;;  %v7383_v5 = vld [vmem:[#allocation271_spill] sm:$0xff] }
 0x259   : > { %v1630_v52 = vsel %vm6909_vm10, %v1605_v62, %v7359_v21  ;;  %v5141_v28 = vsel %vm1711_vm14, %v1704_v2, %v1075_v39  ;;  %v5144_v32 = vsel %vm1711_vm14, %v1703_v42, %v1073_v16  ;;  %v7362_v55 = vld [vmem:[#allocation225_spill] sm:$0xff]  ;;  %v1884_v62 = vsel %vm337_vm1, %v1882_v63, %v5116_v17  ;;  %v7365_v39 = vld [vmem:[#allocation250_spill] sm:$0xff]  ;;  %v7369_v63 = vld [vmem:[#allocation268_spill] sm:$0xff] }
 0x25a   : > { %7360 = vst [vmem:[#allocation212_spill] sm:$0xff] %v5141_v28  ;;  %7361 = vst [vmem:[#allocation213_spill] sm:$0xff] %v5144_v32  ;;  %v1656_v1 = vsel %vm1636_vm11, %v1631_v35, %v7362_v55  ;;  %v1655_v60 = vsel %vm1636_vm11, %v1630_v52, %v7363_v36  ;;  %2062 = vrot.lane.b32.xlu1 %v5079_v10, %s3141_s23  ;;  %2060 = vrot.lane.b32.xlu0 %v1863_v61, %s3141_s23  ;;  %v7364_v6 = vld [vmem:[#allocation249_spill] sm:$0xff]  ;;  %v1904_v42 = vrot.slane %v4963_v26, 3  ;;  %v7366_v35 = vld [vmem:[#allocation180_spill] sm:$0xff] }
 0x25b   : > { %v1681_v2 = vsel %vm1661_vm12, %v1656_v1, %v7364_v6  ;;  %v1680_v9 = vsel %vm1661_vm12, %v1655_v60, %v7365_v39  ;;  %v1903_v16 = vrot.slane %v4960_v15, 3  ;;  %v1608_v52 = vsel %vm1586_vm9, %v1583_v11, %v7366_v35  ;;  %v7367_v28 = vld [vmem:[#allocation181_spill] sm:$0xff]  ;;  %v7368_v36 = vld [vmem:[#allocation267_spill] sm:$0xff]  ;;  %v1079_v1 = vpop.permute.xlu1 %1078  ;;  %v1077_v58 = vpop.permute.xlu0 %1076 }
 0x25c   : > { %v1607_v32 = vsel %vm1586_vm9, %v1582_v25, %v7367_v28  ;;  %v1706_v21 = vsel %vm1686_vm13, %v1681_v2, %v7368_v36  ;;  %v1705_v34 = vsel %vm1686_vm13, %v1680_v9, %v7369_v63  ;;  %v1633_v60 = vsel %vm6909_vm10, %v1608_v52, %v7370_v13  ;;  %v7371_v26 = vld [vmem:[#allocation203_spill] sm:$0xff]  ;;  %v7374_v25 = vld [vmem:[#allocation161_spill] sm:$0xff]  ;;  %v7376_v63 = vld [vmem:[#allocation228_spill] sm:$0xff] }
 0x25d   : > { %v1632_v15 = vsel %vm6909_vm10, %v1607_v32, %v7371_v26  ;;  %v5174_v39 = vsel %vm1711_vm14, %v1706_v21, %v1079_v1  ;;  %v5177_v11 = vsel %vm1711_vm14, %v1705_v34, %v1077_v58  ;;  %v1585_v36 = vsel %vm1561_vm8, %v5068_v27, %v7374_v25  ;;  %v7375_v2 = vld [vmem:[#allocation227_spill] sm:$0xff]  ;;  %v7377_v21 = vld [vmem:[#allocation162_spill] sm:$0xff]  ;;  %v7379_v52 = vld [vmem:[#allocation252_spill] sm:$0xff] }
 0x25e   : > { %7372 = vst [vmem:[#allocation149_spill] sm:$0xff] %v5174_v39  ;;  %7373 = vst [vmem:[#allocation152_spill] sm:$0xff] %v5177_v11  ;;  %v1658_v9 = vsel %vm1636_vm11, %v1633_v60, %v7375_v2  ;;  %v1657_v6 = vsel %vm1636_vm11, %v1632_v15, %v7376_v63  ;;  %2083 = vrot.lane.b32.xlu1 %v5116_v17, %s3142_s24  ;;  %2081 = vrot.lane.b32.xlu0 %v1884_v62, %s3142_s24  ;;  %v7378_v34 = vld [vmem:[#allocation251_spill] sm:$0xff]  ;;  %v7380_v25 = vld [vmem:[#allocation182_spill] sm:$0xff] }
 0x25f   : > { %v1584_v58 = vsel %vm1561_vm8, %v5084_v47, %v7377_v21  ;;  %v1683_v32 = vsel %vm1661_vm12, %v1658_v9, %v7378_v34  ;;  %v1682_v1 = vsel %vm1661_vm12, %v1657_v6, %v7379_v52  ;;  %v1905_v60 = vsel %vm446_vm2, %v1903_v16, %v1904_v42  ;;  %v7381_v39 = vld [vmem:[#allocation183_spill] sm:$0xff]  ;;  %v7382_v27 = vld [vmem:[#allocation270_spill] sm:$0xff]  ;;  %v1083_v47 = vpop.permute.xlu1 %1082  ;;  %v1081_v8 = vpop.permute.xlu0 %1080  ;;  %v7384_v9 = vld [vmem:[#allocation204_spill] sm:$0xff] }
 0x260   : > { %v1610_v15 = vsel %vm1586_vm9, %v1585_v36, %v7380_v25  ;;  %v1609_v11 = vsel %vm1586_vm9, %v1584_v58, %v7381_v39  ;;  %v1708_v55 = vsel %vm1686_vm13, %v1683_v32, %v7382_v27  ;;  %v1707_v21 = vsel %vm1686_vm13, %v1682_v1, %v7383_v5  ;;  %v7385_v6 = vld [vmem:[#allocation205_spill] sm:$0xff]  ;;  %v7389_v32 = vld [vmem:[#allocation230_spill] sm:$0xff] }
 0x261   : > { %v1635_v34 = vsel %vm6909_vm10, %v1610_v15, %v7384_v9  ;;  %v1634_v16 = vsel %vm6909_vm10, %v1609_v11, %v7385_v6  ;;  %v5210_v52 = vsel %vm1711_vm14, %v1708_v55, %v1083_v47  ;;  %v5213_v36 = vsel %vm1711_vm14, %v1707_v21, %v1081_v8  ;;  %v7388_v58 = vld [vmem:[#allocation229_spill] sm:$0xff]  ;;  %v7391_v15 = vld [vmem:[#allocation254_spill] sm:$0xff]  ;;  %v7392_v55 = vld [vmem:[#allocation59_spill] sm:$0xff] }
 0x262   : > { %7386 = vst [vmem:[#allocation239_spill] sm:$0xff] %v5210_v52  ;;  %7387 = vst [vmem:[#allocation240_spill] sm:$0xff] %v5213_v36  ;;  %v1660_v27 = vsel %vm1636_vm11, %v1635_v34, %v7388_v58  ;;  %v1659_v5 = vsel %vm1636_vm11, %v1634_v16, %v7389_v32  ;;  %2104 = vrot.lane.b32.xlu1 %v1904_v42, %s3143_s25  ;;  %2102 = vrot.lane.b32.xlu0 %v1905_v60, %s3143_s25  ;;  %v7390_v1 = vld [vmem:[#allocation253_spill] sm:$0xff]  ;;  %v7393_v21 = vld [vmem:[#allocation60_spill] sm:$0xff] }
 0x263   : > { %v1685_v11 = vsel %vm1661_vm12, %v1660_v27, %v7390_v1  ;;  %v1684_v47 = vsel %vm1661_vm12, %v1659_v5, %v7391_v15  ;;  %v1087_v52 = vpop.permute.xlu1 %1086  ;;  %v1085_v16 = vpop.permute.xlu0 %1084 }
 0x264   : > { %v1710_v8 = vsel %vm1686_vm13, %v1685_v11, %v7392_v55  ;;  %v1709_v34 = vsel %vm1686_vm13, %v1684_v47, %v7393_v21  ;;  %v202_v11 = vld [vmem:[%s3188_s17 + $0xf0] sm:$0xff]  ;;  %v203_v55 = vld [vmem:[%s3188_s17 + $0xf8] sm:$0xff] }
 0x265   : > { %v5230_v36 = vsel %vm1711_vm14, %v1710_v8, %v1087_v52  ;;  %v5233_v32 = vsel %vm1711_vm14, %v1709_v34, %v1085_v16  ;;  %v1960_v8 = vrot.slane %v202_v11, 7  ;;  %v1961_v21 = vrot.slane %v203_v55, 7 }
 0x266   : > { %7394 = vst [vmem:[#allocation171_spill] sm:$0xff] %v5230_v36  ;;  %7395 = vst [vmem:[#allocation172_spill] sm:$0xff] %v5233_v32  ;;  %1874 = vrot.lane.b32.xlu1 %v5079_v10, %s3136_s18  ;;  %1872 = vrot.lane.b32.xlu0 %v1863_v61, %s3136_s18  ;;  %v7399_v10 = vld [vmem:[#allocation238_spill] sm:$0xff]  ;;  %v2054_v36 = vrot.slane %v203_v55, 1 }
 0x267   : > { %v5238_v27 = vpop.permute.xlu1 %1117  ;;  %v5240_v5 = vpop.permute.xlu0 %1115  ;;  %v7400_v61 = vrot.slane %v7399_v10, 7 }
 0x268   : > { %7396 = vst [vmem:[#allocation192_spill] sm:$0xff] %v5238_v27 }
 0x26a   : > { %1895 = vrot.lane.b32.xlu1 %v5116_v17, %s3137_s19  ;;  %1893 = vrot.lane.b32.xlu0 %v1884_v62, %s3137_s19  ;;  %v1962_v17 = vsel %vm1926_vm4, %v1960_v8, %v1961_v21  ;;  %v2053_v62 = vrot.slane %v202_v11, 1  ;;  %v2096_v21 = vrot.slane %v203_v55, 3  ;;  %vm1761_vm4 = vcmask 392192  }
 0x26b   : > { %v5246_v52 = vpop.permute.xlu1 %1121  ;;  %v5248_v47 = vpop.permute.xlu0 %1119 }
 0x26c   : > { %7397 = vst [vmem:[#allocation193_spill] sm:$0xff] %v5246_v52  ;;  %7398 = vst [vmem:[#allocation215_spill] sm:$0xff] %v5248_v47  ;;  %v2055_v10 = vsel %vm6914_vm0, %v2053_v62, %v2054_v36 }
 0x26e   : > { %1914 = vrot.lane.b32.xlu1 %v1905_v60, %s3138_s20  ;;  %1987 = vrot.lane.b32.xlu0 %v7400_v61, %s3139_s21  ;;  %v2074_v61 = vrot.slane %v202_v11, 2 }
 0x26f   : > { %v5255_v34 = vpop.permute.xlu1 %1125  ;;  %v5257_v16 = vpop.permute.xlu0 %1123 }
 0x270   : > { %7401 = vst [vmem:[#allocation216_spill] sm:$0xff] %v5255_v34  ;;  %7402 = vst [vmem:[#allocation241_spill] sm:$0xff] %v5257_v16  ;;  %v2075_v34 = vrot.slane %v203_v55, 2 }
 0x272   : > { %2007 = vrot.lane.b32.xlu1 %v1960_v8, %s3139_s21  ;;  %1916 = vrot.lane.b32.xlu0 %v1904_v42, %s3138_s20  ;;  %v2076_v42 = vsel %vm337_vm1, %v2074_v61, %v2075_v34  ;;  %v2095_v8 = vrot.slane %v202_v11, 3  ;;  %v6902_v61 = vmov 0.0   ;;  %vm6907_vm1 = vmmov 0  }
 0x273   : > { %v1964_v32 = vpop.permute.xlu1 %1963  ;;  %v5262_v60 = vpop.permute.xlu0 %1127  ;;  %2982 = vmatprep.subr.bf16.mxu0 %v6902_v61  ;;  %3032 = vmatprep.subr.bf16.mxu1 %v6902_v61 }
 0x274   : > { %7403 = vst [vmem:[#allocation242_spill] sm:$0xff] %v5262_v60  ;;  %v2097_v62 = vsel %vm446_vm2, %v2095_v8, %v2096_v21  ;;  %2996 = vmatprep.mubr.msk.bf16.mxu0 %vm6907_vm1, %v6902_v61  ;;  %3016 = vmatprep.mubr.msk.bf16.mxu1 %vm6907_vm1, %v6902_v61  ;;  %vm1736_vm2 = vcmask 359424   ;;  %vm6911_vm1 = vcmask 490496  }
 0x276   : > { %2043 = vrot.lane.b32.xlu1 %v202_v11, %s3140_s22  ;;  %2009 = vrot.lane.b32.xlu0 %v1962_v17, %s3139_s21  ;;  %v3073_v17 = vld [vmem:[%s6684_s1] sm:$0xff]   ;;  %v3074_v11 = vld [vmem:[%s6684_s1 + $0x8] sm:$0xff]  }
 0x277   : > { %v5267_v52 = vpop.permute.xlu1 %1967  ;;  %v1966_v16 = vpop.permute.xlu0 %1965  ;;  %2983 = vmatpush3.bf16.msra.mxu0 %v3073_v17  ;;  %3039 = vmatpush3.bf16.msra.mxu1 %v3073_v17  ;;  %v2134_v17 = vsel %vm1561_vm8, %v4818_v46, %v1964_v32  ;;  %v7406_v46 = vld [vmem:[#allocation39_spill] sm:$0xff] }
 0x278   : > { %2984 = vmatprep.subr.bf16.mxu0 %v6902_v61  ;;  %3033 = vmatprep.subr.bf16.mxu1 %v6902_v61  ;;  %v2135_v8 = vsel %vm1561_vm8, %v4814_v20, %v1966_v16  ;;  %v3076_v16 = vld [vmem:[%s6684_s1 + $0x18] sm:$0xff]   ;;  %v2158_v32 = vsel %vm1586_vm9, %v2134_v17, %v4158_v59  ;;  %v7408_v17 = vld [vmem:[#allocation19_spill] sm:$0xff] }
 0x279   : > { %v2159_v20 = vsel %vm1586_vm9, %v2135_v8, %v4156_v33  ;;  %v2182_v59 = vsel %vm6909_vm10, %v2158_v32, %v4262_v54  ;;  %v2136_v54 = vsel %vm1561_vm8, %v4834_v30, %v5267_v52  ;;  %v7410_v30 = vld [vmem:[#allocation38_spill] sm:$0xff] }
 0x27a   : > { %2064 = vrot.lane.b32.xlu1 %v2055_v10, %s3141_s23  ;;  %2045 = vrot.lane.b32.xlu0 %v203_v55, %s3140_s22  ;;  %v2183_v33 = vsel %vm6909_vm10, %v2159_v20, %v4260_v3  ;;  %v7407_v3 = vld [vmem:[#allocation78_spill] sm:$0xff]  ;;  %s3151_s22 = smov 60  }
 0x27b   : > { %v5272_v60 = vpop.permute.xlu1 %1971  ;;  %v1970_v47 = vpop.permute.xlu0 %1969  ;;  %2985 = vmatpush3.bf16.msra.mxu0 %v3074_v11  ;;  %3040 = vmatpush3.bf16.msra.mxu1 %v3074_v11  ;;  %v2207_v20 = vsel %vm1636_vm11, %v2183_v33, %v4364_v4  ;;  %v3078_v4 = vld [vmem:[%s6684_s1 + $0x28] sm:$0xff]  }
 0x27c   : > { %2986 = vmatprep.subr.bf16.mxu0 %v6902_v61  ;;  %3034 = vmatprep.subr.bf16.mxu1 %v6902_v61  ;;  %v2231_v52 = vsel %vm1661_vm12, %v2207_v20, %v7280_v48  ;;  %v3079_v48 = vld [vmem:[%s6684_s1 + $0x30] ss:$0 sps:$4 sm:$0x33]  }
 0x27e   : > { %2085 = vrot.lane.b32.xlu1 %v2076_v42, %s3142_s24  ;;  %2066 = vrot.lane.b32.xlu0 %v2054_v36, %s3141_s23  ;;  %v3075_v42 = vld [vmem:[%s6684_s1 + $0x10] sm:$0xff]   ;;  %s3152_s23 = smov 64  }
 0x27f   : > { %v5280_v10 = vpop.permute.xlu1 %1991  ;;  %v5282_v27 = vpop.permute.xlu0 %1973  ;;  %2987 = vmatpush3.bf16.msra.mxu0 %v3075_v42  ;;  %3041 = vmatpush3.bf16.msra.mxu1 %v3075_v42  ;;  %v2137_v42 = vsel %vm1561_vm8, %v4826_v12, %v1970_v47  ;;  %v2206_v47 = vsel %vm1636_vm11, %v2182_v59, %v7278_v22  ;;  %v2160_v22 = vsel %vm1586_vm9, %v2136_v54, %v7284_v29  ;;  %v2279_v29 = vrot.slane %v2231_v52, 1  ;;  %v3100_v52 = vld [vmem:[%s3188_s17 + $0x38] sm:$0xff] }
 0x280   : > { %2988 = vmatprep.subr.bf16.mxu0 %v6902_v61  ;;  %3035 = vmatprep.subr.bf16.mxu1 %v6902_v61  ;;  %v2230_v59 = vsel %vm1661_vm12, %v2206_v47, %v7281_v56  ;;  %v2581_v56 = vsel %vm2579_vm15, %v3079_v48, 0  ;;  %vm1786_vm15 = vcmask 424960  }
 0x282   : > { %2106 = vrot.lane.b32.xlu1 %v2097_v62, %s3143_s25  ;;  %2087 = vrot.lane.b32.xlu0 %v2075_v34, %s3142_s24  ;;  %v7404_v34 = vld [vmem:[#allocation17_spill] sm:$0xff] }
 0x283   : > { %v5292_v36 = vpop.permute.xlu1 %1989  ;;  %v5294_v55 = vpop.permute.xlu0 %1993  ;;  %2989 = vmatpush3.bf16.msra.mxu0 %v3076_v16  ;;  %3042 = vmatpush3.bf16.msra.mxu1 %v3076_v16  ;;  %v7409_v16 = vld [vmem:[#allocation41_spill] sm:$0xff] }
 0x284   : > { %2990 = vmatprep.subr.bf16.mxu0 %v6902_v61  ;;  %3036 = vmatprep.subr.bf16.mxu1 %v6902_v61 }
 0x286   : > { %1190 = vrot.lane.b32.xlu1 %v7404_v34, %s3148_s8  ;;  %2108 = vrot.lane.b32.xlu0 %v2096_v21, %s3143_s25  ;;  %v7405_v21 = vld [vmem:[#allocation16_spill] sm:$0xff]  ;;  %v3077_v34 = vld [vmem:[%s6684_s1 + $0x20] sm:$0xff]   ;;  %s3046_s25 = smul.u32 48, %s7783_s13 }
 0x287   : > { %v5308_v62 = vpop.permute.xlu1 %1977  ;;  %v5310_v1 = vpop.permute.xlu0 %1975  ;;  %2991 = vmatpush3.bf16.msra.mxu0 %v3077_v34  ;;  %3043 = vmatpush3.bf16.msra.mxu1 %v3077_v34  ;;  %v2184_v34 = vsel %vm6909_vm10, %v2160_v22, %v7286_v19 }
 0x288   : > { %2992 = vmatprep.subr.bf16.mxu0 %v6902_v61  ;;  %3037 = vmatprep.subr.bf16.mxu1 %v6902_v61  ;;  %v2208_v19 = vsel %vm1636_vm11, %v2184_v34, %v7290_v44 }
 0x28a   : > { %1192 = vrot.lane.b32.xlu1 %v7405_v21, %s3148_s8  ;;  %1265 = vrot.lane.b32.xlu0 %v7406_v46, %s3149_s11  ;;  %v2161_v46 = vsel %vm1586_vm9, %v2137_v42, %v7283_v31  ;;  %v7412_v42 = vld [vmem:[#allocation224_spill] sm:$0xff] }
 0x28b   : > { %v5327_v11 = vpop.permute.xlu1 %1866  ;;  %v5329_v8 = vpop.permute.xlu0 %1864  ;;  %v2185_v31 = vsel %vm6909_vm10, %v2161_v46, %v7285_v40  ;;  %2993 = vmatpush3.bf16.msra.mxu0 %v3078_v4  ;;  %v7411_v40 = vld [vmem:[#allocation75_spill] sm:$0xff]  ;;  %3044 = vmatpush3.bf16.msra.mxu1 %v3078_v4 }
 0x28c   : > { %2994 = vmatprep.subr.bf16.mxu0 %v6902_v61  ;;  %3038 = vmatprep.subr.bf16.mxu1 %v6902_v61 }
 0x28e   : > { %1340 = vrot.lane.b32.xlu1 %v7407_v3, %s3150_s16  ;;  %1194 = vrot.lane.b32.xlu0 %v7408_v17, %s3148_s8  ;;  %v2209_v3 = vsel %vm1636_vm11, %v2185_v31, %v7289_v7  ;;  %v2278_v17 = vrot.slane %v2230_v59, 1  ;;  %v7413_v7 = vld [vmem:[#allocation82_spill] sm:$0xff] }
 0x28f   : > { %v5349_v21 = vpop.permute.xlu1 %1887  ;;  %v5351_v12 = vpop.permute.xlu0 %1885  ;;  %2995 = vmatpush3.bf16.msra.mxu0 %v2581_v56  ;;  %v5404_v46 = vsel %vm1661_vm12, %v2209_v3, %v7293_v37  ;;  %3045 = vmatpush3.bf16.msra.mxu1 %v2581_v56  ;;  %v3101_v37 = vld [vmem:[%s3188_s17 + $0x40] sm:$0xff] }
 0x290   : > { %v2280_v47 = vsel %vm6914_vm0, %v2278_v17, %v2279_v29  ;;  %v7416_v17 = vld [vmem:[#allocation43_spill] sm:$0xff] }
 0x292   : > { %1269 = vrot.lane.b32.xlu1 %v7409_v16, %s3149_s11  ;;  %1267 = vrot.lane.b32.xlu0 %v7410_v30, %s3149_s11  ;;  %v2232_v16 = vsel %vm1661_vm12, %v2208_v19, %v7294_v41  ;;  %v2282_v30 = vrot.slane %v5404_v46, 1 }
 0x293   : > { %v5372_v32 = vpop.permute.xlu1 %1997  ;;  %v5374_v33 = vpop.permute.xlu0 %1995  ;;  %v2281_v22 = vrot.slane %v2232_v16, 1  ;;  %v7418_v16 = vld [vmem:[#allocation31_spill] sm:$0xff] }
 0x295   : > { %v2283_v41 = vsel %vm6914_vm0, %v2281_v22, %v2282_v30 }
 0x296   : > { %1342 = vrot.lane.b32.xlu1 %v7411_v40, %s3150_s16  ;;  %1414 = vrot.lane.b32.xlu0 %v7412_v42, %s3151_s22  ;;  %v7414_v40 = vld [vmem:[#allocation21_spill] sm:$0xff]  ;;  %v7415_v42 = vld [vmem:[#allocation11_spill] sm:$0xff] }
 0x297   : > { %v5391_v20 = vpop.permute.xlu1 %1908  ;;  %v5393_v54 = vpop.permute.xlu0 %1906 }
 0x29a   : > { %1344 = vrot.lane.b32.xlu0 %v7413_v7, %s3150_s16  ;;  %2314 = vrot.lane.b32.xlu1 %v2280_v47, %s3152_s23  ;;  %v2139_v7 = vsel %vm1561_vm8, %v4838_v45, %v5282_v27  ;;  %v7420_v45 = vld [vmem:[#allocation8_spill] sm:$0xff]  ;;  %v7421_v27 = vld [vmem:[#allocation10_spill] sm:$0xff] }
 0x29b   : > { %v5408_v44 = vpop.permute.xlu1 %2001  ;;  %v5410_v4 = vpop.permute.xlu0 %1999 }
 0x29e   : > { %1416 = vrot.lane.b32.xlu0 %v3100_v52, %s3151_s22  ;;  %1418 = vrot.lane.b32.xlu1 %v3101_v37, %s3151_s22  ;;  %v7419_v52 = vld [vmem:[#allocation86_spill] sm:$0xff]  ;;  %v2138_v37 = vsel %vm1561_vm8, %v4842_v23, %v5272_v60 }
 0x29f   : > { %v5421_v31 = vpop.permute.xlu1 %2037  ;;  %v5423_v59 = vpop.permute.xlu0 %2035 }
 0x2a2   : > { %2316 = vrot.lane.b32.xlu0 %v2279_v29, %s3152_s23  ;;  %2318 = vrot.lane.b32.xlu1 %v2283_v41, %s3152_s23  ;;  %v7417_v29 = vld [vmem:[#allocation18_spill] sm:$0xff] }
 0x2a3   : > { %v5430_v48 = vpop.permute.xlu1 %2058  ;;  %v5432_v34 = vpop.permute.xlu0 %2056 }
 0x2a6   : > { %1198 = vrot.lane.b32.xlu0 %v7414_v40, %s3148_s8  ;;  %1143 = vrot.lane.b32.xlu1 %v7415_v42, %s3146_s28  ;;  %v2163_v40 = vsel %vm1586_vm9, %v2139_v7, %v7295_v24  ;;  %v2162_v42 = vsel %vm1586_vm9, %v2138_v37, %v7296_v57  ;;  %v7422_v24 = vld [vmem:[#allocation40_spill] sm:$0xff]  ;;  %v7423_v7 = vld [vmem:[#allocation61_spill] sm:$0xff] }
 0x2a7   : > { %v5438_v56 = vpop.permute.xlu1 %1870  ;;  %v5440_v3 = vpop.permute.xlu0 %1868  ;;  %v2187_v23 = vsel %vm6909_vm10, %v2163_v40, %v7297_v14  ;;  %v3102_v37 = vld [vmem:[%s3188_s17 + $0x50] sm:$0xff] }
 0x2aa   : > { %1273 = vrot.lane.b32.xlu0 %v7416_v17, %s3149_s11  ;;  %1196 = vrot.lane.b32.xlu1 %v7417_v29, %s3148_s8  ;;  %v2186_v29 = vsel %vm6909_vm10, %v2162_v42, %v7298_v51  ;;  %v7424_v51 = vld [vmem:[#allocation28_spill] sm:$0xff] }
 0x2ab   : > { %v5446_v19 = vpop.permute.xlu1 %2079  ;;  %v5448_v47 = vpop.permute.xlu0 %2077  ;;  %v2210_v14 = vsel %vm1636_vm11, %v2186_v29, %v7302_v43  ;;  %v2149_v43 = vsel %vm1561_vm8, %v5060_v38, %v5294_v55  ;;  %v7427_v29 = vld [vmem:[#allocation79_spill] sm:$0xff]  ;;  %v7428_v55 = vld [vmem:[#allocation106_spill] sm:$0xff] }
 0x2ae   : > { %1218 = vrot.lane.b32.xlu0 %v7418_v16, %s3148_s8  ;;  %1348 = vrot.lane.b32.xlu1 %v7419_v52, %s3150_s16  ;;  %v2211_v16 = vsel %vm1636_vm11, %v2187_v23, %v7301_v53  ;;  %v7426_v23 = vld [vmem:[#allocation30_spill] sm:$0xff] }
 0x2af   : > { %v5460_v22 = vpop.permute.xlu1 %1891  ;;  %v5462_v41 = vpop.permute.xlu0 %1889  ;;  %v5498_v40 = vsel %vm1661_vm12, %v2211_v16, %v7303_v50  ;;  %v2173_v16 = vsel %vm1586_vm9, %v2149_v43, %v7366_v35 }
 0x2b0   : > { %v6904_v42 = vrot.slane %v5498_v40, 1 }
 0x2b2   : > { %1141 = vrot.lane.b32.xlu0 %v7420_v45, %s3146_s28  ;;  %1145 = vrot.lane.b32.xlu1 %v7421_v27, %s3146_s28  ;;  %v2234_v27 = vsel %vm1661_vm12, %v2210_v14, %v7304_v18 }
 0x2b3   : > { %v5474_v60 = vpop.permute.xlu1 %1981  ;;  %v5476_v17 = vpop.permute.xlu0 %1979  ;;  %v2284_v50 = vrot.slane %v2234_v27, 1  ;;  %v7432_v27 = vld [vmem:[#allocation58_spill] sm:$0xff] }
 0x2b5   : > { %v2286_v38 = vsel %vm6914_vm0, %v2284_v50, %v6904_v42  ;;  %v3104_v50 = vld [vmem:[%s3188_s17 + $0xa0] sm:$0xff]  ;;  %v7466_v42 = vld [vmem:[#allocation90_spill] sm:$0xff] }
 0x2b6   : > { %1271 = vrot.lane.b32.xlu0 %v7422_v24, %s3149_s11  ;;  %1293 = vrot.lane.b32.xlu1 %v7423_v7, %s3149_s11  ;;  %v2148_v24 = vsel %vm1561_vm8, %v5064_v49, %v5280_v10  ;;  %v2197_v10 = vsel %vm6909_vm10, %v2173_v16, %v7370_v13  ;;  %v7436_v16 = vld [vmem:[#allocation178_spill] sm:$0xff] }
 0x2b7   : > { %v5486_v57 = vpop.permute.xlu1 %2100  ;;  %v5488_v52 = vpop.permute.xlu0 %2098  ;;  %v2172_v49 = vsel %vm1586_vm9, %v2148_v24, %v7367_v28  ;;  %v2221_v43 = vsel %vm1636_vm11, %v2197_v10, %v7375_v2  ;;  %v7435_v24 = vld [vmem:[#allocation251_spill] sm:$0xff] }
 0x2b8   : > { %v2245_v2 = vsel %vm1661_vm12, %v2221_v43, %v7435_v24  ;;  %v7440_v10 = vld [vmem:[#allocation99_spill] sm:$0xff]  ;;  %v7445_v24 = vld [vmem:[#allocation225_spill] sm:$0xff] }
 0x2ba   : > { %1422 = vrot.lane.b32.xlu0 %v3102_v37, %s3151_s22  ;;  %1216 = vrot.lane.b32.xlu1 %v7424_v51, %s3148_s8  ;;  %v2196_v37 = vsel %vm6909_vm10, %v2172_v49, %v7371_v26  ;;  %v7431_v51 = vld [vmem:[#allocation54_spill] sm:$0xff]  ;;  %v2147_v26 = vsel %vm1561_vm8, %v5049_v0, %v5292_v36  ;;  %v2300_v36 = vrot.slane %v2245_v2, 1 }
 0x2bb   : > { %v5500_v45 = vpop.permute.xlu1 %1912  ;;  %v5502_v53 = vpop.permute.xlu0 %1910  ;;  %v2220_v13 = vsel %vm1636_vm11, %v2196_v37, %v7376_v63  ;;  %v7439_v63 = vld [vmem:[#allocation252_spill] sm:$0xff]  ;;  %v7441_v37 = vld [vmem:[#allocation103_spill] sm:$0xff] }
 0x2bc   : > { %7425 = vst [vmem:[#allocation118_spill] sm:$0xff] %v5502_v53  ;;  %v2244_v0 = vsel %vm1661_vm12, %v2220_v13, %v7439_v63 }
 0x2bd   : > { %v2299_v43 = vrot.slane %v2244_v0, 1  ;;  %v3105_v0 = vld [vmem:[%s3188_s17 + $0xa8] sm:$0xff] }
 0x2be   : > { %1220 = vrot.lane.b32.xlu0 %v7426_v23, %s3148_s8  ;;  %1346 = vrot.lane.b32.xlu1 %v7427_v29, %s3150_s16  ;;  %v3103_v29 = vld [vmem:[%s3188_s17 + $0x48] sm:$0xff] }
 0x2bf   : > { %v5517_v7 = vpop.permute.xlu1 %1985  ;;  %v5519_v18 = vpop.permute.xlu0 %1983 }
 0x2c2   : > { %1368 = vrot.lane.b32.xlu0 %v7428_v55, %s3150_s16  ;;  %2322 = vrot.lane.b32.xlu1 %v2286_v38, %s3152_s23  ;;  %v2171_v38 = vsel %vm1586_vm9, %v2147_v26, %v7436_v16 }
 0x2c4   : > { %v5533_v14 = vpop.permute.xlu1 %2005  ;;  %v5535_v35 = vpop.permute.xlu0 %2003 }
 0x2c5   : > { %7429 = vst [vmem:[#allocation119_spill] sm:$0xff] %v5533_v14  ;;  %7430 = vst [vmem:[#allocation120_spill] sm:$0xff] %v5535_v35  ;;  %v7508_v14 = vld [vmem:[#allocation126_spill] sm:$0xff] }
 0x2c6   : > { %1291 = vrot.lane.b32.xlu0 %v7431_v51, %s3149_s11  ;;  %1295 = vrot.lane.b32.xlu1 %v7432_v27, %s3149_s11  ;;  %v7442_v51 = vld [vmem:[#allocation200_spill] sm:$0xff] }
 0x2c7   : > { %v2195_v27 = vsel %vm6909_vm10, %v2171_v38, %v7442_v51  ;;  %v7448_v38 = vld [vmem:[#allocation249_spill] sm:$0xff]  ;;  %v7452_v51 = vld [vmem:[#allocation23_spill] sm:$0xff] }
 0x2c8   : > { %v5545_v28 = vpop.permute.xlu1 %2041  ;;  %v5547_v23 = vpop.permute.xlu0 %2039  ;;  %v2219_v13 = vsel %vm1636_vm11, %v2195_v27, %v7445_v24 }
 0x2c9   : > { %7433 = vst [vmem:[#allocation121_spill] sm:$0xff] %v5545_v28  ;;  %7434 = vst [vmem:[#allocation122_spill] sm:$0xff] %v5547_v23  ;;  %v5591_v63 = vsel %vm1661_vm12, %v2219_v13, %v7448_v38  ;;  %v7458_v38 = vld [vmem:[#allocation45_spill] sm:$0xff] }
 0x2ca   : > { %1420 = vrot.lane.b32.xlu0 %v3103_v29, %s3151_s22  ;;  %1442 = vrot.lane.b32.xlu1 %v3104_v50, %s3151_s22  ;;  %v2301_v50 = vsel %vm6914_vm0, %v2299_v43, %v2300_v36  ;;  %7449 = vst [vmem:[#allocation134_spill] sm:$0xff] %v5591_v63  ;;  %v7502_v28 = vld [vmem:[#allocation169_spill] sm:$0xff] }
 0x2cb   : > { %v2150_v35 = vsel %vm1561_vm8, %v7502_v28, %v5374_v33  ;;  %v7509_v28 = vld [vmem:[#allocation164_spill] sm:$0xff] }
 0x2cc   : > { %v5562_v55 = vpop.permute.xlu1 %2062  ;;  %v5564_v49 = vpop.permute.xlu0 %2060 }
 0x2cd   : > { %7437 = vst [vmem:[#allocation123_spill] sm:$0xff] %v5562_v55  ;;  %7438 = vst [vmem:[#allocation63_spill] sm:$0xff] %v5564_v49 }
 0x2ce   : > { %1366 = vrot.lane.b32.xlu0 %v7440_v10, %s3150_s16  ;;  %1370 = vrot.lane.b32.xlu1 %v7441_v37, %s3150_s16  ;;  %v3106_v10 = vld [vmem:[%s3188_s17 + $0x98] sm:$0xff] }
 0x2d0   : > { %v5574_v26 = vpop.permute.xlu1 %2083  ;;  %v5576_v29 = vpop.permute.xlu0 %2081 }
 0x2d1   : > { %7443 = vst [vmem:[#allocation124_spill] sm:$0xff] %v5574_v26  ;;  %7444 = vst [vmem:[#allocation64_spill] sm:$0xff] %v5576_v29  ;;  %v3110_v29 = vld [vmem:[%s3188_s17 + $0x8] sm:$0xff] }
 0x2d2   : > { %2320 = vrot.lane.b32.xlu0 %v2282_v30, %s3152_s23  ;;  %2342 = vrot.lane.b32.xlu1 %v2301_v50, %s3152_s23  ;;  %v6901_v30 = vrot.slane %v5591_v63, 1  ;;  %v7455_v50 = vld [vmem:[#allocation3_spill] sm:$0xff]  ;;  %v7497_v26 = vld [vmem:[#allocation48_spill] sm:$0xff] }
 0x2d4   : > { %v5585_v2 = vpop.permute.xlu1 %2104  ;;  %v5587_v16 = vpop.permute.xlu0 %2102 }
 0x2d5   : > { %7446 = vst [vmem:[#allocation125_spill] sm:$0xff] %v5585_v2  ;;  %7447 = vst [vmem:[#allocation67_spill] sm:$0xff] %v5587_v16  ;;  %v7494_v16 = vld [vmem:[#allocation87_spill] sm:$0xff] }
 0x2d6   : > { %1444 = vrot.lane.b32.xlu1 %v3105_v0, %s3151_s22  ;;  %1440 = vrot.lane.b32.xlu0 %v3106_v10, %s3151_s22  ;;  %v7459_v0 = vld [vmem:[#allocation13_spill] sm:$0xff] }
 0x2d8   : > { %v5597_v37 = vpop.permute.xlu1 %1874  ;;  %v5599_v46 = vpop.permute.xlu0 %1872 }
 0x2d9   : > { %7450 = vst [vmem:[#allocation261_spill] sm:$0xff] %v5597_v37  ;;  %7451 = vst [vmem:[#allocation135_spill] sm:$0xff] %v5599_v46  ;;  %v7474_v37 = vld [vmem:[#allocation15_spill] sm:$0xff] }
 0x2da   : > { %2340 = vrot.lane.b32.xlu1 %v6901_v30, %s3152_s23  ;;  %1202 = vrot.lane.b32.xlu0 %v7452_v51, %s3148_s8  ;;  %v7462_v30 = vld [vmem:[#allocation22_spill] sm:$0xff] }
 0x2dc   : > { %v5607_v27 = vpop.permute.xlu1 %1895  ;;  %v5609_v43 = vpop.permute.xlu0 %1893 }
 0x2dd   : > { %7453 = vst [vmem:[#allocation136_spill] sm:$0xff] %v5607_v27  ;;  %7454 = vst [vmem:[#allocation137_spill] sm:$0xff] %v5609_v43  ;;  %v7480_v43 = vld [vmem:[#allocation44_spill] sm:$0xff] }
 0x2de   : > { %1129 = vrot.lane.b32.xlu1 %v7455_v50, %s3146_s28  ;;  %2344 = vrot.lane.b32.xlu0 %v2300_v36, %s3152_s23  ;;  %v7463_v50 = vld [vmem:[#allocation20_spill] sm:$0xff] }
 0x2e0   : > { %v5614_v24 = vpop.permute.xlu1 %1914  ;;  %v5616_v13 = vpop.permute.xlu0 %1987 }
 0x2e1   : > { %7456 = vst [vmem:[#allocation138_spill] sm:$0xff] %v5614_v24  ;;  %7457 = vst [vmem:[#allocation139_spill] sm:$0xff] %v5616_v13  ;;  %v7473_v24 = vld [vmem:[#allocation81_spill] sm:$0xff] }
 0x2e2   : > { %1277 = vrot.lane.b32.xlu1 %v7458_v38, %s3149_s11  ;;  %1147 = vrot.lane.b32.xlu0 %v7459_v0, %s3146_s28  ;;  %v7467_v38 = vld [vmem:[#allocation33_spill] sm:$0xff]  ;;  %v5639_v0 = vld [vmem:[%s3188_s17 + $0x68] sm:$0xff] }
 0x2e4   : > { %v5622_v10 = vpop.permute.xlu1 %2007  ;;  %v5624_v51 = vpop.permute.xlu0 %1916 }
 0x2e5   : > { %7460 = vst [vmem:[#allocation140_spill] sm:$0xff] %v5622_v10  ;;  %7461 = vst [vmem:[#allocation155_spill] sm:$0xff] %v5624_v51  ;;  %v7468_v10 = vld [vmem:[#allocation70_spill] sm:$0xff] }
 0x2e6   : > { %1204 = vrot.lane.b32.xlu1 %v7462_v30, %s3148_s8  ;;  %1200 = vrot.lane.b32.xlu0 %v7463_v50, %s3148_s8  ;;  %v1500_v51 = vsel %vm1486_vm5, %v5639_v0, %v7468_v10  ;;  %v7469_v30 = vld [vmem:[#allocation115_spill] sm:$0xff]  ;;  %v2140_v10 = vsel %vm1561_vm8, %v7473_v24, %v5310_v1  ;;  %v7481_v1 = vld [vmem:[#allocation42_spill] sm:$0xff] }
 0x2e7   : > { %v1525_v27 = vsel %vm6916_vm6, %v1500_v51, %v7469_v30  ;;  %v7475_v51 = vld [vmem:[#allocation12_spill] sm:$0xff] }
 0x2e8   : > { %v5630_v36 = vpop.permute.xlu1 %2043  ;;  %v5632_v61 = vpop.permute.xlu0 %2009 }
 0x2e9   : > { %7464 = vst [vmem:[#allocation156_spill] sm:$0xff] %v5630_v36  ;;  %7465 = vst [vmem:[#allocation141_spill] sm:$0xff] %v5632_v61  ;;  %v7472_v61 = vld [vmem:[#allocation131_spill] sm:$0xff] }
 0x2ea   : > { %1352 = vrot.lane.b32.xlu1 %v7466_v42, %s3150_s16  ;;  %1222 = vrot.lane.b32.xlu0 %v7467_v38, %s3148_s8  ;;  %v5652_v42 = vsel %vm6915_vm7, %v1525_v27, %v7472_v61  ;;  %v7478_v61 = vld [vmem:[#allocation174_spill] sm:$0xff] }
 0x2eb   : > { %v2141_v38 = vsel %vm1561_vm8, %v5652_v42, %v5308_v62 }
 0x2ec   : > { %v5646_v50 = vpop.permute.xlu1 %2064  ;;  %v5648_v36 = vpop.permute.xlu0 %2045  ;;  %v2165_v27 = vsel %vm1586_vm9, %v2141_v38, %v7478_v61  ;;  %v3108_v38 = vld [vmem:[%s3188_s17 + $0x60] sm:$0xff] }
 0x2ed   : > { %7470 = vst [vmem:[#allocation157_spill] sm:$0xff] %v5646_v50  ;;  %7471 = vst [vmem:[#allocation158_spill] sm:$0xff] %v5648_v36  ;;  %v7479_v50 = vld [vmem:[#allocation175_spill] sm:$0xff] }
 0x2ee   : > { %1151 = vrot.lane.b32.xlu1 %v7474_v37, %s3146_s28  ;;  %1149 = vrot.lane.b32.xlu0 %v7475_v51, %s3146_s28  ;;  %v2164_v62 = vsel %vm1586_vm9, %v2140_v10, %v7479_v50  ;;  %v7482_v37 = vld [vmem:[#allocation195_spill] sm:$0xff]  ;;  %v7483_v51 = vld [vmem:[#allocation196_spill] sm:$0xff]  ;;  %v7486_v50 = vld [vmem:[#allocation65_spill] sm:$0xff] }
 0x2ef   : > { %v2189_v24 = vsel %vm6909_vm10, %v2165_v27, %v7482_v37 }
 0x2f0   : > { %v5664_v30 = vpop.permute.xlu1 %2085  ;;  %v5666_v36 = vpop.permute.xlu0 %2066 }
 0x2f1   : > { %7476 = vst [vmem:[#allocation159_spill] sm:$0xff] %v5664_v30  ;;  %7477 = vst [vmem:[#allocation160_spill] sm:$0xff] %v5666_v36  ;;  %v2188_v30 = vsel %vm6909_vm10, %v2164_v62, %v7483_v51  ;;  %v7490_v51 = vld [vmem:[#allocation35_spill] sm:$0xff] }
 0x2f2   : > { %1279 = vrot.lane.b32.xlu1 %v7480_v43, %s3149_s11  ;;  %1275 = vrot.lane.b32.xlu0 %v7481_v1, %s3149_s11  ;;  %v7487_v43 = vld [vmem:[#allocation218_spill] sm:$0xff]  ;;  %v7488_v1 = vld [vmem:[#allocation219_spill] sm:$0xff] }
 0x2f3   : > { %v2213_v10 = vsel %vm1636_vm11, %v2189_v24, %v7487_v43  ;;  %v2212_v27 = vsel %vm1636_vm11, %v2188_v30, %v7488_v1 }
 0x2f4   : > { %v5680_v63 = vpop.permute.xlu1 %2106  ;;  %v5682_v36 = vpop.permute.xlu0 %2087 }
 0x2f5   : > { %7484 = vst [vmem:[#allocation264_spill] sm:$0xff] %v5680_v63  ;;  %7485 = vst [vmem:[#allocation265_spill] sm:$0xff] %v5682_v36  ;;  %v7492_v63 = vld [vmem:[#allocation244_spill] sm:$0xff]  ;;  %v7493_v36 = vld [vmem:[#allocation243_spill] sm:$0xff] }
 0x2f6   : > { %1426 = vrot.lane.b32.xlu1 %v3108_v38, %s3151_s22  ;;  %1297 = vrot.lane.b32.xlu0 %v7486_v50, %s3149_s11  ;;  %v7491_v38 = vld [vmem:[#allocation32_spill] sm:$0xff]  ;;  %v2236_v50 = vsel %vm1661_vm12, %v2212_v27, %v7492_v63  ;;  %v5704_v24 = vsel %vm1661_vm12, %v2213_v10, %v7493_v36 }
 0x2f7   : > { %v2287_v1 = vrot.slane %v2236_v50, 1  ;;  %v7496_v63 = vld [vmem:[#allocation52_spill] sm:$0xff]  ;;  %v1488_v50 = vsel %vm1486_vm5, %v3110_v29, %v7497_v26  ;;  %v7503_v26 = vld [vmem:[#allocation110_spill] sm:$0xff]  ;;  %v3111_v29 = vld [vmem:[%s3188_s17 + $0x10] sm:$0xff] }
 0x2f8   : > { %v5692_v46 = vpop.permute.xlu1 %1190  ;;  %v5694_v62 = vpop.permute.xlu0 %2108 }
 0x2f9   : > { %7489 = vst [vmem:[#allocation180_spill] sm:$0xff] %v5694_v62  ;;  %v7498_v62 = vld [vmem:[#allocation93_spill] sm:$0xff] }
 0x2fa   : > { %1226 = vrot.lane.b32.xlu1 %v7490_v51, %s3148_s8  ;;  %1224 = vrot.lane.b32.xlu0 %v7491_v38, %s3148_s8  ;;  %v7495_v51 = vld [vmem:[#allocation83_spill] sm:$0xff] }
 0x2fb   : > { %v3109_v38 = vld [vmem:[%s3188_s17] sm:$0xff] }
 0x2fc   : > { %v5706_v13 = vpop.permute.xlu1 %1192  ;;  %v5708_v30 = vpop.permute.xlu0 %1265  ;;  %v1487_v27 = vsel %vm1486_vm5, %v3109_v38, %v7496_v63  ;;  %v7501_v38 = vld [vmem:[#allocation168_spill] sm:$0xff] }
 0x2fd   : > { %v1512_v49 = vsel %vm6916_vm6, %v1487_v27, %v7498_v62  ;;  %v2151_v63 = vsel %vm1561_vm8, %v7501_v38, %v5372_v32  ;;  %v7504_v62 = vld [vmem:[#allocation55_spill] sm:$0xff]  ;;  %v7505_v27 = vld [vmem:[#allocation92_spill] sm:$0xff]  ;;  %v7507_v32 = vld [vmem:[#allocation97_spill] sm:$0xff] }
 0x2fe   : > { %1354 = vrot.lane.b32.xlu1 %v7494_v16, %s3150_s16  ;;  %1350 = vrot.lane.b32.xlu0 %v7495_v51, %s3150_s16  ;;  %v7499_v16 = vrot.slane %v5704_v24, 1  ;;  %v7500_v51 = vld [vmem:[#allocation127_spill] sm:$0xff] }
 0x2ff   : > { %v1537_v23 = vsel %vm6915_vm7, %v1512_v49, %v7500_v51  ;;  %v1513_v49 = vsel %vm6916_vm6, %v1488_v50, %v7505_v27  ;;  %v7511_v50 = vld [vmem:[#allocation185_spill] sm:$0xff] }
 0x300   : > { %v5718_v10 = vpop.permute.xlu1 %1340  ;;  %v5720_v2 = vpop.permute.xlu0 %1194  ;;  %v2289_v55 = vsel %vm6914_vm0, %v2287_v1, %v7499_v16  ;;  %v1489_v1 = vsel %vm1486_vm5, %v3111_v29, %v7504_v62  ;;  %v7506_v16 = vld [vmem:[#allocation143_spill] sm:$0xff]  ;;  %v1538_v33 = vsel %vm6915_vm7, %v1513_v49, %v7508_v14  ;;  %v7510_v29 = vld [vmem:[#allocation129_spill] sm:$0xff]  ;;  %v7512_v14 = vld [vmem:[#allocation142_spill] sm:$0xff] }
 0x301   : > { %v1562_v51 = vsel %vm1561_vm8, %v1537_v23, %v7506_v16  ;;  %v1514_v38 = vsel %vm6916_vm6, %v1489_v1, %v7507_v32  ;;  %v2175_v23 = vsel %vm1586_vm9, %v2151_v63, %v7380_v25  ;;  %v2174_v1 = vsel %vm1586_vm9, %v2150_v35, %v7381_v39  ;;  %v7513_v16 = vld [vmem:[#allocation145_spill] sm:$0xff]  ;;  %v7514_v32 = vld [vmem:[#allocation207_spill] sm:$0xff]  ;;  %v7518_v63 = vld [vmem:[#allocation166_spill] sm:$0xff] }
 0x302   : > { %2326 = vrot.lane.b32.xlu1 %v2289_v55, %s3152_s23  ;;  %1372 = vrot.lane.b32.xlu0 %v7503_v26, %s3150_s16  ;;  %v1587_v55 = vsel %vm1586_vm9, %v1562_v51, %v7509_v28  ;;  %v1539_v62 = vsel %vm6915_vm7, %v1514_v38, %v7510_v29  ;;  %v1563_v49 = vsel %vm1561_vm8, %v1538_v33, %v7512_v14  ;;  %v7515_v38 = vld [vmem:[#allocation69_spill] sm:$0xff]  ;;  %v7517_v29 = vld [vmem:[#allocation163_spill] sm:$0xff]  ;;  %v7519_v35 = vld [vmem:[#allocation232_spill] sm:$0xff] }
 0x303   : > { %v1612_v27 = vsel %vm6909_vm10, %v1587_v55, %v7511_v50  ;;  %v1564_v51 = vsel %vm1561_vm8, %v1539_v62, %v7513_v16  ;;  %v7516_v55 = vld [vmem:[#allocation62_spill] sm:$0xff]  ;;  %v1588_v25 = vsel %vm1586_vm9, %v1563_v49, %v7517_v29  ;;  %v7520_v62 = vld [vmem:[#allocation256_spill] sm:$0xff]  ;;  %v2198_v14 = vsel %vm6909_vm10, %v2174_v1, %v7385_v6 }
 0x304   : > { %v5754_v26 = vpop.permute.xlu1 %1269  ;;  %v5756_v53 = vpop.permute.xlu0 %1267  ;;  %v1637_v28 = vsel %vm1636_vm11, %v1612_v27, %v7514_v32  ;;  %v1589_v39 = vsel %vm1586_vm9, %v1564_v51, %v7518_v63  ;;  %v2199_v27 = vsel %vm6909_vm10, %v2175_v23, %v7384_v9  ;;  %v7521_v32 = vld [vmem:[#allocation184_spill] sm:$0xff]  ;;  %v7524_v63 = vld [vmem:[#allocation206_spill] sm:$0xff]  ;;  %v7525_v9 = vld [vmem:[#allocation209_spill] sm:$0xff] }
 0x305   : > { %v1662_v33 = vsel %vm1661_vm12, %v1637_v28, %v7519_v35  ;;  %v1613_v51 = vsel %vm6909_vm10, %v1588_v25, %v7521_v32  ;;  %v3112_v1 = vld [vmem:[%s3188_s17 + $0x58] sm:$0xff]  ;;  %v2223_v25 = vsel %vm1636_vm11, %v2199_v27, %v7388_v58  ;;  %v7529_v27 = vld [vmem:[#allocation255_spill] sm:$0xff] }
 0x306   : > { %1301 = vrot.lane.b32.xlu1 %v7515_v38, %s3149_s11  ;;  %1299 = vrot.lane.b32.xlu0 %v7516_v55, %s3149_s11  ;;  %v1687_v50 = vsel %vm1686_vm13, %v1662_v33, %v7520_v62  ;;  %v7522_v38 = vld [vmem:[#allocation187_spill] sm:$0xff]  ;;  %v7523_v55 = vld [vmem:[#allocation76_spill] sm:$0xff]  ;;  %v1638_v35 = vsel %vm1636_vm11, %v1613_v51, %v7524_v63  ;;  %v7528_v32 = vld [vmem:[#allocation234_spill] sm:$0xff] }
 0x307   : > { %v1614_v28 = vsel %vm6909_vm10, %v1589_v39, %v7522_v38  ;;  %v1712_v29 = vsel %vm1711_vm14, %v1687_v50, %v7523_v55  ;;  %v7526_v39 = vld [vmem:[#allocation230_spill] sm:$0xff]  ;;  %v7527_v50 = vld [vmem:[#allocation231_spill] sm:$0xff]  ;;  %vm6910_vm10 = vcmask 523264  }
 0x308   : > { %v1343_v16 = vpop.permute.xlu1 %1342  ;;  %v1415_v49 = vpop.permute.xlu0 %1414  ;;  %v1639_v23 = vsel %vm1636_vm11, %v1614_v28, %v7525_v9  ;;  %v1737_v6 = vsel %vm1736_vm2, %v1712_v29, %v5240_v5  ;;  %v2222_v33 = vsel %vm1636_vm11, %v2198_v14, %v7526_v39  ;;  %v1663_v5 = vsel %vm1661_vm12, %v1638_v35, %v7527_v50  ;;  %v7530_v28 = vld [vmem:[#allocation258_spill] sm:$0xff]  ;;  %v7531_v63 = vld [vmem:[#allocation107_spill] sm:$0xff]  ;;  %v7532_v9 = vld [vmem:[#allocation253_spill] sm:$0xff] }
 0x309   : > { %v1762_v62 = vsel %vm1761_vm4, %v1737_v6, %v5692_v46  ;;  %v1688_v14 = vsel %vm1686_vm13, %v1663_v5, %v7529_v27  ;;  %v2246_v35 = vsel %vm1661_vm12, %v2222_v33, %v7391_v15  ;;  %v7533_v6 = vld [vmem:[#allocation71_spill] sm:$0xff]  ;;  %v7534_v39 = vld [vmem:[#allocation80_spill] sm:$0xff] }
 0x30a   : > { %1428 = vrot.lane.b32.xlu1 %v5639_v0, %s3151_s22  ;;  %1424 = vrot.lane.b32.xlu0 %v3112_v1, %s3151_s22  ;;  %v1664_v0 = vsel %vm1661_vm12, %v1639_v23, %v7528_v32  ;;  %v1787_v51 = vsel %vm1786_vm15, %v1762_v62, %v5708_v30  ;;  %v3113_v30 = vld [vmem:[%s3188_s17 + $0xb0] sm:$0xff]  ;;  %v5831_v23 = vsel %vm1661_vm12, %v2223_v25, %v7532_v9  ;;  %v7535_v62 = vld [vmem:[#allocation192_spill] sm:$0xff]  ;;  %v7536_v5 = vld [vmem:[#allocation215_spill] sm:$0xff] }
 0x30b   : > { %v1689_v46 = vsel %vm1686_vm13, %v1664_v0, %v7530_v28  ;;  %v1812_v55 = vsel %vm6912_vm3, %v1787_v51, %v5718_v10  ;;  %v1713_v1 = vsel %vm1711_vm14, %v1688_v14, %v7533_v6  ;;  %v5843_v0 = vld [vmem:[%s3188_s17 + $0xc8] sm:$0xff]  ;;  %v3115_v25 = vld [vmem:[%s3188_s17 + $0xc0] sm:$0xff]  ;;  %v2302_v28 = vrot.slane %v2246_v35, 1 }
 0x30c   : > { %v2315_v38 = vpop.permute.xlu1 %2314  ;;  %v1345_v58 = vpop.permute.xlu0 %1344  ;;  %v1837_v29 = vsel %vm6911_vm1, %v1812_v55, %v1415_v49  ;;  %v1714_v10 = vsel %vm1711_vm14, %v1689_v46, %v7534_v39  ;;  %v1738_v50 = vsel %vm1736_vm2, %v1713_v1, %v7535_v62  ;;  %v2117_v15 = vsel %vm1486_vm5, %v5843_v0, %v5327_v11 }
 0x30d   : > { %v2387_v49 = vsel %vm6910_vm10, %v1837_v29, %v2315_v38  ;;  %v1739_v32 = vsel %vm1736_vm2, %v1714_v10, %v7536_v5  ;;  %v2116_v33 = vsel %vm1486_vm5, %v3115_v25, %v5329_v8  ;;  %v1763_v38 = vsel %vm1761_vm4, %v1738_v50, %v5706_v13 }
 0x30e   : > { %1374 = vrot.lane.b32.xlu1 %v7531_v63, %s3150_s16  ;;  %1446 = vrot.lane.b32.xlu0 %v3113_v30, %s3151_s22  ;;  %v1764_v14 = vsel %vm1761_vm4, %v1739_v32, %v5720_v2  ;;  %v2303_v46 = vrot.slane %v5831_v23, 1  ;;  %v1788_v11 = vsel %vm1786_vm15, %v1763_v38, %v5756_v53  ;;  %v2435_v29 = vcombine.high %v2387_v49, %v2387_v49  ;;  %v7538_v63 = vld [vmem:[#allocation114_spill] sm:$0xff]  ;;  %v7542_v32 = vld [vmem:[#allocation5_spill] sm:$0xff] }
 0x30f   : > { %v1789_v55 = vsel %vm1786_vm15, %v1764_v14, %v5754_v26  ;;  %v7537_v8 = vrot.slane %v5498_v40, 1  ;;  %v2123_v2 = vsel %vm6916_vm6, %v2117_v15, %v5349_v21  ;;  %v2122_v13 = vsel %vm6916_vm6, %v2116_v33, %v5351_v12 }
 0x310   : > { %v1419_v51 = vpop.permute.xlu1 %1418  ;;  %v1417_v27 = vpop.permute.xlu0 %1416  ;;  %v1813_v30 = vsel %vm6912_vm3, %v1788_v11, %v1343_v16  ;;  %v1814_v26 = vsel %vm6912_vm3, %v1789_v55, %v1345_v58  ;;  %v2129_v53 = vsel %vm6915_vm7, %v2123_v2, %v5391_v20  ;;  %v2128_v40 = vsel %vm6915_vm7, %v2122_v13, %v5393_v54  ;;  %v7547_v55 = vld [vmem:[#allocation4_spill] sm:$0xff]  ;;  %v7550_v13 = vld [vmem:[#allocation27_spill] sm:$0xff] }
 0x311   : > { %v1839_v35 = vsel %vm6911_vm1, %v1814_v26, %v1419_v51  ;;  %v1838_v9 = vsel %vm6911_vm1, %v1813_v30, %v1417_v27  ;;  %v2153_v21 = vsel %vm1561_vm8, %v2129_v53, %v5408_v44  ;;  %v2304_v58 = vsel %vm6914_vm0, %v2302_v28, %v2303_v46  ;;  %v7551_v30 = vld [vmem:[#allocation24_spill] sm:$0xff]  ;;  %v3117_v26 = vld [vmem:[%s3188_s17 + $0x18] sm:$0xff]  ;;  %v7552_v53 = vld [vmem:[#allocation47_spill] sm:$0xff] }
 0x312   : > { %2324 = vrot.lane.b32.xlu1 %v7537_v8, %s3152_s23  ;;  %1376 = vrot.lane.b32.xlu0 %v7538_v63, %s3150_s16  ;;  %v2152_v20 = vsel %vm1561_vm8, %v2128_v40, %v5410_v4  ;;  %v2447_v54 = vcombine.low %v2387_v49, %v2435_v29  ;;  %v7539_v39 = vrot.slane %v5704_v24, 1  ;;  %v2177_v44 = vsel %vm1586_vm9, %v2153_v21, %v5421_v31  ;;  %v7548_v8 = vld [vmem:[#allocation49_spill] sm:$0xff] }
 0x313   : > { %v2176_v10 = vsel %vm1586_vm9, %v2152_v20, %v5423_v59  ;;  %vm6913_vm3 = vcmask 818176   ;;  %v1490_v40 = vsel %vm1486_vm5, %v3117_v26, %v7552_v53  ;;  %v7554_v21 = vld [vmem:[#allocation73_spill] sm:$0xff]  ;;  %v7555_v20 = vld [vmem:[#allocation56_spill] sm:$0xff] }
 0x314   : > { %v2319_v23 = vpop.permute.xlu1 %2318  ;;  %v2317_v6 = vpop.permute.xlu0 %2316  ;;  %v7565_v26 = vld [vmem:[#allocation173_spill] sm:$0xff]  ;;  %v7566_v53 = vld [vmem:[#allocation144_spill] sm:$0xff] }
 0x315   : > { %v5880_v12 = vsel %vm6910_vm10, %v1839_v35, %v2319_v23  ;;  %v2388_v16 = vsel %vm6910_vm10, %v1838_v9, %v2317_v6  ;;  %vm7540_vm10 = vcmask 195584   ;;  %v5965_v35 = vld [vmem:[%s3188_s17 + $0x78] sm:$0xff]  ;;  %v7553_v9 = vld [vmem:[#allocation72_spill] sm:$0xff]  ;;  %v5971_v6 = vld [vmem:[%s3188_s17 + $0x70] sm:$0xff] }
 0x316   : > { %v2448_v1 = vcombine.low %v2388_v16, %v5880_v12  ;;  %2346 = vrot.lane.b32.xlu1 %v2304_v58, %s3152_s23  ;;  %2328 = vrot.lane.b32.xlu0 %v7539_v39, %s3152_s23  ;;  %v2201_v62 = vsel %vm7540_vm10, %v2177_v44, %v5430_v48  ;;  %vm7541_vm1 = vmmov %vm7540_vm10  ;;  %vm7544_vm10 = vmmov 0   ;;  %v1502_v23 = vsel %vm1486_vm5, %v5965_v35, %v7553_v9  ;;  %v3120_v58 = vld [vmem:[%s3188_s17 + $0x20] sm:$0xff]  ;;  %v7557_v44 = vld [vmem:[#allocation116_spill] sm:$0xff] }
 0x317   : > { %v2200_v4 = vsel %vm7541_vm1, %v2176_v10, %v5432_v34  ;;  %v2225_v24 = vsel %vm1636_vm11, %v2201_v62, %v5446_v19  ;;  %v3116_v34 = vld [vmem:[%s3188_s17 + $0xb8] sm:$0xff]  ;;  %v1501_v16 = vsel %vm1486_vm5, %v5971_v6, %v7554_v21  ;;  %v1527_v10 = vsel %vm6916_vm6, %v1502_v23, %v7557_v44  ;;  %v7558_v62 = vld [vmem:[#allocation117_spill] sm:$0xff]  ;;  %v7568_v21 = vld [vmem:[#allocation151_spill] sm:$0xff] }
 0x318   : > { %v2483_v49 = vpack.c.bf16 %v2448_v1, %v2447_v54  ;;  %v5899_v50 = vpop.permute.xlu1 %1143  ;;  %v5901_v5 = vpop.permute.xlu0 %1198  ;;  %v2224_v31 = vsel %vm1636_vm11, %v2200_v4, %v5448_v47  ;;  %v5909_v59 = vsel %vm1661_vm12, %v2225_v24, %v5486_v57  ;;  %v7543_v47 = vmov 0.0   ;;  %v7556_v1 = vld [vmem:[#allocation96_spill] sm:$0xff]  ;;  %v7567_v9 = vld [vmem:[#allocation146_spill] sm:$0xff] }
 0x319   : > { %v2248_v48 = vsel %vm1661_vm12, %v2224_v31, %v5488_v52  ;;  %v2306_v57 = vrot.slane %v5909_v59, 1  ;;  %v7545_v52 = vld [vmem:[#allocation25_spill] sm:$0xff]  ;;  %v1491_v54 = vsel %vm1486_vm5, %v3120_v58, %v7555_v20  ;;  %v1515_v39 = vsel %vm6916_vm6, %v1490_v40, %v7556_v1 }
 0x31a   : > { %1448 = vrot.lane.b32.xlu1 %v3116_v34, %s3151_s22  ;;  %1131 = vrot.lane.b32.xlu0 %v7542_v32, %s3146_s28  ;;  %v2305_v33 = vrot.slane %v2248_v48, 1  ;;  %v1526_v4 = vsel %vm6916_vm6, %v1501_v16, %v7558_v62  ;;  %v7559_v31 = vld [vmem:[#allocation101_spill] sm:$0xff]  ;;  %v7560_v34 = vld [vmem:[#allocation128_spill] sm:$0xff]  ;;  %v1575_v16 = vsel %vm1561_vm8, %v5652_v42, %v7568_v21 }
 0x31b   : > { %2997 = vmatmul.mubr.msk.bf16.vlgmr.msra.gmra.mrb[0].mxu0 %vm6913_vm3, %v2483_v49  ;;  %v1516_v48 = vsel %vm6916_vm6, %v1491_v54, %v7559_v31  ;;  %v1540_v32 = vsel %vm6915_vm7, %v1515_v39, %v7560_v34  ;;  %v7571_v54 = vld [vmem:[#allocation167_spill] sm:$0xff]  ;;  %v7575_v34 = vld [vmem:[#allocation177_spill] sm:$0xff]  ;;  %vm7580_vm3 = vmmov %vm7541_vm1 }
 0x31c   : > { %v5918_v15 = vpop.permute.xlu1 %1196  ;;  %v5920_v19 = vpop.permute.xlu0 %1273  ;;  %3000 = vmatprep.mubr.msk.bf16.mxu0 %vm7544_vm10, %v7543_v47  ;;  %v2307_v38 = vsel %vm6914_vm0, %v2305_v33, %v2306_v57  ;;  %v7561_v33 = vld [vmem:[#allocation132_spill] sm:$0xff]  ;;  %v1565_v40 = vsel %vm1561_vm8, %v1540_v32, %v7566_v53  ;;  %vm7583_vm0 = vmmov %vm7541_vm1  ;;  %v7667_v59 = vld [vmem:[#allocation57_spill] sm:$0xff] }
 0x31d   : > { %vm7587_vm6 = vmmov %vm7583_vm0 }
 0x31e   : > { %1206 = vrot.lane.b32.xlu1 %v7545_v52, %s3148_s8  ;;  %1450 = vrot.lane.b32.xlu0 %v3115_v25, %s3151_s22  ;;  %v7546_v25 = vld [vmem:[#allocation7_spill] sm:$0xff]  ;;  %v1552_v52 = vsel %vm6915_vm7, %v1527_v10, %v7561_v33  ;;  %v7572_v10 = vld [vmem:[#allocation165_spill] sm:$0xff]  ;;  %v1600_v33 = vsel %vm1586_vm9, %v1575_v16, %v7478_v61 }
 0x31f   : > { %v1590_v62 = vsel %vm1586_vm9, %v1565_v40, %v7572_v10  ;;  %v1625_v61 = vsel %vm7580_vm3, %v1600_v33, %v7482_v37  ;;  %v7582_v40 = vld [vmem:[#allocation197_spill] sm:$0xff]  ;;  %vm7588_vm3 = vmmov %vm7583_vm0 }
 0x320   : > { %v5928_v51 = vpop.permute.xlu1 %1348  ;;  %v5930_v27 = vpop.permute.xlu0 %1218  ;;  %v1650_v10 = vsel %vm1636_vm11, %v1625_v61, %v7487_v43 }
 0x322   : > { %2350 = vrot.lane.b32.xlu1 %v2307_v38, %s3152_s23  ;;  %2348 = vrot.lane.b32.xlu0 %v2303_v46, %s3152_s23  ;;  %v7549_v46 = vld [vmem:[#allocation150_spill] sm:$0xff]  ;;  %v7562_v38 = vld [vmem:[#allocation133_spill] sm:$0xff] }
 0x324   : > { %v5937_v14 = vpop.permute.xlu1 %1145  ;;  %v5939_v28 = vpop.permute.xlu0 %1141 }
 0x326   : > { %1135 = vrot.lane.b32.xlu1 %v7546_v25, %s3146_s28  ;;  %1133 = vrot.lane.b32.xlu0 %v7547_v55, %s3146_s28  ;;  %v1551_v25 = vsel %vm6915_vm7, %v1526_v4, %v7562_v38  ;;  %v7563_v55 = vld [vmem:[#allocation130_spill] sm:$0xff]  ;;  %v7573_v4 = vld [vmem:[#allocation188_spill] sm:$0xff] }
 0x327   : > { %v7576_v38 = vld [vmem:[#allocation210_spill] sm:$0xff] }
 0x328   : > { %v5945_v11 = vpop.permute.xlu1 %1293  ;;  %v5947_v29 = vpop.permute.xlu0 %1271 }
 0x32a   : > { %1281 = vrot.lane.b32.xlu1 %v7548_v8, %s3149_s11  ;;  %1155 = vrot.lane.b32.xlu0 %v7549_v46, %s3146_s28  ;;  %v1541_v8 = vsel %vm6915_vm7, %v1516_v48, %v7563_v55  ;;  %v2143_v46 = vsel %vm1561_vm8, %v1552_v52, %v5474_v60  ;;  %v7569_v60 = vld [vmem:[#allocation153_spill] sm:$0xff]  ;;  %v7574_v48 = vld [vmem:[#allocation176_spill] sm:$0xff]  ;;  %v7577_v55 = vld [vmem:[#allocation46_spill] sm:$0xff] }
 0x32b   : > { %v1566_v23 = vsel %vm1561_vm8, %v1541_v8, %v7567_v9  ;;  %v1577_v58 = vsel %vm1561_vm8, %v1552_v52, %v7569_v60  ;;  %v2167_v42 = vsel %vm1586_vm9, %v2143_v46, %v7574_v48  ;;  %v7578_v8 = vld [vmem:[#allocation14_spill] sm:$0xff]  ;;  %vm7585_vm7 = vmmov %vm7583_vm0 }
 0x32c   : > { %v5953_v63 = vpop.permute.xlu1 %1216  ;;  %v5955_v2 = vpop.permute.xlu0 %1422  ;;  %v1591_v1 = vsel %vm1586_vm9, %v1566_v23, %v7571_v54  ;;  %v1602_v52 = vsel %vm1586_vm9, %v1577_v58, %v7574_v48  ;;  %v7584_v23 = vld [vmem:[#allocation259_spill] sm:$0xff]  ;;  %v2191_v16 = vsel %vm7585_vm7, %v2167_v42, %v7582_v40  ;;  %v7586_v60 = vld [vmem:[#allocation198_spill] sm:$0xff]  ;;  %v7589_v54 = vld [vmem:[#allocation208_spill] sm:$0xff]  ;;  %vm7608_vm7 = vcmask 523264  }
 0x32d   : > { %v1616_v31 = vsel %vm7541_vm1, %v1591_v1, %v7573_v4  ;;  %v1627_v9 = vsel %vm7583_vm0, %v1602_v52, %v7582_v40  ;;  %v7592_v42 = vld [vmem:[#allocation221_spill] sm:$0xff]  ;;  %v7594_v52 = vld [vmem:[#allocation194_spill] sm:$0xff]  ;;  %vm7602_vm0 = vcmask 457728  }
 0x32e   : > { %1210 = vrot.lane.b32.xlu1 %v7550_v13, %s3148_s8  ;;  %1208 = vrot.lane.b32.xlu0 %v7551_v30, %s3148_s8  ;;  %v2142_v13 = vsel %vm1561_vm8, %v1551_v25, %v5476_v17  ;;  %v7564_v30 = vld [vmem:[#allocation94_spill] sm:$0xff] }
 0x32f   : > { %v7570_v17 = vld [vmem:[#allocation154_spill] sm:$0xff]  ;;  %v2166_v32 = vsel %vm1586_vm9, %v2142_v13, %v7575_v34 }
 0x330   : > { %v5985_v49 = vpop.permute.xlu1 %1346  ;;  %v5987_v24 = vpop.permute.xlu0 %1220  ;;  %v1576_v20 = vsel %vm1561_vm8, %v1551_v25, %v7570_v17  ;;  %v1641_v25 = vsel %vm1636_vm11, %v1616_v31, %v7576_v38  ;;  %v2190_v58 = vsel %vm7587_vm6, %v2166_v32, %v7586_v60  ;;  %v7591_v31 = vld [vmem:[#allocation220_spill] sm:$0xff]  ;;  %v7593_v32 = vld [vmem:[#allocation241_spill] sm:$0xff]  ;;  %vm7603_vm6 = vcmask 490496  }
 0x331   : > { %v1601_v46 = vsel %vm1586_vm9, %v1576_v20, %v7575_v34  ;;  %v1652_v48 = vsel %vm1636_vm11, %v1627_v9, %v7591_v31  ;;  %v7595_v38 = vld [vmem:[#allocation53_spill] sm:$0xff] }
 0x332   : > { %1356 = vrot.lane.b32.xlu1 %v7564_v30, %s3150_s16  ;;  %1230 = vrot.lane.b32.xlu0 %v7565_v26, %s3148_s8  ;;  %v7579_v30 = vld [vmem:[#allocation186_spill] sm:$0xff]  ;;  %v7581_v26 = vld [vmem:[#allocation235_spill] sm:$0xff]  ;;  %v1626_v37 = vsel %vm7588_vm3, %v1601_v46, %v7586_v60  ;;  %vm7619_vm3 = vmmov %vm7602_vm0 }
 0x333   : > { %v1615_v13 = vsel %vm7541_vm1, %v1590_v62, %v7579_v30  ;;  %v1666_v53 = vsel %vm1661_vm12, %v1641_v25, %v7581_v26  ;;  %v7590_v62 = vld [vmem:[#allocation85_spill] sm:$0xff]  ;;  %v1651_v34 = vsel %vm1636_vm11, %v1626_v37, %v7592_v42  ;;  %v1675_v30 = vsel %vm1661_vm12, %v1650_v10, %v7493_v36  ;;  %v7598_v26 = vld [vmem:[#allocation148_spill] sm:$0xff] }
 0x334   : > { %v2323_v39 = vpop.permute.xlu1 %2322  ;;  %v6020_v44 = vpop.permute.xlu0 %1368  ;;  %v1691_v21 = vsel %vm1686_vm13, %v1666_v53, %v7584_v23  ;;  %v1640_v1 = vsel %vm1636_vm11, %v1615_v13, %v7589_v54  ;;  %v7596_v25 = vld [vmem:[#allocation233_spill] sm:$0xff]  ;;  %v2144_v53 = vsel %vm1561_vm8, %v7598_v26, %v5519_v18 }
 0x335   : > { %v1716_v4 = vsel %vm1711_vm14, %v1691_v21, %v7590_v62  ;;  %v1665_v43 = vsel %vm1661_vm12, %v1640_v1, %v7596_v25  ;;  %v7597_v13 = vld [vmem:[#allocation245_spill] sm:$0xff]  ;;  %v7599_v21 = vld [vmem:[#allocation246_spill] sm:$0xff] }
 0x336   : > { %1283 = vrot.lane.b32.xlu1 %v7577_v55, %s3149_s11  ;;  %1153 = vrot.lane.b32.xlu0 %v7578_v8, %s3146_s28  ;;  %v1741_v33 = vsel %vm1736_vm2, %v1716_v4, %v7593_v32  ;;  %v2215_v55 = vsel %vm1636_vm11, %v2191_v16, %v7591_v31  ;;  %v2214_v8 = vsel %vm1636_vm11, %v2190_v58, %v7592_v42  ;;  %v7601_v36 = vld [vmem:[#allocation113_spill] sm:$0xff]  ;;  %v7610_v42 = vld [vmem:[#allocation263_spill] sm:$0xff] }
 0x337   : > { %v1766_v46 = vsel %vm1761_vm4, %v1741_v33, %v5901_v5  ;;  %v1677_v61 = vsel %vm1661_vm12, %v1652_v48, %v7597_v13  ;;  %v1676_v16 = vsel %vm1661_vm12, %v1651_v34, %v7599_v21  ;;  %v7600_v5 = vld [vmem:[#allocation257_spill] sm:$0xff]  ;;  %v2145_v58 = vsel %vm1561_vm8, %v7601_v36, %v5517_v7  ;;  %v7605_v7 = vld [vmem:[#allocation260_spill] sm:$0xff]  ;;  %v7609_v48 = vld [vmem:[#allocation262_spill] sm:$0xff] }
 0x338   : > { %v6056_v17 = vpop.permute.xlu1 %1295  ;;  %v6058_v20 = vpop.permute.xlu0 %1291  ;;  %v1791_v40 = vsel %vm1786_vm15, %v1766_v46, %v5920_v19  ;;  %v1690_v60 = vsel %vm1686_vm13, %v1665_v43, %v7600_v5  ;;  %v7604_v19 = vld [vmem:[#allocation34_spill] sm:$0xff]  ;;  %v2238_v54 = vsel %vm1661_vm12, %v2214_v8, %v7599_v21  ;;  %v6116_v1 = vsel %vm1661_vm12, %v2215_v55, %v7597_v13  ;;  %v7611_v32 = vld [vmem:[#allocation193_spill] sm:$0xff]  ;;  %v7613_v55 = vld [vmem:[#allocation211_spill] sm:$0xff] }
 0x339   : > { %v1816_v37 = vsel %vm7602_vm0, %v1791_v40, %v5928_v51  ;;  %v1700_v10 = vsel %vm1686_vm13, %v1675_v30, %v7605_v7  ;;  %v7606_v51 = vld [vmem:[#allocation77_spill] sm:$0xff]  ;;  %v1701_v34 = vsel %vm1686_vm13, %v1676_v16, %v7610_v42  ;;  %v2290_v46 = vrot.slane %v2238_v54, 1  ;;  %v7614_v13 = vld [vmem:[#allocation199_spill] sm:$0xff]  ;;  %v7616_v40 = vld [vmem:[#allocation98_spill] sm:$0xff] }
 0x33a   : > { %1305 = vrot.lane.b32.xlu1 %v7594_v52, %s3149_s11  ;;  %1285 = vrot.lane.b32.xlu0 %v7595_v38, %s3149_s11  ;;  %v1841_v18 = vsel %vm7603_vm6, %v1816_v37, %v5955_v2  ;;  %v1715_v62 = vsel %vm1711_vm14, %v1690_v60, %v7606_v51  ;;  %v7607_v2 = vld [vmem:[#allocation37_spill] sm:$0xff]  ;;  %v7612_v52 = vld [vmem:[#allocation36_spill] sm:$0xff]  ;;  %v2291_v30 = vrot.slane %v6116_v1, 1  ;;  %v7617_v21 = vld [vmem:[#allocation91_spill] sm:$0xff]  ;;  %vm7620_vm0 = vcmask 64512  }
 0x33b   : > { %v2168_v4 = vsel %vm1586_vm9, %v2144_v53, %v7607_v2  ;;  %v2391_v31 = vsel %vm7608_vm7, %v1841_v18, %v2323_v39  ;;  %v1740_v33 = vsel %vm1736_vm2, %v1715_v62, %v7611_v32  ;;  %v2169_v38 = vsel %vm1586_vm9, %v2145_v58, %v7612_v52  ;;  %v6151_v16 = vld [vmem:[%s3188_s17 + $0xd8] sm:$0xff]  ;;  %v6157_v5 = vld [vmem:[%s3188_s17 + $0xd0] sm:$0xff]  ;;  %vm7621_vm6 = vmmov %vm7620_vm0 }
 0x33c   : > { %v6095_v9 = vpop.permute.xlu1 %1442  ;;  %v1421_v23 = vpop.permute.xlu0 %1420  ;;  %v1725_v39 = vsel %vm1711_vm14, %v1700_v10, %v7613_v55  ;;  %v1765_v8 = vsel %vm1761_vm4, %v1740_v33, %v5918_v15  ;;  %v2437_v53 = vcombine.high %v2391_v31, %v2391_v31  ;;  %v2119_v15 = vsel %vm1486_vm5, %v6151_v16, %v5438_v56  ;;  %v7624_v10 = vld [vmem:[#allocation223_spill] sm:$0xff]  ;;  %v7631_v32 = vld [vmem:[#allocation118_spill] sm:$0xff]  ;;  %v7634_v55 = vld [vmem:[#allocation120_spill] sm:$0xff] }
 0x33d   : > { %v1790_v26 = vsel %vm1786_vm15, %v1765_v8, %v5947_v29  ;;  %v2118_v60 = vsel %vm1486_vm5, %v6157_v5, %v5440_v3  ;;  %v7618_v29 = vld [vmem:[#allocation74_spill] sm:$0xff]  ;;  %v2125_v37 = vsel %vm7620_vm0, %v2119_v15, %v5460_v22  ;;  %v2436_v56 = vcombine.high %v5880_v12, %v5880_v12  ;;  %v7633_v52 = vld [vmem:[#allocation119_spill] sm:$0xff] }
 0x33e   : > { %1228 = vrot.lane.b32.xlu1 %v7604_v19, %s3148_s8  ;;  %1430 = vrot.lane.b32.xlu0 %v5971_v6, %s3151_s22  ;;  %v1702_v6 = vsel %vm1686_vm13, %v1677_v61, %v7609_v48  ;;  %vm7615_vm13 = vmmov %vm7541_vm1  ;;  %v2193_v36 = vsel %vm7541_vm1, %v2169_v38, %v7618_v29  ;;  %v1815_v58 = vsel %vm7619_vm3, %v1790_v26, %v5985_v49  ;;  %vm7622_vm7 = vcmask 490496   ;;  %v7630_v48 = vld [vmem:[#allocation190_spill] sm:$0xff]  ;;  %v7635_v26 = vld [vmem:[#allocation248_spill] sm:$0xff] }
 0x33f   : > { %v2192_v61 = vsel %vm7615_vm13, %v2168_v4, %v7614_v13  ;;  %v2124_v18 = vsel %vm7621_vm6, %v2118_v60, %v5462_v41  ;;  %v1840_v19 = vsel %vm7622_vm7, %v1815_v58, %v1421_v23  ;;  %vm7623_vm13 = vcmask 97280   ;;  %v7627_v41 = vld [vmem:[#allocation222_spill] sm:$0xff]  ;;  %v7628_v23 = vld [vmem:[#allocation217_spill] sm:$0xff]  ;;  %v7638_v60 = vld [vmem:[#allocation247_spill] sm:$0xff] }
 0x340   : > { %v6133_v25 = vpop.permute.xlu1 %1370  ;;  %v6135_v43 = vpop.permute.xlu0 %1366  ;;  %v2131_v3 = vsel %vm7623_vm13, %v2125_v37, %v5500_v45  ;;  %v2216_v51 = vsel %vm1636_vm11, %v2192_v61, %v7624_v10  ;;  %vm7625_vm1 = vcmask 523264   ;;  %vm7626_vm3 = vcmask 1046528   ;;  %v7629_v45 = vld [vmem:[#allocation189_spill] sm:$0xff]  ;;  %vm7632_vm0 = vmmov %vm7623_vm13 }
 0x341   : > { %v2292_v22 = vsel %vm7626_vm3, %v2290_v46, %v2291_v30  ;;  %v2217_v62 = vsel %vm1636_vm11, %v2193_v36, %v7627_v41  ;;  %v2450_v12 = vcombine.low %v2391_v31, %v2437_v53  ;;  %v1727_v4 = vsel %vm1711_vm14, %v1702_v6, %v7629_v45  ;;  %v7636_v53 = vld [vmem:[#allocation121_spill] sm:$0xff] }
 0x342   : > { %1360 = vrot.lane.b32.xlu1 %v7616_v40, %s3150_s16  ;;  %1358 = vrot.lane.b32.xlu0 %v7617_v21, %s3150_s16  ;;  %v1726_v42 = vsel %vm1711_vm14, %v1701_v34, %v7630_v48  ;;  %v2130_v33 = vsel %vm7632_vm0, %v2124_v18, %v7631_v32  ;;  %v2155_v38 = vsel %vm1561_vm8, %v2131_v3, %v7633_v52  ;;  %v7637_v40 = vld [vmem:[#allocation122_spill] sm:$0xff]  ;;  %vm7640_vm14 = vcmask 195584  }
 0x343   : > { %v2154_v31 = vsel %vm1561_vm8, %v2130_v33, %v7634_v55  ;;  %v1751_v8 = vsel %vm1736_vm2, %v1726_v42, %v5899_v50  ;;  %v2240_v6 = vsel %vm1661_vm12, %v2216_v51, %v7635_v26  ;;  %v2179_v34 = vsel %vm1586_vm9, %v2155_v38, %v7636_v53  ;;  %v7639_v50 = vld [vmem:[#allocation123_spill] sm:$0xff]  ;;  %v7641_v18 = vld [vmem:[#allocation66_spill] sm:$0xff]  ;;  %vm7643_vm6 = vmmov %vm7640_vm14 }
 0x344   : > { %v2343_v54 = vpop.permute.xlu1 %2342  ;;  %v2321_v7 = vpop.permute.xlu0 %2320  ;;  %v2178_v21 = vsel %vm1586_vm9, %v2154_v31, %v7637_v40  ;;  %v1776_v15 = vsel %vm1761_vm4, %v1751_v8, %v5930_v27  ;;  %v6208_v29 = vsel %vm1661_vm12, %v2217_v62, %v7638_v60  ;;  %v2203_v36 = vsel %vm7640_vm14, %v2179_v34, %v7639_v50  ;;  %v7642_v27 = vld [vmem:[#allocation63_spill] sm:$0xff]  ;;  %v7662_v26 = vld [vmem:[#allocation9_spill] sm:$0xff] }
 0x345   : > { %v2390_v49 = vsel %vm7625_vm1, %v1840_v19, %v2321_v7  ;;  %v1750_v58 = vsel %vm1736_vm2, %v1725_v39, %v5939_v28  ;;  %v1801_v37 = vsel %vm1786_vm15, %v1776_v15, %v5945_v11  ;;  %v7644_v19 = vld [vmem:[#allocation124_spill] sm:$0xff]  ;;  %vm7645_vm7 = vcmask 457728   ;;  %v7652_v62 = vld [vmem:[#allocation67_spill] sm:$0xff]  ;;  %v7663_v34 = vld [vmem:[#allocation29_spill] sm:$0xff] }
 0x346   : > { %v2449_v2 = vcombine.low %v2436_v56, %v2390_v49  ;;  %2330 = vrot.lane.b32.xlu1 %v2292_v22, %s3152_s23  ;;  %1380 = vrot.lane.b32.xlu0 %v7628_v23, %s3150_s16  ;;  %v2202_v56 = vsel %vm7643_vm6, %v2178_v21, %v7642_v27  ;;  %v2227_v7 = vsel %vm1636_vm11, %v2203_v36, %v7644_v19  ;;  %vm7646_vm13 = vcmask 818176   ;;  %v7647_v11 = vld [vmem:[#allocation64_spill] sm:$0xff]  ;;  %vm7650_vm3 = vmmov %vm7645_vm7  ;;  %v3123_v23 = vld [vmem:[%s3188_s17 + $0x80] sm:$0xff] }
 0x347   : > { %v1775_v3 = vsel %vm1761_vm4, %v1750_v58, %v5953_v63  ;;  %v1826_v28 = vsel %vm7645_vm7, %v1801_v37, %v6020_v44  ;;  %v1752_v39 = vsel %vm1736_vm2, %v1727_v4, %v5937_v14  ;;  %vm7648_vm1 = vcmask 490496   ;;  %v7649_v44 = vld [vmem:[#allocation125_spill] sm:$0xff]  ;;  %vm7654_vm6 = vmmov %vm7650_vm3  ;;  %v7665_v15 = vld [vmem:[#allocation6_spill] sm:$0xff] }
 0x348   : > { %v2484_v46 = vpack.c.bf16 %v2450_v12, %v2449_v2  ;;  %v1445_v13 = vpop.permute.xlu1 %1444  ;;  %v1441_v61 = vpop.permute.xlu0 %1440  ;;  %v1800_v10 = vsel %vm1786_vm15, %v1775_v3, %v6058_v20  ;;  %v1851_v51 = vsel %vm7648_vm1, %v1826_v28, %v6095_v9  ;;  %v6243_v22 = vsel %vm1661_vm12, %v2227_v7, %v7649_v44  ;;  %vm7653_vm14 = vmmov %vm7648_vm1  ;;  %v7666_v36 = vld [vmem:[#allocation26_spill] sm:$0xff]  ;;  %v7668_v37 = vld [vmem:[#allocation139_spill] sm:$0xff] }
 0x349   : > { %v1777_v41 = vsel %vm1761_vm4, %v1752_v39, %v5987_v24  ;;  %v1825_v14 = vsel %vm7650_vm3, %v1800_v10, %v6135_v43  ;;  %vm7651_vm0 = vcmask 523264   ;;  %v2309_v42 = vrot.slane %v6243_v22, 1  ;;  %v7671_v19 = vld [vmem:[#allocation68_spill] sm:$0xff]  ;;  %v7672_v28 = vld [vmem:[#allocation179_spill] sm:$0xff]  ;;  %v7675_v10 = vld [vmem:[#allocation201_spill] sm:$0xff] }
 0x34a   : > { %1432 = vrot.lane.b32.xlu1 %v5965_v35, %s3151_s22  ;;  %1303 = vrot.lane.b32.xlu0 %v7641_v18, %s3149_s11  ;;  %v2226_v35 = vsel %vm1636_vm11, %v2202_v56, %v7647_v11  ;;  %v2401_v20 = vsel %vm7651_vm0, %v1851_v51, %v2343_v54  ;;  %v1802_v12 = vsel %vm1786_vm15, %v1777_v41, %v6056_v17  ;;  %vm7655_vm7 = vmmov %vm7651_vm0  ;;  %v2293_v17 = vrot.slane %v2240_v6, 1  ;;  %v7669_v18 = vld [vmem:[#allocation236_spill] sm:$0xff]  ;;  %v7670_v56 = vld [vmem:[#allocation102_spill] sm:$0xff] }
 0x34b   : > { %3001 = vmatmul.mubr.msk.bf16.gmra.mrb[4].mxu0 %vm7646_vm13, %v2484_v46  ;;  %v2250_v9 = vsel %vm1661_vm12, %v2226_v35, %v7652_v62  ;;  %v1850_v2 = vsel %vm7653_vm14, %v1825_v14, %v1441_v61  ;;  %v1827_v24 = vsel %vm7654_vm6, %v1802_v12, %v6133_v25  ;;  %v2442_v54 = vcombine.high %v2401_v20, %v2401_v20  ;;  %vm7656_vm13 = vmmov %vm7648_vm1  ;;  %v7658_v25 = vld [vmem:[#allocation111_spill] sm:$0xff]  ;;  %v7673_v35 = vld [vmem:[#allocation266_spill] sm:$0xff] }
 0x34c   : > { %v2341_v49 = vpop.permute.xlu1 %2340  ;;  %v6237_v63 = vpop.permute.xlu0 %1202  ;;  %3004 = vmatprep.mubr.msk.bf16.mxu0 %vm7544_vm10, %v7543_v47  ;;  %v1852_v45 = vsel %vm7656_vm13, %v1827_v24, %v1445_v13  ;;  %v2308_v32 = vrot.slane %v2250_v9, 1  ;;  %vm7657_vm1 = vmmov %vm7651_vm0  ;;  %v2294_v52 = vrot.slane %v6208_v29, 1  ;;  %vm7659_vm3 = vcmask 1046528   ;;  %v7674_v39 = vld [vmem:[#allocation147_spill] sm:$0xff]  ;;  %v7677_v41 = vld [vmem:[#allocation89_spill] sm:$0xff] }
 0x34d   : > { %v2400_v43 = vsel %vm7655_vm7, %v1850_v2, %v2341_v49  ;;  %vm7660_vm0 = vmmov %vm7659_vm3  ;;  %vm7661_vm14 = vcmask 818176   ;;  %v2146_v27 = vsel %vm1561_vm8, %v7669_v18, %v7668_v37  ;;  %vm7676_vm6 = vcmask 195584   ;;  %v7678_v14 = vld [vmem:[#allocation50_spill] sm:$0xff]  ;;  %v7691_v37 = vld [vmem:[#allocation261_spill] sm:$0xff] }
 0x34e   : > { %1454 = vrot.lane.b32.xlu1 %v6157_v5, %s3151_s22  ;;  %1434 = vrot.lane.b32.xlu0 %v3123_v23, %s3151_s22  ;;  %v2457_v38 = vcombine.low %v2400_v43, %v2401_v20  ;;  %v2310_v13 = vsel %vm7659_vm3, %v2308_v32, %v2309_v42  ;;  %v2295_v61 = vsel %vm7660_vm0, %v2293_v17, %v2294_v52  ;;  %v7679_v20 = vld [vmem:[#allocation226_spill] sm:$0xff]  ;;  %v3124_v23 = vld [vmem:[%s3188_s17 + $0x90] sm:$0xff]  ;;  %vm7684_vm7 = vcmask 1043456   ;;  %vm7688_vm13 = vmmov %vm7660_vm0 }
 0x34f   : > { %v2170_v11 = vsel %vm1586_vm9, %v2146_v27, %v7672_v28  ;;  %v7680_v2 = vld [vmem:[#allocation170_spill] sm:$0xff]  ;;  %vm7693_vm3 = vcmask 97280   ;;  %v7695_v28 = vld [vmem:[#allocation88_spill] sm:$0xff] }
 0x350   : > { %v6263_v4 = vpop.permute.xlu1 %1129  ;;  %v2345_v48 = vpop.permute.xlu0 %2344  ;;  %v2194_v51 = vsel %vm7676_vm6, %v2170_v11, %v7675_v10  ;;  %v7681_v24 = vld [vmem:[#allocation250_spill] sm:$0xff] }
 0x351   : > { %v2402_v33 = vsel %vm7657_vm1, %v1852_v45, %v2345_v48  ;;  %v2218_v62 = vsel %vm1636_vm11, %v2194_v51, %v7679_v20  ;;  %v1338_v45 = vrot.slane %v6151_v16, 4  ;;  %vm7690_vm1 = vcmask 64512   ;;  %v7692_v27 = vld [vmem:[#allocation138_spill] sm:$0xff]  ;;  %v7698_v51 = vld [vmem:[#allocation136_spill] sm:$0xff] }
 0x352   : > { %v2458_v55 = vcombine.low %v2442_v54, %v2402_v33  ;;  %2332 = vrot.lane.b32.xlu1 %v2291_v30, %s3152_s23  ;;  %1378 = vrot.lane.b32.xlu0 %v7658_v25, %s3150_s16  ;;  %v2242_v43 = vsel %vm1661_vm12, %v2218_v62, %v7681_v24  ;;  %v1337_v54 = vrot.slane %v6157_v5, 4  ;;  %v7682_v33 = vld [vmem:[#allocation95_spill] sm:$0xff]  ;;  %vm7699_vm0 = vmmov %vm7690_vm1 }
 0x353   : > { %v2296_v32 = vrot.slane %v2242_v43, 1  ;;  %v7703_v43 = vld [vmem:[#allocation156_spill] sm:$0xff] }
 0x354   : > { %v2488_v31 = vpack.c.bf16 %v2458_v55, %v2457_v38  ;;  %v6273_v8 = vpop.permute.xlu1 %1277  ;;  %v6275_v46 = vpop.permute.xlu0 %1147  ;;  %v7683_v38 = vld [vmem:[#allocation51_spill] sm:$0xff]  ;;  %v1339_v55 = vsel %vm7684_vm7, %v1337_v54, %v1338_v45 }
 0x356   : > { %2354 = vrot.lane.b32.xlu1 %v2310_v13, %s3152_s23  ;;  %2334 = vrot.lane.b32.xlu0 %v2295_v61, %s3152_s23  ;;  %v7685_v13 = vld [vmem:[#allocation135_spill] sm:$0xff] }
 0x357   : > { %3017 = vmatmul.mubr.msk.bf16.vlgmr.msra.gmra.mrb[0].mxu1 %vm7661_vm14, %v2488_v31  ;;  %v3125_v31 = vld [vmem:[%s3188_s17 + $0xe0] sm:$0xff]  ;;  %vm7708_vm14 = vmmov %vm7676_vm6  ;;  %vm7710_vm6 = vcmask 457728  }
 0x358   : > { %v6286_v1 = vpop.permute.xlu1 %1204  ;;  %v6288_v30 = vpop.permute.xlu0 %1200  ;;  %3020 = vmatprep.mubr.msk.bf16.mxu1 %vm7544_vm10, %v7543_v47  ;;  %v2120_v61 = vsel %vm1486_vm5, %v3125_v31, %v7685_v13  ;;  %vm7713_vm7 = vmmov %vm7708_vm14 }
 0x35a   : > { %1452 = vrot.lane.b32.xlu1 %v5843_v0, %s3151_s22  ;;  %1139 = vrot.lane.b32.xlu0 %v7662_v26, %s3146_s28  ;;  %v7664_v0 = vld [vmem:[#allocation269_spill] sm:$0xff]  ;;  %v7686_v26 = vld [vmem:[#allocation134_spill] sm:$0xff] }
 0x35c   : > { %v6296_v6 = vpop.permute.xlu1 %1352  ;;  %v6298_v53 = vpop.permute.xlu0 %1222 }
 0x35e   : > { %2352 = vrot.lane.b32.xlu1 %v2306_v57, %s3152_s23  ;;  %1214 = vrot.lane.b32.xlu0 %v7663_v34, %s3148_s8  ;;  %v7687_v34 = vrot.slane %v7686_v26, 1  ;;  %v7705_v26 = vld [vmem:[#allocation84_spill] sm:$0xff] }
 0x360   : > { %v6305_v40 = vpop.permute.xlu1 %1151  ;;  %v6307_v21 = vpop.permute.xlu0 %1149 }
 0x362   : > { %1159 = vrot.lane.b32.xlu1 %v7664_v0, %s3146_s28  ;;  %1137 = vrot.lane.b32.xlu0 %v7665_v15, %s3146_s28  ;;  %v2298_v0 = vsel %vm7688_vm13, %v2296_v32, %v7687_v34  ;;  %v7689_v15 = vld [vmem:[#allocation137_spill] sm:$0xff]  ;;  %v7706_v34 = vld [vmem:[#allocation191_spill] sm:$0xff]  ;;  %vm7715_vm13 = vcmask 490496  }
 0x364   : > { %v6313_v60 = vpop.permute.xlu1 %1279  ;;  %v1276_v50 = vpop.permute.xlu0 %1275 }
 0x366   : > { %1212 = vrot.lane.b32.xlu1 %v7666_v36, %s3148_s8  ;;  %1289 = vrot.lane.b32.xlu0 %v7667_v59, %s3149_s11  ;;  %v2126_v36 = vsel %vm7690_vm1, %v2120_v61, %v7689_v15  ;;  %v6382_v59 = vld [vmem:[%s3188_s17 + $0xe8] sm:$0xff]  ;;  %v7709_v15 = vld [vmem:[#allocation158_spill] sm:$0xff]  ;;  %vm7716_vm1 = vmmov %vm7715_vm13 }
 0x367   : > { %v2121_v18 = vsel %vm1486_vm5, %v6382_v59, %v7691_v37  ;;  %vm7702_vm5 = vmmov %vm7693_vm3  ;;  %v7712_v37 = vld [vmem:[#allocation160_spill] sm:$0xff] }
 0x368   : > { %v6319_v57 = vpop.permute.xlu1 %1426  ;;  %v6321_v58 = vpop.permute.xlu0 %1297 }
 0x36a   : > { %1364 = vrot.lane.b32.xlu1 %v7670_v56, %s3150_s16  ;;  %1234 = vrot.lane.b32.xlu0 %v7671_v19, %s3148_s8  ;;  %v2132_v56 = vsel %vm7693_vm3, %v2126_v36, %v7692_v27  ;;  %v7694_v19 = vld [vmem:[#allocation216_spill] sm:$0xff] }
 0x36b   : > { %v1742_v11 = vsel %vm1736_vm2, %v7695_v28, %v7694_v19 }
 0x36c   : > { %v6330_v7 = vpop.permute.xlu1 %1226  ;;  %v6332_v3 = vpop.permute.xlu0 %1224 }
 0x36e   : > { %1161 = vrot.lane.b32.xlu1 %v7673_v35, %s3146_s28  ;;  %1157 = vrot.lane.b32.xlu0 %v7674_v39, %s3146_s28  ;;  %v7696_v35 = vld [vmem:[#allocation242_spill] sm:$0xff]  ;;  %v7697_v39 = vld [vmem:[#allocation104_spill] sm:$0xff]  ;;  %s6628_s28 = scalar_lea.vmem %s6686_s3, %s3046_s25 }
 0x36f   : > { %v1743_v10 = vsel %vm1736_vm2, %v7697_v39, %v7696_v35  ;;  %v7717_v35 = vld [vmem:[#allocation265_spill] sm:$0xff] }
 0x370   : > { %v6342_v49 = vpop.permute.xlu1 %1354  ;;  %v1351_v44 = vpop.permute.xlu0 %1350  ;;  %v1768_v32 = vsel %vm1761_vm4, %v1743_v10, %v6237_v63 }
 0x371   : > { %v1793_v13 = vsel %vm1786_vm15, %v1768_v32, %v6273_v8 }
 0x372   : > { %1309 = vrot.lane.b32.xlu1 %v7677_v41, %s3149_s11  ;;  %1287 = vrot.lane.b32.xlu0 %v7678_v14, %s3149_s11  ;;  %v2127_v41 = vsel %vm7699_vm0, %v2121_v18, %v7698_v51  ;;  %v7700_v14 = vld [vmem:[#allocation140_spill] sm:$0xff]  ;;  %v1818_v36 = vsel %vm7710_vm6, %v1793_v13, %v6296_v6  ;;  %vm7722_vm0 = vmmov %vm7710_vm6 }
 0x373   : > { %v2156_v20 = vsel %vm1561_vm8, %v2132_v56, %v7700_v14  ;;  %v7714_v18 = vld [vmem:[#allocation100_spill] sm:$0xff]  ;;  %v1843_v56 = vsel %vm7715_vm13, %v1818_v36, %v6319_v57  ;;  %v7721_v14 = vld [vmem:[#allocation159_spill] sm:$0xff]  ;;  %vm7735_vm13 = vmmov %vm7722_vm0 }
 0x374   : > { %v2327_v9 = vpop.permute.xlu1 %2326  ;;  %v6350_v12 = vpop.permute.xlu0 %1372  ;;  %v2180_v54 = vsel %vm1586_vm9, %v2156_v20, %v7703_v43  ;;  %v1744_v27 = vsel %vm1736_vm2, %v7714_v18, %v6263_v4  ;;  %v7720_v51 = vld [vmem:[#allocation180_spill] sm:$0xff] }
 0x376   : > { %1232 = vrot.lane.b32.xlu1 %v7680_v2, %s3148_s8  ;;  %1438 = vrot.lane.b32.xlu0 %v3124_v23, %s3151_s22  ;;  %v7701_v23 = vld [vmem:[#allocation155_spill] sm:$0xff] }
 0x377   : > { %v2133_v24 = vsel %vm7702_vm5, %v2127_v41, %v7701_v23  ;;  %vm7724_vm5 = vmmov %vm7716_vm1 }
 0x378   : > { %v6360_v48 = vpop.permute.xlu1 %1301  ;;  %v6362_v17 = vpop.permute.xlu0 %1299 }
 0x37a   : > { %1362 = vrot.lane.b32.xlu1 %v7682_v33, %s3150_s16  ;;  %1236 = vrot.lane.b32.xlu0 %v7683_v38, %s3148_s8  ;;  %v1767_v33 = vsel %vm1761_vm4, %v1742_v11, %v6288_v30  ;;  %v7704_v38 = vld [vmem:[#allocation141_spill] sm:$0xff] }
 0x37b   : > { %v1792_v61 = vsel %vm1786_vm15, %v1767_v33, %v1276_v50  ;;  %v7726_v33 = vld [vmem:[#allocation213_spill] sm:$0xff] }
 0x37c   : > { %v1429_v25 = vpop.permute.xlu1 %1428  ;;  %v1425_v5 = vpop.permute.xlu0 %1424 }
 0x37e   : > { %2338 = vrot.lane.b32.xlu1 %v2298_v0, %s3152_s23  ;;  %1384 = vrot.lane.b32.xlu0 %v1339_v55, %s3150_s16  ;;  %v2157_v55 = vsel %vm1561_vm8, %v2133_v24, %v7704_v38  ;;  %v7707_v0 = vld [vmem:[#allocation157_spill] sm:$0xff]  ;;  %vm7711_vm8 = vmmov %vm7710_vm6  ;;  %v1753_v38 = vsel %vm1736_vm2, %v7726_v33, %v6275_v46 }
 0x37f   : > { %v2204_v63 = vsel %vm7708_vm14, %v2180_v54, %v7707_v0  ;;  %v2181_v30 = vsel %vm1586_vm9, %v2157_v55, %v7709_v15  ;;  %v1817_v8 = vsel %vm7711_vm8, %v1792_v61, %v1351_v44  ;;  %v1769_v44 = vsel %vm1761_vm4, %v1744_v27, %v6286_v1  ;;  %vm7730_vm6 = vmmov %vm7716_vm1 }
 0x380   : > { %v6399_v62 = vpop.permute.xlu1 %1374  ;;  %v1447_v2 = vpop.permute.xlu0 %1446  ;;  %v2205_v50 = vsel %vm7713_vm7, %v2181_v30, %v7712_v37  ;;  %v1842_v19 = vsel %vm7716_vm1, %v1817_v8, %v1425_v5  ;;  %vm7718_vm9 = vcmask 523264   ;;  %v1794_v57 = vsel %vm1786_vm15, %v1769_v44, %v6313_v60  ;;  %v3127_v5 = vld [vmem:[%s3188_s17 + $0x88] sm:$0xff]  ;;  %vm7736_vm1 = vmmov %vm7722_vm0 }
 0x381   : > { %v2229_v6 = vsel %vm1636_vm11, %v2205_v50, %v7717_v35  ;;  %v2393_v39 = vsel %vm7718_vm9, %v1843_v56, %v2327_v9  ;;  %vm7719_vm3 = vmmov %vm7718_vm9  ;;  %v2228_v20 = vsel %vm1636_vm11, %v2204_v63, %v7721_v14  ;;  %v1819_v1 = vsel %vm7722_vm0, %v1794_v57, %v6342_v49  ;;  %v7723_v9 = vld [vmem:[#allocation264_spill] sm:$0xff]  ;;  %v7727_v49 = vld [vmem:[#allocation214_spill] sm:$0xff] }
 0x382   : > { %1311 = vrot.lane.b32.xlu1 %v7705_v26, %s3149_s11  ;;  %1307 = vrot.lane.b32.xlu0 %v7706_v34, %s3149_s11  ;;  %v2253_v4 = vsel %vm1661_vm12, %v2229_v6, %v7720_v51  ;;  %v2252_v23 = vsel %vm1661_vm12, %v2228_v20, %v7723_v9  ;;  %v2438_v24 = vcombine.high %v2393_v39, %v2393_v39  ;;  %vm7725_vm14 = vmmov %vm7719_vm3  ;;  %vm7729_vm12 = vcmask 1046528  }
 0x383   : > { %v1844_v43 = vsel %vm7724_vm5, %v1819_v1, %v1429_v25  ;;  %v2312_v32 = vrot.slane %v2253_v4, 1  ;;  %v2311_v13 = vrot.slane %v2252_v23, 1  ;;  %v1778_v25 = vsel %vm1761_vm4, %v1753_v38, %v6298_v53  ;;  %vm7728_vm11 = vmmov %vm7722_vm0  ;;  %v7742_v23 = vld [vmem:[#allocation108_spill] sm:$0xff] }
 0x384   : > { %v2325_v28 = vpop.permute.xlu1 %2324  ;;  %v1377_v11 = vpop.permute.xlu0 %1376  ;;  %v1803_v61 = vsel %vm1786_vm15, %v1778_v25, %v6321_v58  ;;  %vm7731_vm8 = vmmov %vm7719_vm3  ;;  %vm7732_vm7 = vcmask 818176   ;;  %v7733_v58 = vld [vmem:[#allocation152_spill] sm:$0xff] }
 0x385   : > { %v2392_v10 = vsel %vm7719_vm3, %v1842_v19, %v2325_v28  ;;  %v1828_v46 = vsel %vm7728_vm11, %v1803_v61, %v6350_v12  ;;  %v2313_v63 = vsel %vm7729_vm12, %v2311_v13, %v2312_v32  ;;  %v1755_v15 = vsel %vm1736_vm2, %v7733_v58, %v6305_v40  ;;  %v7734_v12 = vld [vmem:[#allocation212_spill] sm:$0xff]  ;;  %vm7737_vm9 = vmmov %vm7724_vm5  ;;  %v7747_v13 = vld [vmem:[#allocation105_spill] sm:$0xff] }
 0x386   : > { %v2451_v41 = vcombine.low %v2392_v10, %v2393_v39  ;;  %1458 = vrot.lane.b32.xlu1 %v3125_v31, %s3151_s22  ;;  %1436 = vrot.lane.b32.xlu0 %v3127_v5, %s3151_s22  ;;  %v1754_v30 = vsel %vm1736_vm2, %v7734_v12, %v6307_v21  ;;  %v1780_v29 = vsel %vm1761_vm4, %v1755_v15, %v6330_v7  ;;  %vm7738_vm3 = vmmov %vm7724_vm5 }
 0x387   : > { %v1805_v8 = vsel %vm1786_vm15, %v1780_v29, %v6360_v48  ;;  %vm7739_vm0 = vmmov %vm7731_vm8 }
 0x388   : > { %v2347_v54 = vpop.permute.xlu1 %2346  ;;  %v2329_v60 = vpop.permute.xlu0 %2328  ;;  %v1830_v7 = vsel %vm7736_vm1, %v1805_v8, %v1377_v11  ;;  %vm7740_vm5 = vmmov %vm7739_vm0 }
 0x389   : > { %v2394_v31 = vsel %vm7725_vm14, %v1844_v43, %v2329_v60  ;;  %vm7741_vm14 = vmmov %vm7732_vm7 }
 0x38a   : > { %v2452_v55 = vcombine.low %v2438_v24, %v2394_v31  ;;  %1386 = vrot.lane.b32.xlu1 %v1338_v45, %s3150_s16  ;;  %1382 = vrot.lane.b32.xlu0 %v7727_v49, %s3150_s16  ;;  %v1853_v45 = vsel %vm7730_vm6, %v1828_v46, %v1447_v2  ;;  %vm7743_vm11 = vmmov %vm7736_vm1  ;;  %v7748_v46 = vld [vmem:[#allocation240_spill] sm:$0xff] }
 0x38b   : > { %v2403_v53 = vsel %vm7731_vm8, %v1853_v45, %v2347_v54  ;;  %vm7744_vm12 = vmmov %vm7738_vm3 }
 0x38c   : > { %v2485_v26 = vpack.c.bf16 %v2452_v55, %v2451_v41  ;;  %v1449_v34 = vpop.permute.xlu1 %1448  ;;  %v1132_v0 = vpop.permute.xlu0 %1131  ;;  %v2443_v37 = vcombine.high %v2403_v53, %v2403_v53  ;;  %vm7745_vm6 = vmmov %vm7739_vm0  ;;  %v7746_v55 = vld [vmem:[#allocation112_spill] sm:$0xff] }
 0x38d   : > { %v1745_v24 = vsel %vm1736_vm2, %v7742_v23, %v1132_v0  ;;  %vm7749_vm8 = vmmov %vm7736_vm1 }
 0x38e   : > { %2358 = vrot.lane.b32.xlu1 %v2313_v63, %s3152_s23  ;;  %2336 = vrot.lane.b32.xlu0 %v2294_v52, %s3152_s23  ;;  %v1779_v52 = vsel %vm1761_vm4, %v1754_v30, %v6332_v3 }
 0x38f   : > { %3005 = vmatmul.mubr.msk.bf16.gmra.mrb[8].mxu0 %vm7732_vm7, %v2485_v26  ;;  %v1804_v40 = vsel %vm1786_vm15, %v1779_v52, %v6362_v17  ;;  %vm7750_vm7 = vmmov %vm7736_vm1 }
 0x390   : > { %v1207_v36 = vpop.permute.xlu1 %1206  ;;  %v1451_v2 = vpop.permute.xlu0 %1450  ;;  %3008 = vmatprep.mubr.msk.bf16.mxu0 %vm7544_vm10, %v7543_v47  ;;  %v1829_v21 = vsel %vm7735_vm13, %v1804_v40, %v6399_v62  ;;  %vm7751_vm13 = vmmov %vm7738_vm3 }
 0x391   : > { %v1854_v3 = vsel %vm7737_vm9, %v1829_v21, %v1449_v34  ;;  %v1855_v50 = vsel %vm7738_vm3, %v1830_v7, %v1451_v2  ;;  %v1770_v43 = vsel %vm1761_vm4, %v1745_v24, %v1207_v36  ;;  %vm7752_vm1 = vmmov %vm7738_vm3 }
 0x392   : > { %1460 = vrot.lane.b32.xlu1 %v6382_v59, %s3151_s22  ;;  %1456 = vrot.lane.b32.xlu0 %v6151_v16, %s3151_s22  ;;  %v2459_v59 = vcombine.low %v2403_v53, %v2443_v37  ;;  %vm7753_vm9 = vmmov %vm7750_vm7 }
 0x393   : > { %vm7754_vm3 = vmmov %vm7739_vm0 }
 0x394   : > { %v2351_v48 = vpop.permute.xlu1 %2350  ;;  %v2349_v18 = vpop.permute.xlu0 %2348 }
 0x395   : > { %v6502_v17 = vsel %vm7739_vm0, %v1855_v50, %v2351_v48  ;;  %v2404_v27 = vsel %vm7740_vm5, %v1854_v3, %v2349_v18  ;;  %vm7755_vm5 = vmmov %vm7752_vm1  ;;  %v7757_v18 = vld [vmem:[#allocation149_spill] sm:$0xff] }
 0x396   : > { %v2460_v56 = vcombine.low %v2404_v27, %v6502_v17  ;;  %2360 = vrot.lane.b32.xlu1 %v2312_v32, %s3152_s23  ;;  %2356 = vrot.lane.b32.xlu0 %v2309_v42, %s3152_s23 }
 0x398   : > { %v2489_v16 = vpack.c.bf16 %v2460_v56, %v2459_v59  ;;  %v1136_v62 = vpop.permute.xlu1 %1135  ;;  %v1134_v19 = vpop.permute.xlu0 %1133 }
 0x399   : > { %v1747_v49 = vsel %vm1736_vm2, %v7746_v55, %v1136_v62  ;;  %v1746_v25 = vsel %vm1736_vm2, %v7747_v13, %v1134_v19 }
 0x39a   : > { %3021 = vmatmul.mubr.msk.bf16.gmra.mrb[4].mxu1 %vm7741_vm14, %v2489_v16  ;;  %vm7756_vm14 = vmmov %vm7739_vm0 }
 0x39b   : > { %3024 = vmatprep.mubr.msk.bf16.mxu1 %vm7544_vm10, %v7543_v47 }
 0x39c   : > { %v1282_v28 = vpop.permute.xlu1 %1281  ;;  %v1156_v11 = vpop.permute.xlu0 %1155 }
 0x39d   : > { %v1795_v54 = vsel %vm1786_vm15, %v1770_v43, %v1282_v28  ;;  %v1757_v63 = vsel %vm1736_vm2, %v7748_v46, %v1156_v11  ;;  %v7763_v46 = vld [vmem:[#allocation237_spill] sm:$0xff] }
 0x3a0   : > { %v1211_v35 = vpop.permute.xlu1 %1210  ;;  %v1209_v6 = vpop.permute.xlu0 %1208 }
 0x3a1   : > { %v1772_v34 = vsel %vm1761_vm4, %v1747_v49, %v1211_v35  ;;  %v1771_v0 = vsel %vm1761_vm4, %v1746_v25, %v1209_v6  ;;  %v2444_v35 = vcombine.high %v6502_v17, %v6502_v17 }
 0x3a4   : > { %v1357_v44 = vpop.permute.xlu1 %1356  ;;  %v1231_v39 = vpop.permute.xlu0 %1230 }
 0x3a5   : > { %v1820_v31 = vsel %vm7743_vm11, %v1795_v54, %v1357_v44  ;;  %v1782_v15 = vsel %vm1761_vm4, %v1757_v63, %v1231_v39  ;;  %vm7758_vm11 = vcmask 818176  }
 0x3a8   : > { %v1284_v10 = vpop.permute.xlu1 %1283  ;;  %v1154_v51 = vpop.permute.xlu0 %1153 }
 0x3a9   : > { %v1796_v45 = vsel %vm1786_vm15, %v1771_v0, %v1284_v10  ;;  %v1756_v27 = vsel %vm1736_vm2, %v7757_v18, %v1154_v51 }
 0x3ac   : > { %v1306_v4 = vpop.permute.xlu1 %1305  ;;  %v1286_v57 = vpop.permute.xlu0 %1285 }
 0x3ad   : > { %v1797_v53 = vsel %vm1786_vm15, %v1772_v34, %v1286_v57  ;;  %v1807_v36 = vsel %vm1786_vm15, %v1782_v15, %v1306_v4 }
 0x3b0   : > { %v1229_v22 = vpop.permute.xlu1 %1228  ;;  %v1431_v42 = vpop.permute.xlu0 %1430 }
 0x3b1   : > { %v1845_v33 = vsel %vm7744_vm12, %v1820_v31, %v1431_v42  ;;  %v1781_v62 = vsel %vm1761_vm4, %v1756_v27, %v1229_v22  ;;  %vm7759_vm12 = vmmov %vm7750_vm7 }
 0x3b4   : > { %v1361_v41 = vpop.permute.xlu1 %1360  ;;  %v1359_v5 = vpop.permute.xlu0 %1358 }
 0x3b5   : > { %v1822_v12 = vsel %vm7749_vm8, %v1797_v53, %v1361_v41  ;;  %v1821_v30 = vsel %vm7750_vm7, %v1796_v45, %v1359_v5  ;;  %vm7761_vm8 = vmmov %vm7739_vm0 }
 0x3b6   : > { %vm7762_vm7 = vmmov %vm7758_vm11 }
 0x3b8   : > { %v2331_v14 = vpop.permute.xlu1 %2330  ;;  %v1381_v20 = vpop.permute.xlu0 %1380 }
 0x3b9   : > { %v2395_v38 = vsel %vm7745_vm6, %v1845_v33, %v2331_v14  ;;  %v1832_v40 = vsel %vm7753_vm9, %v1807_v36, %v1381_v20  ;;  %vm7760_vm6 = vmmov %vm7752_vm1 }
 0x3ba   : > { %v2439_v58 = vcombine.high %v2395_v38, %v2395_v38 }
 0x3bc   : > { %v1433_v1 = vpop.permute.xlu1 %1432  ;;  %v1304_v9 = vpop.permute.xlu0 %1303  ;;  %v2453_v7 = vcombine.low %v2395_v38, %v2439_v58 }
 0x3bd   : > { %v1846_v2 = vsel %vm7751_vm13, %v1821_v30, %v1433_v1  ;;  %v1806_v19 = vsel %vm1786_vm15, %v1781_v62, %v1304_v9  ;;  %vm2754_vm13 = vcmask 80896  }
 0x3c0   : > { %v1455_v60 = vpop.permute.xlu1 %1454  ;;  %v1435_v32 = vpop.permute.xlu0 %1434 }
 0x3c1   : > { %v1847_v29 = vsel %vm7752_vm1, %v1822_v12, %v1435_v32  ;;  %v1857_v3 = vsel %vm7755_vm5, %v1832_v40, %v1455_v60  ;;  %v6562_v32 = vld [vmem:[%s6685_s2] ss:$0 sm:$0xff]  ;;  %vm7764_vm1 = vmmov %vm7753_vm9 }
 0x3c2   : > { %vm7765_vm9 = vmmov %vm7755_vm5 }
 0x3c4   : > { %v2333_v61 = vpop.permute.xlu1 %2332  ;;  %v1379_v26 = vpop.permute.xlu0 %1378 }
 0x3c5   : > { %v2396_v37 = vsel %vm7754_vm3, %v1846_v2, %v2333_v61  ;;  %v1831_v11 = vsel %vm7759_vm12, %v1806_v19, %v1379_v26  ;;  %vm7766_vm3 = vmmov %vm7739_vm0 }
 0x3c6   : > { %vm7773_vm12 = vmmov %vm7755_vm5 }
 0x3c8   : > { %v2355_v52 = vpop.permute.xlu1 %2354  ;;  %v2335_v8 = vpop.permute.xlu0 %2334 }
 0x3c9   : > { %v6539_v21 = vsel %vm7739_vm0, %v1847_v29, %v2335_v8  ;;  %v2407_v48 = vsel %vm7756_vm14, %v1857_v3, %v2355_v52  ;;  %v7767_v29 = vld [vmem:[#allocation109_spill] sm:$0xff]  ;;  %v7768_v3 = vld [vmem:[#allocation172_spill] sm:$0xff]  ;;  %vm7769_vm0 = vmmov %vm7764_vm1 }
 0x3ca   : > { %v2454_v50 = vcombine.low %v2396_v37, %v6539_v21  ;;  %v2445_v28 = vcombine.high %v2407_v48, %v2407_v48  ;;  %v2440_v27 = vcombine.high %v6539_v21, %v6539_v21  ;;  %vm7770_vm14 = vmmov %vm7766_vm3  ;;  %v7774_v21 = vld [vmem:[#allocation239_spill] sm:$0xff] }
 0x3cc   : > { %v2486_v59 = vpack.c.bf16 %v2454_v50, %v2453_v7  ;;  %v1453_v56 = vpop.permute.xlu1 %1452  ;;  %v1140_v16 = vpop.permute.xlu0 %1139  ;;  %v2462_v51 = vcombine.low %v2407_v48, %v2445_v28 }
 0x3cd   : > { %v1856_v6 = vsel %vm7760_vm6, %v1831_v11, %v1453_v56  ;;  %v1749_v63 = vsel %vm1736_vm2, %v7763_v46, %v1140_v16  ;;  %vm7775_vm6 = vmmov %vm7766_vm3 }
 0x3ce   : > { %3009 = vmatmul.mubr.msk.bf16.gmra.mrb[12].mxu0 %vm7758_vm11, %v2486_v59  ;;  %vm7771_vm11 = vmmov %vm7769_vm0 }
 0x3cf   : > { %3012 = vmatprep.mubr.msk.bf16.mxu0 %vm7544_vm10, %v7543_v47 }
 0x3d0   : > { %v2353_v44 = vpop.permute.xlu1 %2352  ;;  %v1215_v39 = vpop.permute.xlu0 %1214 }
 0x3d1   : > { %v2406_v10 = vsel %vm7761_vm8, %v1856_v6, %v2353_v44  ;;  %v1774_v45 = vsel %vm1761_vm4, %v1749_v63, %v1215_v39  ;;  %v7772_v6 = vld [vmem:[#allocation171_spill] sm:$0xff]  ;;  %vm7776_vm8 = vmmov %vm7769_vm0 }
 0x3d2   : > { %v2461_v4 = vcombine.low %v2444_v35, %v2406_v10 }
 0x3d4   : > { %v2490_v57 = vpack.c.bf16 %v2462_v51, %v2461_v4  ;;  %v1160_v22 = vpop.permute.xlu1 %1159  ;;  %v1138_v42 = vpop.permute.xlu0 %1137 }
 0x3d5   : > { %v1748_v52 = vsel %vm1736_vm2, %v7767_v29, %v1138_v42  ;;  %v1759_v50 = vsel %vm1736_vm2, %v7768_v3, %v1160_v22 }
 0x3d6   : > { %3025 = vmatmul.mubr.msk.bf16.gmra.mrb[8].mxu1 %vm7762_vm7, %v2490_v57 }
 0x3d7   : > { %3028 = vmatprep.mubr.msk.bf16.mxu1 %vm7544_vm10, %v7543_v47  ;;  %vm2756_vm10 = vcmask 76800  }
 0x3d8   : > { %v1213_v41 = vpop.permute.xlu1 %1212  ;;  %v1290_v5 = vpop.permute.xlu0 %1289 }
 0x3d9   : > { %v1799_v58 = vsel %vm1786_vm15, %v1774_v45, %v1290_v5  ;;  %v1773_v40 = vsel %vm1761_vm4, %v1748_v52, %v1213_v41 }
 0x3dc   : > { %v1365_v14 = vpop.permute.xlu1 %1364  ;;  %v1235_v17 = vpop.permute.xlu0 %1234 }
 0x3dd   : > { %v1824_v12 = vsel %vm7764_vm1, %v1799_v58, %v1365_v14  ;;  %v1784_v59 = vsel %vm1761_vm4, %v1759_v50, %v1235_v17  ;;  %vm7777_vm1 = vmmov %vm7769_vm0 }
 0x3e0   : > { %v1162_v20 = vpop.permute.xlu1 %1161  ;;  %v1158_v1 = vpop.permute.xlu0 %1157 }
 0x3e1   : > { %v1760_v44 = vsel %vm1736_vm2, %v7772_v6, %v1162_v20  ;;  %v1758_v51 = vsel %vm1736_vm2, %v7774_v21, %v1158_v1  ;;  %vm7778_vm2 = vmmov %vm7755_vm5 }
 0x3e4   : > { %v1310_v9 = vpop.permute.xlu1 %1309  ;;  %v1288_v23 = vpop.permute.xlu0 %1287 }
 0x3e5   : > { %v1798_v37 = vsel %vm1786_vm15, %v1773_v40, %v1288_v23  ;;  %v1809_v62 = vsel %vm1786_vm15, %v1784_v59, %v1310_v9 }
 0x3e8   : > { %v1233_v24 = vpop.permute.xlu1 %1232  ;;  %v1439_v43 = vpop.permute.xlu0 %1438 }
 0x3e9   : > { %v1849_v30 = vsel %vm7765_vm9, %v1824_v12, %v1439_v43  ;;  %v1783_v41 = vsel %vm1761_vm4, %v1758_v51, %v1233_v24  ;;  %vm7779_vm9 = vmmov %vm7778_vm2 }
 0x3ec   : > { %v1363_v54 = vpop.permute.xlu1 %1362  ;;  %v1237_v60 = vpop.permute.xlu0 %1236 }
 0x3ed   : > { %v1823_v48 = vsel %vm7769_vm0, %v1798_v37, %v1363_v54  ;;  %v1785_v4 = vsel %vm1761_vm4, %v1760_v44, %v1237_v60  ;;  %vm7780_vm4 = vmmov %vm7766_vm3 }
 0x3ee   : > { %v2617_v31 = vpop.f32.mrb[0].mxu0 }
 0x3ef   : > { %v2618_v47 = vadd.f32 %v6562_v32, %v2617_v31  ;;  %v2998_v33 = vpop.f32.mrb[1].mxu0 }
 0x3f0   : > { %v2620_v38 = vpop.f32.mrb[2].mxu0  ;;  %v2339_v55 = vpop.permute.xlu1 %2338 }
 0x3f1   : > { %v2706_v49 = vcombine.high %v2618_v47, %v2618_v47  ;;  %v6566_v13 = vadd.f32 %v6562_v32, %v2620_v38  ;;  %v2999_v25 = vpop.f32.mrb[3].mxu0  ;;  %v1385_v61 = vpop.permute.xlu0 %1384  ;;  %v2399_v36 = vsel %vm7766_vm3, %v1849_v30, %v2339_v55 }
 0x3f2   : > { %v2441_v7 = vcombine.high %v2399_v36, %v2399_v36  ;;  %v1834_v11 = vsel %vm7771_vm11, %v1809_v62, %v1385_v61 }
 0x3f3   : > { %v2730_v26 = vcombine.low %v2618_v47, %v2706_v49  ;;  %2757 = vst.msk [vmem:[#allocation2 + $0x8] sm:$0xf] %vm2756_vm10, %v6566_v13  ;;  %v2707_v55 = vcombine.high %v6566_v13, %v6566_v13 }
 0x3f4   : > { %v1312_v34 = vpop.permute.xlu1 %1311  ;;  %v2456_v28 = vcombine.low %v2399_v36, %v2441_v7 }
 0x3f5   : > { %2755 = vst.msk [vmem:[#allocation2] sm:$0xff] %vm2754_vm13, %v2730_v26  ;;  %v1308_v0 = vpop.permute.xlu0 %1307  ;;  %v1810_v5 = vsel %vm1786_vm15, %v1785_v4, %v1312_v34 }
 0x3f6   : > { %v1808_v14 = vsel %vm1786_vm15, %v1783_v41, %v1308_v0  ;;  %vm7781_vm15 = vmmov %vm7762_vm7 }
 0x3f8   : > { %v1459_v53 = vpop.permute.xlu1 %1458 }
 0x3f9   : > { %v1437_v15 = vpop.permute.xlu0 %1436  ;;  %v1859_v39 = vsel %vm7773_vm12, %v1834_v11, %v1459_v53 }
 0x3fa   : > { %v1848_v56 = vsel %vm7755_vm5, %v1823_v48, %v1437_v15  ;;  %v2781_v53 = vld [vmem:[#allocation2 + $0x8] sm:$0xf]  ;;  %vm2876_vm5 = vcmask 78848  }
 0x3fc   : > { %v1387_v2 = vpop.permute.xlu1 %1386  ;;  %v2780_v58 = vld [vmem:[#allocation2] sm:$0xff] }
 0x3fd   : > { %v1383_v8 = vpop.permute.xlu0 %1382  ;;  %v1835_v17 = vsel %vm7776_vm8, %v1810_v5, %v1387_v2 }
 0x3fe   : > { %v1833_v20 = vsel %vm7777_vm1, %v1808_v14, %v1383_v8 }
 0x400   : > { %v2359_v18 = vpop.permute.xlu1 %2358 }
 0x401   : > { %v2337_v16 = vpop.permute.xlu0 %2336  ;;  %v2409_v57 = vsel %vm7775_vm6, %v1859_v39, %v2359_v18 }
 0x402   : > { %v2398_v19 = vsel %vm7770_vm14, %v1848_v56, %v2337_v16  ;;  %v2446_v9 = vcombine.high %v2409_v57, %v2409_v57 }
 0x403   : > { %v2455_v35 = vcombine.low %v2440_v27, %v2398_v19 }
 0x404   : > { %v1461_v10 = vpop.permute.xlu1 %1460 }
 0x405   : > { %v2487_v22 = vpack.c.bf16 %v2456_v28, %v2455_v35  ;;  %v1457_v42 = vpop.permute.xlu0 %1456  ;;  %v1860_v1 = vsel %vm7778_vm2, %v1835_v17, %v1461_v10 }
 0x406   : > { %v1858_v43 = vsel %vm7779_vm9, %v1833_v20, %v1457_v42 }
 0x407   : > { %3013 = vmatmul.mubr.msk.bf16.gmra.mrb[16].mxu0 %vm7762_vm7, %v2487_v22 }
 0x408   : > { %v2361_v23 = vpop.permute.xlu1 %2360 }
 0x409   : > { %v2410_v54 = vsel %vm7766_vm3, %v1860_v1, %v2361_v23  ;;  %v2357_v60 = vpop.permute.xlu0 %2356 }
 0x40a   : > { %v2464_v24 = vcombine.low %v2446_v9, %v2410_v54  ;;  %v2408_v31 = vsel %vm7780_vm4, %v1858_v43, %v2357_v60 }
 0x40b   : > { %v2463_v47 = vcombine.low %v2408_v31, %v2409_v57 }
 0x40d   : > { %v2491_v33 = vpack.c.bf16 %v2464_v24, %v2463_v47 }
 0x40f   : > { %3029 = vmatmul.mubr.msk.bf16.gmra.mrb[12].mxu1 %vm7781_vm15, %v2491_v33 }
 0x41e   : > { %v2625_v38 = vpop.f32.mrb[4].mxu0 }
 0x41f   : > { %v2626_v49 = vadd.f32 %v6562_v32, %v2625_v38  ;;  %v3002_v25 = vpop.f32.mrb[5].mxu0 }
 0x420   : > { %v2628_v61 = vpop.f32.mrb[6].mxu0 }
 0x421   : > { %v2708_v26 = vcombine.high %v2626_v49, %v2626_v49  ;;  %v2731_v34 = vcombine.low %v2707_v55, %v2626_v49  ;;  %v2629_v0 = vadd.f32 %v6562_v32, %v2628_v61  ;;  %v3003_v46 = vpop.f32.mrb[7].mxu0 }
 0x423   : > { %2758 = vst.msk [vmem:[#allocation2 + $0x10] sm:$0xff] %vm2754_vm13, %v2731_v34  ;;  %v2709_v63 = vcombine.high %v2629_v0, %v2629_v0 }
 0x424   : > { %2759 = vst.msk [vmem:[#allocation2 + $0x18] sm:$0xf] %vm2756_vm10, %v2708_v26 }
 0x425   : > { %v2732_v45 = vcombine.low %v2629_v0, %v2709_v63 }
 0x427   : > { %2760 = vst.msk [vmem:[#allocation2 + $0x20] sm:$0xff] %vm2754_vm13, %v2732_v45 }
 0x42a   : > { %v2793_v13 = vld [vmem:[#allocation2 + $0x10] sm:$0xff]  ;;  %v2657_v15 = vpop.f32.mrb[0].mxu1 }
 0x42b   : > { %v2794_v12 = vld [vmem:[#allocation2 + $0x18] sm:$0xf]  ;;  %v2805_v30 = vmax.f32 %v2780_v58, %v2793_v13  ;;  %v2658_v36 = vadd.f32 %v6562_v32, %v2657_v15  ;;  %v3018_v2 = vpop.f32.mrb[1].mxu1 }
 0x42c   : > { %v2806_v29 = vmax.f32 %v2781_v53, %v2794_v12  ;;  %v2660_v52 = vpop.f32.mrb[2].mxu1 }
 0x42d   : > { %2817 = vst.msk [vmem:[#allocation2] sm:$0xff] %vm2754_vm13, %v2805_v30  ;;  %v2716_v8 = vcombine.high %v2658_v36, %v2658_v36  ;;  %v2661_v40 = vadd.f32 %v6562_v32, %v2660_v52  ;;  %v3019_v37 = vpop.f32.mrb[3].mxu1 }
 0x42e   : > { %2769 = vst.msk [vmem:[#allocation2 + $0x68] sm:$0xf] %vm2756_vm10, %v2658_v36  ;;  %2818 = vst.msk [vmem:[#allocation2 + $0x8] sm:$0xf] %vm2756_vm10, %v2806_v29  ;;  %v2782_v57 = vld [vmem:[#allocation2 + $0x20] sm:$0xff] }
 0x42f   : > { %v2717_v7 = vcombine.high %v2661_v40, %v2661_v40  ;;  %v2737_v3 = vcombine.low %v2716_v8, %v2661_v40 }
 0x431   : > { %2770 = vst.msk [vmem:[#allocation2 + $0x70] sm:$0xff] %vm2754_vm13, %v2737_v3 }
 0x432   : > { %2771 = vst.msk [vmem:[#allocation2 + $0x78] sm:$0xf] %vm2756_vm10, %v2717_v7 }
 0x435   : > { %v2829_v50 = vld [vmem:[#allocation2] ss:$2 sm:$0x3f]  ;;  %v2841_v48 = vld [vmem:[#allocation2 + $0x1] ss:$2 sm:$0x3f] }
 0x436   : > { %v2852_v18 = vmax.f32 %v2829_v50, %v2841_v48  ;;  %v2787_v21 = vld [vmem:[#allocation2 + $0x68] sm:$0xf] }
 0x438   : > { %vm2858_vm0 = vcmp.gt.f32.partialorder %v2852_v18, 0.0  ;;  %v2864_v27 = vmul.f32 0.01, %v2852_v18 }
 0x439   : > { %v2800_v39 = vld [vmem:[#allocation2 + $0x78] sm:$0xf] }
 0x43a   : > { %v2870_v59 = vsel %vm2858_vm0, %v2852_v18, %v2864_v27  ;;  %v2812_v22 = vmax.f32 %v2787_v21, %v2800_v39 }
 0x43b   : > { %2877 = vst.msk [vmem:[%s6628_s28] sm:$0x3f] %vm2876_vm5, %v2870_v59 }
 0x462   : > { %v2633_v56 = vpop.f32.mrb[8].mxu0 }
 0x463   : > { %v2634_v16 = vadd.f32 %v6562_v32, %v2633_v56  ;;  %v3006_v62 = vpop.f32.mrb[9].mxu0 }
 0x464   : > { %v2636_v19 = vpop.f32.mrb[10].mxu0 }
 0x465   : > { %v2710_v28 = vcombine.high %v2634_v16, %v2634_v16  ;;  %2761 = vst.msk [vmem:[#allocation2 + $0x28] sm:$0xf] %vm2756_vm10, %v2634_v16  ;;  %v2637_v11 = vadd.f32 %v6562_v32, %v2636_v19  ;;  %v3007_v35 = vpop.f32.mrb[11].mxu0 }
 0x467   : > { %v2711_v6 = vcombine.high %v2637_v11, %v2637_v11  ;;  %v2733_v44 = vcombine.low %v2710_v28, %v2637_v11 }
 0x469   : > { %2762 = vst.msk [vmem:[#allocation2 + $0x30] sm:$0xff] %vm2754_vm13, %v2733_v44 }
 0x46a   : > { %2763 = vst.msk [vmem:[#allocation2 + $0x38] sm:$0xf] %vm2756_vm10, %v2711_v6 }
 0x46c   : > { %v2783_v41 = vld [vmem:[#allocation2 + $0x28] sm:$0xf] }
 0x46d   : > { %v2665_v10 = vpop.f32.mrb[4].mxu1 }
 0x46e   : > { %v2666_v51 = vadd.f32 %v6562_v32, %v2665_v10  ;;  %v3022_v4 = vpop.f32.mrb[5].mxu1 }
 0x46f   : > { %v2668_v42 = vpop.f32.mrb[6].mxu1 }
 0x470   : > { %v2795_v5 = vld [vmem:[#allocation2 + $0x30] sm:$0xff]  ;;  %v2718_v17 = vcombine.high %v2666_v51, %v2666_v51  ;;  %v2669_v20 = vadd.f32 %v6562_v32, %v2668_v42  ;;  %v3023_v9 = vpop.f32.mrb[7].mxu1 }
 0x471   : > { %v2796_v14 = vld [vmem:[#allocation2 + $0x38] sm:$0xf]  ;;  %v2807_v1 = vmax.f32 %v2782_v57, %v2795_v5 }
 0x472   : > { %v2808_v23 = vmax.f32 %v2783_v41, %v2796_v14  ;;  %2824 = vst.msk [vmem:[#allocation2 + $0x38] sm:$0xf] %vm2756_vm10, %v2812_v22  ;;  %v2738_v43 = vcombine.low %v2666_v51, %v2718_v17  ;;  %2773 = vst.msk [vmem:[#allocation2 + $0x88] sm:$0xf] %vm2756_vm10, %v2669_v20  ;;  %v2719_v46 = vcombine.high %v2669_v20, %v2669_v20 }
 0x473   : > { %2819 = vst.msk [vmem:[#allocation2 + $0x10] sm:$0xff] %vm2754_vm13, %v2807_v1 }
 0x474   : > { %2820 = vst.msk [vmem:[#allocation2 + $0x18] sm:$0xf] %vm2756_vm10, %v2808_v23  ;;  %v2799_v23 = vld [vmem:[#allocation2 + $0x70] sm:$0xff] }
 0x475   : > { %2772 = vst.msk [vmem:[#allocation2 + $0x80] sm:$0xff] %vm2754_vm13, %v2738_v43 }
 0x479   : > { %v2789_v2 = vld [vmem:[#allocation2 + $0x88] sm:$0xf] }
 0x47b   : > { %v2831_v54 = vld [vmem:[#allocation2 + $0x10] ss:$2 sm:$0x3f]  ;;  %v2843_v60 = vld [vmem:[#allocation2 + $0x11] ss:$2 sm:$0x3f] }
 0x47c   : > { %v2853_v24 = vmax.f32 %v2831_v54, %v2843_v60  ;;  %v2788_v29 = vld [vmem:[#allocation2 + $0x80] sm:$0xff] }
 0x47e   : > { %vm2859_vm14 = vcmp.gt.f32.partialorder %v2853_v24, 0.0  ;;  %v2865_v31 = vmul.f32 0.01, %v2853_v24 }
 0x480   : > { %v2871_v47 = vsel %vm2859_vm14, %v2853_v24, %v2865_v31 }
 0x481   : > { %2878 = vst.msk [vmem:[%s6628_s28 + $0x8] sm:$0x3f] %vm2876_vm5, %v2871_v47 }
 0x4a1   : > { %v2641_v33 = vpop.f32.mrb[12].mxu0 }
 0x4a2   : > { %v2642_v38 = vadd.f32 %v6562_v32, %v2641_v33  ;;  %v3010_v55 = vpop.f32.mrb[13].mxu0 }
 0x4a3   : > { %v2644_v49 = vpop.f32.mrb[14].mxu0 }
 0x4a4   : > { %v2712_v25 = vcombine.high %v2642_v38, %v2642_v38  ;;  %v2645_v61 = vadd.f32 %v6562_v32, %v2644_v49  ;;  %v3011_v26 = vpop.f32.mrb[15].mxu0 }
 0x4a6   : > { %v2734_v34 = vcombine.low %v2642_v38, %v2712_v25  ;;  %2765 = vst.msk [vmem:[#allocation2 + $0x48] sm:$0xf] %vm2756_vm10, %v2645_v61  ;;  %v2713_v16 = vcombine.high %v2645_v61, %v2645_v61 }
 0x4a8   : > { %2764 = vst.msk [vmem:[#allocation2 + $0x40] sm:$0xff] %vm2754_vm13, %v2734_v34 }
 0x4a9   : > { %v2673_v0 = vpop.f32.mrb[8].mxu1 }
 0x4aa   : > { %v2674_v63 = vadd.f32 %v6562_v32, %v2673_v0  ;;  %v3026_v45 = vpop.f32.mrb[9].mxu1 }
 0x4ab   : > { %v2676_v53 = vpop.f32.mrb[10].mxu1 }
 0x4ac   : > { %v2720_v58 = vcombine.high %v2674_v63, %v2674_v63  ;;  %v2739_v13 = vcombine.low %v2719_v46, %v2674_v63  ;;  %v2677_v15 = vadd.f32 %v6562_v32, %v2676_v53  ;;  %v3027_v12 = vpop.f32.mrb[11].mxu1 }
 0x4ad   : > { %v2785_v3 = vld [vmem:[#allocation2 + $0x48] sm:$0xf] }
 0x4ae   : > { %2774 = vst.msk [vmem:[#allocation2 + $0x90] sm:$0xff] %vm2754_vm13, %v2739_v13  ;;  %v2721_v30 = vcombine.high %v2677_v15, %v2677_v15 }
 0x4af   : > { %2775 = vst.msk [vmem:[#allocation2 + $0x98] sm:$0xf] %vm2756_vm10, %v2720_v58  ;;  %v2784_v7 = vld [vmem:[#allocation2 + $0x40] sm:$0xff] }
 0x4b0   : > { %v2740_v36 = vcombine.low %v2677_v15, %v2721_v30 }
 0x4b2   : > { %2776 = vst.msk [vmem:[#allocation2 + $0xa0] sm:$0xff] %vm2754_vm13, %v2740_v36 }
 0x4b5   : > { %v2801_v52 = vld [vmem:[#allocation2 + $0x90] sm:$0xff] }
 0x4b6   : > { %v2802_v8 = vld [vmem:[#allocation2 + $0x98] sm:$0xf]  ;;  %v2813_v40 = vmax.f32 %v2788_v29, %v2801_v52 }
 0x4b7   : > { %v2814_v37 = vmax.f32 %v2789_v2, %v2802_v8 }
 0x4b8   : > { %2825 = vst.msk [vmem:[#allocation2 + $0x40] sm:$0xff] %vm2754_vm13, %v2813_v40 }
 0x4b9   : > { %2826 = vst.msk [vmem:[#allocation2 + $0x48] sm:$0xf] %vm2756_vm10, %v2814_v37 }
 0x4c0   : > { %v2837_v50 = vld [vmem:[#allocation2 + $0x40] ss:$2 sm:$0x3f]  ;;  %v2849_v48 = vld [vmem:[#allocation2 + $0x41] ss:$2 sm:$0x3f] }
 0x4c1   : > { %v2856_v18 = vmax.f32 %v2837_v50, %v2849_v48 }
 0x4c3   : > { %vm2862_vm11 = vcmp.gt.f32.partialorder %v2856_v18, 0.0  ;;  %v2868_v27 = vmul.f32 0.01, %v2856_v18 }
 0x4c5   : > { %v2874_v59 = vsel %vm2862_vm11, %v2856_v18, %v2868_v27 }
 0x4c6   : > { %2881 = vst.msk [vmem:[%s6628_s28 + $0x20] sm:$0x3f] %vm2876_vm5, %v2874_v59 }
 0x4da   : > { %v2649_v56 = vpop.f32.mrb[16].mxu0 }
 0x4db   : > { %v2650_v62 = vadd.f32 %v6562_v32, %v2649_v56  ;;  %v3014_v19 = vpop.f32.mrb[17].mxu0 }
 0x4dc   : > { %v2652_v28 = vpop.f32.mrb[18].mxu0 }
 0x4dd   : > { %v2714_v11 = vcombine.high %v2650_v62, %v2650_v62  ;;  %v2735_v35 = vcombine.low %v2713_v16, %v2650_v62  ;;  %v2653_v6 = vadd.f32 %v6562_v32, %v2652_v28  ;;  %v3015_v44 = vpop.f32.mrb[19].mxu0 }
 0x4df   : > { %2766 = vst.msk [vmem:[#allocation2 + $0x50] sm:$0xff] %vm2754_vm13, %v2735_v35  ;;  %v2715_v39 = vcombine.high %v2653_v6, %v2653_v6 }
 0x4e0   : > { %2767 = vst.msk [vmem:[#allocation2 + $0x58] sm:$0xf] %vm2756_vm10, %v2714_v11 }
 0x4e1   : > { %v2736_v10 = vcombine.low %v2653_v6, %v2715_v39 }
 0x4e2   : > { %v2681_v21 = vpop.f32.mrb[12].mxu1 }
 0x4e3   : > { %2768 = vst.msk [vmem:[#allocation2 + $0x60] sm:$0xff] %vm2754_vm13, %v2736_v10  ;;  %v2682_v51 = vadd.f32 %v6562_v32, %v2681_v21  ;;  %v3030_v4 = vpop.f32.mrb[13].mxu1 }
 0x4e4   : > { %v2684_v57 = vpop.f32.mrb[14].mxu1 }
 0x4e5   : > { %v2722_v22 = vcombine.high %v2682_v51, %v2682_v51  ;;  %2777 = vst.msk [vmem:[#allocation2 + $0xa8] sm:$0xf] %vm2756_vm10, %v2682_v51  ;;  %v2685_v42 = vadd.f32 %v6562_v32, %v2684_v57  ;;  %v3031_v41 = vpop.f32.mrb[15].mxu1  ;;  %v2790_v32 = vld [vmem:[#allocation2 + $0xa0] sm:$0xff] }
 0x4e6   : > { %v2797_v5 = vld [vmem:[#allocation2 + $0x50] sm:$0xff] }
 0x4e7   : > { %v2798_v14 = vld [vmem:[#allocation2 + $0x58] sm:$0xf]  ;;  %v2809_v17 = vmax.f32 %v2784_v7, %v2797_v5  ;;  %v2723_v9 = vcombine.high %v2685_v42, %v2685_v42  ;;  %v2741_v1 = vcombine.low %v2722_v22, %v2685_v42 }
 0x4e8   : > { %v2810_v20 = vmax.f32 %v2785_v3, %v2798_v14 }
 0x4e9   : > { %2821 = vst.msk [vmem:[#allocation2 + $0x20] sm:$0xff] %vm2754_vm13, %v2809_v17  ;;  %2778 = vst.msk [vmem:[#allocation2 + $0xb0] sm:$0xff] %vm2754_vm13, %v2741_v1 }
 0x4ea   : > { %2822 = vst.msk [vmem:[#allocation2 + $0x28] sm:$0xf] %vm2756_vm10, %v2810_v20  ;;  %2779 = vst.msk [vmem:[#allocation2 + $0xb8] sm:$0xf] %vm2756_vm10, %v2723_v9  ;;  %v2786_v43 = vld [vmem:[#allocation2 + $0x60] sm:$0xff] }
 0x4eb   : > { %v2811_v54 = vmax.f32 %v2786_v43, %v2799_v23 }
 0x4ec   : > { %v2791_v47 = vld [vmem:[#allocation2 + $0xa8] sm:$0xf] }
 0x4ed   : > { %2823 = vst.msk [vmem:[#allocation2 + $0x30] sm:$0xff] %vm2754_vm13, %v2811_v54 }
 0x4f0   : > { %v2803_v33 = vld [vmem:[#allocation2 + $0xb0] sm:$0xff] }
 0x4f1   : > { %v2833_v60 = vld [vmem:[#allocation2 + $0x20] ss:$2 sm:$0x3f]  ;;  %v2845_v24 = vld [vmem:[#allocation2 + $0x21] ss:$2 sm:$0x3f]  ;;  %v2815_v55 = vmax.f32 %v2790_v32, %v2803_v33 }
 0x4f2   : > { %v2854_v31 = vmax.f32 %v2833_v60, %v2845_v24  ;;  %v2804_v38 = vld [vmem:[#allocation2 + $0xb8] sm:$0xf] }
 0x4f3   : > { %v2816_v49 = vmax.f32 %v2791_v47, %v2804_v38  ;;  %2827 = vst.msk [vmem:[#allocation2 + $0x50] sm:$0xff] %vm2754_vm13, %v2815_v55 }
 0x4f4   : > { %vm2860_vm12 = vcmp.gt.f32.partialorder %v2854_v31, 0.0  ;;  %v2866_v25 = vmul.f32 0.01, %v2854_v31  ;;  %v2835_v61 = vld [vmem:[#allocation2 + $0x30] ss:$2 sm:$0x3f] }
 0x4f5   : > { %v2847_v26 = vld [vmem:[#allocation2 + $0x31] ss:$2 sm:$0x3f]  ;;  %2828 = vst.msk [vmem:[#allocation2 + $0x58] sm:$0xf] %vm2756_vm10, %v2816_v49 }
 0x4f6   : > { %v2872_v34 = vsel %vm2860_vm12, %v2854_v31, %v2866_v25  ;;  %v2855_v0 = vmax.f32 %v2835_v61, %v2847_v26 }
 0x4f7   : > { %2879 = vst.msk [vmem:[%s6628_s28 + $0x10] sm:$0x3f] %vm2876_vm5, %v2872_v34 }
 0x4f8   : > { %vm2861_vm6 = vcmp.gt.f32.partialorder %v2855_v0, 0.0  ;;  %v2867_v46 = vmul.f32 0.01, %v2855_v0 }
 0x4fa   : > { %v2873_v63 = vsel %vm2861_vm6, %v2855_v0, %v2867_v46 }
 0x4fb   : > { %2880 = vst.msk [vmem:[%s6628_s28 + $0x18] sm:$0x3f] %vm2876_vm5, %v2873_v63 }
 0x4fc   : > { %v2839_v45 = vld [vmem:[#allocation2 + $0x50] ss:$2 sm:$0x3f]  ;;  %v2851_v53 = vld [vmem:[#allocation2 + $0x51] ss:$2 sm:$0x3f] }
 0x4fd   : > { %v2857_v58 = vmax.f32 %v2839_v45, %v2851_v53 }
 0x4ff   : > { %vm2863_vm8 = vcmp.gt.f32.partialorder %v2857_v58, 0.0  ;;  %v2869_v13 = vmul.f32 0.01, %v2857_v58 }
 0x501   : > { %v2875_v15 = vsel %vm2863_vm8, %v2857_v58, %v2869_v13 }
 0x502   : > { %2882 = vst.msk [vmem:[%s6628_s28 + $0x28] sm:$0x3f] %vm2876_vm5, %v2875_v15 }
 0x503 PF: > { %s13_s12 = sadd.s32 1, %s3134_s12  }
 0x504   : > { %p10_p4 = scmp.ge.s32.totalorder %s13_s12, 4  }
 0x506   :  { %12 = sbr.rel (!%p10_p4) target bundleno = 1 (0x1), region = 74 }

// kernel: tpu_custom_call.1
= control target key start
LH: loop header
LB: loop body
LE: loop exit
PB: predicated region body
PF: predicated region fallthrough
CT: control target
= control target key end

     0   :  { %s7058_s12 = smov 0   ;;  %s10914_s0 = inlined_call_operand.vmem [shape: f32[2,16,16,4], index: 0, kind: input, shape index: {}]   ;;  %s10915_s1 = inlined_call_operand.vmem [shape: bf16[25,4,10], index: 1, kind: input, shape index: {}]   ;;  %s10916_s2 = inlined_call_operand.vmem [shape: f32[1,10], index: 2, kind: input, shape index: {}]   ;;  %s10917_s3 = inlined_call_operand.vmem [shape: f32[2,6,6,10], index: 3, kind: output, shape index: {}]  }
   0x1 LB: > { %s5398_s13 = sadd.s32 4294967295, %s7034_s12   ;;  %p5402_p0 = scmp.ge.s32.totalorder %s7034_s12, 1  ;;  %s7034_s12 = sphi %s7058_s12, %s13_s12  }
   0x2   : > { %p137_p1 = scmp.lt.s32.totalorder %s7034_s12, 3 }
   0x4   : > { %p138_p2 = pnand %p5402_p0, %p137_p1 }
   0x6   : > { %141 = sbr.rel (%p138_p2) target bundleno = 1180 (0x49c), region = 32 }
   0xd   : > { %v5418_v0 = vld [vmem:[%s10915_s1 + $0x2] sm:$0x3]  ;;  %vm496_vm0 = vcmask 1041408   ;;  %v10919_v1 = vmov 0.0   ;;  %p161_p3 = scmp.lt.s32.totalorder %s5398_s13, 1  ;;  %vm7037_vm1 = vmmov 0  }
   0xe   : > { %5972 = vmatprep.subr.bf16.mxu0 %v10919_v1  ;;  %6922 = vmatprep.subr.bf16.mxu1 %v10919_v1  ;;  %v498_v2 = vsel %vm496_vm0, %v5418_v0, 0  ;;  %vm298_vm2 = vcmask 1042432   ;;  %vm299_vm3 = vcmask 1046532   ;;  %v5449_v3 = vld [vmem:[%s10915_s1 + $0x4] sm:$0x3]  ;;  %vm468_vm4 = vcmask 31744  }
   0xf   : > { %5973 = vmatpush3.bf16.msra.mxu0 %v498_v2  ;;  %6923 = vmatpush3.bf16.msra.mxu1 %v498_v2  ;;  %s11911_s13 = smov (!%p161_p3, %s5398_s13), 1  ;;  %v285_v4 = vld [vmem:[%s10915_s1] sm:$0x3]  ;;  %vm7124_vm5 = vmor %vm298_vm2, %vm299_vm3  ;;  %v11264_v15 = vmov 0  ;;  %v937_v23 = vsel %vm496_vm0, %v5449_v3, 0  ;;  %vm740_vm6 = vcmask 1045508  }
  0x10   : > { %5974 = vmatprep.mubr.msk.bf16.mxu0 %vm7037_vm1, %v10919_v1  ;;  %5994 = vmatprep.mubr.msk.bf16.mxu1 %vm7037_vm1, %v10919_v1  ;;  %s5721_s16 = sshll.u32 %s11911_s13, 8  ;;  %v11265_v15 = vsel %vm7124_vm5, 4294967295, %v11264_v15  ;;  %v633_v27 = vsel %vm496_vm0, %v285_v4, 0  ;;  %vm7542_vm7 = vmor %vm496_vm0, %vm740_vm6  ;;  %vm1062_vm8 = vcmask 1040384   ;;  %vm1063_vm9 = vcmask 1044484   ;;  %s6924_s21 = smul.u32 48, %s11911_s13 }
  0x11   : > { %6048 = vmatprep.subr.bf16.mxu0 %v10919_v1  ;;  %6010 = vmatprep.subr.bf16.mxu1 %v10919_v1  ;;  %s7084_s19 = scalar_lea.vmem %s10914_s0, %s5721_s16  ;;  %11266 = vst [vmem:[#allocation8_spill] sm:$0xff] %v11265_v15  ;;  %vm7862_vm10 = vmor %vm1062_vm8, %vm1063_vm9  ;;  %vm5216_vm11 = vcmask 76800   ;;  %vm5214_vm12 = vcmask 80896   ;;  %vm5336_vm14 = vcmask 78848  }
  0x12   : > { %v7093_v5 = vld [vmem:[%s7084_s19] sm:$0xff]  ;;  %v7096_v6 = vld [vmem:[%s7084_s19 + $0x8] sm:$0xff]  ;;  %v7099_v7 = vld [vmem:[%s7084_s19 + $0x10] sm:$0xff]  ;;  %s10855_s23 = scalar_lea.vmem %s10917_s3, %s6924_s21 }
  0x13   : > { %11259 = vst [vmem:[#allocation3_spill] sm:$0xff] %v7093_v5  ;;  %11260 = vst [vmem:[#allocation4_spill] sm:$0xff] %v7096_v6  ;;  %v7103_v8 = vcombine.high %v7093_v5, %v7093_v5  ;;  %v7107_v9 = vcombine.high %v7099_v7, %v7099_v7  ;;  %v7111_v10 = vcombine.high %v7096_v6, %v7096_v6  ;;  %v5406_v11 = vrot.slane %v7093_v5, 9  ;;  %v7115_v12 = vld [vmem:[%s7084_s19 + $0x68] sm:$0xff]  ;;  %v7118_v13 = vld [vmem:[%s7084_s19 + $0x70] sm:$0xff] }
  0x14   : > { %v7121_v14 = vld [vmem:[%s7084_s19 + $0x78] sm:$0xff]  ;;  %v306_v16 = vrot.slane %v7096_v6, 5  ;;  %v5407_v17 = vrot.slane %v7099_v7, 9  ;;  %v7132_v18 = vcombine.high %v7118_v13, %v7118_v13  ;;  %v7136_v19 = vcombine.high %v7115_v12, %v7115_v12  ;;  %v7163_v37 = vld [vmem:[%s7084_s19 + $0x20] sm:$0xff]  ;;  %v7182_v48 = vld [vmem:[%s7084_s19 + $0x28] sm:$0xff] }
  0x15   : > { %11261 = vst [vmem:[#allocation5_spill] sm:$0xff] %v7103_v8  ;;  %11262 = vst [vmem:[#allocation6_spill] sm:$0xff] %v7107_v9  ;;  %v303_v20 = vrot.slane %v7103_v8, 5  ;;  %v309_v21 = vrot.slane %v7111_v10, 5  ;;  %v313_v22 = vrot.slane %v7107_v9, 5  ;;  %v7144_v25 = vcombine.high %v7121_v14, %v7121_v14  ;;  %v7160_v36 = vld [vmem:[%s7084_s19 + $0x18] sm:$0xff] }
  0x16   : > { %11263 = vst [vmem:[#allocation7_spill] sm:$0xff] %v7111_v10  ;;  %11267 = vst [vmem:[#allocation9_spill] sm:$0xff] %v7136_v19  ;;  %v308_v24 = vrot.slane %v306_v16, 4  ;;  %v10918_v26 = vrot.slane %v7115_v12, 5  ;;  %v369_v31 = vrot.slane %v7136_v19, 5  ;;  %v5413_v34 = vrot.slane %v7118_v13, 9 }
  0x17   : > { %11268 = vst [vmem:[#allocation10_spill] sm:$0xff] %v7144_v25  ;;  %v304_v28 = vsel %vm7124_vm5, %v5406_v11, %v303_v20  ;;  %v305_v29 = vrot.slane %v303_v20, 4  ;;  %v314_v30 = vsel %vm7124_vm5, %v5407_v17, %v313_v22  ;;  %v373_v35 = vrot.slane %v7132_v18, 5  ;;  %v7198_v55 = vld [vmem:[%s7084_s19 + $0x80] sm:$0xff]  ;;  %v7208_v60 = vld [vmem:[%s7084_s19 + $0x88] sm:$0xff]  ;;  %v7211_v61 = vld [vmem:[%s7084_s19 + $0x90] sm:$0xff] }
  0x18   : > { %v310_v32 = vsel %vm7124_vm5, %v308_v24, %v309_v21  ;;  %v368_v33 = vrot.slane %v10918_v26, 4  ;;  %v376_v40 = vrot.slane %v7121_v14, 5  ;;  %v379_v41 = vrot.slane %v7144_v25, 5 }
  0x19   : > { %v307_v38 = vsel %vm7124_vm5, %v305_v29, %v306_v16  ;;  %v422_v39 = vcombine.low %v310_v32, %v314_v30  ;;  %v7175_v44 = vsel %vm7124_vm5, %v5413_v34, %v373_v35  ;;  %v375_v45 = vrot.slane %v373_v35, 4  ;;  %v7261_v35 = vld [vmem:[%s7084_s19 + $0x38] sm:$0xff] }
  0x1a   : > { %v421_v42 = vcombine.low %v304_v28, %v307_v38  ;;  %v7171_v43 = vsel %vm7124_vm5, %v368_v33, %v369_v31  ;;  %11270 = vst [vmem:[#allocation12_spill] sm:$0xff] %v7175_v44  ;;  %v378_v46 = vrot.slane %v376_v40, 4  ;;  %v7186_v49 = vcombine.high %v7163_v37, %v7163_v37 }
  0x1b   : > { %11269 = vst [vmem:[#allocation11_spill] sm:$0xff] %v7171_v43  ;;  %v7179_v47 = vcombine.low %v7171_v43, %v7175_v44  ;;  %v7190_v50 = vcombine.high %v7160_v36, %v7160_v36  ;;  %v7194_v52 = vsel %vm7124_vm5, %v375_v45, %v376_v40  ;;  %v315_v53 = vrot.slane %v313_v22, 4  ;;  %v7466_v43 = vld [vmem:[%s7084_s19 + $0x58] sm:$0xff] }
  0x1c   : > { %v457_v51 = vpack.c.bf16 %v422_v39, %v421_v42  ;;  %11272 = vst [vmem:[#allocation14_spill] sm:$0xff] %v7194_v52  ;;  %v316_v54 = vrot.slane %v7160_v36, 5  ;;  %v7202_v56 = vsel %vm7124_vm5, %v378_v46, %v379_v41  ;;  %v5408_v58 = vrot.slane %v7163_v37, 9 }
  0x1d   : > { %11271 = vst [vmem:[#allocation13_spill] sm:$0xff] %v7179_v47  ;;  %11273 = vst [vmem:[#allocation15_spill] sm:$0xff] %v7202_v56  ;;  %v319_v57 = vrot.slane %v7190_v50, 5  ;;  %v323_v59 = vrot.slane %v7186_v49, 5  ;;  %v7216_v62 = vcombine.low %v7194_v52, %v7202_v56  ;;  %v326_v2 = vrot.slane %v7182_v48, 5 }
  0x1e   : > { %5975 = vmatmul.mubr.msk.bf16.vlgmr.msra.gmra.mrb[0].mxu0 %vm468_vm4, %v457_v51  ;;  %v317_v63 = vsel %vm7124_vm5, %v315_v53, %v316_v54  ;;  %v318_v0 = vrot.slane %v316_v54, 4  ;;  %v7227_v16 = vcombine.high %v7198_v55, %v7198_v55  ;;  %v7237_v21 = vcombine.high %v7211_v61, %v7211_v61 }
  0x1f   : > { %11274 = vst [vmem:[#allocation16_spill] sm:$0xff] %v7216_v62  ;;  %6049 = vmatpush3.bf16.msra.mxu0 %v937_v23  ;;  %5978 = vmatprep.mubr.msk.bf16.mxu0 %vm7037_vm1, %v10919_v1  ;;  %v324_v3 = vsel %vm7124_vm5, %v5408_v58, %v323_v59  ;;  %v325_v4 = vrot.slane %v323_v59, 4  ;;  %v1789_v11 = vcombine.low %v314_v30, %v317_v63  ;;  %v7244_v23 = vld [vmem:[%s7084_s19 + $0x30] sm:$0xff]  ;;  %v5414_v30 = vrot.slane %v7198_v55, 9  ;;  %v7292_v58 = vld [vmem:[%s7084_s19 + $0xa0] sm:$0xff] }
  0x20   : > { %11275 = vst [vmem:[#allocation17_spill] sm:$0xff] %v7227_v16  ;;  %v7231_v17 = vpack.c.bf16 %v7216_v62, %v7179_v47  ;;  %v320_v20 = vsel %vm7124_vm5, %v318_v0, %v319_v57  ;;  %11277 = vst [vmem:[#allocation19_spill] sm:$0xff] %v7237_v21  ;;  %v7241_v22 = vcombine.high %v7208_v60, %v7208_v60  ;;  %6124 = vmatprep.subr.bf16.mxu0 %v10919_v1 }
  0x21   : > { %v7249_v24 = vsel %vm7124_vm5, %v325_v4, %v326_v2  ;;  %v423_v28 = vcombine.low %v317_v63, %v320_v20  ;;  %v1790_v29 = vcombine.low %v320_v20, %v324_v3  ;;  %v383_v32 = vrot.slane %v7227_v16, 5  ;;  %v7306_v4 = vld [vmem:[%s7084_s19 + $0x98] sm:$0xff] }
  0x22   : > { %11276 = vst [vmem:[#allocation18_spill] sm:$0xff] %v7231_v17  ;;  %11278 = vst [vmem:[#allocation20_spill] sm:$0xff] %v7241_v22  ;;  %5995 = vmatmul.mubr.msk.bf16.vlgmr.msra.gmra.mrb[0].mxu1 %vm468_vm4, %v7231_v17  ;;  %v7255_v31 = vcombine.low %v324_v3, %v7249_v24  ;;  %v386_v33 = vrot.slane %v7208_v60, 5  ;;  %v389_v34 = vrot.slane %v7241_v22, 5  ;;  %v5415_v39 = vrot.slane %v7211_v61, 9 }
  0x23   : > { %11279 = vst [vmem:[#allocation21_spill] sm:$0xff] %v7249_v24  ;;  %6011 = vmatpush3.bf16.msra.mxu1 %v633_v27  ;;  %5998 = vmatprep.mubr.msk.bf16.mxu1 %vm7037_vm1, %v10919_v1  ;;  %v7265_v38 = vpack.c.bf16 %v1790_v29, %v1789_v11  ;;  %v393_v40 = vrot.slane %v7237_v21, 5  ;;  %v7271_v41 = vcombine.high %v7244_v23, %v7244_v23  ;;  %v385_v27 = vrot.slane %v383_v32, 4 }
  0x24   : > { %11280 = vst [vmem:[#allocation22_spill] sm:$0xff] %v7255_v31  ;;  %v458_v42 = vpack.c.bf16 %v7255_v31, %v423_v28  ;;  %v7276_v45 = vsel %vm7124_vm5, %v5414_v30, %v383_v32  ;;  %v388_v46 = vrot.slane %v386_v33, 4  ;;  %6086 = vmatprep.subr.bf16.mxu1 %v10919_v1  ;;  %v7285_v53 = vcombine.high %v7182_v48, %v7182_v48 }
  0x25   : > { %11281 = vst [vmem:[#allocation23_spill] sm:$0xff] %v7265_v38  ;;  %11282 = vst [vmem:[#allocation24_spill] sm:$0xff] %v7276_v45  ;;  %v7281_v51 = vsel %vm7124_vm5, %v5415_v39, %v393_v40  ;;  %v7289_v54 = vcombine.high %v7261_v35, %v7261_v35  ;;  %v328_v57 = vrot.slane %v326_v2, 4  ;;  %v7297_v59 = vsel %vm7124_vm5, %v385_v27, %v386_v33 }
  0x26   : > { %11283 = vst [vmem:[#allocation25_spill] sm:$0xff] %v7281_v51  ;;  %11284 = vst [vmem:[#allocation26_spill] sm:$0xff] %v7285_v53  ;;  %5979 = vmatmul.mubr.msk.bf16.gmra.mrb[4].mxu0 %vm468_vm4, %v458_v42  ;;  %v7301_v63 = vsel %vm7124_vm5, %v388_v46, %v389_v34  ;;  %v5409_v0 = vrot.slane %v7244_v23, 9  ;;  %v333_v3 = vrot.slane %v7271_v41, 5  ;;  %v7310_v2 = vcombine.low %v7276_v45, %v7297_v59 }
  0x27   : > { %11285 = vst [vmem:[#allocation27_spill] sm:$0xff] %v7297_v59  ;;  %11286 = vst [vmem:[#allocation28_spill] sm:$0xff] %v7301_v63  ;;  %v7314_v11 = vcombine.low %v7301_v63, %v7281_v51  ;;  %5982 = vmatprep.mubr.msk.bf16.mxu0 %vm7037_vm1, %v10919_v1  ;;  %v329_v20 = vrot.slane %v7285_v53, 5  ;;  %v336_v28 = vrot.slane %v7261_v35, 5  ;;  %v339_v32 = vrot.slane %v7289_v54, 5 }
  0x28   : > { %11287 = vst [vmem:[#allocation29_spill] sm:$0xff] %v7310_v2  ;;  %v7322_v29 = vsel %vm7124_vm5, %v5409_v0, %v333_v3  ;;  %v335_v30 = vrot.slane %v333_v3, 4  ;;  %v7327_v33 = vcombine.high %v7292_v58, %v7292_v58  ;;  %v7339_v27 = vcombine.high %v7306_v4, %v7306_v4  ;;  %v7350_v3 = vld [vmem:[%s7084_s19 + $0xa8] sm:$0xff] }
  0x29   : > { %11288 = vst [vmem:[#allocation30_spill] sm:$0xff] %v7314_v11  ;;  %11289 = vst [vmem:[#allocation31_spill] sm:$0xff] %v7322_v29  ;;  %v7331_v34 = vpack.c.bf16 %v7314_v11, %v7310_v2  ;;  %v7335_v39 = vsel %vm7124_vm5, %v328_v57, %v329_v20  ;;  %v338_v42 = vrot.slane %v336_v28, 4  ;;  %v395_v26 = vrot.slane %v393_v40, 4  ;;  %v7354_v57 = vld [vmem:[%s7084_s19 + $0x40] sm:$0xff]  ;;  %v7366_v11 = vld [vmem:[%s7084_s19 + $0x48] sm:$0xff] }
  0x2a   : > { %11291 = vst [vmem:[#allocation33_spill] sm:$0xff] %v7335_v39  ;;  %v7343_v46 = vsel %vm7124_vm5, %v335_v30, %v336_v28  ;;  %v7347_v0 = vcombine.low %v7335_v39, %v7322_v29  ;;  %v396_v1 = vrot.slane %v7306_v4, 5  ;;  %v399_v28 = vrot.slane %v7339_v27, 5  ;;  %v7369_v40 = vld [vmem:[%s7084_s19 + $0x50] sm:$0xff] }
  0x2b   : > { %11290 = vst [vmem:[#allocation32_spill] sm:$0xff] %v7331_v34  ;;  %11292 = vst [vmem:[#allocation34_spill] sm:$0xff] %v7343_v46  ;;  %5999 = vmatmul.mubr.msk.bf16.gmra.mrb[4].mxu1 %vm468_vm4, %v7331_v34  ;;  %v7360_v20 = vsel %vm7124_vm5, %v338_v42, %v339_v32  ;;  %v5416_v30 = vrot.slane %v7292_v58, 9  ;;  %v403_v17 = vrot.slane %v7327_v33, 5  ;;  %v11295_v2 = vmov 0.0  }
  0x2c   : > { %11293 = vst [vmem:[#allocation35_spill] sm:$0xff] %v7347_v0  ;;  %11294 = vst [vmem:[#allocation36_spill] sm:$0xff] %v7360_v20  ;;  %6002 = vmatprep.mubr.msk.bf16.mxu1 %vm7037_vm1, %v11295_v2  ;;  %v7375_v34 = vcombine.low %v7343_v46, %v7360_v20  ;;  %v7381_v42 = vsel %vm7124_vm5, %v395_v26, %v396_v1  ;;  %v398_v62 = vrot.slane %v396_v1, 4  ;;  %v406_v39 = vrot.slane %v7350_v3, 5 }
  0x2d   : > { %11297 = vst [vmem:[#allocation38_spill] sm:$0xff] %v7381_v42  ;;  %v7385_v47 = vsel %vm7124_vm5, %v5416_v30, %v403_v17  ;;  %v405_v24 = vrot.slane %v403_v17, 4  ;;  %v7390_v38 = vcombine.high %v7354_v57, %v7354_v57  ;;  %v7400_v1 = vcombine.high %v7369_v40, %v7369_v40  ;;  %v7407_v17 = vld [vmem:[%s7084_s19 + $0xb0] sm:$0xff] }
  0x2e   : > { %11296 = vst [vmem:[#allocation37_spill] sm:$0xff] %v7375_v34  ;;  %11298 = vst [vmem:[#allocation39_spill] sm:$0xff] %v7385_v47  ;;  %v459_v32 = vpack.c.bf16 %v7375_v34, %v7347_v0  ;;  %v7396_v31 = vsel %vm7124_vm5, %v398_v62, %v399_v28  ;;  %v7404_v26 = vcombine.high %v7366_v11, %v7366_v11  ;;  %v5410_v62 = vrot.slane %v7354_v57, 9  ;;  %v7420_v0 = vld [vmem:[%s7084_s19 + $0xb8] sm:$0xff] }
  0x2f   : > { %11299 = vst [vmem:[#allocation40_spill] sm:$0xff] %v7396_v31  ;;  %11300 = vst [vmem:[#allocation41_spill] sm:$0xff] %v7400_v1  ;;  %v7411_v30 = vsel %vm7124_vm5, %v405_v24, %v406_v39  ;;  %v7415_v34 = vcombine.low %v7381_v42, %v7396_v31  ;;  %v343_v28 = vrot.slane %v7390_v38, 5  ;;  %v346_v24 = vrot.slane %v7366_v11, 5 }
  0x30   : > { %11301 = vst [vmem:[#allocation42_spill] sm:$0xff] %v7404_v26  ;;  %11302 = vst [vmem:[#allocation43_spill] sm:$0xff] %v7407_v17  ;;  %5983 = vmatmul.mubr.msk.bf16.gmra.mrb[8].mxu0 %vm468_vm4, %v459_v32  ;;  %v7425_v51 = vcombine.low %v7385_v47, %v7411_v30  ;;  %v349_v59 = vrot.slane %v7404_v26, 5  ;;  %v5411_v31 = vrot.slane %v7369_v40, 9  ;;  %v353_v32 = vrot.slane %v7400_v1, 5 }
  0x31   : > { %11303 = vst [vmem:[#allocation44_spill] sm:$0xff] %v7411_v30  ;;  %11304 = vst [vmem:[#allocation45_spill] sm:$0xff] %v7415_v34  ;;  %5986 = vmatprep.mubr.msk.bf16.mxu0 %vm7037_vm1, %v11295_v2  ;;  %v7434_v42 = vsel %vm7124_vm5, %v5410_v62, %v343_v28  ;;  %v345_v63 = vrot.slane %v343_v28, 4  ;;  %v7439_v30 = vcombine.high %v7407_v17, %v7407_v17  ;;  %v348_v56 = vrot.slane %v346_v24, 4  ;;  %v7454_v28 = vld [vmem:[%s7084_s19 + $0x60] sm:$0xff] }
  0x32   : > { %11305 = vst [vmem:[#allocation46_spill] sm:$0xff] %v7420_v0  ;;  %11306 = vst [vmem:[#allocation47_spill] sm:$0xff] %v7425_v51  ;;  %v7443_v47 = vpack.c.bf16 %v7425_v51, %v7415_v34  ;;  %v7447_v45 = vcombine.high %v7350_v3, %v7350_v3  ;;  %v7451_v62 = vcombine.high %v7420_v0, %v7420_v0  ;;  %v408_v51 = vrot.slane %v406_v39, 4 }
  0x33   : > { %11307 = vst [vmem:[#allocation48_spill] sm:$0xff] %v7434_v42  ;;  %11308 = vst [vmem:[#allocation49_spill] sm:$0xff] %v7439_v30  ;;  %v7458_v44 = vsel %vm7124_vm5, %v345_v63, %v346_v24  ;;  %v7462_v52 = vsel %vm7124_vm5, %v5411_v31, %v353_v32  ;;  %v5417_v34 = vrot.slane %v7407_v17, 9  ;;  %v7472_v20 = vsel %vm7124_vm5, %v348_v56, %v349_v59 }
  0x34   : > { %11309 = vst [vmem:[#allocation50_spill] sm:$0xff] %v7443_v47  ;;  %11310 = vst [vmem:[#allocation51_spill] sm:$0xff] %v7447_v45  ;;  %6003 = vmatmul.mubr.msk.bf16.gmra.mrb[8].mxu1 %vm468_vm4, %v7443_v47  ;;  %v7476_v63 = vcombine.low %v7434_v42, %v7458_v44  ;;  %v409_v24 = vrot.slane %v7447_v45, 5  ;;  %v413_v31 = vrot.slane %v7439_v30, 5  ;;  %v7484_v39 = vcombine.low %v7472_v20, %v7462_v52 }
  0x35   : > { %11311 = vst [vmem:[#allocation52_spill] sm:$0xff] %v7451_v62  ;;  %11312 = vst [vmem:[#allocation53_spill] sm:$0xff] %v7454_v28  ;;  %6006 = vmatprep.mubr.msk.bf16.mxu1 %vm7037_vm1, %v11295_v2  ;;  %v416_v47 = vrot.slane %v7420_v0, 5  ;;  %v419_v56 = vrot.slane %v7451_v62, 5  ;;  %v7490_v59 = vcombine.high %v7454_v28, %v7454_v28  ;;  %v5412_v17 = vrot.slane %v7454_v28, 9 }
  0x36   : > { %11313 = vst [vmem:[#allocation54_spill] sm:$0xff] %v7458_v44  ;;  %11314 = vst [vmem:[#allocation55_spill] sm:$0xff] %v7462_v52  ;;  %v7494_v44 = vsel %vm7124_vm5, %v408_v51, %v409_v24  ;;  %v7498_v42 = vsel %vm7124_vm5, %v5417_v34, %v413_v31  ;;  %v415_v29 = vrot.slane %v413_v31, 4  ;;  %v7502_v52 = vcombine.high %v7466_v43, %v7466_v43 }
  0x37   : > { %11315 = vst [vmem:[#allocation56_spill] sm:$0xff] %v7472_v20  ;;  %11316 = vst [vmem:[#allocation57_spill] sm:$0xff] %v7476_v63  ;;  %v7506_v20 = vpack.c.bf16 %v7484_v39, %v7476_v63  ;;  %v418_v46 = vrot.slane %v416_v47, 4  ;;  %v7510_v62 = vcombine.low %v7494_v44, %v7498_v42  ;;  %v355_v51 = vrot.slane %v353_v32, 4 }
  0x38   : > { %11317 = vst [vmem:[#allocation58_spill] sm:$0xff] %v7484_v39  ;;  %11318 = vst [vmem:[#allocation59_spill] sm:$0xff] %v7494_v44  ;;  %v7514_v24 = vsel %vm7124_vm5, %v415_v29, %v416_v47  ;;  %v356_v34 = vrot.slane %v7466_v43, 5  ;;  %v359_v31 = vrot.slane %v7502_v52, 5  ;;  %v363_v32 = vrot.slane %v7490_v59, 5 }
  0x39   : > { %11319 = vst [vmem:[#allocation60_spill] sm:$0xff] %v7498_v42  ;;  %11320 = vst [vmem:[#allocation61_spill] sm:$0xff] %v7506_v20  ;;  %5987 = vmatmul.mubr.msk.bf16.gmra.mrb[12].mxu0 %vm468_vm4, %v7506_v20  ;;  %v7523_v39 = vsel %vm7124_vm5, %v418_v46, %v419_v56  ;;  %v750_v20 = vrot.slane %v7111_v10, 6  ;;  %v11327_v42 = vmov 0  ;;  %v5471_v10 = vld [vmem:[%s10915_s1 + $0x6] sm:$0x3] }
  0x3a   : > { %11321 = vst [vmem:[#allocation62_spill] sm:$0xff] %v7510_v62  ;;  %11322 = vst [vmem:[#allocation63_spill] sm:$0xff] %v7514_v24  ;;  %v7528_v47 = vcombine.low %v7514_v24, %v7523_v39  ;;  %5990 = vmatprep.mubr.msk.bf16.mxu0 %vm7037_vm1, %v11295_v2  ;;  %v7534_v29 = vsel %vm7124_vm5, %v355_v51, %v356_v34  ;;  %v358_v63 = vrot.slane %v356_v34, 4  ;;  %v365_v56 = vrot.slane %v363_v32, 4 }
  0x3b   : > { %11323 = vst [vmem:[#allocation64_spill] sm:$0xff] %v7523_v39  ;;  %11325 = vst [vmem:[#allocation66_spill] sm:$0xff] %v7534_v29  ;;  %v7539_v46 = vsel %vm7124_vm5, %v5412_v17, %v363_v32  ;;  %v11328_v42 = vsel %vm7542_vm7, 4294967295, %v11327_v42  ;;  %v240_v34 = vcombine.low %v7093_v5, %v7103_v8  ;;  %v5437_v17 = vrot.slane %v7093_v5, 10 }
  0x3c   : > { %11324 = vst [vmem:[#allocation65_spill] sm:$0xff] %v7528_v47  ;;  %11326 = vst [vmem:[#allocation67_spill] sm:$0xff] %v7539_v46  ;;  %v7548_v39 = vpack.c.bf16 %v7528_v47, %v7510_v62  ;;  %v7552_v51 = vsel %vm7124_vm5, %v358_v63, %v359_v31  ;;  %v11332_v32 = vrot.slane %v7115_v12, 5  ;;  %v241_v47 = vcombine.low %v7096_v6, %v7099_v7 }
  0x3d   : > { %11329 = vst [vmem:[#allocation68_spill] sm:$0xff] %v11328_v42  ;;  %11331 = vst [vmem:[#allocation70_spill] sm:$0xff] %v7552_v51  ;;  %v7565_v44 = vcombine.low %v7534_v29, %v7552_v51  ;;  %v744_v63 = vrot.slane %v7103_v8, 6  ;;  %v5438_v62 = vrot.slane %v7099_v7, 10  ;;  %v757_v5 = vrot.slane %v7160_v36, 6 }
  0x3e   : > { %11330 = vst [vmem:[#allocation69_spill] sm:$0xff] %v7548_v39  ;;  %v7561_v24 = vsel %vm7124_vm5, %v365_v56, %v11332_v32  ;;  %6007 = vmatmul.mubr.msk.bf16.gmra.mrb[12].mxu1 %vm468_vm4, %v7548_v39  ;;  %v7578_v56 = vcombine.low %v7163_v37, %v7186_v49  ;;  %v747_v32 = vrot.slane %v7096_v6, 6  ;;  %v754_v39 = vrot.slane %v7107_v9, 6 }
  0x3f   : > { %11333 = vst [vmem:[#allocation71_spill] sm:$0xff] %v7561_v24  ;;  %11334 = vst [vmem:[#allocation72_spill] sm:$0xff] %v7565_v44  ;;  %v7574_v31 = vcombine.low %v7539_v46, %v7561_v24  ;;  %6012 = vmatprep.mubr.msk.bf16.mxu1 %vm7037_vm1, %v11295_v2  ;;  %v745_v15 = vsel %vm7542_vm7, %v5437_v17, %v744_v63  ;;  %v746_v51 = vrot.slane %v744_v63, 4  ;;  %v759_v0 = vrot.slane %v757_v5, 4 }
  0x40   : > { %11336 = vst [vmem:[#allocation74_spill] sm:$0xff] %v7578_v56  ;;  %v7589_v24 = vcombine.low %v7182_v48, %v7244_v23  ;;  %v749_v29 = vrot.slane %v747_v32, 4  ;;  %v755_v63 = vsel %vm7542_vm7, %v5438_v62, %v754_v39  ;;  %v756_v6 = vrot.slane %v754_v39, 4 }
  0x41   : > { %11335 = vst [vmem:[#allocation73_spill] sm:$0xff] %v7574_v31  ;;  %v7593_v46 = vpack.c.bf16 %v7574_v31, %v7565_v44  ;;  %v748_v17 = vsel %vm7542_vm7, %v746_v51, %v747_v32  ;;  %v276_v31 = vpack.c.bf16 %v241_v47, %v240_v34  ;;  %v760_v32 = vrot.slane %v7190_v50, 6 }
  0x42   : > { %11337 = vst [vmem:[#allocation75_spill] sm:$0xff] %v7589_v24  ;;  %v751_v44 = vsel %vm7542_vm7, %v749_v29, %v750_v20  ;;  %v862_v8 = vcombine.low %v745_v15, %v748_v17  ;;  %v758_v62 = vsel %vm7542_vm7, %v756_v6, %v757_v5  ;;  %v5439_v39 = vrot.slane %v7163_v37, 10  ;;  %v5487_v5 = vld [vmem:[%s10915_s1 + $0x8] sm:$0x3] }
  0x43   : > { %11338 = vst [vmem:[#allocation76_spill] sm:$0xff] %v7593_v46  ;;  %5991 = vmatmul.mubr.msk.bf16.gmra.mrb[16].mxu0 %vm468_vm4, %v7593_v46  ;;  %v863_v51 = vcombine.low %v751_v44, %v755_v63  ;;  %v1260_v45 = vsel %vm496_vm0, %v5471_v10, 0  ;;  %v764_v47 = vrot.slane %v7186_v49, 6  ;;  %v767_v34 = vrot.slane %v7182_v48, 6 }
  0x44   : > { %6050 = vmatprep.mubr.msk.bf16.mxu0 %vm7037_vm1, %v11295_v2  ;;  %v1999_v20 = vcombine.low %v755_v63, %v758_v62  ;;  %v7620_v15 = vcombine.low %v7107_v9, %v7160_v36  ;;  %v770_v6 = vrot.slane %v7285_v53, 6  ;;  %v761_v10 = vsel %vm7542_vm7, %v759_v0, %v760_v32 }
  0x45   : > { %v898_v29 = vpack.c.bf16 %v863_v51, %v862_v8  ;;  %v765_v44 = vsel %vm7542_vm7, %v5439_v39, %v764_v47  ;;  %v766_v17 = vrot.slane %v764_v47, 4  ;;  %v769_v63 = vrot.slane %v767_v34, 4 }
  0x46   : > { %11339 = vst [vmem:[#allocation77_spill] sm:$0xff] %v7620_v15  ;;  %6013 = vmatmul.mubr.msk.bf16.vlgmr.msra.gmra.mrb[16].mxu1 %vm468_vm4, %v276_v31  ;;  %v2000_v8 = vcombine.low %v761_v10, %v765_v44  ;;  %v5440_v51 = vrot.slane %v7244_v23, 10  ;;  %v774_v46 = vrot.slane %v7271_v41, 6  ;;  %v1460_v30 = vsel %vm496_vm0, %v5487_v5, 0 }
  0x47   : > { %6087 = vmatpush3.bf16.msra.mxu1 %v1260_v45  ;;  %6016 = vmatprep.mubr.msk.bf16.mxu1 %vm7037_vm1, %v11295_v2  ;;  %v7638_v31 = vsel %vm7542_vm7, %v766_v17, %v767_v34  ;;  %v7642_v0 = vsel %vm7542_vm7, %v769_v63, %v770_v6  ;;  %v777_v45 = vrot.slane %v7261_v35, 6  ;;  %v277_v47 = vpack.c.bf16 %v7578_v56, %v7620_v15 }
  0x48   : > { %11340 = vst [vmem:[#allocation78_spill] sm:$0xff] %v7638_v31  ;;  %11341 = vst [vmem:[#allocation79_spill] sm:$0xff] %v7642_v0  ;;  %6162 = vmatprep.subr.bf16.mxu1 %v11295_v2  ;;  %v7646_v32 = vpack.c.bf16 %v2000_v8, %v1999_v20  ;;  %v7650_v39 = vsel %vm7542_vm7, %v5440_v51, %v774_v46  ;;  %v864_v34 = vcombine.low %v758_v62, %v761_v10 }
  0x49   : > { %11343 = vst [vmem:[#allocation81_spill] sm:$0xff] %v7650_v39  ;;  %v7656_v5 = vcombine.low %v765_v44, %v7638_v31  ;;  %v7660_v6 = vcombine.low %v7642_v0, %v7650_v39  ;;  %v776_v20 = vrot.slane %v774_v46, 4  ;;  %v779_v17 = vrot.slane %v777_v45, 4 }
  0x4a   : > { %11342 = vst [vmem:[#allocation80_spill] sm:$0xff] %v7646_v32  ;;  %v780_v63 = vrot.slane %v7289_v54, 6  ;;  %v7671_v62 = vcombine.low %v7271_v41, %v7261_v35  ;;  %v787_v44 = vrot.slane %v7366_v11, 6  ;;  %v7758_v0 = vcombine.low %v7454_v28, %v7490_v59 }
  0x4b   : > { %6051 = vmatmul.mubr.msk.bf16.vlgmr.msra.gmra.mrb[20].mxu0 %vm468_vm4, %v898_v29  ;;  %11344 = vst [vmem:[#allocation82_spill] sm:$0xff] %v7656_v5  ;;  %11345 = vst [vmem:[#allocation83_spill] sm:$0xff] %v7660_v6  ;;  %v784_v29 = vrot.slane %v7390_v38, 6  ;;  %v7679_v46 = vsel %vm7542_vm7, %v776_v20, %v777_v45  ;;  %v790_v20 = vrot.slane %v7404_v26, 6 }
  0x4c   : > { %6125 = vmatpush3.bf16.msra.mxu0 %v1460_v30  ;;  %6054 = vmatprep.mubr.msk.bf16.mxu0 %vm7037_vm1, %v11295_v2  ;;  %11346 = vst [vmem:[#allocation84_spill] sm:$0xff] %v7671_v62  ;;  %v899_v30 = vpack.c.bf16 %v7656_v5, %v864_v34  ;;  %11347 = vst [vmem:[#allocation85_spill] sm:$0xff] %v7679_v46  ;;  %v7683_v10 = vsel %vm7542_vm7, %v779_v17, %v780_v63  ;;  %v5441_v34 = vrot.slane %v7354_v57, 10 }
  0x4d   : > { %6200 = vmatprep.subr.bf16.mxu0 %v11295_v2  ;;  %11348 = vst [vmem:[#allocation86_spill] sm:$0xff] %v7683_v10  ;;  %v278_v51 = vpack.c.bf16 %v7671_v62, %v7589_v24  ;;  %v786_v8 = vrot.slane %v784_v29, 4  ;;  %v789_v45 = vrot.slane %v787_v44, 4  ;;  %v5442_v17 = vrot.slane %v7369_v40, 10  ;;  %11360 = vst [vmem:[#allocation98_spill] sm:$0xff] %v7758_v0 }
  0x4e   : > { %6017 = vmatmul.mubr.msk.bf16.gmra.mrb[20].mxu1 %vm468_vm4, %v277_v47  ;;  %v7691_v47 = vcombine.low %v7679_v46, %v7683_v10  ;;  %v794_v63 = vrot.slane %v7400_v1, 6  ;;  %v7705_v5 = vcombine.low %v7366_v11, %v7369_v40  ;;  %v7712_v24 = vsel %vm7542_vm7, %v5441_v34, %v784_v29 }
  0x4f   : > { %6020 = vmatprep.mubr.msk.bf16.mxu1 %vm7037_vm1, %v11295_v2  ;;  %11352 = vst [vmem:[#allocation90_spill] sm:$0xff] %v7712_v24  ;;  %v797_v62 = vrot.slane %v7466_v43, 6  ;;  %v7719_v15 = vsel %vm7542_vm7, %v786_v8, %v787_v44  ;;  %v7723_v31 = vsel %vm7542_vm7, %v789_v45, %v790_v20  ;;  %v804_v29 = vrot.slane %v7490_v59, 6 }
  0x50   : > { %11349 = vst [vmem:[#allocation87_spill] sm:$0xff] %v7691_v47  ;;  %11351 = vst [vmem:[#allocation89_spill] sm:$0xff] %v7705_v5  ;;  %v900_v56 = vpack.c.bf16 %v7691_v47, %v7660_v6  ;;  %v7737_v8 = vcombine.low %v7712_v24, %v7719_v15  ;;  %v796_v45 = vrot.slane %v794_v63, 4  ;;  %v5443_v47 = vrot.slane %v7454_v28, 10 }
  0x51   : > { %11353 = vst [vmem:[#allocation91_spill] sm:$0xff] %v7719_v15  ;;  %11354 = vst [vmem:[#allocation92_spill] sm:$0xff] %v7723_v31  ;;  %v799_v20 = vrot.slane %v797_v62, 4  ;;  %v806_v6 = vrot.slane %v804_v29, 4 }
  0x52   : > { %11357 = vst [vmem:[#allocation95_spill] sm:$0xff] %v7737_v8 }
  0x53   : > { %6055 = vmatmul.mubr.msk.bf16.gmra.mrb[24].mxu0 %vm468_vm4, %v899_v30  ;;  %v7701_v30 = vcombine.low %v7354_v57, %v7390_v38 }
  0x54   : > { %6058 = vmatprep.mubr.msk.bf16.mxu0 %vm7037_vm1, %v11295_v2 }
  0x55   : > { %11350 = vst [vmem:[#allocation88_spill] sm:$0xff] %v7701_v30  ;;  %v7732_v34 = vpack.c.bf16 %v7705_v5, %v7701_v30  ;;  %v814_v5 = vrot.slane %v7132_v18, 6  ;;  %v817_v30 = vrot.slane %v7121_v14, 6 }
  0x56   : > { %6021 = vmatmul.mubr.msk.bf16.gmra.mrb[24].mxu1 %vm468_vm4, %v278_v51  ;;  %v7727_v51 = vsel %vm7542_vm7, %v5442_v17, %v794_v63  ;;  %v800_v17 = vrot.slane %v7502_v52, 6  ;;  %v7754_v63 = vcombine.low %v7400_v1, %v7466_v43 }
  0x57   : > { %6024 = vmatprep.mubr.msk.bf16.mxu1 %vm7037_vm1, %v11295_v2  ;;  %11355 = vst [vmem:[#allocation93_spill] sm:$0xff] %v7727_v51  ;;  %11356 = vst [vmem:[#allocation94_spill] sm:$0xff] %v7732_v34  ;;  %v7741_v44 = vcombine.low %v7723_v31, %v7727_v51  ;;  %v7766_v51 = vcombine.low %v7115_v12, %v7118_v13  ;;  %v7780_v31 = vsel %vm7542_vm7, %v5443_v47, %v804_v29 }
  0x58   : > { %11359 = vst [vmem:[#allocation97_spill] sm:$0xff] %v7754_v63  ;;  %v7776_v15 = vsel %vm7542_vm7, %v799_v20, %v800_v17  ;;  %11365 = vst [vmem:[#allocation103_spill] sm:$0xff] %v7780_v31  ;;  %v816_v10 = vrot.slane %v814_v5, 4  ;;  %v819_v20 = vrot.slane %v817_v30, 4  ;;  %v820_v17 = vrot.slane %v7144_v25, 6 }
  0x59   : > { %11358 = vst [vmem:[#allocation96_spill] sm:$0xff] %v7741_v44  ;;  %v7762_v32 = vpack.c.bf16 %v7741_v44, %v7737_v8  ;;  %11362 = vst [vmem:[#allocation100_spill] sm:$0xff] %v7766_v51  ;;  %v7795_v47 = vpack.c.bf16 %v7758_v0, %v7754_v63  ;;  %v1083_v63 = vrot.slane %v7190_v50, 7 }
  0x5a   : > { %11364 = vst [vmem:[#allocation102_spill] sm:$0xff] %v7776_v15  ;;  %v7827_v0 = vsel %vm7542_vm7, %v819_v20, %v820_v17  ;;  %v1077_v20 = vrot.slane %v7107_v9, 7  ;;  %v1080_v17 = vrot.slane %v7160_v36, 7 }
  0x5b   : > { %6059 = vmatmul.mubr.msk.bf16.gmra.mrb[28].mxu0 %vm468_vm4, %v900_v56  ;;  %v807_v56 = vrot.slane %v7115_v12, 6  ;;  %11361 = vst [vmem:[#allocation99_spill] sm:$0xff] %v7762_v32  ;;  %v7788_v12 = vcombine.low %v7132_v18, %v7121_v14  ;;  %11368 = vst [vmem:[#allocation106_spill] sm:$0xff] %v7795_v47 }
  0x5c   : > { %6062 = vmatprep.mubr.msk.bf16.mxu0 %vm7037_vm1, %v11295_v2  ;;  %11375 = vst [vmem:[#allocation113_spill] sm:$0xff] %v7827_v0 }
  0x5d   : > { %v7784_v44 = vsel %vm7542_vm7, %v806_v6, %v807_v56  ;;  %11367 = vst [vmem:[#allocation105_spill] sm:$0xff] %v7788_v12  ;;  %v809_v8 = vrot.slane %v807_v56, 4 }
  0x5e   : > { %6025 = vmatmul.mubr.msk.bf16.gmra.mrb[28].mxu1 %vm468_vm4, %v7732_v34  ;;  %v7772_v34 = vsel %vm7542_vm7, %v796_v45, %v797_v62  ;;  %11366 = vst [vmem:[#allocation104_spill] sm:$0xff] %v7784_v44  ;;  %v810_v62 = vrot.slane %v7136_v19, 6  ;;  %v5444_v45 = vrot.slane %v7118_v13, 10  ;;  %v7805_v6 = vcombine.low %v7780_v31, %v7784_v44 }
  0x5f   : > { %6028 = vmatprep.mubr.msk.bf16.mxu1 %vm7037_vm1, %v11295_v2  ;;  %11363 = vst [vmem:[#allocation101_spill] sm:$0xff] %v7772_v34  ;;  %v7801_v14 = vcombine.low %v7772_v34, %v7776_v15  ;;  %v7811_v13 = vpack.c.bf16 %v7788_v12, %v7766_v51  ;;  %v824_v12 = vrot.slane %v7227_v16, 6  ;;  %v827_v51 = vrot.slane %v7208_v60, 6 }
  0x60   : > { %11370 = vst [vmem:[#allocation108_spill] sm:$0xff] %v7805_v6  ;;  %v7815_v29 = vsel %vm7542_vm7, %v809_v8, %v810_v62  ;;  %v7819_v56 = vsel %vm7542_vm7, %v5444_v45, %v814_v5  ;;  %v7839_v8 = vcombine.low %v7198_v55, %v7227_v16  ;;  %v5460_v45 = vrot.slane %v7099_v7, 11  ;;  %v11417_v16 = vld [vmem:[#allocation7_spill] sm:$0xff] }
  0x61   : > { %11369 = vst [vmem:[#allocation107_spill] sm:$0xff] %v7801_v14  ;;  %11371 = vst [vmem:[#allocation109_spill] sm:$0xff] %v7811_v13  ;;  %v7835_v5 = vpack.c.bf16 %v7805_v6, %v7801_v14  ;;  %v7850_v62 = vcombine.low %v7815_v29, %v7819_v56  ;;  %v830_v6 = vrot.slane %v7241_v22, 6  ;;  %v11381_v14 = vmov 0 }
  0x62   : > { %11372 = vst [vmem:[#allocation110_spill] sm:$0xff] %v7815_v29  ;;  %11373 = vst [vmem:[#allocation111_spill] sm:$0xff] %v7819_v56  ;;  %v11382_v14 = vsel %vm7862_vm10, 4294967295, %v11381_v14  ;;  %v5461_v56 = vrot.slane %v7163_v37, 11  ;;  %v826_v44 = vrot.slane %v824_v12, 4  ;;  %v829_v9 = vrot.slane %v827_v51, 4 }
  0x63   : > { %6063 = vmatmul.mubr.msk.bf16.gmra.mrb[32].mxu0 %vm468_vm4, %v7762_v32  ;;  %v7823_v32 = vsel %vm7542_vm7, %v816_v10, %v817_v30  ;;  %11376 = vst [vmem:[#allocation114_spill] sm:$0xff] %v7835_v5  ;;  %11377 = vst [vmem:[#allocation115_spill] sm:$0xff] %v7839_v8  ;;  %v7843_v10 = vcombine.low %v7208_v60, %v7211_v61  ;;  %v5445_v30 = vrot.slane %v7198_v55, 10  ;;  %v1079_v29 = vrot.slane %v1077_v20, 4 }
  0x64   : > { %6066 = vmatprep.mubr.msk.bf16.mxu0 %vm7037_vm1, %v11295_v2  ;;  %11374 = vst [vmem:[#allocation112_spill] sm:$0xff] %v7823_v32  ;;  %11379 = vst [vmem:[#allocation117_spill] sm:$0xff] %v7850_v62  ;;  %v1082_v15 = vrot.slane %v1080_v17, 4  ;;  %v834_v31 = vrot.slane %v7237_v21, 6  ;;  %v1087_v34 = vrot.slane %v7186_v49, 7  ;;  %v837_v37 = vrot.slane %v7306_v4, 6 }
  0x65   : > { %11378 = vst [vmem:[#allocation116_spill] sm:$0xff] %v7843_v10  ;;  %11383 = vst [vmem:[#allocation119_spill] sm:$0xff] %v11382_v14  ;;  %v7882_v22 = vsel %vm7862_vm10, %v5460_v45, %v1077_v20  ;;  %v7907_v20 = vsel %vm7542_vm7, %v829_v9, %v830_v6  ;;  %v844_v9 = vrot.slane %v7327_v33, 6  ;;  %v11036_v6 = vrot.slane %v7271_v41, 7 }
  0x66   : > { %6029 = vmatmul.mubr.msk.bf16.gmra.mrb[32].mxu1 %vm468_vm4, %v7795_v47  ;;  %v7857_v47 = vcombine.low %v7823_v32, %v7827_v0  ;;  %v7872_v0 = vsel %vm7542_vm7, %v5445_v30, %v824_v12  ;;  %v5446_v32 = vrot.slane %v7211_v61, 10  ;;  %v1090_v12 = vrot.slane %v7182_v48, 7  ;;  %11387 = vst [vmem:[#allocation123_spill] sm:$0xff] %v7907_v20 }
  0x67   : > { %6032 = vmatprep.mubr.msk.bf16.mxu1 %vm7037_vm1, %v11295_v2  ;;  %11384 = vst [vmem:[#allocation120_spill] sm:$0xff] %v7872_v0  ;;  %v7891_v30 = vsel %vm7862_vm10, %v1082_v15, %v1083_v63  ;;  %v1088_v24 = vsel %vm7862_vm10, %v5461_v56, %v1087_v34  ;;  %v1089_v39 = vrot.slane %v1087_v34, 4  ;;  %v1093_v56 = vrot.slane %v7285_v53, 7 }
  0x68   : > { %11380 = vst [vmem:[#allocation118_spill] sm:$0xff] %v7857_v47  ;;  %v7899_v45 = vpack.c.bf16 %v7857_v47, %v7850_v62  ;;  %v2210_v15 = vcombine.low %v7891_v30, %v1088_v24  ;;  %v7914_v34 = vsel %vm7542_vm7, %v5446_v32, %v834_v31  ;;  %v1092_v63 = vrot.slane %v1090_v12, 4 }
  0x69   : > { %11388 = vst [vmem:[#allocation124_spill] sm:$0xff] %v7914_v34  ;;  %v7930_v32 = vpack.c.bf16 %v7843_v10, %v7839_v8  ;;  %v836_v62 = vrot.slane %v834_v31, 4  ;;  %v7968_v10 = vcombine.low %v7237_v21, %v7306_v4  ;;  %v11415_v21 = vld [vmem:[#allocation43_spill] sm:$0xff]  ;;  %v1073_v25 = vrot.slane %v11417_v16, 7 }
  0x6a   : > { %11385 = vst [vmem:[#allocation121_spill] sm:$0xff] %v7899_v45 }
  0x6b   : > { %6067 = vmatmul.mubr.msk.bf16.gmra.mrb[36].mxu0 %vm468_vm4, %v7835_v5  ;;  %v7886_v5 = vsel %vm7862_vm10, %v1079_v29, %v1080_v17  ;;  %v7903_v29 = vsel %vm7542_vm7, %v826_v44, %v827_v51  ;;  %v5462_v17 = vrot.slane %v7244_v23, 11  ;;  %v7923_v51 = vsel %vm7862_vm10, %v1089_v39, %v1090_v12  ;;  %11391 = vst [vmem:[#allocation127_spill] sm:$0xff] %v7930_v32 }
  0x6c   : > { %6070 = vmatprep.mubr.msk.bf16.mxu0 %vm7037_vm1, %v11295_v2  ;;  %v2209_v46 = vcombine.low %v7882_v22, %v7886_v5  ;;  %11386 = vst [vmem:[#allocation122_spill] sm:$0xff] %v7903_v29  ;;  %11389 = vst [vmem:[#allocation125_spill] sm:$0xff] %v7923_v51  ;;  %v7938_v47 = vcombine.low %v7872_v0, %v7903_v29  ;;  %v840_v39 = vrot.slane %v7339_v27, 6 }
  0x6d   : > { %v7951_v12 = vcombine.low %v7907_v20, %v7914_v34  ;;  %11398 = vst [vmem:[#allocation134_spill] sm:$0xff] %v7968_v10  ;;  %v7976_v8 = vsel %vm7542_vm7, %v836_v62, %v837_v37  ;;  %v7994_v34 = vcombine.high %v7182_v48, %v7244_v23  ;;  %v11411_v20 = vld [vmem:[#allocation4_spill] sm:$0xff] }
  0x6e   : > { %6033 = vmatmul.mubr.msk.bf16.gmra.mrb[36].mxu1 %vm468_vm4, %v7811_v13  ;;  %v7925_v44 = vpack.c.bf16 %v2210_v15, %v2209_v46  ;;  %v7934_v13 = vsel %vm7862_vm10, %v1092_v63, %v1093_v56  ;;  %11393 = vst [vmem:[#allocation129_spill] sm:$0xff] %v7938_v47  ;;  %v7945_v46 = vsel %vm7862_vm10, %v5462_v17, %v11036_v6  ;;  %v839_v15 = vrot.slane %v837_v37, 4 }
  0x6f   : > { %6036 = vmatprep.mubr.msk.bf16.mxu1 %vm7037_vm1, %v11295_v2  ;;  %11392 = vst [vmem:[#allocation128_spill] sm:$0xff] %v7934_v13  ;;  %11394 = vst [vmem:[#allocation130_spill] sm:$0xff] %v7945_v46  ;;  %v7954_v63 = vcombine.low %v1088_v24, %v7923_v51  ;;  %v7958_v31 = vcombine.low %v7934_v13, %v7945_v46  ;;  %v5447_v56 = vrot.slane %v7292_v58, 10  ;;  %v846_v17 = vrot.slane %v844_v9, 4  ;;  %v11416_v13 = vld [vmem:[#allocation52_spill] sm:$0xff] }
  0x70   : > { %11390 = vst [vmem:[#allocation126_spill] sm:$0xff] %v7925_v44  ;;  %11395 = vst [vmem:[#allocation131_spill] sm:$0xff] %v7951_v12  ;;  %v847_v6 = vrot.slane %v7350_v3, 6  ;;  %v7972_v24 = vcombine.low %v7292_v58, %v7327_v33  ;;  %v7982_v53 = vpack.c.bf16 %v7951_v12, %v7938_v47  ;;  %v7990_v44 = vcombine.low %v7186_v49, %v7182_v48  ;;  %v11410_v47 = vld [vmem:[#allocation5_spill] sm:$0xff]  ;;  %v11414_v12 = vld [vmem:[#allocation51_spill] sm:$0xff] }
  0x71   : > { %11396 = vst [vmem:[#allocation132_spill] sm:$0xff] %v7954_v63  ;;  %11397 = vst [vmem:[#allocation133_spill] sm:$0xff] %v7958_v31  ;;  %v8000_v62 = vsel %vm7542_vm7, %v5447_v56, %v844_v9  ;;  %v1067_v29 = vrot.slane %v11410_v47, 7  ;;  %v1070_v9 = vrot.slane %v11411_v20, 7  ;;  %v850_v0 = vrot.slane %v11414_v12, 6 }
  0x72   : > { %11399 = vst [vmem:[#allocation135_spill] sm:$0xff] %v7972_v24  ;;  %11400 = vst [vmem:[#allocation136_spill] sm:$0xff] %v7976_v8  ;;  %v8004_v37 = vsel %vm7542_vm7, %v846_v17, %v847_v6  ;;  %v8012_v48 = vpack.c.bf16 %v7972_v24, %v7968_v10  ;;  %v5448_v24 = vrot.slane %v11415_v21, 10  ;;  %v849_v10 = vrot.slane %v847_v6, 4 }
  0x73   : > { %6071 = vmatmul.mubr.msk.bf16.gmra.mrb[40].mxu0 %vm468_vm4, %v7899_v45  ;;  %11401 = vst [vmem:[#allocation137_spill] sm:$0xff] %v7982_v53  ;;  %v7986_v45 = vsel %vm7542_vm7, %v839_v15, %v840_v39  ;;  %11403 = vst [vmem:[#allocation139_spill] sm:$0xff] %v7990_v44  ;;  %v11407_v39 = vld [vmem:[#allocation49_spill] sm:$0xff]  ;;  %v8024_v17 = vcombine.low %v8000_v62, %v8004_v37  ;;  %v1069_v19 = vrot.slane %v1067_v29, 4  ;;  %v1072_v28 = vrot.slane %v1070_v9, 4 }
  0x74   : > { %6074 = vmatprep.mubr.msk.bf16.mxu0 %vm7037_vm1, %v11295_v2  ;;  %11402 = vst [vmem:[#allocation138_spill] sm:$0xff] %v7986_v45  ;;  %11404 = vst [vmem:[#allocation140_spill] sm:$0xff] %v7994_v34  ;;  %v854_v15 = vrot.slane %v11407_v39, 6  ;;  %v8020_v56 = vcombine.low %v7976_v8, %v7986_v45  ;;  %v11418_v45 = vld [vmem:[#allocation3_spill] sm:$0xff]  ;;  %v8051_v16 = vsel %vm7542_vm7, %v849_v10, %v850_v0 }
  0x75   : > { %11405 = vst [vmem:[#allocation141_spill] sm:$0xff] %v8000_v62  ;;  %11406 = vst [vmem:[#allocation142_spill] sm:$0xff] %v8004_v37  ;;  %v5459_v8 = vrot.slane %v11418_v45, 11  ;;  %v8037_v37 = vcombine.low %v7350_v3, %v11415_v21  ;;  %v1074_v0 = vsel %vm7862_vm10, %v1072_v28, %v1073_v25 }
  0x76   : > { %6037 = vmatmul.mubr.msk.bf16.gmra.mrb[40].mxu1 %vm468_vm4, %v7930_v32  ;;  %v11408_v32 = vld [vmem:[#allocation46_spill] sm:$0xff]  ;;  %11409 = vst [vmem:[#allocation49_spill] sm:$0xff] %v8012_v48  ;;  %11413 = vst [vmem:[#allocation5_spill] sm:$0xff] %v8024_v17  ;;  %v856_v46 = vrot.slane %v854_v15, 4  ;;  %v8045_v62 = vpack.c.bf16 %v8024_v17, %v8020_v56  ;;  %v8055_v45 = vsel %vm7542_vm7, %v5448_v24, %v854_v15  ;;  %v5469_v15 = vrot.slane %v7292_v58, 11 }
  0x77   : > { %6040 = vmatprep.mubr.msk.bf16.mxu1 %vm7037_vm1, %v11295_v2  ;;  %v857_v49 = vrot.slane %v11408_v32, 6  ;;  %11412 = vst [vmem:[#allocation46_spill] sm:$0xff] %v8020_v56  ;;  %11419 = vst [vmem:[#allocation4_spill] sm:$0xff] %v8037_v37  ;;  %v8041_v6 = vcombine.low %v11407_v39, %v11408_v32  ;;  %v1068_v17 = vsel %vm7862_vm10, %v5459_v8, %v1067_v29  ;;  %v1100_v29 = vrot.slane %v7261_v35, 7 }
  0x78   : > { %11421 = vst [vmem:[#allocation7_spill] sm:$0xff] %v8045_v62  ;;  %v1071_v56 = vsel %vm7862_vm10, %v1069_v19, %v1070_v9  ;;  %v5497_v19 = vld [vmem:[%s10915_s1 + $0xa] sm:$0x3]  ;;  %v1186_v28 = vcombine.low %v1074_v0, %v7882_v22  ;;  %v1385_v24 = vcombine.low %v11410_v47, %v11411_v20  ;;  %v1167_v22 = vrot.slane %v7327_v33, 7 }
  0x79   : > { %v859_v51 = vrot.slane %v857_v49, 4  ;;  %11420 = vst [vmem:[#allocation43_spill] sm:$0xff] %v8041_v6  ;;  %v8073_v10 = vpack.c.bf16 %v8041_v6, %v8037_v37  ;;  %v1185_v25 = vcombine.low %v1068_v17, %v1071_v56  ;;  %v1187_v56 = vcombine.low %v7886_v5, %v7891_v30 }
  0x7a   : > { %v5481_v17 = vcombine.high %v11411_v20, %v7099_v7  ;;  %v1103_v0 = vrot.slane %v7289_v54, 7  ;;  %v11426_v47 = vrot.slane %v7271_v41, 7  ;;  %v8120_v5 = vsel %vm7862_vm10, %v5469_v15, %v1167_v22 }
  0x7b   : > { %6075 = vmatmul.mubr.msk.bf16.gmra.mrb[44].mxu0 %vm468_vm4, %v7982_v53  ;;  %v860_v53 = vrot.slane %v11416_v13, 6  ;;  %11422 = vst [vmem:[#allocation3_spill] sm:$0xff] %v8073_v10  ;;  %v1221_v9 = vpack.c.bf16 %v1186_v28, %v1185_v25  ;;  %v1173_v7 = vrot.slane %v11414_v12, 7  ;;  %v5470_v30 = vrot.slane %v11415_v21, 11 }
  0x7c   : > { %6078 = vmatprep.mubr.msk.bf16.mxu0 %vm7037_vm1, %v11295_v2  ;;  %v1107_v25 = vrot.slane %v7390_v38, 7  ;;  %v8138_v15 = vcombine.low %v7306_v4, %v7339_v27  ;;  %v1110_v20 = vrot.slane %v7366_v11, 7  ;;  %v11429_v6 = vrot.slane %v11407_v39, 7 }
  0x7d   : > { %v8063_v13 = vsel %vm7542_vm7, %v859_v51, %v860_v53  ;;  %v8079_v53 = vcombine.low %v8051_v16, %v8055_v45 }
  0x7e   : > { %6041 = vmatmul.mubr.msk.bf16.gmra.mrb[44].mxu1 %vm468_vm4, %v8012_v48  ;;  %v8059_v48 = vsel %vm7542_vm7, %v856_v46, %v857_v49  ;;  %v1653_v46 = vsel %vm496_vm0, %v5497_v19, 0  ;;  %v1170_v49 = vrot.slane %v7350_v3, 7  ;;  %v5508_v19 = vld [vmem:[%s10915_s1 + $0xc] sm:$0x3]  ;;  %11428 = vst [vmem:[#allocation147_spill] sm:$0xff] %v8138_v15 }
  0x7f   : > { %6044 = vmatprep.mubr.msk.bf16.mxu1 %vm7037_vm1, %v11295_v2  ;;  %11423 = vst [vmem:[#allocation143_spill] sm:$0xff] %v8079_v53  ;;  %v8083_v8 = vcombine.low %v8059_v48, %v8063_v13 }
  0x81   : > { %11424 = vst [vmem:[#allocation144_spill] sm:$0xff] %v8083_v8  ;;  %v8096_v51 = vpack.c.bf16 %v8083_v8, %v8079_v53  ;;  %v1169_v8 = vrot.slane %v1167_v22, 4  ;;  %v1172_v53 = vrot.slane %v1170_v49, 4  ;;  %v1864_v22 = vsel %vm496_vm0, %v5508_v19, 0 }
  0x82   : > { %v1222_v19 = vpack.c.bf16 %v7954_v63, %v1187_v56 }
  0x83   : > { %6079 = vmatmul.mubr.msk.bf16.gmra.mrb[48].mxu0 %vm468_vm4, %v8045_v62  ;;  %11425 = vst [vmem:[#allocation145_spill] sm:$0xff] %v8096_v51  ;;  %v1099_v62 = vrot.slane %v11426_v47, 4  ;;  %v8130_v28 = vsel %vm7862_vm10, %v1169_v8, %v1170_v49  ;;  %v8134_v47 = vcombine.high %v7208_v60, %v7211_v61  ;;  %v8150_v8 = vsel %vm7862_vm10, %v5470_v30, %v11429_v6 }
  0x84   : > { %6082 = vmatprep.mubr.msk.bf16.mxu0 %vm7037_vm1, %v11295_v2  ;;  %11430 = vst [vmem:[#allocation148_spill] sm:$0xff] %v8150_v8  ;;  %v1421_v60 = vpack.c.bf16 %v5481_v17, %v1385_v24  ;;  %v8154_v61 = vcombine.low %v8120_v5, %v8130_v28  ;;  %v5463_v6 = vrot.slane %v7354_v57, 11  ;;  %v8170_v24 = vcombine.low %v7327_v33, %v7350_v3 }
  0x85   : > { %11427 = vst [vmem:[#allocation146_spill] sm:$0xff] %v8134_v47  ;;  %v8174_v17 = vcombine.high %v7350_v3, %v11415_v21  ;;  %v1112_v33 = vrot.slane %v1110_v20, 4  ;;  %v5464_v30 = vrot.slane %v7369_v40, 11  ;;  %v1117_v3 = vrot.slane %v7400_v1, 7  ;;  %v11459_v1 = vld [vmem:[#allocation71_spill] sm:$0xff] }
  0x86   : > { %6045 = vmatmul.mubr.msk.bf16.gmra.mrb[48].mxu1 %vm468_vm4, %v8073_v10  ;;  %v1102_v10 = vrot.slane %v1100_v29, 4  ;;  %11431 = vst [vmem:[#allocation149_spill] sm:$0xff] %v8154_v61  ;;  %11433 = vst [vmem:[#allocation151_spill] sm:$0xff] %v8170_v24 }
  0x87   : > { %6088 = vmatprep.mubr.msk.bf16.mxu1 %vm7037_vm1, %v11295_v2  ;;  %11434 = vst [vmem:[#allocation152_spill] sm:$0xff] %v8174_v17 }
  0x8b   : > { %6083 = vmatmul.mubr.msk.bf16.gmra.mrb[52].mxu0 %vm468_vm4, %v8096_v51  ;;  %v8144_v51 = vsel %vm7862_vm10, %v1172_v53, %v1173_v7  ;;  %v8165_v53 = vsel %vm7862_vm10, %v1099_v62, %v1100_v29  ;;  %v1109_v62 = vrot.slane %v1107_v25, 4  ;;  %v1113_v29 = vrot.slane %v7404_v26, 7  ;;  %v11456_v26 = vld [vmem:[#allocation70_spill] sm:$0xff] }
  0x8c   : > { %6126 = vmatprep.mubr.msk.bf16.mxu0 %vm7037_vm1, %v11295_v2  ;;  %v8158_v49 = vcombine.low %v8144_v51, %v8150_v8  ;;  %v8200_v7 = vcombine.low %v7261_v35, %v7354_v57  ;;  %v8229_v57 = vcombine.low %v7261_v35, %v7289_v54  ;;  %v11448_v35 = vld [vmem:[#allocation66_spill] sm:$0xff]  ;;  %v11449_v54 = vld [vmem:[#allocation55_spill] sm:$0xff] }
  0x8d   : > { %v8248_v37 = vcombine.low %v11449_v54, %v11448_v35  ;;  %v8275_v35 = vld [vmem:[%s7084_s19 + $0x78] sm:$0xff] }
  0x8e   : > { %11432 = vst [vmem:[#allocation150_spill] sm:$0xff] %v8158_v49  ;;  %6089 = vmatmul.mubr.msk.bf16.vlgmr.msra.gmra.mrb[52].mxu1 %vm468_vm4, %v1221_v9  ;;  %v8180_v9 = vsel %vm7862_vm10, %v1102_v10, %v1103_v0  ;;  %v1387_v10 = vcombine.low %v7160_v36, %v7190_v50  ;;  %v8196_v0 = vcombine.low %v7244_v23, %v7271_v41  ;;  %11436 = vst [vmem:[#allocation154_spill] sm:$0xff] %v8200_v7  ;;  %v11445_v41 = vld [vmem:[#allocation56_spill] sm:$0xff] }
  0x8f   : > { %6163 = vmatpush3.bf16.msra.mxu1 %v1653_v46  ;;  %6092 = vmatprep.mubr.msk.bf16.mxu1 %vm7037_vm1, %v11295_v2  ;;  %v8206_v56 = vcombine.low %v8165_v53, %v8180_v9  ;;  %v8214_v36 = vsel %vm7862_vm10, %v1109_v62, %v1110_v20  ;;  %v8218_v50 = vsel %vm7862_vm10, %v1112_v33, %v1113_v29  ;;  %v11439_v20 = vld [vmem:[#allocation34_spill] sm:$0xff]  ;;  %v11443_v62 = vld [vmem:[#allocation36_spill] sm:$0xff] }
  0x90   : > { %6238 = vmatprep.subr.bf16.mxu1 %v11295_v2  ;;  %11435 = vst [vmem:[#allocation153_spill] sm:$0xff] %v8196_v0  ;;  %v8222_v23 = vsel %vm7862_vm10, %v5464_v30, %v1117_v3  ;;  %11438 = vst [vmem:[#allocation156_spill] sm:$0xff] %v8229_v57  ;;  %v1422_v33 = vpack.c.bf16 %v7990_v44, %v1387_v10  ;;  %v1120_v30 = vrot.slane %v7466_v43, 7  ;;  %v11446_v46 = vld [vmem:[#allocation54_spill] sm:$0xff] }
  0x91   : > { %11437 = vst [vmem:[#allocation155_spill] sm:$0xff] %v8206_v56  ;;  %v8244_v63 = vcombine.low %v11446_v46, %v11445_v41  ;;  %11450 = vst [vmem:[#allocation36_spill] sm:$0xff] %v8248_v37  ;;  %v8260_v10 = vcombine.low %v8218_v50, %v8222_v23  ;;  %v1127_v41 = vrot.slane %v7490_v59, 7  ;;  %v8279_v54 = vcombine.low %v8275_v35, %v7198_v55  ;;  %v11461_v55 = vld [vmem:[#allocation14_spill] sm:$0xff]  ;;  %v11462_v37 = vld [vmem:[#allocation12_spill] sm:$0xff] }
  0x92   : > { %v1423_v46 = vpack.c.bf16 %v8229_v57, %v7994_v34  ;;  %v11465_v57 = vld [vmem:[#allocation24_spill] sm:$0xff]  ;;  %v8311_v34 = vld [vmem:[%s7084_s19 + $0xc0] sm:$0xff] }
  0x93   : > { %6127 = vmatmul.mubr.msk.bf16.vlgmr.msra.gmra.mrb[56].mxu0 %vm468_vm4, %v1421_v60  ;;  %v8210_v60 = vsel %vm7862_vm10, %v5463_v6, %v1107_v25  ;;  %v11440_v25 = vld [vmem:[#allocation31_spill] sm:$0xff]  ;;  %v11442_v6 = vld [vmem:[#allocation48_spill] sm:$0xff]  ;;  %11452 = vst [vmem:[#allocation54_spill] sm:$0xff] %v8260_v10  ;;  %11454 = vst [vmem:[#allocation55_spill] sm:$0xff] %v8279_v54 }
  0x94   : > { %6201 = vmatpush3.bf16.msra.mxu0 %v1864_v22  ;;  %6130 = vmatprep.mubr.msk.bf16.mxu0 %vm7037_vm1, %v11295_v2  ;;  %v8233_v22 = vcombine.low %v11440_v25, %v11439_v20  ;;  %v8237_v29 = vcombine.low %v11443_v62, %v11442_v6  ;;  %11447 = vst [vmem:[#allocation48_spill] sm:$0xff] %v8244_v63  ;;  %v8266_v25 = vld [vmem:[%s7084_s19 + $0x70] sm:$0xff]  ;;  %v11469_v54 = vld [vmem:[#allocation28_spill] sm:$0xff] }
  0x95   : > { %6276 = vmatprep.subr.bf16.mxu0 %v11295_v2  ;;  %v1223_v20 = vpack.c.bf16 %v8206_v56, %v7958_v31  ;;  %v8270_v6 = vcombine.low %v8266_v25, %v7132_v18  ;;  %v1119_v56 = vrot.slane %v1117_v3, 4  ;;  %v11455_v31 = vld [vmem:[#allocation67_spill] sm:$0xff]  ;;  %v8296_v63 = vcombine.low %v11462_v37, %v11461_v55  ;;  %v11473_v37 = vld [vmem:[#allocation38_spill] sm:$0xff] }
  0x96   : > { %11441 = vst [vmem:[#allocation34_spill] sm:$0xff] %v8233_v22  ;;  %11444 = vst [vmem:[#allocation31_spill] sm:$0xff] %v8237_v29  ;;  %6093 = vmatmul.mubr.msk.bf16.gmra.mrb[56].mxu1 %vm468_vm4, %v1222_v19  ;;  %v8256_v19 = vcombine.low %v8210_v60, %v8214_v36  ;;  %v8285_v12 = vcombine.low %v11456_v26, %v11455_v31  ;;  %v11458_v29 = vld [vmem:[#allocation11_spill] sm:$0xff]  ;;  %v8300_v3 = vcombine.low %v7306_v4, %v7292_v58  ;;  %v8316_v58 = vld [vmem:[%s7084_s19 + $0x68] sm:$0xff] }
  0x97   : > { %6096 = vmatprep.mubr.msk.bf16.mxu1 %vm7037_vm1, %v11295_v2  ;;  %11453 = vst [vmem:[#allocation66_spill] sm:$0xff] %v8270_v6  ;;  %v8289_v8 = vcombine.low %v11459_v1, %v11458_v29  ;;  %11463 = vst [vmem:[#allocation11_spill] sm:$0xff] %v8296_v63  ;;  %v11466_v26 = vld [vmem:[#allocation15_spill] sm:$0xff]  ;;  %v1122_v1 = vrot.slane %v1120_v30, 4  ;;  %v1123_v29 = vrot.slane %v7502_v52, 7  ;;  %v1129_v55 = vrot.slane %v1127_v41, 4 }
  0x98   : > { %11451 = vst [vmem:[#allocation56_spill] sm:$0xff] %v8256_v19  ;;  %11457 = vst [vmem:[#allocation67_spill] sm:$0xff] %v8285_v12  ;;  %v8304_v31 = vcombine.low %v11466_v26, %v11465_v57  ;;  %v1130_v4 = vrot.slane %v8316_v58, 7  ;;  %v11470_v6 = vld [vmem:[#allocation27_spill] sm:$0xff]  ;;  %v8337_v22 = vcombine.low %v11408_v32, %v8311_v34  ;;  %v8342_v57 = vcombine.high %v8311_v34, %v8311_v34 }
  0x99   : > { %11460 = vst [vmem:[#allocation70_spill] sm:$0xff] %v8289_v8  ;;  %11464 = vst [vmem:[#allocation71_spill] sm:$0xff] %v8300_v3  ;;  %v8325_v7 = vcombine.low %v11470_v6, %v11469_v54  ;;  %v11474_v8 = vld [vmem:[#allocation25_spill] sm:$0xff]  ;;  %v11477_v6 = vld [vmem:[#allocation39_spill] sm:$0xff]  ;;  %v8380_v32 = vcombine.low %v7390_v38, %v7366_v11 }
  0x9a   : > { %11467 = vst [vmem:[#allocation14_spill] sm:$0xff] %v8304_v31  ;;  %v8333_v12 = vcombine.low %v11474_v8, %v11473_v37  ;;  %v11478_v54 = vld [vmem:[#allocation40_spill] sm:$0xff]  ;;  %v5507_v8 = vrot.slane %v8311_v34, 9  ;;  %v8361_v37 = vpack.c.bf16 %v8260_v10, %v8256_v19 }
  0x9b   : > { %6131 = vmatmul.mubr.msk.bf16.gmra.mrb[60].mxu0 %vm468_vm4, %v1422_v33  ;;  %v11468_v33 = vld [vmem:[#allocation53_spill] sm:$0xff]  ;;  %11471 = vst [vmem:[#allocation12_spill] sm:$0xff] %v8325_v7  ;;  %v8346_v26 = vcombine.low %v11478_v54, %v11477_v6  ;;  %v11481_v3 = vld [vmem:[#allocation44_spill] sm:$0xff]  ;;  %v8365_v6 = vsel %vm7862_vm10, %v1119_v56, %v1120_v30  ;;  %v11112_v54 = vrot.slane %v8342_v57, 5  ;;  %11484 = vst [vmem:[#allocation25_spill] sm:$0xff] %v8380_v32 }
  0x9c   : > { %6134 = vmatprep.mubr.msk.bf16.mxu0 %vm7037_vm1, %v11295_v2  ;;  %v5465_v62 = vrot.slane %v11468_v33, 11  ;;  %v8329_v33 = vcombine.low %v11415_v21, %v11407_v39  ;;  %11475 = vst [vmem:[#allocation15_spill] sm:$0xff] %v8333_v12  ;;  %11476 = vst [vmem:[#allocation53_spill] sm:$0xff] %v8337_v22  ;;  %v11480_v21 = vld [vmem:[#allocation59_spill] sm:$0xff]  ;;  %v8384_v56 = vcombine.high %v7366_v11, %v7369_v40  ;;  %v11489_v40 = vld [vmem:[#allocation60_spill] sm:$0xff] }
  0x9d   : > { %11479 = vst [vmem:[#allocation28_spill] sm:$0xff] %v8346_v26  ;;  %v8350_v31 = vcombine.low %v11481_v3, %v11480_v21  ;;  %11483 = vst [vmem:[#allocation38_spill] sm:$0xff] %v8361_v37  ;;  %v8372_v21 = vsel %vm7862_vm10, %v1122_v1, %v1123_v29  ;;  %v8389_v30 = vsel %vm7862_vm10, %v1129_v55, %v1130_v4  ;;  %v1137_v1 = vrot.slane %v7132_v18, 7  ;;  %v11488_v11 = vld [vmem:[#allocation63_spill] sm:$0xff]  ;;  %v11493_v3 = vld [vmem:[#allocation9_spill] sm:$0xff] }
  0x9e   : > { %11472 = vst [vmem:[#allocation24_spill] sm:$0xff] %v8329_v33  ;;  %6097 = vmatmul.mubr.msk.bf16.gmra.mrb[60].mxu1 %vm468_vm4, %v1223_v20  ;;  %v8376_v20 = vsel %vm7862_vm10, %v5465_v62, %v1127_v41  ;;  %11485 = vst [vmem:[#allocation39_spill] sm:$0xff] %v8384_v56  ;;  %v1140_v29 = vrot.slane %v8275_v35, 7  ;;  %v8397_v38 = vsel %vm7124_vm5, %v5507_v8, %v11112_v54  ;;  %v11491_v62 = vld [vmem:[#allocation64_spill] sm:$0xff]  ;;  %v1132_v18 = vrot.slane %v1130_v4, 4  ;;  %v11509_v33 = vld [vmem:[#allocation90_spill] sm:$0xff] }
  0x9f   : > { %11482 = vst [vmem:[#allocation27_spill] sm:$0xff] %v8350_v31  ;;  %6100 = vmatprep.mubr.msk.bf16.mxu1 %vm7037_vm1, %v11295_v2  ;;  %11487 = vst [vmem:[#allocation40_spill] sm:$0xff] %v8397_v38  ;;  %v8407_v55 = vcombine.low %v11491_v62, %v8397_v38  ;;  %v1133_v10 = vrot.slane %v11493_v3, 7  ;;  %v8412_v19 = vcombine.low %v8365_v6, %v8372_v21  ;;  %v5466_v54 = vrot.slane %v8266_v25, 11  ;;  %v11497_v38 = vld [vmem:[#allocation10_spill] sm:$0xff]  ;;  %v11506_v31 = vld [vmem:[#allocation85_spill] sm:$0xff] }
  0xa0   : > { %v8416_v8 = vcombine.low %v8376_v20, %v8389_v30  ;;  %v8425_v4 = vpack.c.bf16 %v8384_v56, %v8380_v32  ;;  %v1142_v62 = vrot.slane %v1140_v29, 4  ;;  %v1143_v22 = vrot.slane %v11497_v38, 7  ;;  %v8502_v12 = vld [vmem:[%s7084_s19 + $0x90] sm:$0xff] }
  0xa1   : > { %11492 = vst [vmem:[#allocation44_spill] sm:$0xff] %v8407_v55  ;;  %11494 = vst [vmem:[#allocation63_spill] sm:$0xff] %v8412_v19  ;;  %v8432_v41 = vsel %vm7862_vm10, %v1132_v18, %v1133_v10  ;;  %v8444_v56 = vsel %vm7862_vm10, %v5466_v54, %v1137_v1  ;;  %v8448_v55 = vcombine.low %v7490_v59, %v8316_v58  ;;  %v11502_v54 = vld [vmem:[#allocation128_spill] sm:$0xff] }
  0xa2   : > { %11495 = vst [vmem:[#allocation60_spill] sm:$0xff] %v8416_v8  ;;  %11496 = vst [vmem:[#allocation64_spill] sm:$0xff] %v8425_v4 }
  0xa3   : > { %6135 = vmatmul.mubr.msk.bf16.gmra.mrb[64].mxu0 %vm468_vm4, %v1423_v46  ;;  %v8403_v46 = vcombine.low %v11489_v40, %v11488_v11  ;;  %v1139_v40 = vrot.slane %v1137_v1, 4  ;;  %v8436_v11 = vcombine.low %v7466_v43, %v7502_v52  ;;  %11500 = vst [vmem:[#allocation158_spill] sm:$0xff] %v8448_v55  ;;  %v8459_v52 = vsel %vm7862_vm10, %v1142_v62, %v1143_v22  ;;  %v11503_v1 = vld [vmem:[#allocation125_spill] sm:$0xff]  ;;  %v11510_v22 = vld [vmem:[#allocation86_spill] sm:$0xff] }
  0xa4   : > { %6138 = vmatprep.mubr.msk.bf16.mxu0 %vm7037_vm1, %v11295_v2  ;;  %v2211_v18 = vcombine.low %v11503_v1, %v11502_v54  ;;  %v8476_v62 = vcombine.low %v11510_v22, %v11509_v33  ;;  %v7001_v1 = vld [vmem:[%s7084_s19 + $0x80] sm:$0xff]  ;;  %v11516_v22 = vld [vmem:[#allocation20_spill] sm:$0xff] }
  0xa5   : > { %11490 = vst [vmem:[#allocation59_spill] sm:$0xff] %v8403_v46  ;;  %11498 = vst [vmem:[#allocation10_spill] sm:$0xff] %v8436_v11  ;;  %v11501_v46 = vld [vmem:[#allocation17_spill] sm:$0xff]  ;;  %v8455_v43 = vsel %vm7862_vm10, %v1139_v40, %v1140_v29  ;;  %v5467_v26 = vrot.slane %v7001_v1, 11  ;;  %v5468_v1 = vrot.slane %v8502_v12, 11 }
  0xa6   : > { %6101 = vmatmul.mubr.msk.bf16.gmra.mrb[64].mxu1 %vm468_vm4, %v8361_v37  ;;  %v8440_v37 = vpack.c.bf16 %v8416_v8, %v8412_v19  ;;  %v1147_v10 = vrot.slane %v11501_v46, 7  ;;  %v11504_v8 = vld [vmem:[#allocation130_spill] sm:$0xff]  ;;  %v7000_v19 = vld [vmem:[%s7084_s19 + $0x88] sm:$0xff]  ;;  %v11507_v29 = vld [vmem:[#allocation81_spill] sm:$0xff]  ;;  %11511 = vst [vmem:[#allocation125_spill] sm:$0xff] %v8476_v62  ;;  %v8516_v62 = vcombine.high %v8316_v58, %v8266_v25 }
  0xa7   : > { %6104 = vmatprep.mubr.msk.bf16.mxu1 %vm7037_vm1, %v11295_v2  ;;  %v8465_v59 = vcombine.low %v11504_v8, %v8165_v53  ;;  %v8472_v40 = vcombine.low %v11507_v29, %v11506_v31  ;;  %v8483_v53 = vcombine.low %v8432_v41, %v8444_v56  ;;  %v8487_v8 = vcombine.low %v8455_v43, %v8459_v52 }
  0xa8   : > { %11499 = vst [vmem:[#allocation157_spill] sm:$0xff] %v8440_v37  ;;  %v8494_v31 = vpack.c.bf16 %v8448_v55, %v8436_v11  ;;  %v1149_v33 = vrot.slane %v1147_v10, 4 }
  0xa9   : > { %11505 = vst [vmem:[#allocation17_spill] sm:$0xff] %v8465_v59  ;;  %11508 = vst [vmem:[#allocation128_spill] sm:$0xff] %v8472_v40  ;;  %v8479_v54 = vpack.c.bf16 %v8465_v59, %v2211_v18  ;;  %v8508_v11 = vpack.c.bf16 %v8487_v8, %v8483_v53  ;;  %v8512_v18 = vsel %vm7862_vm10, %v5467_v26, %v1147_v10  ;;  %v11533_v59 = vld [vmem:[#allocation102_spill] sm:$0xff] }
  0xaa   : > { %11513 = vst [vmem:[#allocation85_spill] sm:$0xff] %v8483_v53  ;;  %11514 = vst [vmem:[#allocation81_spill] sm:$0xff] %v8487_v8  ;;  %v8526_v40 = vcombine.low %v8275_v35, %v11497_v38  ;;  %v8530_v8 = vcombine.low %v8180_v9, %v8210_v60  ;;  %v8534_v26 = vcombine.low %v8214_v36, %v8218_v50  ;;  %v8547_v35 = vld [vmem:[%s7084_s19 + $0x98] sm:$0xff]  ;;  %v11521_v60 = vld [vmem:[#allocation92_spill] sm:$0xff] }
  0xab   : > { %6139 = vmatmul.mubr.msk.bf16.gmra.mrb[68].mxu0 %vm468_vm4, %v8425_v4  ;;  %v1150_v4 = vrot.slane %v7000_v19, 7  ;;  %11512 = vst [vmem:[#allocation130_spill] sm:$0xff] %v8479_v54  ;;  %11515 = vst [vmem:[#allocation90_spill] sm:$0xff] %v8494_v31  ;;  %v1153_v54 = vrot.slane %v11516_v22, 7  ;;  %v1160_v9 = vrot.slane %v8547_v35, 7  ;;  %v11522_v38 = vld [vmem:[#allocation91_spill] sm:$0xff] }
  0xac   : > { %6142 = vmatprep.mubr.msk.bf16.mxu0 %vm7037_vm1, %v11295_v2  ;;  %11518 = vst [vmem:[#allocation86_spill] sm:$0xff] %v8508_v11  ;;  %11520 = vst [vmem:[#allocation159_spill] sm:$0xff] %v8526_v40  ;;  %v8552_v10 = vcombine.low %v11522_v38, %v11521_v60  ;;  %v11524_v36 = vld [vmem:[#allocation101_spill] sm:$0xff]  ;;  %v8572_v60 = vpack.c.bf16 %v8526_v40, %v8516_v62  ;;  %v8588_v40 = vcombine.low %v11501_v46, %v7000_v19  ;;  %v7004_v19 = vld [vmem:[%s7084_s19 + $0xb8] sm:$0xff] }
  0xad   : > { %v1152_v29 = vrot.slane %v1150_v4, 4  ;;  %v8522_v22 = vsel %vm7862_vm10, %v1149_v33, %v1150_v4  ;;  %v11525_v50 = vld [vmem:[#allocation93_spill] sm:$0xff]  ;;  %v8592_v38 = vcombine.low %v8222_v23, %v8365_v6  ;;  %v1180_v46 = vrot.slane %v7004_v19, 7  ;;  %v11535_v6 = vld [vmem:[#allocation110_spill] sm:$0xff] }
  0xae   : > { %6105 = vmatmul.mubr.msk.bf16.gmra.mrb[68].mxu1 %vm468_vm4, %v8440_v37  ;;  %v11517_v37 = vld [vmem:[#allocation19_spill] sm:$0xff]  ;;  %11523 = vst [vmem:[#allocation92_spill] sm:$0xff] %v8552_v10  ;;  %v8556_v33 = vcombine.low %v11525_v50, %v11524_v36  ;;  %11528 = vst [vmem:[#allocation93_spill] sm:$0xff] %v8572_v60 }
  0xaf   : > { %6108 = vmatprep.mubr.msk.bf16.mxu1 %vm7037_vm1, %v11295_v2  ;;  %v1157_v3 = vrot.slane %v11517_v37, 7  ;;  %11519 = vst [vmem:[#allocation19_spill] sm:$0xff] %v8516_v62  ;;  %v8540_v25 = vsel %vm7862_vm10, %v1152_v29, %v1153_v54  ;;  %v8562_v29 = vcombine.low %v8512_v18, %v8522_v22  ;;  %v1162_v54 = vrot.slane %v1160_v9, 4  ;;  %11530 = vst [vmem:[#allocation161_spill] sm:$0xff] %v8588_v40  ;;  %v11593_v62 = vld [vmem:[#allocation48_spill] sm:$0xff] }
  0xb1   : > { %v8544_v4 = vsel %vm7862_vm10, %v5468_v1, %v1157_v3  ;;  %11526 = vst [vmem:[#allocation91_spill] sm:$0xff] %v8562_v29  ;;  %v1159_v50 = vrot.slane %v1157_v3, 4  ;;  %v8596_v3 = vcombine.low %v8372_v21, %v8376_v20 }
  0xb2   : > { %v8568_v1 = vcombine.low %v8540_v25, %v8544_v4 }
  0xb3   : > { %6143 = vmatmul.mubr.msk.bf16.gmra.mrb[72].mxu0 %vm468_vm4, %v8494_v31  ;;  %11531 = vst [vmem:[#allocation162_spill] sm:$0xff] %v8596_v3 }
  0xb4   : > { %6146 = vmatprep.mubr.msk.bf16.mxu0 %vm7037_vm1, %v11295_v2  ;;  %11527 = vst [vmem:[#allocation101_spill] sm:$0xff] %v8568_v1  ;;  %v8583_v31 = vpack.c.bf16 %v8568_v1, %v8562_v29  ;;  %v11536_v1 = vld [vmem:[#allocation104_spill] sm:$0xff] }
  0xb5   : > { %v8613_v20 = vcombine.low %v11536_v1, %v11535_v6  ;;  %v11540_v1 = vrot.slane %v11407_v39, 7  ;;  %v11541_v6 = vld [vmem:[#allocation52_spill] sm:$0xff] }
  0xb6   : > { %6109 = vmatmul.mubr.msk.bf16.gmra.mrb[72].mxu1 %vm468_vm4, %v8508_v11  ;;  %v1163_v11 = vrot.slane %v7339_v27, 7  ;;  %11529 = vst [vmem:[#allocation160_spill] sm:$0xff] %v8583_v31  ;;  %v1161_v27 = vsel %vm7862_vm10, %v1159_v50, %v1160_v9  ;;  %v1182_v50 = vrot.slane %v1180_v46, 4  ;;  %v1183_v21 = vrot.slane %v11541_v6, 7 }
  0xb7   : > { %6112 = vmatprep.mubr.msk.bf16.mxu1 %vm7037_vm1, %v11295_v2  ;;  %11537 = vst [vmem:[#allocation102_spill] sm:$0xff] %v8613_v20 }
  0xb8   : > { %v8604_v36 = vsel %vm7862_vm10, %v1162_v54, %v1163_v11  ;;  %v8624_v11 = vpack.c.bf16 %v8134_v47, %v8588_v40  ;;  %v8649_v39 = vsel %vm7862_vm10, %v1182_v50, %v1183_v21  ;;  %v11544_v54 = vld [vmem:[#allocation111_spill] sm:$0xff]  ;;  %v8671_v21 = vpack.c.bf16 %v8170_v24, %v8138_v15 }
  0xb9   : > { %v8620_v9 = vcombine.low %v1161_v27, %v8604_v36  ;;  %v11592_v15 = vld [vmem:[#allocation31_spill] sm:$0xff] }
  0xba   : > { %11539 = vst [vmem:[#allocation104_spill] sm:$0xff] %v8624_v11  ;;  %11551 = vst [vmem:[#allocation163_spill] sm:$0xff] %v8671_v21  ;;  %v1827_v53 = vpack.c.bf16 %v11593_v62, %v11592_v15 }
  0xbb   : > { %6147 = vmatmul.mubr.msk.bf16.gmra.mrb[76].mxu0 %vm468_vm4, %v8572_v60  ;;  %v11532_v60 = vld [vmem:[#allocation103_spill] sm:$0xff]  ;;  %11538 = vst [vmem:[#allocation110_spill] sm:$0xff] %v8620_v9 }
  0xbc   : > { %6150 = vmatprep.mubr.msk.bf16.mxu0 %vm7037_vm1, %v11295_v2  ;;  %v8609_v23 = vcombine.low %v11533_v59, %v11532_v60  ;;  %v1179_v60 = vrot.slane %v11540_v1, 4  ;;  %v11543_v1 = vld [vmem:[#allocation112_spill] sm:$0xff] }
  0xbd   : > { %v8653_v47 = vcombine.low %v11544_v54, %v11543_v1  ;;  %v11554_v54 = vld [vmem:[#allocation123_spill] sm:$0xff]  ;;  %v8696_v1 = vcombine.low %v8444_v56, %v8455_v43  ;;  %v8715_v56 = vld [vmem:[%s7084_s19 + $0x18] sm:$0xff] }
  0xbe   : > { %11534 = vst [vmem:[#allocation103_spill] sm:$0xff] %v8609_v23  ;;  %6113 = vmatmul.mubr.msk.bf16.gmra.mrb[76].mxu1 %vm468_vm4, %v8583_v31  ;;  %v8637_v31 = vpack.c.bf16 %v8154_v61, %v8620_v9  ;;  %v8645_v59 = vsel %vm7862_vm10, %v1179_v60, %v1180_v46  ;;  %v11546_v61 = vld [vmem:[#allocation120_spill] sm:$0xff]  ;;  %v11547_v9 = vld [vmem:[#allocation113_spill] sm:$0xff]  ;;  %v11555_v60 = vld [vmem:[#allocation122_spill] sm:$0xff] }
  0xbf   : > { %6116 = vmatprep.mubr.msk.bf16.mxu1 %vm7037_vm1, %v11295_v2  ;;  %11545 = vst [vmem:[#allocation112_spill] sm:$0xff] %v8653_v47  ;;  %v8657_v29 = vcombine.low %v11547_v9, %v11546_v61  ;;  %v8667_v46 = vcombine.low %v8645_v59, %v8649_v39  ;;  %v8692_v50 = vcombine.low %v11555_v60, %v11554_v54  ;;  %11557 = vst [vmem:[#allocation122_spill] sm:$0xff] %v8696_v1  ;;  %v7005_v54 = vld [vmem:[%s7084_s19 + $0x10] sm:$0xff]  ;;  %v11563_v60 = vld [vmem:[#allocation6_spill] sm:$0xff] }
  0xc0   : > { %11542 = vst [vmem:[#allocation52_spill] sm:$0xff] %v8637_v31  ;;  %11564 = vst [vmem:[#allocation6_spill] sm:$0xff] %v8715_v56  ;;  %v8718_v43 = vld [vmem:[%s7084_s19 + $0x20] sm:$0xff] }
  0xc1   : > { %11548 = vst [vmem:[#allocation111_spill] sm:$0xff] %v8657_v29  ;;  %11550 = vst [vmem:[#allocation113_spill] sm:$0xff] %v8667_v46  ;;  %v8684_v9 = vpack.c.bf16 %v8667_v46, %v8158_v49 }
  0xc2   : > { %11556 = vst [vmem:[#allocation123_spill] sm:$0xff] %v8692_v50  ;;  %11565 = vst [vmem:[#allocation167_spill] sm:$0xff] %v8718_v43 }
  0xc3   : > { %6151 = vmatmul.mubr.msk.bf16.gmra.mrb[80].mxu0 %vm468_vm4, %v8624_v11  ;;  %v8661_v11 = vcombine.low %v8389_v30, %v8432_v41  ;;  %v8680_v41 = vcombine.low %v7004_v19, %v11541_v6  ;;  %11553 = vst [vmem:[#allocation165_spill] sm:$0xff] %v8684_v9  ;;  %v11558_v19 = vld [vmem:[#allocation136_spill] sm:$0xff]  ;;  %v8704_v30 = vcombine.low %v8459_v52, %v8512_v18  ;;  %v11566_v52 = vld [vmem:[#allocation141_spill] sm:$0xff] }
  0xc4   : > { %6154 = vmatprep.mubr.msk.bf16.mxu0 %vm7037_vm1, %v11295_v2  ;;  %v11559_v6 = vld [vmem:[#allocation124_spill] sm:$0xff]  ;;  %v8742_v18 = vcombine.low %v8522_v22, %v8540_v25 }
  0xc5   : > { %11549 = vst [vmem:[#allocation120_spill] sm:$0xff] %v8661_v11  ;;  %11552 = vst [vmem:[#allocation164_spill] sm:$0xff] %v8680_v41  ;;  %v8700_v61 = vcombine.low %v11559_v6, %v11558_v19  ;;  %v1589_v19 = vcombine.low %v8715_v56, %v8718_v43  ;;  %v5519_v6 = vld [vmem:[%s10915_s1 + $0xe] sm:$0x3] }
  0xc6   : > { %6117 = vmatmul.mubr.msk.bf16.gmra.mrb[80].mxu1 %vm468_vm4, %v8637_v31  ;;  %11561 = vst [vmem:[#allocation124_spill] sm:$0xff] %v8704_v30  ;;  %v1588_v31 = vcombine.low %v7005_v54, %v11563_v60  ;;  %v2074_v60 = vsel %vm496_vm0, %v5519_v6, 0  ;;  %v11576_v6 = vld [vmem:[#allocation21_spill] sm:$0xff] }
  0xc7   : > { %6120 = vmatprep.mubr.msk.bf16.mxu1 %vm7037_vm1, %v11295_v2  ;;  %11560 = vst [vmem:[#allocation136_spill] sm:$0xff] %v8700_v61 }
  0xc8   : > { %v1614_v54 = vpack.c.bf16 %v1589_v19, %v1588_v31  ;;  %v5530_v31 = vld [vmem:[%s10915_s1 + $0x10] sm:$0x3]  ;;  %v11574_v19 = vld [vmem:[#allocation23_spill] sm:$0xff] }
  0xc9   : > { %v2284_v25 = vsel %vm496_vm0, %v5530_v31, 0  ;;  %v8786_v31 = vcombine.low %v8604_v36, %v8120_v5 }
  0xcb   : > { %6155 = vmatmul.mubr.msk.bf16.gmra.mrb[84].mxu0 %vm468_vm4, %v8671_v21  ;;  %v8708_v21 = vpack.c.bf16 %v8680_v41, %v8174_v17  ;;  %v11570_v17 = vld [vmem:[#allocation142_spill] sm:$0xff] }
  0xcc   : > { %6158 = vmatprep.mubr.msk.bf16.mxu0 %vm7037_vm1, %v11295_v2  ;;  %v8746_v46 = vcombine.low %v11570_v17, %v8051_v16  ;;  %v5518_v16 = vrot.slane %v8311_v34, 10  ;;  %v11159_v17 = vrot.slane %v8342_v57, 6 }
  0xcd   : > { %11562 = vst [vmem:[#allocation166_spill] sm:$0xff] %v8708_v21 }
  0xce   : > { %6121 = vmatmul.mubr.msk.bf16.gmra.mrb[84].mxu1 %vm468_vm4, %v8684_v9  ;;  %v11567_v9 = vld [vmem:[#allocation138_spill] sm:$0xff]  ;;  %11571 = vst [vmem:[#allocation142_spill] sm:$0xff] %v8746_v46 }
  0xcf   : > { %6164 = vmatprep.mubr.msk.bf16.mxu1 %vm7037_vm1, %v11295_v2  ;;  %v8738_v41 = vcombine.low %v11567_v9, %v11566_v52  ;;  %11569 = vst [vmem:[#allocation138_spill] sm:$0xff] %v8742_v18  ;;  %v11575_v52 = vld [vmem:[#allocation33_spill] sm:$0xff] }
  0xd0   : > { %11578 = vst [vmem:[#allocation33_spill] sm:$0xff] %v8786_v31 }
  0xd1   : > { %11568 = vst [vmem:[#allocation141_spill] sm:$0xff] %v8738_v41 }
  0xd3   : > { %6159 = vmatmul.mubr.msk.bf16.gmra.mrb[88].mxu0 %vm468_vm4, %v8708_v21  ;;  %v8749_v21 = vcombine.low %v8544_v4, %v1161_v27  ;;  %v8769_v4 = vsel %vm7542_vm7, %v5518_v16, %v11159_v17  ;;  %v1615_v27 = vpack.c.bf16 %v8196_v0, %v7990_v44 }
  0xd4   : > { %6202 = vmatprep.mubr.msk.bf16.mxu0 %vm7037_vm1, %v11295_v2  ;;  %11573 = vst [vmem:[#allocation169_spill] sm:$0xff] %v8769_v4  ;;  %v8790_v16 = vcombine.low %v8063_v13, %v8769_v4  ;;  %v8804_v13 = vld [vmem:[%s7084_s19 + $0xc8] sm:$0xff] }
  0xd5   : > { %11572 = vst [vmem:[#allocation168_spill] sm:$0xff] %v8749_v21  ;;  %v8826_v22 = vcombine.high %v8804_v13, %v8804_v13 }
  0xd6   : > { %6165 = vmatmul.mubr.msk.bf16.vlgmr.msra.gmra.mrb[88].mxu1 %vm468_vm4, %v1614_v54  ;;  %v1791_v54 = vcombine.low %v11576_v6, %v11575_v52  ;;  %11579 = vst [vmem:[#allocation21_spill] sm:$0xff] %v8790_v16  ;;  %v11581_v52 = vld [vmem:[#allocation34_spill] sm:$0xff] }
  0xd7   : > { %6239 = vmatpush3.bf16.msra.mxu1 %v2074_v60  ;;  %6168 = vmatprep.mubr.msk.bf16.mxu1 %vm7037_vm1, %v11295_v2  ;;  %v8782_v60 = vcombine.low %v8055_v45, %v8059_v48  ;;  %v11583_v48 = vld [vmem:[#allocation148_spill] sm:$0xff]  ;;  %v2207_v49 = vrot.slane %v8826_v22, 7 }
  0xd8   : > { %6314 = vmatprep.subr.bf16.mxu1 %v11295_v2  ;;  %v1826_v6 = vpack.c.bf16 %v11581_v52, %v1791_v54  ;;  %v8817_v45 = vcombine.low %v11583_v48, %v8645_v59  ;;  %v8835_v59 = vld [vmem:[%s7084_s19 + $0xd0] sm:$0xff]  ;;  %v8841_v48 = vld [vmem:[%s7084_s19 + $0xe0] sm:$0xff] }
  0xd9   : > { %11577 = vst [vmem:[#allocation23_spill] sm:$0xff] %v8782_v60  ;;  %11588 = vst [vmem:[#allocation172_spill] sm:$0xff] %v8841_v48  ;;  %v8873_v44 = vcombine.high %v8841_v48, %v8841_v48  ;;  %v5642_v15 = vrot.slane %v8841_v48, 11  ;;  %v11628_v48 = vld [vmem:[#allocation51_spill] sm:$0xff] }
  0xda   : > { %11584 = vst [vmem:[#allocation148_spill] sm:$0xff] %v8817_v45  ;;  %v8887_v45 = vld [vmem:[%s7084_s19 + $0xe8] sm:$0xff] }
  0xdb   : > { %6203 = vmatmul.mubr.msk.bf16.vlgmr.msra.gmra.mrb[92].mxu0 %vm468_vm4, %v11574_v19  ;;  %v2201_v19 = vrot.slane %v8342_v57, 7  ;;  %11594 = vst [vmem:[#allocation176_spill] sm:$0xff] %v8873_v44  ;;  %v4015_v56 = vrot.slane %v8873_v44, 7  ;;  %11595 = vst [vmem:[#allocation177_spill] sm:$0xff] %v8887_v45 }
  0xdc   : > { %6277 = vmatpush3.bf16.msra.mxu0 %v2284_v25  ;;  %6206 = vmatprep.mubr.msk.bf16.mxu0 %vm7037_vm1, %v11295_v2  ;;  %v8794_v25 = vcombine.low %v8130_v28, %v8144_v51  ;;  %v5529_v51 = vrot.slane %v8311_v34, 11  ;;  %v2204_v28 = vrot.slane %v8804_v13, 7 }
  0xdd   : > { %6352 = vmatprep.subr.bf16.mxu0 %v11295_v2  ;;  %v2203_v5 = vrot.slane %v2201_v19, 4  ;;  %v4017_v42 = vrot.slane %v4015_v56, 4 }
  0xde   : > { %11580 = vst [vmem:[#allocation170_spill] sm:$0xff] %v8794_v25  ;;  %6169 = vmatmul.mubr.msk.bf16.gmra.mrb[92].mxu1 %vm468_vm4, %v1615_v27  ;;  %v2202_v36 = vsel %vm7862_vm10, %v5529_v51, %v2201_v19  ;;  %v11582_v27 = vld [vmem:[#allocation154_spill] sm:$0xff]  ;;  %v11586_v51 = vld [vmem:[#allocation41_spill] sm:$0xff]  ;;  %v2206_v52 = vrot.slane %v2204_v28, 4 }
  0xdf   : > { %6172 = vmatprep.mubr.msk.bf16.mxu1 %vm7037_vm1, %v11295_v2  ;;  %v1616_v54 = vpack.c.bf16 %v8380_v32, %v11582_v27  ;;  %v8820_v9 = vcombine.low %v8649_v39, %v2202_v36  ;;  %v2205_v19 = vsel %vm7862_vm10, %v2203_v5, %v2204_v28  ;;  %v8838_v39 = vld [vmem:[%s7084_s19 + $0xd8] sm:$0xff]  ;;  %v8850_v5 = vcombine.high %v8835_v59, %v8835_v59  ;;  %v8859_v28 = vld [vmem:[%s7084_s19 + $0x60] sm:$0xff] }
  0xe0   : > { %v8843_v0 = vcombine.low %v2202_v36, %v2205_v19  ;;  %v8862_v36 = vld [vmem:[%s7084_s19 + $0x58] sm:$0xff]  ;;  %v5588_v32 = vrot.slane %v8835_v59, 11  ;;  %v2208_v43 = vsel %vm7862_vm10, %v2206_v52, %v2207_v49 }
  0xe1   : > { %11585 = vst [vmem:[#allocation171_spill] sm:$0xff] %v8820_v9  ;;  %v8866_v27 = vcombine.low %v8862_v36, %v8859_v28 }
  0xe2   : > { %11589 = vst [vmem:[#allocation173_spill] sm:$0xff] %v8843_v0 }
  0xe3   : > { %6207 = vmatmul.mubr.msk.bf16.gmra.mrb[96].mxu0 %vm468_vm4, %v1826_v6  ;;  %v7008_v6 = vld [vmem:[%s7084_s19 + $0x50] sm:$0xff]  ;;  %11591 = vst [vmem:[#allocation175_spill] sm:$0xff] %v8866_v27 }
  0xe4   : > { %6210 = vmatprep.mubr.msk.bf16.mxu0 %vm7037_vm1, %v11295_v2  ;;  %v8832_v17 = vcombine.low %v7008_v6, %v11586_v51  ;;  %v8854_v6 = vcombine.high %v8838_v39, %v8838_v39  ;;  %v3136_v51 = vrot.slane %v8838_v39, 7 }
  0xe6   : > { %11587 = vst [vmem:[#allocation41_spill] sm:$0xff] %v8832_v17  ;;  %11590 = vst [vmem:[#allocation174_spill] sm:$0xff] %v8854_v6  ;;  %6173 = vmatmul.mubr.msk.bf16.gmra.mrb[96].mxu1 %vm468_vm4, %v1616_v54  ;;  %v3133_v54 = vrot.slane %v8850_v5, 7  ;;  %v3138_v4 = vrot.slane %v3136_v51, 4  ;;  %v3139_v9 = vrot.slane %v8854_v6, 7  ;;  %v1617_v16 = vpack.c.bf16 %v8866_v27, %v8832_v17 }
  0xe7   : > { %6176 = vmatprep.mubr.msk.bf16.mxu1 %vm7037_vm1, %v11295_v2  ;;  %v11185_v27 = vrot.slane %v8887_v45, 7  ;;  %v8900_v17 = vcombine.low %v2205_v19, %v2208_v43  ;;  %v7012_v45 = vld [vmem:[%s7084_s19 + $0xa8] sm:$0xff] }
  0xe8   : > { %v3135_v62 = vrot.slane %v3133_v54, 4  ;;  %v3134_v25 = vsel %vm7862_vm10, %v5588_v32, %v3133_v54  ;;  %v8897_v52 = vsel %vm7862_vm10, %v3138_v4, %v3139_v9  ;;  %v8906_v32 = vsel %vm7862_vm10, %v5642_v15, %v4015_v56  ;;  %v11600_v9 = vld [vmem:[#allocation36_spill] sm:$0xff]  ;;  %v11601_v4 = vld [vmem:[#allocation67_spill] sm:$0xff] }
  0xe9   : > { %11596 = vst [vmem:[#allocation178_spill] sm:$0xff] %v8897_v52  ;;  %v8902_v44 = vcombine.low %v2208_v43, %v3134_v25  ;;  %11598 = vst [vmem:[#allocation180_spill] sm:$0xff] %v8906_v32 }
  0xea   : > { %v3137_v49 = vsel %vm7862_vm10, %v3135_v62, %v3136_v51  ;;  %v8912_v62 = vsel %vm7862_vm10, %v4017_v42, %v11185_v27  ;;  %v1828_v51 = vpack.c.bf16 %v11601_v4, %v11600_v9  ;;  %v11606_v42 = vld [vmem:[#allocation70_spill] sm:$0xff]  ;;  %v1787_v9 = vrot.slane %v8826_v22, 5 }
  0xeb   : > { %6211 = vmatmul.mubr.msk.bf16.gmra.mrb[100].mxu0 %vm468_vm4, %v1827_v53  ;;  %v4023_v53 = vcombine.low %v3134_v25, %v3137_v49  ;;  %11597 = vst [vmem:[#allocation179_spill] sm:$0xff] %v8902_v44  ;;  %11599 = vst [vmem:[#allocation181_spill] sm:$0xff] %v8912_v62  ;;  %v8918_v19 = vcombine.low %v3137_v49, %v8897_v52  ;;  %v4833_v15 = vcombine.low %v8906_v32, %v8912_v62  ;;  %v11605_v25 = vld [vmem:[#allocation66_spill] sm:$0xff]  ;;  %v11607_v52 = vld [vmem:[#allocation55_spill] sm:$0xff] }
  0xec   : > { %6214 = vmatprep.mubr.msk.bf16.mxu0 %vm7037_vm1, %v11295_v2  ;;  %v1618_v54 = vpack.c.bf16 %v11605_v25, %v8448_v55  ;;  %v1619_v32 = vpack.c.bf16 %v8588_v40, %v11607_v52  ;;  %v9013_v44 = vcombine.low %v8342_v57, %v8804_v13 }
  0xed   : > { %11602 = vst [vmem:[#allocation182_spill] sm:$0xff] %v8918_v19  ;;  %v8921_v43 = vpack.c.bf16 %v4023_v53, %v8900_v17  ;;  %v8930_v56 = vpack.c.bf16 %v4833_v15, %v8918_v19 }
  0xee   : > { %6177 = vmatmul.mubr.msk.bf16.gmra.mrb[100].mxu1 %vm468_vm4, %v1617_v16  ;;  %11618 = vst [vmem:[#allocation187_spill] sm:$0xff] %v9013_v44 }
  0xef   : > { %11603 = vst [vmem:[#allocation183_spill] sm:$0xff] %v8921_v43  ;;  %6180 = vmatprep.mubr.msk.bf16.mxu1 %vm7037_vm1, %v11295_v2  ;;  %11604 = vst [vmem:[#allocation184_spill] sm:$0xff] %v8930_v56  ;;  %v1829_v56 = vpack.c.bf16 %v8296_v63, %v11606_v42  ;;  %v11609_v63 = vld [vmem:[#allocation14_spill] sm:$0xff]  ;;  %v11617_v42 = vrot.slane %v8342_v57, 5 }
  0xf0   : > { %v1830_v25 = vpack.c.bf16 %v8325_v7, %v11609_v63  ;;  %v11615_v63 = vld [vmem:[#allocation28_spill] sm:$0xff] }
  0xf1   : > { %v8932_v16 = vpop.f32.mrb[0].mxu0 }
  0xf2   : > { %v5976_v49 = vpop.f32.mrb[1].mxu0 }
  0xf3   : > { %6215 = vmatmul.mubr.msk.bf16.gmra.mrb[104].mxu0 %vm468_vm4, %v1828_v51  ;;  %v8937_v53 = vpop.f32.mrb[2].mxu0 }
  0xf4   : > { %6218 = vmatprep.mubr.msk.bf16.mxu0 %vm7037_vm1, %v11295_v2  ;;  %v5977_v27 = vpop.f32.mrb[3].mxu0 }
  0xf5   : > { %v8941_v43 = vpop.f32.mrb[0].mxu1 }
  0xf6   : > { %6181 = vmatmul.mubr.msk.bf16.gmra.mrb[104].mxu1 %vm468_vm4, %v1618_v54  ;;  %v5996_v15 = vpop.f32.mrb[1].mxu1 }
  0xf7   : > { %6184 = vmatprep.mubr.msk.bf16.mxu1 %vm7037_vm1, %v11295_v2  ;;  %v8948_v62 = vpop.f32.mrb[2].mxu1 }
  0xf8   : > { %v5997_v51 = vpop.f32.mrb[3].mxu1 }
  0xf9   : > { %v8950_v49 = vpop.f32.mrb[4].mxu0  ;;  %v8964_v51 = vcombine.low %v8502_v12, %v11517_v37  ;;  %v8981_v37 = vcombine.high %v8862_v36, %v8859_v28  ;;  %v1784_v28 = vrot.slane %v8804_v13, 5 }
  0xfa   : > { %v5980_v27 = vpop.f32.mrb[5].mxu0 }
  0xfb   : > { %6219 = vmatmul.mubr.msk.bf16.gmra.mrb[108].mxu0 %vm468_vm4, %v1829_v56  ;;  %v8955_v14 = vpop.f32.mrb[6].mxu0  ;;  %11608 = vst [vmem:[#allocation185_spill] sm:$0xff] %v8964_v51  ;;  %11611 = vst [vmem:[#allocation186_spill] sm:$0xff] %v8981_v37 }
  0xfc   : > { %6222 = vmatprep.mubr.msk.bf16.mxu0 %vm7037_vm1, %v11295_v2  ;;  %v5981_v54 = vpop.f32.mrb[7].mxu0 }
  0xfd   : > { %v11610_v54 = vld [vmem:[#allocation71_spill] sm:$0xff] }
  0xfe   : > { %6185 = vmatmul.mubr.msk.bf16.gmra.mrb[108].mxu1 %vm468_vm4, %v1619_v32  ;;  %v8960_v15 = vpop.f32.mrb[4].mxu1  ;;  %v1620_v4 = vpack.c.bf16 %v11610_v54, %v8964_v51 }
  0xff   : > { %v6000_v52 = vpop.f32.mrb[5].mxu1  ;;  %6188 = vmatprep.mubr.msk.bf16.mxu1 %vm7037_vm1, %v11295_v2 }
 0x100   : > { %v8970_v56 = vpop.f32.mrb[6].mxu1  ;;  %v11612_v52 = vld [vmem:[#allocation9_spill] sm:$0xff] }
 0x101   : > { %v6001_v27 = vpop.f32.mrb[7].mxu1  ;;  %v8985_v7 = vcombine.low %v8316_v58, %v11612_v52  ;;  %v11616_v52 = vld [vmem:[#allocation24_spill] sm:$0xff] }
 0x103   : > { %6223 = vmatmul.mubr.msk.bf16.gmra.mrb[112].mxu0 %vm468_vm4, %v1830_v25  ;;  %v8975_v32 = vpop.f32.mrb[8].mxu0  ;;  %11613 = vst [vmem:[#allocation9_spill] sm:$0xff] %v8985_v7  ;;  %v11614_v25 = vld [vmem:[#allocation15_spill] sm:$0xff]  ;;  %v11624_v7 = vld [vmem:[#allocation53_spill] sm:$0xff] }
 0x104   : > { %6226 = vmatprep.mubr.msk.bf16.mxu0 %vm7037_vm1, %v11295_v2  ;;  %v5984_v12 = vpop.f32.mrb[9].mxu0  ;;  %v1831_v51 = vpack.c.bf16 %v11615_v63, %v11614_v25  ;;  %v1783_v63 = vrot.slane %v11617_v42, 4  ;;  %v1786_v25 = vrot.slane %v1784_v28, 4  ;;  %v1622_v37 = vpack.c.bf16 %v9013_v44, %v11624_v7 }
 0x105   : > { %v8987_v27 = vpop.f32.mrb[10].mxu0  ;;  %v9067_v42 = vcombine.low %v7012_v45, %v11628_v48 }
 0x106   : > { %6189 = vmatmul.mubr.msk.bf16.gmra.mrb[112].mxu1 %vm468_vm4, %v1620_v4  ;;  %v5985_v54 = vpop.f32.mrb[11].mxu0  ;;  %v1621_v4 = vpack.c.bf16 %v11616_v52, %v8170_v24  ;;  %v11620_v52 = vld [vmem:[#allocation59_spill] sm:$0xff]  ;;  %v9024_v40 = vsel %vm7124_vm5, %v1783_v63, %v1784_v28  ;;  %v11626_v28 = vld [vmem:[#allocation44_spill] sm:$0xff] }
 0x107   : > { %v8994_v12 = vpop.f32.mrb[8].mxu1  ;;  %6192 = vmatprep.mubr.msk.bf16.mxu1 %vm7037_vm1, %v11295_v2  ;;  %11622 = vst [vmem:[#allocation188_spill] sm:$0xff] %v9024_v40 }
 0x108   : > { %v6004_v58 = vpop.f32.mrb[9].mxu1 }
 0x109   : > { %v8999_v36 = vpop.f32.mrb[10].mxu1 }
 0x10a   : > { %v6005_v54 = vpop.f32.mrb[11].mxu1 }
 0x10b   : > { %6227 = vmatmul.mubr.msk.bf16.gmra.mrb[116].mxu0 %vm468_vm4, %v1831_v51  ;;  %v11619_v54 = vld [vmem:[#allocation27_spill] sm:$0xff] }
 0x10c   : > { %6230 = vmatprep.mubr.msk.bf16.mxu0 %vm7037_vm1, %v11295_v2  ;;  %v9009_v19 = vpop.f32.mrb[12].mxu0  ;;  %v1832_v24 = vpack.c.bf16 %v11620_v52, %v11619_v54 }
 0x10d   : > { %v5988_v58 = vpop.f32.mrb[13].mxu0 }
 0x10e   : > { %6193 = vmatmul.mubr.msk.bf16.gmra.mrb[116].mxu1 %vm468_vm4, %v1621_v4  ;;  %v9016_v51 = vpop.f32.mrb[14].mxu0  ;;  %v9028_v58 = vsel %vm7124_vm5, %v1786_v25, %v1787_v9 }
 0x10f   : > { %v5989_v0 = vpop.f32.mrb[15].mxu0  ;;  %6196 = vmatprep.mubr.msk.bf16.mxu1 %vm7037_vm1, %v11295_v2  ;;  %11623 = vst [vmem:[#allocation189_spill] sm:$0xff] %v9028_v58 }
 0x110   : > { %v9037_v0 = vcombine.low %v9024_v40, %v9028_v58 }
 0x111   : > { %v9030_v55 = vpop.f32.mrb[12].mxu1 }
 0x112   : > { %v6008_v4 = vpop.f32.mrb[13].mxu1  ;;  %11625 = vst [vmem:[#allocation190_spill] sm:$0xff] %v9037_v0 }
 0x113   : > { %6231 = vmatmul.mubr.msk.bf16.gmra.mrb[120].mxu0 %vm468_vm4, %v1832_v24  ;;  %v9039_v52 = vpop.f32.mrb[14].mxu1  ;;  %v1833_v4 = vpack.c.bf16 %v9037_v0, %v11626_v28 }
 0x114   : > { %6234 = vmatprep.mubr.msk.bf16.mxu0 %vm7037_vm1, %v11295_v2  ;;  %v6009_v63 = vpop.f32.mrb[15].mxu1 }
 0x115   : > { %v5546_v63 = vld [vmem:[%s10915_s1 + $0x12] sm:$0x3] }
 0x116   : > { %v9043_v9 = vpop.f32.mrb[16].mxu0  ;;  %6197 = vmatmul.mubr.msk.bf16.gmra.mrb[120].mxu1 %vm468_vm4, %v1622_v37  ;;  %v2472_v58 = vsel %vm496_vm0, %v5546_v63, 0  ;;  %v11630_v63 = vld [vmem:[#allocation79_spill] sm:$0xff] }
 0x117   : > { %v5992_v25 = vpop.f32.mrb[17].mxu0  ;;  %6240 = vmatprep.mubr.msk.bf16.mxu1 %vm7037_vm1, %v11295_v2 }
 0x118   : > { %v9048_v24 = vpop.f32.mrb[18].mxu0 }
 0x119   : > { %v5993_v7 = vpop.f32.mrb[19].mxu0  ;;  %v669_v54 = vpop.f32.mrb[16].mxu1 }
 0x11a   : > { %v670_v44 = vadd.f32 %v669_v54, %v8932_v16  ;;  %v6014_v37 = vpop.f32.mrb[17].mxu1  ;;  %v7011_v7 = vld [vmem:[%s7084_s19 + $0xa0] sm:$0xff]  ;;  %v5556_v54 = vld [vmem:[%s10915_s1 + $0x14] sm:$0x3] }
 0x11b   : > { %6235 = vmatmul.mubr.msk.bf16.gmra.mrb[124].mxu0 %vm468_vm4, %v1833_v4  ;;  %v672_v25 = vpop.f32.mrb[18].mxu1  ;;  %v9063_v40 = vcombine.high %v8547_v35, %v7011_v7  ;;  %v11629_v4 = vld [vmem:[#allocation80_spill] sm:$0xff]  ;;  %v11631_v37 = vld [vmem:[#allocation78_spill] sm:$0xff]  ;;  %v2645_v6 = vsel %vm496_vm0, %v5556_v54, 0  ;;  %v9118_v35 = vcombine.low %v8311_v34, %v8342_v57 }
 0x11c   : > { %6278 = vmatprep.mubr.msk.bf16.mxu0 %vm7037_vm1, %v11295_v2  ;;  %v673_v0 = vadd.f32 %v672_v25, %v8937_v53  ;;  %v6015_v28 = vpop.f32.mrb[19].mxu1  ;;  %v2001_v25 = vcombine.low %v11631_v37, %v11630_v63  ;;  %v11633_v37 = vld [vmem:[#allocation126_spill] sm:$0xff] }
 0x11d   : > { %11627 = vst [vmem:[#allocation191_spill] sm:$0xff] %v9063_v40  ;;  %11638 = vst [vmem:[#allocation79_spill] sm:$0xff] %v9118_v35 }
 0x11e   : > { %v973_v16 = vpop.f32.mrb[20].mxu0  ;;  %6241 = vmatmul.mubr.msk.bf16.vlgmr.msra.gmra.mrb[124].mxu1 %vm468_vm4, %v11629_v4 }
 0x11f   : > { %v9074_v53 = vadd.f32 %v973_v16, %v670_v44  ;;  %v6052_v28 = vpop.f32.mrb[21].mxu0  ;;  %6315 = vmatpush3.bf16.msra.mxu1 %v2472_v58  ;;  %6244 = vmatprep.mubr.msk.bf16.mxu1 %vm7037_vm1, %v11295_v2 }
 0x120   : > { %v976_v7 = vpop.f32.mrb[22].mxu0  ;;  %6390 = vmatprep.subr.bf16.mxu1 %v11295_v2  ;;  %v11632_v28 = vld [vmem:[#allocation128_spill] sm:$0xff] }
 0x121   : > { %v9082_v45 = vadd.f32 %v976_v7, %v673_v0  ;;  %v6053_v48 = vpop.f32.mrb[23].mxu0  ;;  %v677_v44 = vpop.f32.mrb[20].mxu1  ;;  %v2036_v63 = vpack.c.bf16 %v11632_v28, %v2001_v25  ;;  %v9099_v25 = vcombine.low %v8804_v13, %v8826_v22 }
 0x122   : > { %v678_v16 = vadd.f32 %v677_v44, %v8950_v49  ;;  %v6018_v4 = vpop.f32.mrb[21].mxu1 }
 0x123   : > { %6279 = vmatmul.mubr.msk.bf16.vlgmr.msra.gmra.mrb[128].mxu0 %vm468_vm4, %v11633_v37  ;;  %v680_v58 = vpop.f32.mrb[22].mxu1  ;;  %11634 = vst [vmem:[#allocation51_spill] sm:$0xff] %v9099_v25 }
 0x124   : > { %6353 = vmatpush3.bf16.msra.mxu0 %v2645_v6  ;;  %6282 = vmatprep.mubr.msk.bf16.mxu0 %vm7037_vm1, %v11295_v2  ;;  %v681_v0 = vadd.f32 %v680_v58, %v8955_v14  ;;  %v6019_v7 = vpop.f32.mrb[23].mxu1  ;;  %v9103_v6 = vcombine.low %v8850_v5, %v8838_v39 }
 0x125   : > { %6428 = vmatprep.subr.bf16.mxu0 %v11295_v2  ;;  %v11636_v7 = vld [vmem:[#allocation125_spill] sm:$0xff] }
 0x126   : > { %v981_v54 = vpop.f32.mrb[24].mxu0  ;;  %6245 = vmatmul.mubr.msk.bf16.gmra.mrb[128].mxu1 %vm468_vm4, %v2036_v63  ;;  %11635 = vst [vmem:[#allocation80_spill] sm:$0xff] %v9103_v6 }
 0x127   : > { %v9095_v49 = vadd.f32 %v981_v54, %v678_v16  ;;  %v6056_v48 = vpop.f32.mrb[25].mxu0  ;;  %6248 = vmatprep.mubr.msk.bf16.mxu1 %vm7037_vm1, %v11295_v2  ;;  %v2037_v54 = vpack.c.bf16 %v8552_v10, %v11636_v7 }
 0x128   : > { %v984_v44 = vpop.f32.mrb[26].mxu0  ;;  %v11637_v48 = vld [vmem:[#allocation130_spill] sm:$0xff] }
 0x129   : > { %v9107_v14 = vadd.f32 %v984_v44, %v681_v0  ;;  %v6057_v4 = vpop.f32.mrb[27].mxu0  ;;  %v685_v63 = vpop.f32.mrb[24].mxu1  ;;  %v9122_v0 = vcombine.low %v8804_v13, %v8835_v59 }
 0x12a   : > { %v686_v37 = vadd.f32 %v685_v63, %v8975_v32  ;;  %v6022_v58 = vpop.f32.mrb[25].mxu1 }
 0x12b   : > { %6283 = vmatmul.mubr.msk.bf16.gmra.mrb[132].mxu0 %vm468_vm4, %v11637_v48  ;;  %v688_v44 = vpop.f32.mrb[26].mxu1 }
 0x12c   : > { %6286 = vmatprep.mubr.msk.bf16.mxu0 %vm7037_vm1, %v11295_v2  ;;  %v689_v32 = vadd.f32 %v688_v44, %v8987_v27  ;;  %v6023_v4 = vpop.f32.mrb[27].mxu1 }
 0x12d   : > { %v2038_v4 = vpack.c.bf16 %v8609_v23, %v8556_v33 }
 0x12e   : > { %v989_v58 = vpop.f32.mrb[28].mxu0  ;;  %6249 = vmatmul.mubr.msk.bf16.gmra.mrb[132].mxu1 %vm468_vm4, %v2037_v54  ;;  %v11639_v54 = vpack.c.bf16 %v8534_v26, %v8530_v8 }
 0x12f   : > { %v9130_v48 = vadd.f32 %v989_v58, %v686_v37  ;;  %v6060_v34 = vpop.f32.mrb[29].mxu0  ;;  %6252 = vmatprep.mubr.msk.bf16.mxu1 %vm7037_vm1, %v11295_v2 }
 0x130   : > { %v992_v16 = vpop.f32.mrb[30].mxu0 }
 0x131   : > { %v9134_v10 = vadd.f32 %v992_v16, %v689_v32  ;;  %v6061_v28 = vpop.f32.mrb[31].mxu0  ;;  %v693_v7 = vpop.f32.mrb[28].mxu1 }
 0x132   : > { %v694_v27 = vadd.f32 %v693_v7, %v9009_v19  ;;  %v6026_v44 = vpop.f32.mrb[29].mxu1 }
 0x133   : > { %6287 = vmatmul.mubr.msk.bf16.gmra.mrb[136].mxu0 %vm468_vm4, %v11639_v54  ;;  %v696_v37 = vpop.f32.mrb[30].mxu1 }
 0x134   : > { %6290 = vmatprep.mubr.msk.bf16.mxu0 %vm7037_vm1, %v11295_v2  ;;  %v697_v16 = vadd.f32 %v696_v37, %v9016_v51  ;;  %v6027_v32 = vpop.f32.mrb[31].mxu1  ;;  %v2039_v51 = vpack.c.bf16 %v8653_v47, %v8613_v20  ;;  %v11666_v47 = vld [vmem:[#allocation40_spill] sm:$0xff] }
 0x136   : > { %v997_v28 = vpop.f32.mrb[32].mxu0  ;;  %6253 = vmatmul.mubr.msk.bf16.gmra.mrb[136].mxu1 %vm468_vm4, %v2038_v4  ;;  %v11640_v4 = vpack.c.bf16 %v8596_v3, %v8592_v38  ;;  %v11670_v3 = vld [vmem:[#allocation89_spill] sm:$0xff] }
 0x137   : > { %v9147_v19 = vadd.f32 %v997_v28, %v694_v27  ;;  %v6064_v7 = vpop.f32.mrb[33].mxu0  ;;  %6256 = vmatprep.mubr.msk.bf16.mxu1 %vm7037_vm1, %v11295_v2  ;;  %v2249_v28 = vpack.c.bf16 %v8696_v1, %v8661_v11  ;;  %v11671_v11 = vld [vmem:[#allocation97_spill] sm:$0xff] }
 0x138   : > { %v1000_v58 = vpop.f32.mrb[34].mxu0  ;;  %v2608_v20 = vpack.c.bf16 %v11671_v11, %v11670_v3 }
 0x139   : > { %v9151_v34 = vadd.f32 %v1000_v58, %v697_v16  ;;  %v6065_v44 = vpop.f32.mrb[35].mxu0  ;;  %v701_v54 = vpop.f32.mrb[32].mxu1 }
 0x13a   : > { %v702_v63 = vadd.f32 %v701_v54, %v9043_v9  ;;  %v6030_v23 = vpop.f32.mrb[33].mxu1 }
 0x13b   : > { %6291 = vmatmul.mubr.msk.bf16.gmra.mrb[140].mxu0 %vm468_vm4, %v11640_v4  ;;  %v704_v27 = vpop.f32.mrb[34].mxu1 }
 0x13c   : > { %6294 = vmatprep.mubr.msk.bf16.mxu0 %vm7037_vm1, %v11295_v2  ;;  %v705_v37 = vadd.f32 %v704_v27, %v9048_v24  ;;  %v6031_v16 = vpop.f32.mrb[35].mxu1 }
 0x13e   : > { %v1005_v32 = vpop.f32.mrb[36].mxu0  ;;  %6257 = vmatmul.mubr.msk.bf16.gmra.mrb[140].mxu1 %vm468_vm4, %v2039_v51  ;;  %v2040_v51 = vpack.c.bf16 %v8692_v50, %v8657_v29 }
 0x13f   : > { %v9164_v9 = vadd.f32 %v1005_v32, %v702_v63  ;;  %v6068_v23 = vpop.f32.mrb[37].mxu0  ;;  %6260 = vmatprep.mubr.msk.bf16.mxu1 %vm7037_vm1, %v11295_v2 }
 0x140   : > { %v1008_v7 = vpop.f32.mrb[38].mxu0 }
 0x141   : > { %v9170_v58 = vadd.f32 %v1008_v7, %v705_v37  ;;  %v6069_v44 = vpop.f32.mrb[39].mxu0  ;;  %v709_v54 = vpop.f32.mrb[36].mxu1 }
 0x142   : > { %v710_v24 = vadd.f32 %v709_v54, %v8941_v43  ;;  %v6034_v4 = vpop.f32.mrb[37].mxu1  ;;  %v2250_v43 = vpack.c.bf16 %v8742_v18, %v8704_v30  ;;  %v7015_v18 = vld [vmem:[%s7084_s19 + $0x40] sm:$0xff] }
 0x143   : > { %6295 = vmatmul.mubr.msk.bf16.gmra.mrb[144].mxu0 %vm468_vm4, %v2249_v28  ;;  %v712_v63 = vpop.f32.mrb[38].mxu1 }
 0x144   : > { %6298 = vmatprep.mubr.msk.bf16.mxu0 %vm7037_vm1, %v11295_v2  ;;  %v713_v27 = vadd.f32 %v712_v63, %v8948_v62  ;;  %v6035_v16 = vpop.f32.mrb[39].mxu1  ;;  %v1994_v63 = vrot.slane %v8804_v13, 6 }
 0x146   : > { %v1013_v32 = vpop.f32.mrb[40].mxu0  ;;  %6261 = vmatmul.mubr.msk.bf16.gmra.mrb[144].mxu1 %vm468_vm4, %v2040_v51  ;;  %v2041_v51 = vpack.c.bf16 %v8738_v41, %v8700_v61  ;;  %v1996_v13 = vrot.slane %v1994_v63, 4 }
 0x147   : > { %v9180_v37 = vadd.f32 %v1013_v32, %v710_v24  ;;  %v6072_v23 = vpop.f32.mrb[41].mxu0  ;;  %6264 = vmatprep.mubr.msk.bf16.mxu1 %vm7037_vm1, %v11295_v2 }
 0x148   : > { %v1016_v7 = vpop.f32.mrb[42].mxu0 }
 0x149   : > { %v9186_v28 = vadd.f32 %v1016_v7, %v713_v27  ;;  %v6073_v44 = vpop.f32.mrb[43].mxu0  ;;  %v717_v54 = vpop.f32.mrb[40].mxu1  ;;  %v2251_v7 = vpack.c.bf16 %v8786_v31, %v8749_v21 }
 0x14a   : > { %v718_v62 = vadd.f32 %v717_v54, %v8960_v15  ;;  %v6038_v4 = vpop.f32.mrb[41].mxu1 }
 0x14b   : > { %6299 = vmatmul.mubr.msk.bf16.gmra.mrb[148].mxu0 %vm468_vm4, %v2250_v43  ;;  %v720_v24 = vpop.f32.mrb[42].mxu1  ;;  %v11641_v43 = vrot.slane %v8342_v57, 6 }
 0x14c   : > { %6302 = vmatprep.mubr.msk.bf16.mxu0 %vm7037_vm1, %v11295_v2  ;;  %v721_v16 = vadd.f32 %v720_v24, %v8970_v56  ;;  %v6039_v27 = vpop.f32.mrb[43].mxu1  ;;  %v1997_v56 = vrot.slane %v8826_v22, 6 }
 0x14d   : > { %v1993_v54 = vrot.slane %v11641_v43, 4 }
 0x14e   : > { %v1021_v32 = vpop.f32.mrb[44].mxu0  ;;  %6265 = vmatmul.mubr.msk.bf16.gmra.mrb[148].mxu1 %vm468_vm4, %v2041_v51  ;;  %v9220_v22 = vsel %vm7542_vm7, %v1996_v13, %v1997_v56 }
 0x14f   : > { %v9197_v23 = vadd.f32 %v1021_v32, %v718_v62  ;;  %v6076_v15 = vpop.f32.mrb[45].mxu0  ;;  %6268 = vmatprep.mubr.msk.bf16.mxu1 %vm7037_vm1, %v11295_v2  ;;  %v2042_v32 = vpack.c.bf16 %v8782_v60, %v8746_v46  ;;  %v9216_v43 = vsel %vm7542_vm7, %v1993_v54, %v1994_v63  ;;  %v11645_v63 = vld [vmem:[#allocation148_spill] sm:$0xff]  ;;  %v7014_v46 = vld [vmem:[%s7084_s19 + $0x38] sm:$0xff] }
 0x150   : > { %v1024_v44 = vpop.f32.mrb[46].mxu0 }
 0x151   : > { %v9206_v4 = vadd.f32 %v1024_v44, %v721_v16  ;;  %v6077_v24 = vpop.f32.mrb[47].mxu0  ;;  %v725_v51 = vpop.f32.mrb[44].mxu1 }
 0x152   : > { %v726_v62 = vadd.f32 %v725_v51, %v8994_v12  ;;  %v6042_v27 = vpop.f32.mrb[45].mxu1  ;;  %v9228_v51 = vcombine.low %v9216_v43, %v9220_v22 }
 0x153   : > { %6303 = vmatmul.mubr.msk.bf16.gmra.mrb[152].mxu0 %vm468_vm4, %v2251_v7  ;;  %v728_v15 = vpop.f32.mrb[46].mxu1  ;;  %v11644_v27 = vld [vmem:[#allocation170_spill] sm:$0xff] }
 0x154   : > { %6306 = vmatprep.mubr.msk.bf16.mxu0 %vm7037_vm1, %v11295_v2  ;;  %v729_v12 = vadd.f32 %v728_v15, %v8999_v36  ;;  %v6043_v16 = vpop.f32.mrb[47].mxu1  ;;  %11643 = vst [vmem:[#allocation78_spill] sm:$0xff] %v9228_v51  ;;  %v2252_v54 = vpack.c.bf16 %v11645_v63, %v11644_v27  ;;  %v11646_v15 = vld [vmem:[#allocation21_spill] sm:$0xff] }
 0x155   : > { %v2043_v16 = vpack.c.bf16 %v9228_v51, %v11646_v15 }
 0x156   : > { %v1029_v44 = vpop.f32.mrb[48].mxu0  ;;  %6269 = vmatmul.mubr.msk.bf16.gmra.mrb[152].mxu1 %vm468_vm4, %v2042_v32 }
 0x157   : > { %v9224_v24 = vadd.f32 %v1029_v44, %v726_v62  ;;  %v6080_v7 = vpop.f32.mrb[49].mxu0  ;;  %6272 = vmatprep.mubr.msk.bf16.mxu1 %vm7037_vm1, %v11295_v2 }
 0x158   : > { %v1032_v60 = vpop.f32.mrb[50].mxu0 }
 0x159   : > { %v9234_v13 = vadd.f32 %v1032_v60, %v729_v12  ;;  %v6081_v36 = vpop.f32.mrb[51].mxu0  ;;  %v733_v56 = vpop.f32.mrb[48].mxu1  ;;  %v11647_v60 = vld [vmem:[#allocation167_spill] sm:$0xff]  ;;  %v11648_v12 = vld [vmem:[#allocation6_spill] sm:$0xff] }
 0x15a   : > { %v734_v32 = vadd.f32 %v733_v56, %v9030_v55  ;;  %v6046_v62 = vpop.f32.mrb[49].mxu1  ;;  %v5540_v36 = vcombine.high %v11648_v12, %v11647_v60 }
 0x15b   : > { %6307 = vmatmul.mubr.msk.bf16.gmra.mrb[156].mxu0 %vm468_vm4, %v2252_v54  ;;  %v736_v44 = vpop.f32.mrb[50].mxu1  ;;  %v11649_v62 = vld [vmem:[#allocation171_spill] sm:$0xff] }
 0x15c   : > { %6310 = vmatprep.mubr.msk.bf16.mxu0 %vm7037_vm1, %v11295_v2  ;;  %v737_v7 = vadd.f32 %v736_v44, %v9039_v52  ;;  %v6047_v63 = vpop.f32.mrb[51].mxu1  ;;  %v2253_v51 = vpack.c.bf16 %v8900_v17, %v11649_v62  ;;  %v5567_v44 = vld [vmem:[%s10915_s1 + $0x16] sm:$0x3] }
 0x15e   : > { %v1037_v31 = vpop.f32.mrb[52].mxu0  ;;  %6273 = vmatmul.mubr.msk.bf16.gmra.mrb[156].mxu1 %vm468_vm4, %v2043_v16  ;;  %v11650_v16 = vld [vmem:[#allocation77_spill] sm:$0xff] }
 0x15f   : > { %v9246_v55 = vadd.f32 %v1037_v31, %v734_v32  ;;  %v6084_v56 = vpop.f32.mrb[53].mxu0  ;;  %6316 = vmatprep.mubr.msk.bf16.mxu1 %vm7037_vm1, %v11295_v2  ;;  %v2433_v31 = vpack.c.bf16 %v5540_v36, %v11650_v16 }
 0x160   : > { %v1040_v54 = vpop.f32.mrb[54].mxu0  ;;  %v2826_v56 = vsel %vm496_vm0, %v5567_v44, 0 }
 0x161   : > { %v9252_v15 = vadd.f32 %v1040_v54, %v737_v7  ;;  %v6085_v52 = vpop.f32.mrb[55].mxu0  ;;  %v1296_v63 = vpop.f32.mrb[52].mxu1 }
 0x162   : > { %v1367_v32 = vadd.f32 %v1296_v63, %v9074_v53  ;;  %v6090_v60 = vpop.f32.mrb[53].mxu1  ;;  %v5578_v52 = vld [vmem:[%s10915_s1 + $0x18] sm:$0x3] }
 0x163   : > { %6311 = vmatmul.mubr.msk.bf16.gmra.mrb[160].mxu0 %vm468_vm4, %v2253_v51  ;;  %v1299_v17 = vpop.f32.mrb[54].mxu1  ;;  %v7013_v51 = vld [vmem:[%s7084_s19 + $0x28] sm:$0xff]  ;;  %v11651_v63 = vld [vmem:[#allocation26_spill] sm:$0xff]  ;;  %v2773_v60 = vrot.slane %v8850_v5, 5 }
 0x164   : > { %6354 = vmatprep.mubr.msk.bf16.mxu0 %vm7037_vm1, %v11295_v2  ;;  %v1368_v7 = vadd.f32 %v1299_v17, %v9082_v45  ;;  %v6091_v12 = vpop.f32.mrb[55].mxu1  ;;  %v2410_v16 = vcombine.low %v7013_v51, %v11651_v63  ;;  %v3006_v17 = vsel %vm496_vm0, %v5578_v52, 0 }
 0x165   : > { %v5566_v12 = vrot.slane %v8835_v59, 9  ;;  %v2775_v52 = vrot.slane %v2773_v60, 4 }
 0x166   : > { %v1496_v54 = vpop.f32.mrb[56].mxu0  ;;  %6317 = vmatmul.mubr.msk.bf16.vlgmr.msra.gmra.mrb[160].mxu1 %vm468_vm4, %v2433_v31  ;;  %v2776_v31 = vrot.slane %v8838_v39, 5 }
 0x167   : > { %v9268_v53 = vadd.f32 %v1496_v54, %v1367_v32  ;;  %v6128_v36 = vpop.f32.mrb[57].mxu0  ;;  %6391 = vmatpush3.bf16.msra.mxu1 %v2826_v56  ;;  %6320 = vmatprep.mubr.msk.bf16.mxu1 %vm7037_vm1, %v11295_v2 }
 0x168   : > { %v1499_v62 = vpop.f32.mrb[58].mxu0  ;;  %6466 = vmatprep.subr.bf16.mxu1 %v11295_v2  ;;  %v11652_v36 = vld [vmem:[#allocation84_spill] sm:$0xff] }
 0x169   : > { %v9275_v45 = vadd.f32 %v1499_v62, %v1368_v7  ;;  %v6129_v44 = vpop.f32.mrb[59].mxu0  ;;  %v1304_v32 = vpop.f32.mrb[56].mxu1  ;;  %v2434_v51 = vpack.c.bf16 %v11652_v36, %v2410_v16  ;;  %v11653_v62 = vld [vmem:[#allocation75_spill] sm:$0xff]  ;;  %v11654_v7 = vld [vmem:[#allocation74_spill] sm:$0xff] }
 0x16a   : > { %v1369_v54 = vadd.f32 %v1304_v32, %v9095_v49  ;;  %v6094_v56 = vpop.f32.mrb[57].mxu1  ;;  %v11655_v63 = vpack.c.bf16 %v11653_v62, %v11654_v7  ;;  %v2778_v49 = vrot.slane %v2776_v31, 4  ;;  %v11656_v32 = vld [vmem:[#allocation174_spill] sm:$0xff]  ;;  %v9294_v62 = vcombine.high %v7014_v46, %v7015_v18  ;;  %v7016_v7 = vld [vmem:[%s7084_s19 + $0x48] sm:$0xff] }
 0x16b   : > { %v1307_v44 = vpop.f32.mrb[58].mxu1  ;;  %v2779_v56 = vrot.slane %v11656_v32, 5  ;;  %v9311_v46 = vsel %vm7124_vm5, %v2775_v52, %v2776_v31  ;;  %v11662_v18 = vld [vmem:[#allocation172_spill] sm:$0xff]  ;;  %v11664_v52 = vld [vmem:[#allocation177_spill] sm:$0xff] }
 0x16c   : > { %6355 = vmatmul.mubr.msk.bf16.vlgmr.msra.gmra.mrb[164].mxu0 %vm468_vm4, %v11655_v63  ;;  %v1370_v27 = vadd.f32 %v1307_v44, %v9107_v14  ;;  %v6095_v41 = vpop.f32.mrb[59].mxu1  ;;  %11657 = vst [vmem:[#allocation126_spill] sm:$0xff] %v9294_v62  ;;  %v11658_v63 = vld [vmem:[#allocation42_spill] sm:$0xff]  ;;  %v5620_v1 = vrot.slane %v11662_v18, 9 }
 0x16d   : > { %6429 = vmatpush3.bf16.msra.mxu0 %v3006_v17  ;;  %6358 = vmatprep.mubr.msk.bf16.mxu0 %vm7037_vm1, %v11295_v2  ;;  %v9298_v21 = vcombine.low %v7016_v7, %v11658_v63  ;;  %v11660_v17 = vld [vmem:[#allocation88_spill] sm:$0xff]  ;;  %v9304_v41 = vsel %vm7124_vm5, %v5566_v12, %v2773_v60  ;;  %v11668_v60 = vld [vmem:[#allocation189_spill] sm:$0xff] }
 0x16e   : > { %6504 = vmatprep.subr.bf16.mxu0 %v11295_v2  ;;  %v1504_v16 = vpop.f32.mrb[60].mxu0  ;;  %v2607_v50 = vpack.c.bf16 %v11660_v17, %v11652_v36  ;;  %6321 = vmatmul.mubr.msk.bf16.gmra.mrb[164].mxu1 %vm468_vm4, %v2434_v51  ;;  %v11663_v7 = vld [vmem:[#allocation176_spill] sm:$0xff]  ;;  %v9323_v51 = vsel %vm7124_vm5, %v2778_v49, %v2779_v56 }
 0x16f   : > { %11659 = vst [vmem:[#allocation130_spill] sm:$0xff] %v9298_v21  ;;  %v9307_v14 = vadd.f32 %v1504_v16, %v1369_v54  ;;  %v6132_v44 = vpop.f32.mrb[61].mxu0  ;;  %v3655_v63 = vrot.slane %v11663_v7, 5  ;;  %6324 = vmatprep.mubr.msk.bf16.mxu1 %vm7037_vm1, %v11295_v2  ;;  %v11237_v16 = vrot.slane %v11664_v52, 5  ;;  %v11665_v36 = vld [vmem:[#allocation188_spill] sm:$0xff] }
 0x170   : > { %v1507_v30 = vpop.f32.mrb[62].mxu0  ;;  %v2435_v44 = vpack.c.bf16 %v9298_v21, %v9294_v62  ;;  %v9330_v29 = vcombine.low %v11666_v47, %v11665_v36  ;;  %v2956_v36 = vrot.slane %v8838_v39, 6 }
 0x171   : > { %v9319_v12 = vadd.f32 %v1507_v30, %v1370_v27  ;;  %v6133_v54 = vpop.f32.mrb[63].mxu0  ;;  %v3657_v31 = vrot.slane %v3655_v63, 4  ;;  %v1312_v17 = vpop.f32.mrb[60].mxu1  ;;  %v9334_v30 = vcombine.low %v11668_v60, %v9304_v41  ;;  %v2953_v27 = vrot.slane %v8850_v5, 6 }
 0x172   : > { %11667 = vst [vmem:[#allocation167_spill] sm:$0xff] %v9330_v29  ;;  %v1371_v49 = vadd.f32 %v1312_v17, %v9130_v48  ;;  %v6098_v56 = vpop.f32.mrb[61].mxu1  ;;  %v9341_v54 = vsel %vm7124_vm5, %v5620_v1, %v3655_v63  ;;  %v9354_v48 = vcombine.low %v9311_v46, %v9323_v51 }
 0x173   : > { %v9347_v47 = vsel %vm7124_vm5, %v3657_v31, %v11237_v16  ;;  %v1315_v60 = vpop.f32.mrb[62].mxu1  ;;  %v5577_v56 = vrot.slane %v8835_v59, 10  ;;  %v2955_v16 = vrot.slane %v2953_v27, 4  ;;  %v5631_v59 = vrot.slane %v11662_v18, 10 }
 0x174   : > { %6359 = vmatmul.mubr.msk.bf16.gmra.mrb[168].mxu0 %vm468_vm4, %v2607_v50  ;;  %v4521_v50 = vcombine.low %v9341_v54, %v9347_v47  ;;  %v1372_v1 = vadd.f32 %v1315_v60, %v9134_v10  ;;  %v6099_v63 = vpop.f32.mrb[63].mxu1  ;;  %v2958_v10 = vrot.slane %v2956_v36, 4  ;;  %v2959_v60 = vrot.slane %v11656_v32, 6 }
 0x175   : > { %6362 = vmatprep.mubr.msk.bf16.mxu0 %vm7037_vm1, %v11295_v2  ;;  %v9381_v3 = vsel %vm7542_vm7, %v5577_v56, %v2953_v27 }
 0x176   : > { %v1512_v17 = vpop.f32.mrb[64].mxu0  ;;  %v9362_v39 = vpack.c.bf16 %v4521_v50, %v9354_v48  ;;  %6325 = vmatmul.mubr.msk.bf16.gmra.mrb[168].mxu1 %vm468_vm4, %v2435_v44  ;;  %v3835_v44 = vrot.slane %v11663_v7, 6 }
 0x177   : > { %v9366_v21 = vadd.f32 %v1512_v17, %v1371_v49  ;;  %v6136_v62 = vpop.f32.mrb[65].mxu0  ;;  %6328 = vmatprep.mubr.msk.bf16.mxu1 %vm7037_vm1, %v11295_v2 }
 0x178   : > { %11669 = vst [vmem:[#allocation6_spill] sm:$0xff] %v9362_v39  ;;  %v1515_v63 = vpop.f32.mrb[66].mxu0  ;;  %v11672_v62 = vld [vmem:[#allocation186_spill] sm:$0xff]  ;;  %v9385_v39 = vsel %vm7542_vm7, %v2955_v16, %v2956_v36 }
 0x179   : > { %v9373_v50 = vadd.f32 %v1515_v63, %v1372_v1  ;;  %v6137_v31 = vpop.f32.mrb[67].mxu0  ;;  %v1320_v49 = vpop.f32.mrb[64].mxu1  ;;  %v2436_v17 = vpack.c.bf16 %v11672_v62, %v11671_v11  ;;  %v9389_v1 = vsel %vm7542_vm7, %v2958_v10, %v2959_v60  ;;  %v3837_v63 = vrot.slane %v3835_v44, 4  ;;  %v11676_v60 = vld [vmem:[#allocation169_spill] sm:$0xff] }
 0x17a   : > { %11673 = vst [vmem:[#allocation77_spill] sm:$0xff] %v9389_v1  ;;  %v1373_v18 = vadd.f32 %v1320_v49, %v9147_v19  ;;  %v6102_v31 = vpop.f32.mrb[65].mxu1  ;;  %v11243_v62 = vrot.slane %v11664_v52, 6  ;;  %v9401_v10 = vsel %vm7542_vm7, %v5631_v59, %v3835_v44  ;;  %v9411_v49 = vcombine.low %v11676_v60, %v9216_v43 }
 0x17b   : > { %v1323_v56 = vpop.f32.mrb[66].mxu1  ;;  %11674 = vst [vmem:[#allocation26_spill] sm:$0xff] %v9401_v10  ;;  %v9415_v31 = vcombine.low %v9220_v22, %v9381_v3 }
 0x17c   : > { %6363 = vmatmul.mubr.msk.bf16.gmra.mrb[172].mxu0 %vm468_vm4, %v2608_v20  ;;  %v1374_v16 = vadd.f32 %v1323_v56, %v9151_v34  ;;  %v6103_v36 = vpop.f32.mrb[67].mxu1  ;;  %v9407_v20 = vsel %vm7542_vm7, %v3837_v63, %v11243_v62  ;;  %11677 = vst [vmem:[#allocation74_spill] sm:$0xff] %v9411_v49  ;;  %v9419_v34 = vcombine.low %v9385_v39, %v9389_v1  ;;  %v11679_v56 = vld [vmem:[#allocation98_spill] sm:$0xff]  ;;  %v11685_v1 = vld [vmem:[#allocation115_spill] sm:$0xff] }
 0x17d   : > { %6366 = vmatprep.mubr.msk.bf16.mxu0 %vm7037_vm1, %v11295_v2  ;;  %11675 = vst [vmem:[#allocation75_spill] sm:$0xff] %v9407_v20  ;;  %11678 = vst [vmem:[#allocation174_spill] sm:$0xff] %v9415_v31  ;;  %v4677_v59 = vcombine.low %v9401_v10, %v9407_v20  ;;  %v11680_v36 = vld [vmem:[#allocation100_spill] sm:$0xff] }
 0x17e   : > { %v1520_v19 = vpop.f32.mrb[68].mxu0  ;;  %6329 = vmatmul.mubr.msk.bf16.gmra.mrb[172].mxu1 %vm468_vm4, %v2436_v17  ;;  %v2609_v43 = vpack.c.bf16 %v11680_v36, %v11679_v56  ;;  %v11682_v56 = vld [vmem:[#allocation9_spill] sm:$0xff] }
 0x17f   : > { %v9424_v44 = vadd.f32 %v1520_v19, %v1373_v18  ;;  %v6140_v63 = vpop.f32.mrb[69].mxu0  ;;  %6332 = vmatprep.mubr.msk.bf16.mxu1 %vm7037_vm1, %v11295_v2  ;;  %v9433_v27 = vpack.c.bf16 %v4677_v59, %v9419_v34  ;;  %v11683_v36 = vld [vmem:[#allocation105_spill] sm:$0xff] }
 0x180   : > { %v1523_v60 = vpop.f32.mrb[70].mxu0  ;;  %v2437_v11 = vpack.c.bf16 %v11683_v36, %v11682_v56  ;;  %v11684_v56 = vld [vmem:[#allocation20_spill] sm:$0xff]  ;;  %v2610_v10 = vpack.c.bf16 %v11685_v1, %v11683_v36 }
 0x181   : > { %11681 = vst [vmem:[#allocation42_spill] sm:$0xff] %v9433_v27  ;;  %v9435_v62 = vadd.f32 %v1523_v60, %v1374_v16  ;;  %v6141_v17 = vpop.f32.mrb[71].mxu0  ;;  %v1328_v18 = vpop.f32.mrb[68].mxu1  ;;  %v7019_v27 = vld [vmem:[%s7084_s19 + $0x88] sm:$0xff] }
 0x182   : > { %v1375_v19 = vadd.f32 %v1328_v18, %v9164_v9  ;;  %v6106_v63 = vpop.f32.mrb[69].mxu1  ;;  %v7017_v9 = vld [vmem:[%s7084_s19 + $0x78] sm:$0xff]  ;;  %v7018_v18 = vld [vmem:[%s7084_s19 + $0x80] sm:$0xff] }
 0x183   : > { %v1331_v20 = vpop.f32.mrb[70].mxu1  ;;  %v9449_v63 = vcombine.high %v7017_v9, %v7018_v18  ;;  %v11687_v9 = vld [vmem:[#allocation134_spill] sm:$0xff] }
 0x184   : > { %6367 = vmatmul.mubr.msk.bf16.gmra.mrb[176].mxu0 %vm468_vm4, %v2609_v43  ;;  %v1376_v59 = vadd.f32 %v1331_v20, %v9170_v58  ;;  %v6107_v16 = vpop.f32.mrb[71].mxu1  ;;  %v9453_v43 = vcombine.low %v7019_v27, %v11684_v56 }
 0x185   : > { %6370 = vmatprep.mubr.msk.bf16.mxu0 %vm7037_vm1, %v11295_v2 }
 0x186   : > { %v1528_v60 = vpop.f32.mrb[72].mxu0  ;;  %6333 = vmatmul.mubr.msk.bf16.gmra.mrb[176].mxu1 %vm468_vm4, %v2437_v11  ;;  %v2438_v16 = vpack.c.bf16 %v9453_v43, %v9449_v63 }
 0x187   : > { %v9445_v17 = vadd.f32 %v1528_v60, %v1375_v19  ;;  %v6144_v22 = vpop.f32.mrb[73].mxu0  ;;  %6336 = vmatprep.mubr.msk.bf16.mxu1 %vm7037_vm1, %v11295_v2 }
 0x188   : > { %v1531_v57 = vpop.f32.mrb[74].mxu0 }
 0x189   : > { %v9459_v58 = vadd.f32 %v1531_v57, %v1376_v59  ;;  %v6145_v11 = vpop.f32.mrb[75].mxu0  ;;  %v1336_v20 = vpop.f32.mrb[72].mxu1 }
 0x18a   : > { %v1377_v22 = vadd.f32 %v1336_v20, %v9180_v37  ;;  %v6110_v19 = vpop.f32.mrb[73].mxu1  ;;  %v11686_v37 = vld [vmem:[#allocation116_spill] sm:$0xff] }
 0x18b   : > { %v1339_v27 = vpop.f32.mrb[74].mxu1  ;;  %v2611_v18 = vpack.c.bf16 %v11687_v9, %v11686_v37 }
 0x18c   : > { %6371 = vmatmul.mubr.msk.bf16.gmra.mrb[180].mxu0 %vm468_vm4, %v2610_v10  ;;  %v1378_v1 = vadd.f32 %v1339_v27, %v9186_v28  ;;  %v6111_v56 = vpop.f32.mrb[75].mxu1 }
 0x18d   : > { %6374 = vmatprep.mubr.msk.bf16.mxu0 %vm7037_vm1, %v11295_v2 }
 0x18e   : > { %v1536_v60 = vpop.f32.mrb[76].mxu0  ;;  %6337 = vmatmul.mubr.msk.bf16.gmra.mrb[180].mxu1 %vm468_vm4, %v2438_v16  ;;  %v2439_v16 = vpack.c.bf16 %v9063_v40, %v11687_v9 }
 0x18f   : > { %v9469_v57 = vadd.f32 %v1536_v60, %v1377_v22  ;;  %v6148_v59 = vpop.f32.mrb[77].mxu0  ;;  %6340 = vmatprep.mubr.msk.bf16.mxu1 %vm7037_vm1, %v11295_v2 }
 0x190   : > { %v1539_v11 = vpop.f32.mrb[78].mxu0 }
 0x191   : > { %v9475_v10 = vadd.f32 %v1539_v11, %v1378_v1  ;;  %v6149_v20 = vpop.f32.mrb[79].mxu0  ;;  %v1344_v19 = vpop.f32.mrb[76].mxu1  ;;  %v11689_v11 = vld [vmem:[#allocation4_spill] sm:$0xff] }
 0x192   : > { %v1379_v28 = vadd.f32 %v1344_v19, %v9197_v23  ;;  %v6114_v27 = vpop.f32.mrb[77].mxu1  ;;  %v11688_v23 = vld [vmem:[#allocation135_spill] sm:$0xff] }
 0x193   : > { %v1347_v22 = vpop.f32.mrb[78].mxu1  ;;  %v2612_v20 = vpack.c.bf16 %v11689_v11, %v11688_v23 }
 0x194   : > { %6375 = vmatmul.mubr.msk.bf16.gmra.mrb[184].mxu0 %vm468_vm4, %v2611_v18  ;;  %v1380_v56 = vadd.f32 %v1347_v22, %v9206_v4  ;;  %v6115_v60 = vpop.f32.mrb[79].mxu1 }
 0x195   : > { %6378 = vmatprep.mubr.msk.bf16.mxu0 %vm7037_vm1, %v11295_v2 }
 0x196   : > { %v1544_v59 = vpop.f32.mrb[80].mxu0  ;;  %6341 = vmatmul.mubr.msk.bf16.gmra.mrb[184].mxu1 %vm468_vm4, %v2439_v16 }
 0x197   : > { %v9485_v1 = vadd.f32 %v1544_v59, %v1379_v28  ;;  %v6152_v37 = vpop.f32.mrb[81].mxu0  ;;  %6344 = vmatprep.mubr.msk.bf16.mxu1 %vm7037_vm1, %v11295_v2  ;;  %v11690_v28 = vld [vmem:[#allocation43_spill] sm:$0xff] }
 0x198   : > { %v1547_v19 = vpop.f32.mrb[82].mxu0  ;;  %v2440_v16 = vpack.c.bf16 %v11690_v28, %v9067_v42 }
 0x199   : > { %v9491_v18 = vadd.f32 %v1547_v19, %v1380_v56  ;;  %v6153_v27 = vpop.f32.mrb[83].mxu0  ;;  %v1352_v4 = vpop.f32.mrb[80].mxu1 }
 0x19a   : > { %v1381_v22 = vadd.f32 %v1352_v4, %v9224_v24  ;;  %v6118_v60 = vpop.f32.mrb[81].mxu1  ;;  %v7020_v24 = vld [vmem:[%s7084_s19 + $0xb8] sm:$0xff]  ;;  %v7021_v27 = vld [vmem:[%s7084_s19 + $0xc0] sm:$0xff] }
 0x19b   : > { %v1355_v59 = vpop.f32.mrb[82].mxu1  ;;  %v9505_v4 = vcombine.high %v7020_v24, %v7021_v27 }
 0x19c   : > { %6379 = vmatmul.mubr.msk.bf16.gmra.mrb[188].mxu0 %vm468_vm4, %v2612_v20  ;;  %v1382_v37 = vadd.f32 %v1355_v59, %v9234_v13  ;;  %v6119_v23 = vpop.f32.mrb[83].mxu1  ;;  %v2613_v20 = vpack.c.bf16 %v9118_v35, %v11690_v28 }
 0x19d   : > { %6382 = vmatprep.mubr.msk.bf16.mxu0 %vm7037_vm1, %v11295_v2  ;;  %v2441_v23 = vpack.c.bf16 %v9099_v25, %v9505_v4  ;;  %v11692_v25 = vld [vmem:[#allocation22_spill] sm:$0xff] }
 0x19e   : > { %v1552_v56 = vpop.f32.mrb[84].mxu0  ;;  %6345 = vmatmul.mubr.msk.bf16.gmra.mrb[188].mxu1 %vm468_vm4, %v2440_v16 }
 0x19f   : > { %v9501_v11 = vadd.f32 %v1552_v56, %v1381_v22  ;;  %v6156_v19 = vpop.f32.mrb[85].mxu0  ;;  %6348 = vmatprep.mubr.msk.bf16.mxu1 %vm7037_vm1, %v11295_v2 }
 0x1a0   : > { %v1555_v60 = vpop.f32.mrb[86].mxu0 }
 0x1a1   : > { %v9511_v40 = vadd.f32 %v1555_v60, %v1382_v37  ;;  %v6157_v13 = vpop.f32.mrb[87].mxu0  ;;  %v1360_v59 = vpop.f32.mrb[84].mxu1 }
 0x1a2   : > { %v1383_v16 = vadd.f32 %v1360_v59, %v9246_v55  ;;  %v6122_v22 = vpop.f32.mrb[85].mxu1  ;;  %v2614_v55 = vpack.c.bf16 %v9103_v6, %v9122_v0  ;;  %v11697_v6 = vld [vmem:[#allocation82_spill] sm:$0xff] }
 0x1a3   : > { %v1363_v56 = vpop.f32.mrb[86].mxu1 }
 0x1a4   : > { %6383 = vmatmul.mubr.msk.bf16.gmra.mrb[192].mxu0 %vm468_vm4, %v2613_v20  ;;  %v1384_v19 = vadd.f32 %v1363_v56, %v9252_v15  ;;  %v6123_v24 = vpop.f32.mrb[87].mxu1  ;;  %v5589_v15 = vld [vmem:[%s10915_s1 + $0x1a] sm:$0x3] }
 0x1a5   : > { %6386 = vmatprep.mubr.msk.bf16.mxu0 %vm7037_vm1, %v11295_v2 }
 0x1a6   : > { %v1560_v27 = vpop.f32.mrb[88].mxu0  ;;  %6349 = vmatmul.mubr.msk.bf16.gmra.mrb[192].mxu1 %vm468_vm4, %v2441_v23 }
 0x1a7   : > { %v9521_v37 = vadd.f32 %v1560_v27, %v1383_v16  ;;  %v6160_v60 = vpop.f32.mrb[89].mxu0  ;;  %6392 = vmatprep.mubr.msk.bf16.mxu1 %vm7037_vm1, %v11295_v2 }
 0x1a8   : > { %v1563_v13 = vpop.f32.mrb[90].mxu0 }
 0x1a9   : > { %v9527_v20 = vadd.f32 %v1563_v13, %v1384_v19  ;;  %v6161_v59 = vpop.f32.mrb[91].mxu0  ;;  %v1689_v22 = vpop.f32.mrb[88].mxu1  ;;  %v3186_v19 = vsel %vm496_vm0, %v5589_v15, 0  ;;  %v5600_v13 = vld [vmem:[%s10915_s1 + $0x1c] sm:$0x3] }
 0x1aa   : > { %v1760_v23 = vadd.f32 %v1689_v22, %v9268_v53  ;;  %v6166_v16 = vpop.f32.mrb[89].mxu1  ;;  %v11691_v59 = vld [vmem:[#allocation35_spill] sm:$0xff] }
 0x1ab   : > { %v1692_v56 = vpop.f32.mrb[90].mxu1  ;;  %v11693_v53 = vpack.c.bf16 %v11691_v59, %v11692_v25 }
 0x1ac   : > { %6387 = vmatmul.mubr.msk.bf16.gmra.mrb[196].mxu0 %vm468_vm4, %v2614_v55  ;;  %v1761_v24 = vadd.f32 %v1692_v56, %v9275_v45  ;;  %v6167_v27 = vpop.f32.mrb[91].mxu1  ;;  %v3354_v56 = vsel %vm496_vm0, %v5600_v13, 0 }
 0x1ad   : > { %6430 = vmatprep.mubr.msk.bf16.mxu0 %vm7037_vm1, %v11295_v2 }
 0x1ae   : > { %v1900_v60 = vpop.f32.mrb[92].mxu0  ;;  %6393 = vmatmul.mubr.msk.bf16.vlgmr.msra.gmra.mrb[196].mxu1 %vm468_vm4, %v11693_v53  ;;  %v11694_v53 = vld [vmem:[#allocation37_spill] sm:$0xff] }
 0x1af   : > { %v9545_v55 = vadd.f32 %v1900_v60, %v1760_v23  ;;  %v6204_v22 = vpop.f32.mrb[93].mxu0  ;;  %6467 = vmatpush3.bf16.msra.mxu1 %v3186_v19  ;;  %6396 = vmatprep.mubr.msk.bf16.mxu1 %vm7037_vm1, %v11295_v2  ;;  %v11695_v23 = vld [vmem:[#allocation57_spill] sm:$0xff] }
 0x1b0   : > { %v1903_v16 = vpop.f32.mrb[94].mxu0  ;;  %6542 = vmatprep.subr.bf16.mxu1 %v11295_v2  ;;  %v2788_v60 = vpack.c.bf16 %v11695_v23, %v11694_v53  ;;  %v11696_v22 = vld [vmem:[#allocation83_spill] sm:$0xff] }
 0x1b1   : > { %v9549_v45 = vadd.f32 %v1903_v16, %v1761_v24  ;;  %v6205_v15 = vpop.f32.mrb[95].mxu0  ;;  %v1697_v27 = vpop.f32.mrb[92].mxu1  ;;  %v11698_v19 = vpack.c.bf16 %v11696_v22, %v11697_v6  ;;  %v11700_v6 = vld [vmem:[#allocation95_spill] sm:$0xff] }
 0x1b2   : > { %v1762_v25 = vadd.f32 %v1697_v27, %v9307_v14  ;;  %v6170_v59 = vpop.f32.mrb[93].mxu1  ;;  %v11699_v27 = vld [vmem:[#allocation87_spill] sm:$0xff] }
 0x1b3   : > { %v1700_v35 = vpop.f32.mrb[94].mxu1  ;;  %v2968_v59 = vpack.c.bf16 %v11700_v6, %v11699_v27 }
 0x1b4   : > { %6431 = vmatmul.mubr.msk.bf16.vlgmr.msra.gmra.mrb[200].mxu0 %vm468_vm4, %v11698_v19  ;;  %v1763_v24 = vadd.f32 %v1700_v35, %v9319_v12  ;;  %v6171_v13 = vpop.f32.mrb[95].mxu1  ;;  %v11701_v19 = vld [vmem:[#allocation58_spill] sm:$0xff] }
 0x1b5   : > { %6505 = vmatpush3.bf16.msra.mxu0 %v3354_v56  ;;  %6434 = vmatprep.mubr.msk.bf16.mxu0 %vm7037_vm1, %v11295_v2  ;;  %v11702_v13 = vld [vmem:[#allocation72_spill] sm:$0xff] }
 0x1b6   : > { %6580 = vmatprep.subr.bf16.mxu0 %v11295_v2  ;;  %v1908_v14 = vpop.f32.mrb[96].mxu0  ;;  %6397 = vmatmul.mubr.msk.bf16.gmra.mrb[200].mxu1 %vm468_vm4, %v2788_v60  ;;  %v2789_v60 = vpack.c.bf16 %v11702_v13, %v11701_v19 }
 0x1b7   : > { %v9565_v16 = vadd.f32 %v1908_v14, %v1762_v25  ;;  %v6208_v15 = vpop.f32.mrb[97].mxu0  ;;  %6400 = vmatprep.mubr.msk.bf16.mxu1 %vm7037_vm1, %v11295_v2 }
 0x1b8   : > { %v1911_v53 = vpop.f32.mrb[98].mxu0 }
 0x1b9   : > { %v9571_v56 = vadd.f32 %v1911_v53, %v1763_v24  ;;  %v6209_v23 = vpop.f32.mrb[99].mxu0  ;;  %v1705_v35 = vpop.f32.mrb[96].mxu1  ;;  %v11704_v53 = vld [vmem:[#allocation107_spill] sm:$0xff] }
 0x1ba   : > { %v1764_v12 = vadd.f32 %v1705_v35, %v9366_v21  ;;  %v6174_v22 = vpop.f32.mrb[97].mxu1  ;;  %v11703_v21 = vld [vmem:[#allocation96_spill] sm:$0xff] }
 0x1bb   : > { %v1708_v25 = vpop.f32.mrb[98].mxu1  ;;  %v2969_v23 = vpack.c.bf16 %v11704_v53, %v11703_v21 }
 0x1bc   : > { %6435 = vmatmul.mubr.msk.bf16.gmra.mrb[204].mxu0 %vm468_vm4, %v2968_v59  ;;  %v1765_v14 = vadd.f32 %v1708_v25, %v9373_v50  ;;  %v6175_v15 = vpop.f32.mrb[99].mxu1  ;;  %v11705_v25 = vld [vmem:[#allocation73_spill] sm:$0xff] }
 0x1bd   : > { %6438 = vmatprep.mubr.msk.bf16.mxu0 %vm7037_vm1, %v11295_v2  ;;  %v11706_v15 = vld [vmem:[#allocation13_spill] sm:$0xff] }
 0x1be   : > { %v1916_v27 = vpop.f32.mrb[100].mxu0  ;;  %6401 = vmatmul.mubr.msk.bf16.gmra.mrb[204].mxu1 %vm468_vm4, %v2789_v60  ;;  %v2790_v60 = vpack.c.bf16 %v11706_v15, %v11705_v25 }
 0x1bf   : > { %v9581_v24 = vadd.f32 %v1916_v27, %v1764_v12  ;;  %v6212_v6 = vpop.f32.mrb[101].mxu0  ;;  %6404 = vmatprep.mubr.msk.bf16.mxu1 %vm7037_vm1, %v11295_v2 }
 0x1c0   : > { %v1919_v35 = vpop.f32.mrb[102].mxu0 }
 0x1c1   : > { %v9587_v59 = vadd.f32 %v1919_v35, %v1765_v14  ;;  %v6213_v22 = vpop.f32.mrb[103].mxu0  ;;  %v1713_v19 = vpop.f32.mrb[100].mxu1  ;;  %v11708_v35 = vld [vmem:[#allocation117_spill] sm:$0xff] }
 0x1c2   : > { %v1766_v50 = vadd.f32 %v1713_v19, %v9424_v44  ;;  %v6178_v13 = vpop.f32.mrb[101].mxu1  ;;  %v11707_v44 = vld [vmem:[#allocation108_spill] sm:$0xff] }
 0x1c3   : > { %v1716_v12 = vpop.f32.mrb[102].mxu1  ;;  %v2970_v22 = vpack.c.bf16 %v11708_v35, %v11707_v44 }
 0x1c4   : > { %6439 = vmatmul.mubr.msk.bf16.gmra.mrb[208].mxu0 %vm468_vm4, %v2969_v23  ;;  %v1767_v27 = vadd.f32 %v1716_v12, %v9435_v62  ;;  %v6179_v6 = vpop.f32.mrb[103].mxu1  ;;  %v11709_v12 = vld [vmem:[#allocation16_spill] sm:$0xff] }
 0x1c5   : > { %6442 = vmatprep.mubr.msk.bf16.mxu0 %vm7037_vm1, %v11295_v2  ;;  %v11710_v6 = vld [vmem:[#allocation29_spill] sm:$0xff] }
 0x1c6   : > { %v1924_v21 = vpop.f32.mrb[104].mxu0  ;;  %6405 = vmatmul.mubr.msk.bf16.gmra.mrb[208].mxu1 %vm468_vm4, %v2790_v60  ;;  %v2791_v60 = vpack.c.bf16 %v11710_v6, %v11709_v12 }
 0x1c7   : > { %v9597_v14 = vadd.f32 %v1924_v21, %v1766_v50  ;;  %v6216_v53 = vpop.f32.mrb[105].mxu0  ;;  %6408 = vmatprep.mubr.msk.bf16.mxu1 %vm7037_vm1, %v11295_v2 }
 0x1c8   : > { %v1927_v19 = vpop.f32.mrb[106].mxu0 }
 0x1c9   : > { %v9603_v23 = vadd.f32 %v1927_v19, %v1767_v27  ;;  %v6217_v13 = vpop.f32.mrb[107].mxu0  ;;  %v1721_v25 = vpop.f32.mrb[104].mxu1  ;;  %v11712_v19 = vld [vmem:[#allocation129_spill] sm:$0xff] }
 0x1ca   : > { %v1768_v62 = vadd.f32 %v1721_v25, %v9445_v17  ;;  %v6182_v15 = vpop.f32.mrb[105].mxu1  ;;  %v11711_v17 = vld [vmem:[#allocation118_spill] sm:$0xff] }
 0x1cb   : > { %v1724_v50 = vpop.f32.mrb[106].mxu1  ;;  %v2971_v13 = vpack.c.bf16 %v11712_v19, %v11711_v17 }
 0x1cc   : > { %6443 = vmatmul.mubr.msk.bf16.gmra.mrb[212].mxu0 %vm468_vm4, %v2970_v22  ;;  %v1769_v21 = vadd.f32 %v1724_v50, %v9459_v58  ;;  %v6183_v53 = vpop.f32.mrb[107].mxu1  ;;  %v11713_v50 = vld [vmem:[#allocation30_spill] sm:$0xff] }
 0x1cd   : > { %6446 = vmatprep.mubr.msk.bf16.mxu0 %vm7037_vm1, %v11295_v2  ;;  %v11714_v53 = vld [vmem:[#allocation45_spill] sm:$0xff] }
 0x1ce   : > { %v1932_v44 = vpop.f32.mrb[108].mxu0  ;;  %6409 = vmatmul.mubr.msk.bf16.gmra.mrb[212].mxu1 %vm468_vm4, %v2791_v60  ;;  %v2792_v60 = vpack.c.bf16 %v11714_v53, %v11713_v50 }
 0x1cf   : > { %v9613_v27 = vadd.f32 %v1932_v44, %v1768_v62  ;;  %v6220_v35 = vpop.f32.mrb[109].mxu0  ;;  %6412 = vmatprep.mubr.msk.bf16.mxu1 %vm7037_vm1, %v11295_v2 }
 0x1d0   : > { %v1935_v25 = vpop.f32.mrb[110].mxu0 }
 0x1d1   : > { %v9619_v22 = vadd.f32 %v1935_v25, %v1769_v21  ;;  %v6221_v15 = vpop.f32.mrb[111].mxu0  ;;  %v1729_v12 = vpop.f32.mrb[108].mxu1  ;;  %v11716_v25 = vld [vmem:[#allocation46_spill] sm:$0xff] }
 0x1d2   : > { %v1770_v58 = vadd.f32 %v1729_v12, %v9469_v57  ;;  %v6186_v6 = vpop.f32.mrb[109].mxu1  ;;  %v11715_v57 = vld [vmem:[#allocation131_spill] sm:$0xff] }
 0x1d3   : > { %v1732_v62 = vpop.f32.mrb[110].mxu1  ;;  %v2972_v15 = vpack.c.bf16 %v11716_v25, %v11715_v57 }
 0x1d4   : > { %6447 = vmatmul.mubr.msk.bf16.gmra.mrb[216].mxu0 %vm468_vm4, %v2971_v13  ;;  %v1771_v44 = vadd.f32 %v1732_v62, %v9475_v10  ;;  %v6187_v35 = vpop.f32.mrb[111].mxu1  ;;  %v11717_v62 = vld [vmem:[#allocation47_spill] sm:$0xff] }
 0x1d5   : > { %6450 = vmatprep.mubr.msk.bf16.mxu0 %vm7037_vm1, %v11295_v2  ;;  %v11718_v35 = vld [vmem:[#allocation62_spill] sm:$0xff] }
 0x1d6   : > { %v1940_v17 = vpop.f32.mrb[112].mxu0  ;;  %6413 = vmatmul.mubr.msk.bf16.gmra.mrb[216].mxu1 %vm468_vm4, %v2792_v60  ;;  %v2793_v60 = vpack.c.bf16 %v11718_v35, %v11717_v62 }
 0x1d7   : > { %v9629_v21 = vadd.f32 %v1940_v17, %v1770_v58  ;;  %v6224_v19 = vpop.f32.mrb[113].mxu0  ;;  %6416 = vmatprep.mubr.msk.bf16.mxu1 %vm7037_vm1, %v11295_v2 }
 0x1d8   : > { %v1943_v12 = vpop.f32.mrb[114].mxu0 }
 0x1d9   : > { %v9635_v13 = vadd.f32 %v1943_v12, %v1771_v44  ;;  %v6225_v6 = vpop.f32.mrb[115].mxu0  ;;  %v1737_v50 = vpop.f32.mrb[112].mxu1  ;;  %v11720_v12 = vld [vmem:[#allocation143_spill] sm:$0xff] }
 0x1da   : > { %v1772_v10 = vadd.f32 %v1737_v50, %v9485_v1  ;;  %v6190_v53 = vpop.f32.mrb[113].mxu1  ;;  %v11719_v1 = vld [vmem:[#allocation5_spill] sm:$0xff] }
 0x1db   : > { %v1740_v58 = vpop.f32.mrb[114].mxu1  ;;  %v2973_v6 = vpack.c.bf16 %v11720_v12, %v11719_v1 }
 0x1dc   : > { %6451 = vmatmul.mubr.msk.bf16.gmra.mrb[220].mxu0 %vm468_vm4, %v2972_v15  ;;  %v1773_v17 = vadd.f32 %v1740_v58, %v9491_v18  ;;  %v6191_v19 = vpop.f32.mrb[115].mxu1  ;;  %v11721_v58 = vld [vmem:[#allocation65_spill] sm:$0xff] }
 0x1dd   : > { %6454 = vmatprep.mubr.msk.bf16.mxu0 %vm7037_vm1, %v11295_v2 }
 0x1de   : > { %v1948_v57 = vpop.f32.mrb[116].mxu0  ;;  %6417 = vmatmul.mubr.msk.bf16.gmra.mrb[220].mxu1 %vm468_vm4, %v2793_v60  ;;  %v2794_v60 = vpack.c.bf16 %v9330_v29, %v11721_v58  ;;  %v2795_v58 = vpack.c.bf16 %v9354_v48, %v9334_v30 }
 0x1df   : > { %v9645_v44 = vadd.f32 %v1948_v57, %v1772_v10  ;;  %v6228_v25 = vpop.f32.mrb[117].mxu0  ;;  %6420 = vmatprep.mubr.msk.bf16.mxu1 %vm7037_vm1, %v11295_v2 }
 0x1e0   : > { %v1951_v50 = vpop.f32.mrb[118].mxu0 }
 0x1e1   : > { %v9651_v15 = vadd.f32 %v1951_v50, %v1773_v17  ;;  %v6229_v53 = vpop.f32.mrb[119].mxu0  ;;  %v1745_v62 = vpop.f32.mrb[116].mxu1 }
 0x1e2   : > { %v1774_v18 = vadd.f32 %v1745_v62, %v9501_v11  ;;  %v6194_v35 = vpop.f32.mrb[117].mxu1  ;;  %v11722_v11 = vld [vmem:[#allocation144_spill] sm:$0xff] }
 0x1e3   : > { %v1748_v10 = vpop.f32.mrb[118].mxu1  ;;  %v2974_v12 = vpack.c.bf16 %v9411_v49, %v11722_v11 }
 0x1e4   : > { %6455 = vmatmul.mubr.msk.bf16.gmra.mrb[224].mxu0 %vm468_vm4, %v2973_v6  ;;  %v1775_v19 = vadd.f32 %v1748_v10, %v9511_v40  ;;  %v6195_v57 = vpop.f32.mrb[119].mxu1 }
 0x1e5   : > { %6458 = vmatprep.mubr.msk.bf16.mxu0 %vm7037_vm1, %v11295_v2 }
 0x1e6   : > { %v1956_v25 = vpop.f32.mrb[120].mxu0  ;;  %6421 = vmatmul.mubr.msk.bf16.gmra.mrb[224].mxu1 %vm468_vm4, %v2794_v60 }
 0x1e7   : > { %v9661_v17 = vadd.f32 %v1956_v25, %v1774_v18  ;;  %v6232_v1 = vpop.f32.mrb[121].mxu0  ;;  %6424 = vmatprep.mubr.msk.bf16.mxu1 %vm7037_vm1, %v11295_v2 }
 0x1e8   : > { %v1959_v50 = vpop.f32.mrb[122].mxu0 }
 0x1e9   : > { %v9667_v6 = vadd.f32 %v1959_v50, %v1775_v19  ;;  %v6233_v53 = vpop.f32.mrb[123].mxu0  ;;  %v1753_v62 = vpop.f32.mrb[120].mxu1 }
 0x1ea   : > { %v1776_v40 = vadd.f32 %v1753_v62, %v9521_v37  ;;  %v6198_v35 = vpop.f32.mrb[121].mxu1  ;;  %v2975_v37 = vpack.c.bf16 %v9419_v34, %v9415_v31 }
 0x1eb   : > { %v1756_v18 = vpop.f32.mrb[122].mxu1 }
 0x1ec   : > { %6459 = vmatmul.mubr.msk.bf16.gmra.mrb[228].mxu0 %vm468_vm4, %v2974_v12  ;;  %v1777_v60 = vadd.f32 %v1756_v18, %v9527_v20  ;;  %v6199_v10 = vpop.f32.mrb[123].mxu1  ;;  %v5610_v20 = vld [vmem:[%s10915_s1 + $0x1e] sm:$0x3]  ;;  %v5621_v18 = vld [vmem:[%s10915_s1 + $0x20] sm:$0x3] }
 0x1ed   : > { %6462 = vmatprep.mubr.msk.bf16.mxu0 %vm7037_vm1, %v11295_v2  ;;  %v3527_v35 = vsel %vm496_vm0, %v5610_v20, 0  ;;  %v11724_v10 = vld [vmem:[#allocation132_spill] sm:$0xff] }
 0x1ee   : > { %v1964_v57 = vpop.f32.mrb[124].mxu0  ;;  %6425 = vmatmul.mubr.msk.bf16.gmra.mrb[228].mxu1 %vm468_vm4, %v2795_v58 }
 0x1ef   : > { %v9677_v19 = vadd.f32 %v1964_v57, %v1776_v40  ;;  %v6236_v25 = vpop.f32.mrb[125].mxu0  ;;  %6468 = vmatprep.mubr.msk.bf16.mxu1 %vm7037_vm1, %v11295_v2 }
 0x1f0   : > { %v1967_v1 = vpop.f32.mrb[126].mxu0 }
 0x1f1   : > { %v9683_v48 = vadd.f32 %v1967_v1, %v1777_v60  ;;  %v6237_v11 = vpop.f32.mrb[127].mxu0  ;;  %v2110_v12 = vpop.f32.mrb[124].mxu1  ;;  %v11723_v60 = vld [vmem:[#allocation133_spill] sm:$0xff] }
 0x1f2   : > { %v2181_v50 = vadd.f32 %v2110_v12, %v9545_v55  ;;  %v6242_v53 = vpop.f32.mrb[125].mxu1  ;;  %v11725_v55 = vpack.c.bf16 %v11723_v60, %v11724_v10  ;;  %v3708_v11 = vsel %vm496_vm0, %v5621_v18, 0  ;;  %v11729_v60 = vld [vmem:[#allocation139_spill] sm:$0xff] }
 0x1f3   : > { %v2113_v62 = vpop.f32.mrb[126].mxu1 }
 0x1f4   : > { %6463 = vmatmul.mubr.msk.bf16.gmra.mrb[232].mxu0 %vm468_vm4, %v2975_v37  ;;  %v2182_v34 = vadd.f32 %v2113_v62, %v9549_v45  ;;  %v6243_v40 = vpop.f32.mrb[127].mxu1  ;;  %v11726_v62 = vld [vmem:[#allocation155_spill] sm:$0xff] }
 0x1f5   : > { %6506 = vmatprep.mubr.msk.bf16.mxu0 %vm7037_vm1, %v11295_v2 }
 0x1f6   : > { %v2320_v58 = vpop.f32.mrb[128].mxu0  ;;  %6469 = vmatmul.mubr.msk.bf16.vlgmr.msra.gmra.mrb[232].mxu1 %vm468_vm4, %v11725_v55 }
 0x1f7   : > { %v9701_v57 = vadd.f32 %v2320_v58, %v2181_v50  ;;  %v6280_v25 = vpop.f32.mrb[129].mxu0  ;;  %6543 = vmatpush3.bf16.msra.mxu1 %v3527_v35  ;;  %6472 = vmatprep.mubr.msk.bf16.mxu1 %vm7037_vm1, %v11295_v2  ;;  %v11727_v50 = vld [vmem:[#allocation56_spill] sm:$0xff] }
 0x1f8   : > { %v2323_v37 = vpop.f32.mrb[130].mxu0  ;;  %6618 = vmatprep.subr.bf16.mxu1 %v11295_v2  ;;  %v3148_v40 = vpack.c.bf16 %v11727_v50, %v11726_v62  ;;  %v11728_v58 = vld [vmem:[#allocation140_spill] sm:$0xff] }
 0x1f9   : > { %v9705_v45 = vadd.f32 %v2323_v37, %v2182_v34  ;;  %v6281_v1 = vpop.f32.mrb[131].mxu0  ;;  %v2118_v12 = vpop.f32.mrb[128].mxu1  ;;  %v11730_v35 = vpack.c.bf16 %v11728_v58, %v11729_v60  ;;  %v11731_v37 = vld [vmem:[#allocation156_spill] sm:$0xff]  ;;  %v11733_v60 = vld [vmem:[#allocation54_spill] sm:$0xff] }
 0x1fa   : > { %v2183_v20 = vadd.f32 %v2118_v12, %v9565_v16  ;;  %v6246_v53 = vpop.f32.mrb[129].mxu1  ;;  %v11732_v1 = vld [vmem:[#allocation25_spill] sm:$0xff] }
 0x1fb   : > { %v2121_v10 = vpop.f32.mrb[130].mxu1  ;;  %v3316_v12 = vpack.c.bf16 %v11732_v1, %v11731_v37  ;;  %v11736_v37 = vld [vmem:[#allocation10_spill] sm:$0xff] }
 0x1fc   : > { %6507 = vmatmul.mubr.msk.bf16.vlgmr.msra.gmra.mrb[236].mxu0 %vm468_vm4, %v11730_v35  ;;  %v2184_v34 = vadd.f32 %v2121_v10, %v9571_v56  ;;  %v6247_v18 = vpop.f32.mrb[131].mxu1  ;;  %v11734_v35 = vld [vmem:[#allocation63_spill] sm:$0xff] }
 0x1fd   : > { %6581 = vmatpush3.bf16.msra.mxu0 %v3708_v11  ;;  %6510 = vmatprep.mubr.msk.bf16.mxu0 %vm7037_vm1, %v11295_v2 }
 0x1fe   : > { %6656 = vmatprep.subr.bf16.mxu0 %v11295_v2  ;;  %v2328_v16 = vpop.f32.mrb[132].mxu0  ;;  %6473 = vmatmul.mubr.msk.bf16.gmra.mrb[236].mxu1 %vm468_vm4, %v3148_v40  ;;  %v3149_v40 = vpack.c.bf16 %v11734_v35, %v11733_v60  ;;  %v11737_v35 = vld [vmem:[#allocation60_spill] sm:$0xff] }
 0x1ff   : > { %v9721_v55 = vadd.f32 %v2328_v16, %v2183_v20  ;;  %v6284_v25 = vpop.f32.mrb[133].mxu0  ;;  %6476 = vmatprep.mubr.msk.bf16.mxu1 %vm7037_vm1, %v11295_v2 }
 0x200   : > { %v2331_v53 = vpop.f32.mrb[134].mxu0 }
 0x201   : > { %v9727_v11 = vadd.f32 %v2331_v53, %v2184_v34  ;;  %v6285_v62 = vpop.f32.mrb[135].mxu0  ;;  %v2126_v56 = vpop.f32.mrb[132].mxu1 }
 0x202   : > { %v2185_v50 = vadd.f32 %v2126_v56, %v9581_v24  ;;  %v6250_v58 = vpop.f32.mrb[133].mxu1  ;;  %v11735_v24 = vld [vmem:[#allocation39_spill] sm:$0xff] }
 0x203   : > { %v2129_v20 = vpop.f32.mrb[134].mxu1  ;;  %v3317_v53 = vpack.c.bf16 %v11736_v37, %v11735_v24  ;;  %v11740_v37 = vld [vmem:[#allocation19_spill] sm:$0xff] }
 0x204   : > { %6511 = vmatmul.mubr.msk.bf16.gmra.mrb[240].mxu0 %vm468_vm4, %v3316_v12  ;;  %v2186_v10 = vadd.f32 %v2129_v20, %v9587_v59  ;;  %v6251_v18 = vpop.f32.mrb[135].mxu1  ;;  %v11738_v20 = vld [vmem:[#allocation85_spill] sm:$0xff] }
 0x205   : > { %6514 = vmatprep.mubr.msk.bf16.mxu0 %vm7037_vm1, %v11295_v2 }
 0x206   : > { %v2336_v16 = vpop.f32.mrb[136].mxu0  ;;  %6477 = vmatmul.mubr.msk.bf16.gmra.mrb[240].mxu1 %vm468_vm4, %v3149_v40  ;;  %v3150_v40 = vpack.c.bf16 %v11738_v20, %v11737_v35  ;;  %v11741_v20 = vld [vmem:[#allocation81_spill] sm:$0xff] }
 0x207   : > { %v9737_v34 = vadd.f32 %v2336_v16, %v2185_v50  ;;  %v6288_v25 = vpop.f32.mrb[137].mxu0  ;;  %6480 = vmatprep.mubr.msk.bf16.mxu1 %vm7037_vm1, %v11295_v2 }
 0x208   : > { %v2339_v62 = vpop.f32.mrb[138].mxu0 }
 0x209   : > { %v9743_v12 = vadd.f32 %v2339_v62, %v2186_v10  ;;  %v6289_v56 = vpop.f32.mrb[139].mxu0  ;;  %v2134_v58 = vpop.f32.mrb[136].mxu1 }
 0x20a   : > { %v2187_v59 = vadd.f32 %v2134_v58, %v9597_v14  ;;  %v6254_v60 = vpop.f32.mrb[137].mxu1  ;;  %v11739_v14 = vld [vmem:[#allocation158_spill] sm:$0xff] }
 0x20b   : > { %v2137_v50 = vpop.f32.mrb[138].mxu1  ;;  %v3318_v62 = vpack.c.bf16 %v11740_v37, %v11739_v14 }
 0x20c   : > { %6515 = vmatmul.mubr.msk.bf16.gmra.mrb[244].mxu0 %vm468_vm4, %v3317_v53  ;;  %v2188_v18 = vadd.f32 %v2137_v50, %v9603_v23  ;;  %v6255_v16 = vpop.f32.mrb[139].mxu1  ;;  %v11742_v50 = vld [vmem:[#allocation91_spill] sm:$0xff] }
 0x20d   : > { %6518 = vmatprep.mubr.msk.bf16.mxu0 %vm7037_vm1, %v11295_v2 }
 0x20e   : > { %v2344_v25 = vpop.f32.mrb[140].mxu0  ;;  %6481 = vmatmul.mubr.msk.bf16.gmra.mrb[244].mxu1 %vm468_vm4, %v3150_v40  ;;  %v3151_v40 = vpack.c.bf16 %v11742_v50, %v11741_v20 }
 0x20f   : > { %v9753_v10 = vadd.f32 %v2344_v25, %v2187_v59  ;;  %v6292_v24 = vpop.f32.mrb[141].mxu0  ;;  %6484 = vmatprep.mubr.msk.bf16.mxu1 %vm7037_vm1, %v11295_v2 }
 0x210   : > { %v2347_v56 = vpop.f32.mrb[142].mxu0 }
 0x211   : > { %v9759_v53 = vadd.f32 %v2347_v56, %v2188_v18  ;;  %v6293_v58 = vpop.f32.mrb[143].mxu0  ;;  %v2142_v60 = vpop.f32.mrb[140].mxu1  ;;  %v11744_v56 = vld [vmem:[#allocation161_spill] sm:$0xff] }
 0x212   : > { %v2189_v23 = vadd.f32 %v2142_v60, %v9613_v27  ;;  %v6258_v35 = vpop.f32.mrb[141].mxu1  ;;  %v11743_v27 = vld [vmem:[#allocation159_spill] sm:$0xff] }
 0x213   : > { %v2145_v59 = vpop.f32.mrb[142].mxu1  ;;  %v3319_v58 = vpack.c.bf16 %v11744_v56, %v11743_v27 }
 0x214   : > { %6519 = vmatmul.mubr.msk.bf16.gmra.mrb[248].mxu0 %vm468_vm4, %v3318_v62  ;;  %v2190_v16 = vadd.f32 %v2145_v59, %v9619_v22  ;;  %v6259_v25 = vpop.f32.mrb[143].mxu1  ;;  %v11745_v59 = vld [vmem:[#allocation101_spill] sm:$0xff] }
 0x215   : > { %6522 = vmatprep.mubr.msk.bf16.mxu0 %vm7037_vm1, %v11295_v2  ;;  %v11746_v25 = vld [vmem:[#allocation110_spill] sm:$0xff] }
 0x216   : > { %v2352_v24 = vpop.f32.mrb[144].mxu0  ;;  %6485 = vmatmul.mubr.msk.bf16.gmra.mrb[248].mxu1 %vm468_vm4, %v3151_v40  ;;  %v3152_v40 = vpack.c.bf16 %v11746_v25, %v11745_v59  ;;  %v11747_v25 = vld [vmem:[#allocation147_spill] sm:$0xff] }
 0x217   : > { %v9769_v18 = vadd.f32 %v2352_v24, %v2189_v23  ;;  %v6296_v37 = vpop.f32.mrb[145].mxu0  ;;  %6488 = vmatprep.mubr.msk.bf16.mxu1 %vm7037_vm1, %v11295_v2 }
 0x218   : > { %v2355_v60 = vpop.f32.mrb[146].mxu0 }
 0x219   : > { %v9775_v62 = vadd.f32 %v2355_v60, %v2190_v16  ;;  %v6297_v35 = vpop.f32.mrb[147].mxu0  ;;  %v2150_v20 = vpop.f32.mrb[144].mxu1 }
 0x21a   : > { %v2191_v22 = vadd.f32 %v2150_v20, %v9629_v21  ;;  %v6262_v50 = vpop.f32.mrb[145].mxu1 }
 0x21b   : > { %v2153_v23 = vpop.f32.mrb[146].mxu1 }
 0x21c   : > { %6523 = vmatmul.mubr.msk.bf16.gmra.mrb[252].mxu0 %vm468_vm4, %v3319_v58  ;;  %v2192_v24 = vadd.f32 %v2153_v23, %v9635_v13  ;;  %v6263_v37 = vpop.f32.mrb[147].mxu1  ;;  %v11748_v13 = vld [vmem:[#allocation146_spill] sm:$0xff] }
 0x21d   : > { %6526 = vmatprep.mubr.msk.bf16.mxu0 %vm7037_vm1, %v11295_v2  ;;  %v11749_v23 = vpack.c.bf16 %v11747_v25, %v11748_v13 }
 0x21e   : > { %v2360_v27 = vpop.f32.mrb[148].mxu0  ;;  %6489 = vmatmul.mubr.msk.bf16.gmra.mrb[252].mxu1 %vm468_vm4, %v3152_v40 }
 0x21f   : > { %v9785_v16 = vadd.f32 %v2360_v27, %v2191_v22  ;;  %v6300_v60 = vpop.f32.mrb[149].mxu0  ;;  %6492 = vmatprep.mubr.msk.bf16.mxu1 %vm7037_vm1, %v11295_v2 }
 0x220   : > { %v2363_v21 = vpop.f32.mrb[150].mxu0  ;;  %v11751_v60 = vld [vmem:[#allocation149_spill] sm:$0xff] }
 0x221   : > { %v9789_v35 = vadd.f32 %v2363_v21, %v2192_v24  ;;  %v6301_v58 = vpop.f32.mrb[151].mxu0  ;;  %v2158_v20 = vpop.f32.mrb[148].mxu1  ;;  %v11750_v24 = vld [vmem:[#allocation150_spill] sm:$0xff] }
 0x222   : > { %v2193_v50 = vadd.f32 %v2158_v20, %v9645_v44  ;;  %v6266_v59 = vpop.f32.mrb[149].mxu1  ;;  %v11752_v21 = vpack.c.bf16 %v11750_v24, %v11751_v60  ;;  %v11755_v24 = vld [vmem:[#allocation152_spill] sm:$0xff]  ;;  %v11756_v60 = vld [vmem:[#allocation151_spill] sm:$0xff] }
 0x223   : > { %v2161_v40 = vpop.f32.mrb[150].mxu1 }
 0x224   : > { %6527 = vmatmul.mubr.msk.bf16.gmra.mrb[0].mxu0 %vm468_vm4, %v11749_v23  ;;  %v2194_v22 = vadd.f32 %v2161_v40, %v9651_v15  ;;  %v6267_v37 = vpop.f32.mrb[151].mxu1  ;;  %v11753_v23 = vld [vmem:[#allocation113_spill] sm:$0xff] }
 0x225   : > { %6530 = vmatprep.mubr.msk.bf16.mxu0 %vm7037_vm1, %v11295_v2  ;;  %v11754_v15 = vld [vmem:[#allocation173_spill] sm:$0xff] }
 0x226   : > { %v2368_v27 = vpop.f32.mrb[152].mxu0  ;;  %6493 = vmatmul.mubr.msk.bf16.gmra.mrb[0].mxu1 %vm468_vm4, %v11752_v21  ;;  %v3154_v40 = vpack.c.bf16 %v11754_v15, %v11753_v23  ;;  %v11757_v21 = vpack.c.bf16 %v11755_v24, %v11756_v60 }
 0x227   : > { %v9803_v44 = vadd.f32 %v2368_v27, %v2193_v50  ;;  %v6304_v58 = vpop.f32.mrb[153].mxu0  ;;  %6496 = vmatprep.mubr.msk.bf16.mxu1 %vm7037_vm1, %v11295_v2 }
 0x228   : > { %v2371_v20 = vpop.f32.mrb[154].mxu0 }
 0x229   : > { %v9807_v59 = vadd.f32 %v2371_v20, %v2194_v22  ;;  %v6305_v25 = vpop.f32.mrb[155].mxu0  ;;  %v2166_v13 = vpop.f32.mrb[152].mxu1  ;;  %v11758_v20 = vld [vmem:[#allocation164_spill] sm:$0xff] }
 0x22a   : > { %v2195_v37 = vadd.f32 %v2166_v13, %v9661_v17  ;;  %v6270_v49 = vpop.f32.mrb[153].mxu1  ;;  %v11759_v25 = vld [vmem:[#allocation187_spill] sm:$0xff] }
 0x22b   : > { %v2169_v50 = vpop.f32.mrb[154].mxu1  ;;  %v3322_v23 = vpack.c.bf16 %v11759_v25, %v11758_v20 }
 0x22c   : > { %6531 = vmatmul.mubr.msk.bf16.gmra.mrb[4].mxu0 %vm468_vm4, %v11757_v21  ;;  %v2196_v22 = vadd.f32 %v2169_v50, %v9667_v6  ;;  %v6271_v27 = vpop.f32.mrb[155].mxu1  ;;  %v11760_v50 = vld [vmem:[#allocation179_spill] sm:$0xff] }
 0x22d   : > { %6534 = vmatprep.mubr.msk.bf16.mxu0 %vm7037_vm1, %v11295_v2  ;;  %v11761_v27 = vld [vmem:[#allocation182_spill] sm:$0xff] }
 0x22e   : > { %v2376_v58 = vpop.f32.mrb[156].mxu0  ;;  %6497 = vmatmul.mubr.msk.bf16.gmra.mrb[4].mxu1 %vm468_vm4, %v3154_v40  ;;  %v3155_v15 = vpack.c.bf16 %v11761_v27, %v11760_v50  ;;  %v7022_v40 = vld [vmem:[%s7084_s19 + $0xc8] sm:$0xff] }
 0x22f   : > { %v9822_v49 = vadd.f32 %v2376_v58, %v2195_v37  ;;  %v6308_v17 = vpop.f32.mrb[157].mxu0  ;;  %6500 = vmatprep.mubr.msk.bf16.mxu1 %vm7037_vm1, %v11295_v2  ;;  %v9834_v37 = vld [vmem:[%s7084_s19 + $0xd0] sm:$0xff] }
 0x230   : > { %v2379_v13 = vpop.f32.mrb[158].mxu0  ;;  %v9837_v58 = vcombine.high %v7022_v40, %v9834_v37  ;;  %v9840_v17 = vld [vmem:[%s7084_s19 + $0xd8] sm:$0xff] }
 0x231   : > { %v9826_v24 = vadd.f32 %v2379_v13, %v2196_v22  ;;  %v6309_v6 = vpop.f32.mrb[159].mxu0  ;;  %v2174_v21 = vpop.f32.mrb[156].mxu1  ;;  %v9844_v22 = vcombine.low %v9840_v17, %v11656_v32 }
 0x232   : > { %v2197_v31 = vadd.f32 %v2174_v21, %v9677_v19  ;;  %v6274_v20 = vpop.f32.mrb[157].mxu1  ;;  %11762 = vst [vmem:[#allocation88_spill] sm:$0xff] %v9837_v58 }
 0x233   : > { %11763 = vst [vmem:[#allocation8_spill] sm:$0xff] %v9844_v22  ;;  %v2177_v13 = vpop.f32.mrb[158].mxu1  ;;  %v3323_v27 = vpack.c.bf16 %v9844_v22, %v9837_v58  ;;  %v11765_v22 = vld [vmem:[#allocation153_spill] sm:$0xff] }
 0x234   : > { %6535 = vmatmul.mubr.msk.bf16.gmra.mrb[8].mxu0 %vm468_vm4, %v3322_v23  ;;  %v2198_v19 = vadd.f32 %v2177_v13, %v9683_v48  ;;  %v6275_v6 = vpop.f32.mrb[159].mxu1  ;;  %v5632_v48 = vld [vmem:[%s10915_s1 + $0x22] sm:$0x3] }
 0x235   : > { %6538 = vmatprep.mubr.msk.bf16.mxu0 %vm7037_vm1, %v11295_v2 }
 0x236   : > { %v2384_v23 = vpop.f32.mrb[160].mxu0  ;;  %6501 = vmatmul.mubr.msk.bf16.gmra.mrb[8].mxu1 %vm468_vm4, %v3155_v15 }
 0x237   : > { %v6312_v21 = vpop.f32.mrb[161].mxu0  ;;  %v9852_v20 = vadd.f32 %v2384_v23, %v2197_v31  ;;  %6544 = vmatprep.mubr.msk.bf16.mxu1 %vm7037_vm1, %v11295_v2 }
 0x238   : > { %v2387_v40 = vpop.f32.mrb[162].mxu0 }
 0x239   : > { %v6313_v32 = vpop.f32.mrb[163].mxu0  ;;  %v9856_v50 = vadd.f32 %v2387_v40, %v2198_v19  ;;  %v2508_v29 = vpop.f32.mrb[160].mxu1  ;;  %v3888_v19 = vsel %vm496_vm0, %v5632_v48, 0  ;;  %v5643_v40 = vld [vmem:[%s10915_s1 + $0x24] sm:$0x3] }
 0x23a   : > { %v2579_v15 = vadd.f32 %v2508_v29, %v9701_v57  ;;  %v6318_v13 = vpop.f32.mrb[161].mxu1  ;;  %v11764_v32 = vld [vmem:[#allocation154_spill] sm:$0xff]  ;;  %v4068_v48 = vsel %vm496_vm0, %v5643_v40, 0 }
 0x23b   : > { %v2511_v6 = vpop.f32.mrb[162].mxu1  ;;  %v11766_v29 = vpack.c.bf16 %v11764_v32, %v11765_v22  ;;  %v11767_v22 = vld [vmem:[#allocation41_spill] sm:$0xff] }
 0x23c   : > { %6539 = vmatmul.mubr.msk.bf16.gmra.mrb[12].mxu0 %vm468_vm4, %v3323_v27  ;;  %v2580_v31 = vadd.f32 %v2511_v6, %v9705_v45  ;;  %v6319_v23 = vpop.f32.mrb[163].mxu1  ;;  %v3489_v32 = vpack.c.bf16 %v11767_v22, %v11732_v1 }
 0x23d   : > { %6582 = vmatprep.mubr.msk.bf16.mxu0 %vm7037_vm1, %v11295_v2 }
 0x23e   : > { %6545 = vmatmul.mubr.msk.bf16.vlgmr.msra.gmra.mrb[12].mxu1 %vm468_vm4, %v11766_v29 }
 0x23f   : > { %v2681_v21 = vpop.f32.mrb[164].mxu0  ;;  %6619 = vmatpush3.bf16.msra.mxu1 %v3888_v19  ;;  %6548 = vmatprep.mubr.msk.bf16.mxu1 %vm7037_vm1, %v11295_v2 }
 0x240   : > { %v6356_v57 = vpop.f32.mrb[165].mxu0  ;;  %v9874_v27 = vadd.f32 %v2681_v21, %v2579_v15  ;;  %6694 = vmatprep.subr.bf16.mxu1 %v11295_v2  ;;  %v11768_v21 = vld [vmem:[#allocation31_spill] sm:$0xff] }
 0x241   : > { %v2684_v13 = vpop.f32.mrb[166].mxu0  ;;  %v2516_v23 = vpop.f32.mrb[164].mxu1  ;;  %v11769_v57 = vld [vmem:[#allocation34_spill] sm:$0xff] }
 0x242   : > { %v6357_v45 = vpop.f32.mrb[167].mxu0  ;;  %v9879_v6 = vadd.f32 %v2684_v13, %v2580_v31  ;;  %v2581_v29 = vadd.f32 %v2516_v23, %v9721_v55  ;;  %v6322_v15 = vpop.f32.mrb[165].mxu1  ;;  %v11770_v19 = vpack.c.bf16 %v11768_v21, %v11769_v57  ;;  %v11772_v57 = vld [vmem:[#allocation36_spill] sm:$0xff] }
 0x243   : > { %v2519_v58 = vpop.f32.mrb[166].mxu1  ;;  %v11771_v15 = vld [vmem:[#allocation175_spill] sm:$0xff] }
 0x244   : > { %6583 = vmatmul.mubr.msk.bf16.vlgmr.msra.gmra.mrb[16].mxu0 %vm468_vm4, %v11770_v19  ;;  %v2582_v31 = vadd.f32 %v2519_v58, %v9727_v11  ;;  %v6323_v40 = vpop.f32.mrb[167].mxu1  ;;  %v3490_v11 = vpack.c.bf16 %v11739_v14, %v11771_v15  ;;  %v11773_v19 = vld [vmem:[#allocation48_spill] sm:$0xff] }
 0x245   : > { %6657 = vmatpush3.bf16.msra.mxu0 %v4068_v48  ;;  %6586 = vmatprep.mubr.msk.bf16.mxu0 %vm7037_vm1, %v11295_v2 }
 0x246   : > { %6732 = vmatprep.subr.bf16.mxu0 %v11295_v2  ;;  %6549 = vmatmul.mubr.msk.bf16.gmra.mrb[16].mxu1 %vm468_vm4, %v3489_v32  ;;  %v11774_v32 = vpack.c.bf16 %v11772_v57, %v11773_v19  ;;  %v11775_v57 = vld [vmem:[#allocation70_spill] sm:$0xff] }
 0x247   : > { %v2689_v13 = vpop.f32.mrb[168].mxu0  ;;  %6552 = vmatprep.mubr.msk.bf16.mxu1 %vm7037_vm1, %v11295_v2 }
 0x248   : > { %v6360_v55 = vpop.f32.mrb[169].mxu0  ;;  %v9894_v1 = vadd.f32 %v2689_v13, %v2581_v29 }
 0x249   : > { %v2692_v45 = vpop.f32.mrb[170].mxu0  ;;  %v2524_v22 = vpop.f32.mrb[168].mxu1 }
 0x24a   : > { %v6361_v23 = vpop.f32.mrb[171].mxu0  ;;  %v9898_v48 = vadd.f32 %v2692_v45, %v2582_v31  ;;  %v2583_v58 = vadd.f32 %v2524_v22, %v9737_v34  ;;  %v6326_v21 = vpop.f32.mrb[169].mxu1 }
 0x24b   : > { %v2527_v29 = vpop.f32.mrb[170].mxu1 }
 0x24c   : > { %6587 = vmatmul.mubr.msk.bf16.gmra.mrb[20].mxu0 %vm468_vm4, %v11774_v32  ;;  %v2584_v40 = vadd.f32 %v2527_v29, %v9743_v12  ;;  %v6327_v31 = vpop.f32.mrb[171].mxu1  ;;  %v11776_v12 = vld [vmem:[#allocation67_spill] sm:$0xff] }
 0x24d   : > { %6590 = vmatprep.mubr.msk.bf16.mxu0 %vm7037_vm1, %v11295_v2  ;;  %v11777_v19 = vpack.c.bf16 %v11775_v57, %v11776_v12  ;;  %v11778_v31 = vld [vmem:[#allocation55_spill] sm:$0xff] }
 0x24e   : > { %6553 = vmatmul.mubr.msk.bf16.gmra.mrb[20].mxu1 %vm468_vm4, %v3490_v11 }
 0x24f   : > { %v2697_v13 = vpop.f32.mrb[172].mxu0  ;;  %6556 = vmatprep.mubr.msk.bf16.mxu1 %vm7037_vm1, %v11295_v2 }
 0x250   : > { %v6364_v55 = vpop.f32.mrb[173].mxu0  ;;  %v9911_v14 = vadd.f32 %v2697_v13, %v2583_v58 }
 0x251   : > { %v2700_v34 = vpop.f32.mrb[174].mxu0  ;;  %v2532_v22 = vpop.f32.mrb[172].mxu1 }
 0x252   : > { %v6365_v45 = vpop.f32.mrb[175].mxu0  ;;  %v9915_v23 = vadd.f32 %v2700_v34, %v2584_v40  ;;  %v2585_v15 = vadd.f32 %v2532_v22, %v9753_v10  ;;  %v6330_v21 = vpop.f32.mrb[173].mxu1  ;;  %v11779_v40 = vld [vmem:[#allocation66_spill] sm:$0xff] }
 0x253   : > { %v2535_v11 = vpop.f32.mrb[174].mxu1  ;;  %v11780_v13 = vpack.c.bf16 %v11778_v31, %v11779_v40 }
 0x254   : > { %6591 = vmatmul.mubr.msk.bf16.gmra.mrb[24].mxu0 %vm468_vm4, %v11777_v19  ;;  %v2586_v58 = vadd.f32 %v2535_v11, %v9759_v53  ;;  %v6331_v32 = vpop.f32.mrb[175].mxu1  ;;  %v11781_v53 = vld [vmem:[#allocation185_spill] sm:$0xff]  ;;  %v11782_v11 = vld [vmem:[#allocation14_spill] sm:$0xff] }
 0x255   : > { %6594 = vmatprep.mubr.msk.bf16.mxu0 %vm7037_vm1, %v11295_v2  ;;  %v3492_v57 = vpack.c.bf16 %v11781_v53, %v11744_v56  ;;  %v11783_v32 = vld [vmem:[#allocation11_spill] sm:$0xff] }
 0x256   : > { %6557 = vmatmul.mubr.msk.bf16.gmra.mrb[24].mxu1 %vm468_vm4, %v11780_v13  ;;  %v11784_v31 = vpack.c.bf16 %v11782_v11, %v11783_v32 }
 0x257   : > { %v2705_v29 = vpop.f32.mrb[176].mxu0  ;;  %6560 = vmatprep.mubr.msk.bf16.mxu1 %vm7037_vm1, %v11295_v2 }
 0x258   : > { %v6368_v10 = vpop.f32.mrb[177].mxu0  ;;  %v9929_v55 = vadd.f32 %v2705_v29, %v2585_v15 }
 0x259   : > { %v2708_v34 = vpop.f32.mrb[178].mxu0  ;;  %v2540_v21 = vpop.f32.mrb[176].mxu1 }
 0x25a   : > { %v6369_v45 = vpop.f32.mrb[179].mxu0  ;;  %v9933_v22 = vadd.f32 %v2708_v34, %v2586_v58  ;;  %v2587_v12 = vadd.f32 %v2540_v21, %v9769_v18  ;;  %v6334_v19 = vpop.f32.mrb[177].mxu1 }
 0x25b   : > { %v2543_v15 = vpop.f32.mrb[178].mxu1  ;;  %v11785_v19 = vld [vmem:[#allocation15_spill] sm:$0xff] }
 0x25c   : > { %6595 = vmatmul.mubr.msk.bf16.gmra.mrb[28].mxu0 %vm468_vm4, %v11784_v31  ;;  %v2588_v29 = vadd.f32 %v2543_v15, %v9775_v62  ;;  %v6335_v58 = vpop.f32.mrb[179].mxu1  ;;  %v11786_v62 = vld [vmem:[#allocation12_spill] sm:$0xff]  ;;  %v11788_v15 = vld [vmem:[#allocation71_spill] sm:$0xff] }
 0x25d   : > { %6598 = vmatprep.mubr.msk.bf16.mxu0 %vm7037_vm1, %v11295_v2  ;;  %v11787_v11 = vpack.c.bf16 %v11785_v19, %v11786_v62  ;;  %v11791_v19 = vld [vmem:[#allocation28_spill] sm:$0xff] }
 0x25e   : > { %6561 = vmatmul.mubr.msk.bf16.gmra.mrb[28].mxu1 %vm468_vm4, %v3492_v57 }
 0x25f   : > { %v2713_v40 = vpop.f32.mrb[180].mxu0  ;;  %6564 = vmatprep.mubr.msk.bf16.mxu1 %vm7037_vm1, %v11295_v2 }
 0x260   : > { %v6372_v13 = vpop.f32.mrb[181].mxu0  ;;  %v9946_v56 = vadd.f32 %v2713_v40, %v2587_v12 }
 0x261   : > { %v2716_v18 = vpop.f32.mrb[182].mxu0  ;;  %v2548_v45 = vpop.f32.mrb[180].mxu1 }
 0x262   : > { %v6373_v10 = vpop.f32.mrb[183].mxu0  ;;  %v9950_v34 = vadd.f32 %v2716_v18, %v2588_v29  ;;  %v2589_v21 = vadd.f32 %v2548_v45, %v9785_v16  ;;  %v6338_v53 = vpop.f32.mrb[181].mxu1  ;;  %v11789_v29 = vpack.c.bf16 %v11756_v60, %v11788_v15  ;;  %v3482_v15 = vcombine.low %v9834_v37, %v8850_v5 }
 0x263   : > { %v2551_v57 = vpop.f32.mrb[182].mxu1  ;;  %v11790_v53 = vld [vmem:[#allocation27_spill] sm:$0xff] }
 0x264   : > { %6599 = vmatmul.mubr.msk.bf16.gmra.mrb[32].mxu0 %vm468_vm4, %v11787_v11  ;;  %v2590_v12 = vadd.f32 %v2551_v57, %v9789_v35  ;;  %v6339_v32 = vpop.f32.mrb[183].mxu1  ;;  %v11792_v60 = vpack.c.bf16 %v11790_v53, %v11791_v19  ;;  %v3495_v37 = vpack.c.bf16 %v3482_v15, %v11759_v25  ;;  %v11797_v19 = vld [vmem:[#allocation59_spill] sm:$0xff] }
 0x265   : > { %6602 = vmatprep.mubr.msk.bf16.mxu0 %vm7037_vm1, %v11295_v2  ;;  %v11793_v32 = vld [vmem:[#allocation53_spill] sm:$0xff] }
 0x266   : > { %6565 = vmatmul.mubr.msk.bf16.gmra.mrb[32].mxu1 %vm468_vm4, %v11789_v29 }
 0x267   : > { %v2721_v31 = vpop.f32.mrb[184].mxu0  ;;  %6568 = vmatprep.mubr.msk.bf16.mxu1 %vm7037_vm1, %v11295_v2 }
 0x268   : > { %v6376_v16 = vpop.f32.mrb[185].mxu0  ;;  %v9964_v58 = vadd.f32 %v2721_v31, %v2589_v21 }
 0x269   : > { %v2724_v40 = vpop.f32.mrb[186].mxu0  ;;  %v2556_v10 = vpop.f32.mrb[184].mxu1  ;;  %v9987_v16 = vld [vmem:[%s7084_s19 + $0xe8] sm:$0xff] }
 0x26a   : > { %v6377_v13 = vpop.f32.mrb[187].mxu0  ;;  %v9968_v18 = vadd.f32 %v2724_v40, %v2590_v12  ;;  %v2591_v35 = vadd.f32 %v2556_v10, %v9803_v44  ;;  %v6342_v45 = vpop.f32.mrb[185].mxu1  ;;  %v11794_v12 = vld [vmem:[#allocation24_spill] sm:$0xff]  ;;  %v9991_v40 = vcombine.high %v9987_v16, %v9987_v16 }
 0x26b   : > { %v2559_v62 = vpop.f32.mrb[186].mxu1  ;;  %v11795_v31 = vpack.c.bf16 %v11793_v32, %v11794_v12 }
 0x26c   : > { %6603 = vmatmul.mubr.msk.bf16.gmra.mrb[36].mxu0 %vm468_vm4, %v11792_v60  ;;  %v2592_v21 = vadd.f32 %v2559_v62, %v9807_v59  ;;  %v6343_v11 = vpop.f32.mrb[187].mxu1  ;;  %v11799_v62 = vrot.slane %v11664_v52, 5 }
 0x26d   : > { %6606 = vmatprep.mubr.msk.bf16.mxu0 %vm7037_vm1, %v11295_v2 }
 0x26e   : > { %6569 = vmatmul.mubr.msk.bf16.gmra.mrb[36].mxu1 %vm468_vm4, %v11795_v31  ;;  %v3660_v11 = vrot.slane %v11799_v62, 4  ;;  %v11800_v31 = vld [vmem:[#allocation190_spill] sm:$0xff] }
 0x26f   : > { %v2729_v57 = vpop.f32.mrb[188].mxu0  ;;  %6572 = vmatprep.mubr.msk.bf16.mxu1 %vm7037_vm1, %v11295_v2 }
 0x270   : > { %v6380_v44 = vpop.f32.mrb[189].mxu0  ;;  %v9984_v29 = vadd.f32 %v2729_v57, %v2591_v35  ;;  %v11796_v35 = vld [vmem:[#allocation44_spill] sm:$0xff]  ;;  %v3661_v57 = vrot.slane %v9991_v40, 5 }
 0x271   : > { %v2732_v59 = vpop.f32.mrb[190].mxu0  ;;  %v2564_v45 = vpop.f32.mrb[188].mxu1  ;;  %v11798_v60 = vpack.c.bf16 %v11796_v35, %v11797_v19  ;;  %v11801_v44 = vcombine.low %v9304_v41, %v9311_v46 }
 0x272   : > { %v6381_v13 = vpop.f32.mrb[191].mxu0  ;;  %v9995_v10 = vadd.f32 %v2732_v59, %v2592_v21  ;;  %v2593_v53 = vadd.f32 %v2564_v45, %v9822_v49  ;;  %v6346_v5 = vpop.f32.mrb[189].mxu1  ;;  %v10027_v35 = vsel %vm7124_vm5, %v3660_v11, %v3661_v57 }
 0x273   : > { %v2567_v32 = vpop.f32.mrb[190].mxu1  ;;  %v3676_v15 = vpack.c.bf16 %v11801_v44, %v11800_v31  ;;  %v10015_v13 = vld [vmem:[%s7084_s19 + $0xe0] sm:$0xff]  ;;  %v10021_v5 = vcombine.low %v11663_v7, %v9987_v16  ;;  %v3665_v62 = vcombine.low %v9347_v47, %v10027_v35 }
 0x274   : > { %6607 = vmatmul.mubr.msk.bf16.gmra.mrb[40].mxu0 %vm468_vm4, %v11798_v60  ;;  %v2594_v21 = vadd.f32 %v2567_v32, %v9826_v24  ;;  %v6347_v49 = vpop.f32.mrb[191].mxu1  ;;  %v3483_v45 = vcombine.low %v9840_v17, %v10015_v13  ;;  %v3664_v60 = vcombine.low %v9323_v51, %v9341_v54 }
 0x275   : > { %6610 = vmatprep.mubr.msk.bf16.mxu0 %vm7037_vm1, %v11295_v2 }
 0x276   : > { %6573 = vmatmul.mubr.msk.bf16.gmra.mrb[40].mxu1 %vm468_vm4, %v3495_v37  ;;  %v3496_v11 = vpack.c.bf16 %v10021_v5, %v3483_v45  ;;  %v3677_v31 = vpack.c.bf16 %v3665_v62, %v3664_v60 }
 0x277   : > { %v2737_v12 = vpop.f32.mrb[192].mxu0  ;;  %6576 = vmatprep.mubr.msk.bf16.mxu1 %vm7037_vm1, %v11295_v2 }
 0x278   : > { %v6384_v59 = vpop.f32.mrb[193].mxu0  ;;  %v10023_v24 = vadd.f32 %v2737_v12, %v2593_v53 }
 0x279   : > { %v2740_v41 = vpop.f32.mrb[194].mxu0  ;;  %v2572_v19 = vpop.f32.mrb[192].mxu1 }
 0x27a   : > { %v6385_v46 = vpop.f32.mrb[195].mxu0  ;;  %v10031_v37 = vadd.f32 %v2740_v41, %v2594_v21  ;;  %v2595_v53 = vadd.f32 %v2572_v19, %v9852_v20  ;;  %v6350_v32 = vpop.f32.mrb[193].mxu1 }
 0x27b   : > { %v2575_v57 = vpop.f32.mrb[194].mxu1  ;;  %v11802_v32 = vld [vmem:[#allocation125_spill] sm:$0xff] }
 0x27c   : > { %6611 = vmatmul.mubr.msk.bf16.gmra.mrb[44].mxu0 %vm468_vm4, %v3676_v15  ;;  %v2596_v21 = vadd.f32 %v2575_v57, %v9856_v50  ;;  %v6351_v49 = vpop.f32.mrb[195].mxu1  ;;  %v5654_v50 = vld [vmem:[%s10915_s1 + $0x26] sm:$0x3] }
 0x27d   : > { %6614 = vmatprep.mubr.msk.bf16.mxu0 %vm7037_vm1, %v11295_v2  ;;  %v4236_v60 = vsel %vm496_vm0, %v5654_v50, 0 }
 0x27e   : > { %6577 = vmatmul.mubr.msk.bf16.gmra.mrb[44].mxu1 %vm468_vm4, %v3496_v11  ;;  %v11803_v11 = vld [vmem:[#allocation128_spill] sm:$0xff] }
 0x27f   : > { %v2745_v12 = vpop.f32.mrb[196].mxu0  ;;  %6620 = vmatprep.mubr.msk.bf16.mxu1 %vm7037_vm1, %v11295_v2 }
 0x280   : > { %v10044_v51 = vadd.f32 %v2745_v12, %v2595_v53  ;;  %v6388_v54 = vpop.f32.mrb[197].mxu0  ;;  %v5664_v53 = vld [vmem:[%s10915_s1 + $0x28] sm:$0x3] }
 0x281   : > { %v2748_v47 = vpop.f32.mrb[198].mxu0  ;;  %v2862_v15 = vpop.f32.mrb[196].mxu1 }
 0x282   : > { %v10048_v20 = vadd.f32 %v2748_v47, %v2596_v21  ;;  %v6389_v44 = vpop.f32.mrb[199].mxu0  ;;  %v2933_v59 = vadd.f32 %v2862_v15, %v9874_v27  ;;  %v6394_v45 = vpop.f32.mrb[197].mxu1  ;;  %v11804_v27 = vpack.c.bf16 %v11802_v32, %v11803_v11  ;;  %v11805_v15 = vld [vmem:[#allocation17_spill] sm:$0xff] }
 0x283   : > { %v2865_v41 = vpop.f32.mrb[198].mxu1  ;;  %v11806_v50 = vpack.c.bf16 %v8530_v8, %v11805_v15 }
 0x284   : > { %6615 = vmatmul.mubr.msk.bf16.gmra.mrb[48].mxu0 %vm468_vm4, %v3677_v31  ;;  %v2934_v46 = vadd.f32 %v2865_v41, %v9879_v6  ;;  %v6395_v19 = vpop.f32.mrb[199].mxu1  ;;  %v4385_v31 = vsel %vm496_vm0, %v5664_v53, 0 }
 0x285   : > { %6658 = vmatprep.mubr.msk.bf16.mxu0 %vm7037_vm1, %v11295_v2  ;;  %v11807_v19 = vld [vmem:[#allocation92_spill] sm:$0xff] }
 0x286   : > { %6621 = vmatmul.mubr.msk.bf16.vlgmr.msra.gmra.mrb[48].mxu1 %vm468_vm4, %v11804_v27 }
 0x287   : > { %v3042_v62 = vpop.f32.mrb[200].mxu0  ;;  %6695 = vmatpush3.bf16.msra.mxu1 %v4236_v60  ;;  %6624 = vmatprep.mubr.msk.bf16.mxu1 %vm7037_vm1, %v11295_v2 }
 0x288   : > { %v10066_v57 = vadd.f32 %v3042_v62, %v2933_v59  ;;  %v6432_v21 = vpop.f32.mrb[201].mxu0  ;;  %6770 = vmatprep.subr.bf16.mxu1 %v11295_v2 }
 0x289   : > { %v3045_v49 = vpop.f32.mrb[202].mxu0  ;;  %v2870_v54 = vpop.f32.mrb[200].mxu1  ;;  %v11809_v21 = vpack.c.bf16 %v8592_v38, %v8534_v26 }
 0x28a   : > { %v10070_v6 = vadd.f32 %v3045_v49, %v2934_v46  ;;  %v6433_v12 = vpop.f32.mrb[203].mxu0  ;;  %v2935_v47 = vadd.f32 %v2870_v54, %v9894_v1  ;;  %v6398_v44 = vpop.f32.mrb[201].mxu1  ;;  %v11808_v1 = vpack.c.bf16 %v8556_v33, %v11807_v19  ;;  %v11810_v54 = vld [vmem:[#allocation102_spill] sm:$0xff] }
 0x28b   : > { %v2873_v59 = vpop.f32.mrb[202].mxu1 }
 0x28c   : > { %6659 = vmatmul.mubr.msk.bf16.vlgmr.msra.gmra.mrb[52].mxu0 %vm468_vm4, %v11806_v50  ;;  %v2936_v45 = vadd.f32 %v2873_v59, %v9898_v48  ;;  %v6399_v41 = vpop.f32.mrb[203].mxu1 }
 0x28d   : > { %6733 = vmatpush3.bf16.msra.mxu0 %v4385_v31  ;;  %6662 = vmatprep.mubr.msk.bf16.mxu0 %vm7037_vm1, %v11295_v2  ;;  %v11813_v41 = vld [vmem:[#allocation120_spill] sm:$0xff] }
 0x28e   : > { %6808 = vmatprep.subr.bf16.mxu0 %v11295_v2  ;;  %6625 = vmatmul.mubr.msk.bf16.gmra.mrb[52].mxu1 %vm468_vm4, %v11808_v1 }
 0x28f   : > { %v3050_v46 = vpop.f32.mrb[204].mxu0  ;;  %6628 = vmatprep.mubr.msk.bf16.mxu1 %vm7037_vm1, %v11295_v2 }
 0x290   : > { %v10087_v60 = vadd.f32 %v3050_v46, %v2935_v47  ;;  %v6436_v8 = vpop.f32.mrb[205].mxu0  ;;  %v11811_v47 = vld [vmem:[#allocation103_spill] sm:$0xff]  ;;  %v11814_v46 = vld [vmem:[#allocation162_spill] sm:$0xff] }
 0x291   : > { %v3053_v62 = vpop.f32.mrb[206].mxu0  ;;  %v2878_v48 = vpop.f32.mrb[204].mxu1  ;;  %v11812_v44 = vpack.c.bf16 %v11810_v54, %v11811_v47  ;;  %v11815_v19 = vpack.c.bf16 %v11813_v41, %v11814_v46  ;;  %v11819_v47 = vld [vmem:[#allocation124_spill] sm:$0xff]  ;;  %v11823_v41 = vld [vmem:[#allocation123_spill] sm:$0xff] }
 0x292   : > { %v10091_v53 = vadd.f32 %v3053_v62, %v2936_v45  ;;  %v6437_v32 = vpop.f32.mrb[207].mxu0  ;;  %v2937_v11 = vadd.f32 %v2878_v48, %v9911_v14  ;;  %v6402_v27 = vpop.f32.mrb[205].mxu1  ;;  %v11816_v48 = vld [vmem:[#allocation111_spill] sm:$0xff] }
 0x293   : > { %v2881_v33 = vpop.f32.mrb[206].mxu1 }
 0x294   : > { %6663 = vmatmul.mubr.msk.bf16.gmra.mrb[56].mxu0 %vm468_vm4, %v11809_v21  ;;  %v2938_v49 = vadd.f32 %v2881_v33, %v9915_v23  ;;  %v6403_v12 = vpop.f32.mrb[207].mxu1 }
 0x295   : > { %6666 = vmatprep.mubr.msk.bf16.mxu0 %vm7037_vm1, %v11295_v2 }
 0x296   : > { %6629 = vmatmul.mubr.msk.bf16.gmra.mrb[56].mxu1 %vm468_vm4, %v11812_v44  ;;  %v11820_v44 = vld [vmem:[#allocation122_spill] sm:$0xff] }
 0x297   : > { %v3058_v31 = vpop.f32.mrb[208].mxu0  ;;  %6632 = vmatprep.mubr.msk.bf16.mxu1 %vm7037_vm1, %v11295_v2 }
 0x298   : > { %v10105_v14 = vadd.f32 %v3058_v31, %v2937_v11  ;;  %v6440_v15 = vpop.f32.mrb[209].mxu0  ;;  %v11817_v11 = vld [vmem:[#allocation112_spill] sm:$0xff] }
 0x299   : > { %v3061_v50 = vpop.f32.mrb[210].mxu0  ;;  %v2886_v59 = vpop.f32.mrb[208].mxu1  ;;  %v11818_v27 = vpack.c.bf16 %v11816_v48, %v11817_v11  ;;  %v11821_v15 = vpack.c.bf16 %v11819_v47, %v11820_v44  ;;  %v11825_v11 = vld [vmem:[#allocation168_spill] sm:$0xff]  ;;  %v11829_v47 = vld [vmem:[#allocation141_spill] sm:$0xff] }
 0x29a   : > { %v10109_v26 = vadd.f32 %v3061_v50, %v2938_v49  ;;  %v6441_v38 = vpop.f32.mrb[211].mxu0  ;;  %v2939_v23 = vadd.f32 %v2886_v59, %v9929_v55  ;;  %v6406_v45 = vpop.f32.mrb[209].mxu1 }
 0x29b   : > { %v2889_v1 = vpop.f32.mrb[210].mxu1  ;;  %v11822_v45 = vld [vmem:[#allocation136_spill] sm:$0xff] }
 0x29c   : > { %6667 = vmatmul.mubr.msk.bf16.gmra.mrb[60].mxu0 %vm468_vm4, %v11815_v19  ;;  %v2940_v8 = vadd.f32 %v2889_v1, %v9933_v22  ;;  %v6407_v62 = vpop.f32.mrb[211].mxu1  ;;  %v11824_v46 = vpack.c.bf16 %v11822_v45, %v11823_v41  ;;  %v11831_v41 = vld [vmem:[#allocation170_spill] sm:$0xff] }
 0x29d   : > { %6670 = vmatprep.mubr.msk.bf16.mxu0 %vm7037_vm1, %v11295_v2 }
 0x29e   : > { %6633 = vmatmul.mubr.msk.bf16.gmra.mrb[60].mxu1 %vm468_vm4, %v11818_v27  ;;  %v11826_v27 = vld [vmem:[#allocation138_spill] sm:$0xff] }
 0x29f   : > { %v3066_v32 = vpop.f32.mrb[212].mxu0  ;;  %6636 = vmatprep.mubr.msk.bf16.mxu1 %vm7037_vm1, %v11295_v2 }
 0x2a0   : > { %v10123_v55 = vadd.f32 %v3066_v32, %v2939_v23  ;;  %v6444_v21 = vpop.f32.mrb[213].mxu0 }
 0x2a1   : > { %v3069_v33 = vpop.f32.mrb[214].mxu0  ;;  %v2894_v31 = vpop.f32.mrb[212].mxu1  ;;  %v11827_v21 = vpack.c.bf16 %v11825_v11, %v11826_v27  ;;  %v11835_v11 = vld [vmem:[#allocation23_spill] sm:$0xff] }
 0x2a2   : > { %v10127_v49 = vadd.f32 %v3069_v33, %v2940_v8  ;;  %v6445_v12 = vpop.f32.mrb[215].mxu0  ;;  %v2941_v22 = vadd.f32 %v2894_v31, %v9946_v56  ;;  %v6410_v54 = vpop.f32.mrb[213].mxu1 }
 0x2a3   : > { %v2897_v50 = vpop.f32.mrb[214].mxu1  ;;  %v11828_v54 = vld [vmem:[#allocation142_spill] sm:$0xff] }
 0x2a4   : > { %6671 = vmatmul.mubr.msk.bf16.gmra.mrb[64].mxu0 %vm468_vm4, %v11821_v15  ;;  %v2942_v38 = vadd.f32 %v2897_v50, %v9950_v34  ;;  %v6411_v59 = vpop.f32.mrb[215].mxu1  ;;  %v11830_v44 = vpack.c.bf16 %v11828_v54, %v11829_v47 }
 0x2a5   : > { %6674 = vmatprep.mubr.msk.bf16.mxu0 %vm7037_vm1, %v11295_v2 }
 0x2a6   : > { %6637 = vmatmul.mubr.msk.bf16.gmra.mrb[64].mxu1 %vm468_vm4, %v11824_v46  ;;  %v11832_v46 = vld [vmem:[#allocation33_spill] sm:$0xff] }
 0x2a7   : > { %v3074_v23 = vpop.f32.mrb[216].mxu0  ;;  %6640 = vmatprep.mubr.msk.bf16.mxu1 %vm7037_vm1, %v11295_v2 }
 0x2a8   : > { %v10141_v56 = vadd.f32 %v3074_v23, %v2941_v22  ;;  %v6448_v19 = vpop.f32.mrb[217].mxu0 }
 0x2a9   : > { %v3077_v1 = vpop.f32.mrb[218].mxu0  ;;  %v2902_v32 = vpop.f32.mrb[216].mxu1  ;;  %v11833_v19 = vpack.c.bf16 %v11831_v41, %v11832_v46  ;;  %v11843_v46 = vrot.slane %v11664_v52, 7 }
 0x2aa   : > { %v10145_v8 = vadd.f32 %v3077_v1, %v2942_v38  ;;  %v6449_v62 = vpop.f32.mrb[219].mxu0  ;;  %v2943_v34 = vadd.f32 %v2902_v32, %v9964_v58  ;;  %v6414_v48 = vpop.f32.mrb[217].mxu1 }
 0x2ab   : > { %v2905_v33 = vpop.f32.mrb[218].mxu1  ;;  %v11834_v48 = vld [vmem:[#allocation21_spill] sm:$0xff] }
 0x2ac   : > { %6675 = vmatmul.mubr.msk.bf16.gmra.mrb[68].mxu0 %vm468_vm4, %v11827_v21  ;;  %v2944_v12 = vadd.f32 %v2905_v33, %v9968_v18  ;;  %v6415_v31 = vpop.f32.mrb[219].mxu1  ;;  %v11836_v27 = vpack.c.bf16 %v11834_v48, %v11835_v11  ;;  %v11837_v33 = vrot.slane %v11664_v52, 6  ;;  %v11845_v48 = vld [vmem:[#allocation26_spill] sm:$0xff]  ;;  %v11846_v11 = vld [vmem:[#allocation77_spill] sm:$0xff]  ;;  %v11847_v52 = vld [vmem:[#allocation75_spill] sm:$0xff] }
 0x2ad   : > { %6678 = vmatprep.mubr.msk.bf16.mxu0 %vm7037_vm1, %v11295_v2  ;;  %v3841_v31 = vrot.slane %v9991_v40, 6 }
 0x2ae   : > { %6641 = vmatmul.mubr.msk.bf16.gmra.mrb[68].mxu1 %vm468_vm4, %v11830_v44  ;;  %v11838_v44 = vld [vmem:[#allocation78_spill] sm:$0xff] }
 0x2af   : > { %v3082_v22 = vpop.f32.mrb[220].mxu0  ;;  %6644 = vmatprep.mubr.msk.bf16.mxu1 %vm7037_vm1, %v11295_v2 }
 0x2b0   : > { %v10159_v58 = vadd.f32 %v3082_v22, %v2943_v34  ;;  %v6452_v15 = vpop.f32.mrb[221].mxu0 }
 0x2b1   : > { %v3085_v50 = vpop.f32.mrb[222].mxu0  ;;  %v2910_v23 = vpop.f32.mrb[220].mxu1  ;;  %v11839_v15 = vcombine.low %v9381_v3, %v9385_v39 }
 0x2b2   : > { %v10163_v38 = vadd.f32 %v3085_v50, %v2944_v12  ;;  %v6453_v59 = vpop.f32.mrb[223].mxu0  ;;  %v2945_v18 = vadd.f32 %v2910_v23, %v9984_v29  ;;  %v6418_v45 = vpop.f32.mrb[221].mxu1  ;;  %v3840_v12 = vrot.slane %v11837_v33, 4 }
 0x2b3   : > { %v2913_v1 = vpop.f32.mrb[222].mxu1  ;;  %v3856_v50 = vpack.c.bf16 %v11839_v15, %v11838_v44  ;;  %v11841_v45 = vld [vmem:[#allocation148_spill] sm:$0xff] }
 0x2b4   : > { %6679 = vmatmul.mubr.msk.bf16.gmra.mrb[72].mxu0 %vm468_vm4, %v11833_v19  ;;  %v2946_v62 = vadd.f32 %v2913_v1, %v9995_v10  ;;  %v6419_v32 = vpop.f32.mrb[223].mxu1  ;;  %v4020_v19 = vrot.slane %v11843_v46, 4  ;;  %v4021_v1 = vrot.slane %v9991_v40, 7  ;;  %v11849_v15 = vld [vmem:[#allocation180_spill] sm:$0xff] }
 0x2b5   : > { %6682 = vmatprep.mubr.msk.bf16.mxu0 %vm7037_vm1, %v11295_v2  ;;  %v10200_v32 = vsel %vm7542_vm7, %v3840_v12, %v3841_v31  ;;  %v11909_v31 = vld [vmem:[#allocation8_spill] sm:$0xff] }
 0x2b6   : > { %6645 = vmatmul.mubr.msk.bf16.gmra.mrb[72].mxu1 %vm468_vm4, %v11836_v27  ;;  %v3844_v27 = vcombine.low %v11846_v11, %v11845_v48 }
 0x2b7   : > { %v3090_v34 = vpop.f32.mrb[224].mxu0  ;;  %6648 = vmatprep.mubr.msk.bf16.mxu1 %vm7037_vm1, %v11295_v2 }
 0x2b8   : > { %v10177_v29 = vadd.f32 %v3090_v34, %v2945_v18  ;;  %v6456_v21 = vpop.f32.mrb[225].mxu0  ;;  %v11840_v18 = vld [vmem:[#allocation171_spill] sm:$0xff] }
 0x2b9   : > { %v3093_v22 = vpop.f32.mrb[226].mxu0  ;;  %v2918_v47 = vpop.f32.mrb[224].mxu1  ;;  %v11842_v41 = vpack.c.bf16 %v11840_v18, %v11841_v45  ;;  %v3845_v21 = vcombine.low %v11847_v52, %v10200_v32 }
 0x2ba   : > { %v10184_v10 = vadd.f32 %v3093_v22, %v2946_v62  ;;  %v6457_v54 = vpop.f32.mrb[227].mxu0  ;;  %v2947_v59 = vadd.f32 %v2918_v47, %v10023_v24  ;;  %v6422_v23 = vpop.f32.mrb[225].mxu1  ;;  %v10214_v22 = vsel %vm7862_vm10, %v4020_v19, %v4021_v1  ;;  %v11852_v19 = vld [vmem:[#allocation183_spill] sm:$0xff] }
 0x2bb   : > { %v2921_v34 = vpop.f32.mrb[226].mxu1  ;;  %v11850_v23 = vld [vmem:[#allocation178_spill] sm:$0xff]  ;;  %v3857_v45 = vpack.c.bf16 %v3845_v21, %v3844_v27 }
 0x2bc   : > { %6683 = vmatmul.mubr.msk.bf16.gmra.mrb[76].mxu0 %vm468_vm4, %v11842_v41  ;;  %v2948_v39 = vadd.f32 %v2921_v34, %v10031_v37  ;;  %v6423_v3 = vpop.f32.mrb[227].mxu1  ;;  %v4024_v18 = vcombine.low %v11850_v23, %v11849_v15 }
 0x2bd   : > { %6686 = vmatprep.mubr.msk.bf16.mxu0 %vm7037_vm1, %v11295_v2 }
 0x2be   : > { %6649 = vmatmul.mubr.msk.bf16.gmra.mrb[76].mxu1 %vm468_vm4, %v3856_v50  ;;  %v11851_v50 = vld [vmem:[#allocation181_spill] sm:$0xff] }
 0x2bf   : > { %v3098_v24 = vpop.f32.mrb[228].mxu0  ;;  %6652 = vmatprep.mubr.msk.bf16.mxu1 %vm7037_vm1, %v11295_v2 }
 0x2c0   : > { %v10210_v33 = vadd.f32 %v3098_v24, %v2947_v59  ;;  %v6460_v12 = vpop.f32.mrb[229].mxu0  ;;  %v4025_v59 = vcombine.low %v11851_v50, %v10214_v22 }
 0x2c1   : > { %v3101_v54 = vpop.f32.mrb[230].mxu0  ;;  %v2926_v44 = vpop.f32.mrb[228].mxu1  ;;  %v11853_v12 = vld [vmem:[#allocation84_spill] sm:$0xff] }
 0x2c2   : > { %v10218_v37 = vadd.f32 %v3101_v54, %v2948_v39  ;;  %v6461_v47 = vpop.f32.mrb[231].mxu0  ;;  %v2949_v41 = vadd.f32 %v2926_v44, %v10044_v51  ;;  %v6426_v46 = vpop.f32.mrb[229].mxu1  ;;  %v4037_v24 = vpack.c.bf16 %v4025_v59, %v4024_v18  ;;  %v11854_v54 = vld [vmem:[#allocation126_spill] sm:$0xff] }
 0x2c3   : > { %v2929_v1 = vpop.f32.mrb[230].mxu1  ;;  %v4197_v47 = vpack.c.bf16 %v11854_v54, %v11853_v12 }
 0x2c4   : > { %6687 = vmatmul.mubr.msk.bf16.gmra.mrb[80].mxu0 %vm468_vm4, %v11852_v19  ;;  %v2950_v34 = vadd.f32 %v2929_v1, %v10048_v20  ;;  %v6427_v39 = vpop.f32.mrb[231].mxu1  ;;  %v5675_v20 = vld [vmem:[%s10915_s1 + $0x2a] sm:$0x3] }
 0x2c5   : > { %6690 = vmatprep.mubr.msk.bf16.mxu0 %vm7037_vm1, %v11295_v2  ;;  %v4542_v59 = vsel %vm496_vm0, %v5675_v20, 0 }
 0x2c6   : > { %6653 = vmatmul.mubr.msk.bf16.gmra.mrb[80].mxu1 %vm468_vm4, %v3857_v45 }
 0x2c7   : > { %v3106_v3 = vpop.f32.mrb[232].mxu0  ;;  %6696 = vmatprep.mubr.msk.bf16.mxu1 %vm7037_vm1, %v11295_v2 }
 0x2c8   : > { %v10231_v48 = vadd.f32 %v3106_v3, %v2949_v41  ;;  %v6464_v11 = vpop.f32.mrb[233].mxu0  ;;  %v5686_v41 = vld [vmem:[%s10915_s1 + $0x2c] sm:$0x3]  ;;  %v11855_v3 = vld [vmem:[#allocation130_spill] sm:$0xff] }
 0x2c9   : > { %v3109_v27 = vpop.f32.mrb[234].mxu0  ;;  %v3222_v21 = vpop.f32.mrb[232].mxu1 }
 0x2ca   : > { %v10235_v51 = vadd.f32 %v3109_v27, %v2950_v34  ;;  %v6465_v52 = vpop.f32.mrb[235].mxu0  ;;  %v3293_v44 = vadd.f32 %v3222_v21, %v10066_v57  ;;  %v6470_v15 = vpop.f32.mrb[233].mxu1  ;;  %v4698_v34 = vsel %vm496_vm0, %v5686_v41, 0  ;;  %v11857_v21 = vld [vmem:[#allocation94_spill] sm:$0xff] }
 0x2cb   : > { %v3225_v23 = vpop.f32.mrb[234].mxu1 }
 0x2cc   : > { %6691 = vmatmul.mubr.msk.bf16.gmra.mrb[84].mxu0 %vm468_vm4, %v4037_v24  ;;  %v3294_v18 = vadd.f32 %v3225_v23, %v10070_v6  ;;  %v6471_v50 = vpop.f32.mrb[235].mxu1  ;;  %v11856_v24 = vld [vmem:[#allocation97_spill] sm:$0xff] }
 0x2cd   : > { %6734 = vmatprep.mubr.msk.bf16.mxu0 %vm7037_vm1, %v11295_v2  ;;  %v4198_v11 = vpack.c.bf16 %v11856_v24, %v11855_v3 }
 0x2ce   : > { %6697 = vmatmul.mubr.msk.bf16.vlgmr.msra.gmra.mrb[84].mxu1 %vm468_vm4, %v4197_v47 }
 0x2cf   : > { %v3390_v45 = vpop.f32.mrb[236].mxu0  ;;  %6771 = vmatpush3.bf16.msra.mxu1 %v4542_v59  ;;  %6700 = vmatprep.mubr.msk.bf16.mxu1 %vm7037_vm1, %v11295_v2 }
 0x2d0   : > { %v10252_v57 = vadd.f32 %v3390_v45, %v3293_v44  ;;  %v6508_v46 = vpop.f32.mrb[237].mxu0  ;;  %6846 = vmatprep.subr.bf16.mxu1 %v11295_v2  ;;  %v11858_v45 = vld [vmem:[#allocation106_spill] sm:$0xff] }
 0x2d1   : > { %v3393_v19 = vpop.f32.mrb[238].mxu0  ;;  %v3230_v39 = vpop.f32.mrb[236].mxu1 }
 0x2d2   : > { %v10256_v1 = vadd.f32 %v3393_v19, %v3294_v18  ;;  %v6509_v6 = vpop.f32.mrb[239].mxu0  ;;  %v3295_v27 = vadd.f32 %v3230_v39, %v10087_v60  ;;  %v6474_v52 = vpop.f32.mrb[237].mxu1  ;;  %v11860_v39 = vld [vmem:[#allocation186_spill] sm:$0xff] }
 0x2d3   : > { %v3233_v20 = vpop.f32.mrb[238].mxu1 }
 0x2d4   : > { %6735 = vmatmul.mubr.msk.bf16.vlgmr.msra.gmra.mrb[88].mxu0 %vm468_vm4, %v11857_v21  ;;  %v3296_v12 = vadd.f32 %v3233_v20, %v10091_v53  ;;  %v6475_v54 = vpop.f32.mrb[239].mxu1 }
 0x2d5   : > { %6809 = vmatpush3.bf16.msra.mxu0 %v4698_v34  ;;  %6738 = vmatprep.mubr.msk.bf16.mxu0 %vm7037_vm1, %v11295_v2  ;;  %v11859_v34 = vld [vmem:[#allocation9_spill] sm:$0xff] }
 0x2d6   : > { %6884 = vmatprep.subr.bf16.mxu0 %v11295_v2  ;;  %6701 = vmatmul.mubr.msk.bf16.gmra.mrb[88].mxu1 %vm468_vm4, %v4198_v11  ;;  %v11861_v3 = vpack.c.bf16 %v11859_v34, %v11860_v39  ;;  %v11862_v54 = vld [vmem:[#allocation109_spill] sm:$0xff] }
 0x2d7   : > { %v3398_v47 = vpop.f32.mrb[240].mxu0  ;;  %6704 = vmatprep.mubr.msk.bf16.mxu1 %vm7037_vm1, %v11295_v2 }
 0x2d8   : > { %v10270_v44 = vadd.f32 %v3398_v47, %v3295_v27  ;;  %v6512_v60 = vpop.f32.mrb[241].mxu0 }
 0x2d9   : > { %v3401_v15 = vpop.f32.mrb[242].mxu0  ;;  %v3238_v50 = vpop.f32.mrb[240].mxu1 }
 0x2da   : > { %v10274_v23 = vadd.f32 %v3401_v15, %v3296_v12  ;;  %v6513_v18 = vpop.f32.mrb[243].mxu0  ;;  %v3297_v59 = vadd.f32 %v3238_v50, %v10105_v14  ;;  %v6478_v53 = vpop.f32.mrb[241].mxu1 }
 0x2db   : > { %v3241_v41 = vpop.f32.mrb[242].mxu1 }
 0x2dc   : > { %6739 = vmatmul.mubr.msk.bf16.gmra.mrb[92].mxu0 %vm468_vm4, %v11858_v45  ;;  %v3298_v46 = vadd.f32 %v3241_v41, %v10109_v26  ;;  %v6479_v19 = vpop.f32.mrb[243].mxu1  ;;  %v4200_v26 = vpack.c.bf16 %v9449_v63, %v11683_v36  ;;  %v4201_v45 = vpack.c.bf16 %v11687_v9, %v9453_v43 }
 0x2dd   : > { %6742 = vmatprep.mubr.msk.bf16.mxu0 %vm7037_vm1, %v11295_v2 }
 0x2de   : > { %6705 = vmatmul.mubr.msk.bf16.gmra.mrb[92].mxu1 %vm468_vm4, %v11861_v3 }
 0x2df   : > { %v3406_v6 = vpop.f32.mrb[244].mxu0  ;;  %6708 = vmatprep.mubr.msk.bf16.mxu1 %vm7037_vm1, %v11295_v2 }
 0x2e0   : > { %v10286_v24 = vadd.f32 %v3406_v6, %v3297_v59  ;;  %v6516_v14 = vpop.f32.mrb[245].mxu0 }
 0x2e1   : > { %v3409_v11 = vpop.f32.mrb[246].mxu0  ;;  %v3246_v21 = vpop.f32.mrb[244].mxu1 }
 0x2e2   : > { %v10290_v27 = vadd.f32 %v3409_v11, %v3298_v46  ;;  %v6517_v52 = vpop.f32.mrb[247].mxu0  ;;  %v3299_v20 = vadd.f32 %v3246_v21, %v10123_v55  ;;  %v6482_v12 = vpop.f32.mrb[245].mxu1  ;;  %v11863_v46 = vld [vmem:[#allocation127_spill] sm:$0xff] }
 0x2e3   : > { %v3249_v47 = vpop.f32.mrb[246].mxu1 }
 0x2e4   : > { %6743 = vmatmul.mubr.msk.bf16.gmra.mrb[96].mxu0 %vm468_vm4, %v11862_v54  ;;  %v3300_v60 = vadd.f32 %v3249_v47, %v10127_v49  ;;  %v6483_v15 = vpop.f32.mrb[247].mxu1  ;;  %v11865_v47 = vld [vmem:[#allocation191_spill] sm:$0xff] }
 0x2e5   : > { %6746 = vmatprep.mubr.msk.bf16.mxu0 %vm7037_vm1, %v11295_v2 }
 0x2e6   : > { %6709 = vmatmul.mubr.msk.bf16.gmra.mrb[96].mxu1 %vm468_vm4, %v4200_v26  ;;  %v11864_v26 = vld [vmem:[#allocation49_spill] sm:$0xff] }
 0x2e7   : > { %v3414_v18 = vpop.f32.mrb[248].mxu0  ;;  %6712 = vmatprep.mubr.msk.bf16.mxu1 %vm7037_vm1, %v11295_v2 }
 0x2e8   : > { %v10301_v50 = vadd.f32 %v3414_v18, %v3299_v20  ;;  %v6520_v59 = vpop.f32.mrb[249].mxu0 }
 0x2e9   : > { %v3417_v36 = vpop.f32.mrb[250].mxu0  ;;  %v3254_v53 = vpop.f32.mrb[248].mxu1 }
 0x2ea   : > { %v10305_v63 = vadd.f32 %v3417_v36, %v3300_v60  ;;  %v6521_v55 = vpop.f32.mrb[251].mxu0  ;;  %v3301_v49 = vadd.f32 %v3254_v53, %v10141_v56  ;;  %v6486_v41 = vpop.f32.mrb[249].mxu1  ;;  %v11866_v60 = vpack.c.bf16 %v9067_v42, %v11865_v47 }
 0x2eb   : > { %v3257_v19 = vpop.f32.mrb[250].mxu1 }
 0x2ec   : > { %6747 = vmatmul.mubr.msk.bf16.gmra.mrb[100].mxu0 %vm468_vm4, %v11863_v46  ;;  %v3302_v6 = vadd.f32 %v3257_v19, %v10145_v8  ;;  %v6487_v34 = vpop.f32.mrb[251].mxu1 }
 0x2ed   : > { %6750 = vmatprep.mubr.msk.bf16.mxu0 %vm7037_vm1, %v11295_v2 }
 0x2ee   : > { %6713 = vmatmul.mubr.msk.bf16.gmra.mrb[100].mxu1 %vm468_vm4, %v4201_v45  ;;  %v11867_v45 = vld [vmem:[#allocation3_spill] sm:$0xff] }
 0x2ef   : > { %v3422_v39 = vpop.f32.mrb[252].mxu0  ;;  %6716 = vmatprep.mubr.msk.bf16.mxu1 %vm7037_vm1, %v11295_v2 }
 0x2f0   : > { %v10316_v3 = vadd.f32 %v3422_v39, %v3301_v49  ;;  %v6524_v14 = vpop.f32.mrb[253].mxu0 }
 0x2f1   : > { %v3425_v43 = vpop.f32.mrb[254].mxu0  ;;  %v3262_v11 = vpop.f32.mrb[252].mxu1  ;;  %v10354_v14 = vld [vmem:[%s7084_s19 + $0xf0] sm:$0xff] }
 0x2f2   : > { %v10320_v9 = vadd.f32 %v3425_v43, %v3302_v6  ;;  %v6525_v56 = vpop.f32.mrb[255].mxu0  ;;  %v3303_v52 = vadd.f32 %v3262_v11, %v10159_v58  ;;  %v6490_v21 = vpop.f32.mrb[253].mxu1  ;;  %v11868_v11 = vld [vmem:[#allocation79_spill] sm:$0xff] }
 0x2f3   : > { %v3265_v8 = vpop.f32.mrb[254].mxu1 }
 0x2f4   : > { %6751 = vmatmul.mubr.msk.bf16.gmra.mrb[104].mxu0 %vm468_vm4, %v11864_v26  ;;  %v3304_v20 = vadd.f32 %v3265_v8, %v10163_v38  ;;  %v6491_v12 = vpop.f32.mrb[255].mxu1  ;;  %v4203_v38 = vpack.c.bf16 %v9505_v4, %v11690_v28 }
 0x2f5   : > { %6754 = vmatprep.mubr.msk.bf16.mxu0 %vm7037_vm1, %v11295_v2  ;;  %v11870_v12 = vld [vmem:[#allocation80_spill] sm:$0xff] }
 0x2f6   : > { %6717 = vmatmul.mubr.msk.bf16.gmra.mrb[104].mxu1 %vm468_vm4, %v11866_v60 }
 0x2f7   : > { %v3430_v54 = vpop.f32.mrb[0].mxu0  ;;  %6720 = vmatprep.mubr.msk.bf16.mxu1 %vm7037_vm1, %v11295_v2 }
 0x2f8   : > { %v10332_v15 = vadd.f32 %v3430_v54, %v3303_v52  ;;  %v6528_v58 = vpop.f32.mrb[1].mxu0  ;;  %v11869_v52 = vpack.c.bf16 %v9122_v0, %v11868_v11  ;;  %v11871_v54 = vld [vmem:[#allocation51_spill] sm:$0xff] }
 0x2f9   : > { %v3433_v18 = vpop.f32.mrb[2].mxu0  ;;  %v3270_v55 = vpop.f32.mrb[0].mxu1  ;;  %v11872_v47 = vpack.c.bf16 %v11870_v12, %v11871_v54  ;;  %v5653_v58 = vcombine.high %v9840_v17, %v10015_v13  ;;  %v4365_v17 = vcombine.low %v9987_v16, %v10354_v14 }
 0x2fa   : > { %v10336_v59 = vadd.f32 %v3433_v18, %v3304_v20  ;;  %v6529_v36 = vpop.f32.mrb[3].mxu0  ;;  %v3305_v53 = vadd.f32 %v3270_v55, %v10177_v29  ;;  %v6494_v42 = vpop.f32.mrb[1].mxu1  ;;  %v10368_v20 = vcombine.high %v10354_v14, %v10354_v14  ;;  %v10382_v18 = vld [vmem:[%s7084_s19 + $0xf8] sm:$0xff] }
 0x2fb   : > { %v3273_v49 = vpop.f32.mrb[2].mxu1 }
 0x2fc   : > { %6755 = vmatmul.mubr.msk.bf16.gmra.mrb[108].mxu0 %vm468_vm4, %v11867_v45  ;;  %v3306_v41 = vadd.f32 %v3273_v49, %v10184_v10  ;;  %v6495_v46 = vpop.f32.mrb[3].mxu1  ;;  %v4364_v10 = vcombine.low %v10015_v13, %v11663_v7 }
 0x2fd   : > { %6758 = vmatprep.mubr.msk.bf16.mxu0 %vm7037_vm1, %v11295_v2 }
 0x2fe   : > { %6721 = vmatmul.mubr.msk.bf16.gmra.mrb[108].mxu1 %vm468_vm4, %v4203_v38 }
 0x2ff   : > { %v3438_v19 = vpop.f32.mrb[4].mxu0  ;;  %6724 = vmatprep.mubr.msk.bf16.mxu1 %vm7037_vm1, %v11295_v2 }
 0x300   : > { %v10347_v6 = vadd.f32 %v3438_v19, %v3305_v53  ;;  %v6532_v28 = vpop.f32.mrb[5].mxu0 }
 0x301   : > { %v3441_v4 = vpop.f32.mrb[6].mxu0  ;;  %v3278_v39 = vpop.f32.mrb[4].mxu1 }
 0x302   : > { %v10351_v29 = vadd.f32 %v3441_v4, %v3306_v41  ;;  %v6533_v34 = vpop.f32.mrb[7].mxu0  ;;  %v3307_v43 = vadd.f32 %v3278_v39, %v10210_v33  ;;  %v6498_v56 = vpop.f32.mrb[5].mxu1  ;;  %v4371_v33 = vpack.c.bf16 %v4364_v10, %v11870_v12  ;;  %v11873_v12 = vld [vmem:[#allocation61_spill] sm:$0xff] }
 0x303   : > { %v3281_v21 = vpop.f32.mrb[6].mxu1 }
 0x304   : > { %6759 = vmatmul.mubr.msk.bf16.gmra.mrb[112].mxu0 %vm468_vm4, %v11869_v52  ;;  %v3308_v26 = vadd.f32 %v3281_v21, %v10218_v37  ;;  %v6499_v8 = vpop.f32.mrb[7].mxu1  ;;  %v4194_v37 = vcombine.low %v9987_v16, %v9991_v40  ;;  %v4366_v40 = vcombine.low %v10368_v20, %v10382_v18 }
 0x305   : > { %6762 = vmatprep.mubr.msk.bf16.mxu0 %vm7037_vm1, %v11295_v2 }
 0x306   : > { %6725 = vmatmul.mubr.msk.bf16.gmra.mrb[112].mxu1 %vm468_vm4, %v11872_v47  ;;  %v4205_v49 = vpack.c.bf16 %v4194_v37, %v5653_v58  ;;  %v4372_v4 = vpack.c.bf16 %v4366_v40, %v4365_v17  ;;  %v11875_v17 = vld [vmem:[#allocation76_spill] sm:$0xff] }
 0x307   : > { %v3446_v7 = vpop.f32.mrb[8].mxu0  ;;  %6728 = vmatprep.mubr.msk.bf16.mxu1 %vm7037_vm1, %v11295_v2 }
 0x308   : > { %v10375_v0 = vadd.f32 %v3446_v7, %v3307_v43  ;;  %v6536_v60 = vpop.f32.mrb[9].mxu0  ;;  %v5708_v7 = vld [vmem:[%s10915_s1 + $0x30] sm:$0x3] }
 0x309   : > { %v3449_v36 = vpop.f32.mrb[10].mxu0  ;;  %v3286_v53 = vpop.f32.mrb[8].mxu1  ;;  %v4998_v60 = vsel %vm496_vm0, %v5708_v7, 0 }
 0x30a   : > { %v10386_v55 = vadd.f32 %v3449_v36, %v3308_v26  ;;  %v6537_v38 = vpop.f32.mrb[11].mxu0  ;;  %v3309_v42 = vadd.f32 %v3286_v53, %v10231_v48  ;;  %v6502_v45 = vpop.f32.mrb[9].mxu1 }
 0x30b   : > { %v3289_v13 = vpop.f32.mrb[10].mxu1  ;;  %v11874_v38 = vld [vmem:[#allocation99_spill] sm:$0xff] }
 0x30c   : > { %6763 = vmatmul.mubr.msk.bf16.gmra.mrb[116].mxu0 %vm468_vm4, %v4371_v33  ;;  %v3310_v41 = vadd.f32 %v3289_v13, %v10235_v51  ;;  %v6503_v46 = vpop.f32.mrb[11].mxu1  ;;  %v5697_v51 = vld [vmem:[%s10915_s1 + $0x2e] sm:$0x3] }
 0x30d   : > { %6766 = vmatprep.mubr.msk.bf16.mxu0 %vm7037_vm1, %v11295_v2  ;;  %v4854_v26 = vsel %vm496_vm0, %v5697_v51, 0 }
 0x30e   : > { %6729 = vmatmul.mubr.msk.bf16.gmra.mrb[116].mxu1 %vm468_vm4, %v4205_v49 }
 0x30f   : > { %v3454_v19 = vpop.f32.mrb[12].mxu0  ;;  %6772 = vmatprep.mubr.msk.bf16.mxu1 %vm7037_vm1, %v11295_v2 }
 0x310   : > { %v10398_v48 = vadd.f32 %v3454_v19, %v3309_v42  ;;  %v6540_v28 = vpop.f32.mrb[13].mxu0 }
 0x311   : > { %v3457_v34 = vpop.f32.mrb[14].mxu0  ;;  %v3563_v10 = vpop.f32.mrb[12].mxu1 }
 0x312   : > { %v10402_v16 = vadd.f32 %v3457_v34, %v3310_v41  ;;  %v6541_v39 = vpop.f32.mrb[15].mxu0  ;;  %v3634_v43 = vadd.f32 %v3563_v10, %v10252_v57  ;;  %v6546_v56 = vpop.f32.mrb[13].mxu1 }
 0x313   : > { %v3566_v11 = vpop.f32.mrb[14].mxu1 }
 0x314   : > { %6767 = vmatmul.mubr.msk.bf16.gmra.mrb[120].mxu0 %vm468_vm4, %v4372_v4  ;;  %v3635_v52 = vadd.f32 %v3566_v11, %v10256_v1  ;;  %v6547_v21 = vpop.f32.mrb[15].mxu1 }
 0x315   : > { %6810 = vmatprep.mubr.msk.bf16.mxu0 %vm7037_vm1, %v11295_v2 }
 0x316   : > { %6773 = vmatmul.mubr.msk.bf16.vlgmr.msra.gmra.mrb[120].mxu1 %vm468_vm4, %v11873_v12 }
 0x317   : > { %v3744_v8 = vpop.f32.mrb[16].mxu0  ;;  %6847 = vmatpush3.bf16.msra.mxu1 %v4854_v26  ;;  %6776 = vmatprep.mubr.msk.bf16.mxu1 %vm7037_vm1, %v11295_v2 }
 0x318   : > { %v10418_v57 = vadd.f32 %v3744_v8, %v3634_v43  ;;  %v6584_v33 = vpop.f32.mrb[17].mxu0  ;;  %v11877_v43 = vld [vmem:[#allocation18_spill] sm:$0xff] }
 0x319   : > { %v3747_v54 = vpop.f32.mrb[18].mxu0  ;;  %v3571_v58 = vpop.f32.mrb[16].mxu1 }
 0x31a   : > { %v10422_v1 = vadd.f32 %v3747_v54, %v3635_v52  ;;  %v6585_v47 = vpop.f32.mrb[19].mxu0  ;;  %v3636_v37 = vadd.f32 %v3571_v58, %v10270_v44  ;;  %v6550_v36 = vpop.f32.mrb[17].mxu1 }
 0x31b   : > { %v3574_v53 = vpop.f32.mrb[18].mxu1 }
 0x31c   : > { %6811 = vmatmul.mubr.msk.bf16.vlgmr.msra.gmra.mrb[124].mxu0 %vm468_vm4, %v11874_v38  ;;  %v3637_v42 = vadd.f32 %v3574_v53, %v10274_v23  ;;  %v6551_v45 = vpop.f32.mrb[19].mxu1  ;;  %v11876_v23 = vld [vmem:[#allocation114_spill] sm:$0xff] }
 0x31d   : > { %6885 = vmatpush3.bf16.msra.mxu0 %v4998_v60  ;;  %6814 = vmatprep.mubr.msk.bf16.mxu0 %vm7037_vm1, %v11295_v2  ;;  %v11879_v60 = vld [vmem:[#allocation32_spill] sm:$0xff] }
 0x31e   : > { %6777 = vmatmul.mubr.msk.bf16.gmra.mrb[124].mxu1 %vm468_vm4, %v11875_v17 }
 0x31f   : > { %v3752_v49 = vpop.f32.mrb[20].mxu0  ;;  %6780 = vmatprep.mubr.msk.bf16.mxu1 %vm7037_vm1, %v11295_v2 }
 0x320   : > { %v10433_v40 = vadd.f32 %v3752_v49, %v3636_v37  ;;  %v6588_v13 = vpop.f32.mrb[21].mxu0 }
 0x321   : > { %v3755_v44 = vpop.f32.mrb[22].mxu0  ;;  %v3579_v19 = vpop.f32.mrb[20].mxu1 }
 0x322   : > { %v10437_v41 = vadd.f32 %v3755_v44, %v3637_v42  ;;  %v6589_v46 = vpop.f32.mrb[23].mxu0  ;;  %v3638_v28 = vadd.f32 %v3579_v19, %v10286_v24  ;;  %v6554_v4 = vpop.f32.mrb[21].mxu1 }
 0x323   : > { %v3582_v34 = vpop.f32.mrb[22].mxu1  ;;  %v11881_v46 = vld [vmem:[#allocation50_spill] sm:$0xff] }
 0x324   : > { %6815 = vmatmul.mubr.msk.bf16.gmra.mrb[128].mxu0 %vm468_vm4, %v11876_v23  ;;  %v3639_v39 = vadd.f32 %v3582_v34, %v10290_v27  ;;  %v6555_v10 = vpop.f32.mrb[23].mxu1  ;;  %v11878_v27 = vld [vmem:[#allocation121_spill] sm:$0xff] }
 0x325   : > { %6818 = vmatprep.mubr.msk.bf16.mxu0 %vm7037_vm1, %v11295_v2 }
 0x326   : > { %6781 = vmatmul.mubr.msk.bf16.gmra.mrb[128].mxu1 %vm468_vm4, %v11877_v43 }
 0x327   : > { %v3760_v51 = vpop.f32.mrb[24].mxu0  ;;  %6784 = vmatprep.mubr.msk.bf16.mxu1 %vm7037_vm1, %v11295_v2 }
 0x328   : > { %v10447_v56 = vadd.f32 %v3760_v51, %v3638_v28  ;;  %v6592_v11 = vpop.f32.mrb[25].mxu0 }
 0x329   : > { %v3763_v52 = vpop.f32.mrb[26].mxu0  ;;  %v3587_v26 = vpop.f32.mrb[24].mxu1 }
 0x32a   : > { %v10451_v24 = vadd.f32 %v3763_v52, %v3639_v39  ;;  %v6593_v21 = vpop.f32.mrb[27].mxu0  ;;  %v3640_v8 = vadd.f32 %v3587_v26, %v10301_v50  ;;  %v6558_v7 = vpop.f32.mrb[25].mxu1 }
 0x32b   : > { %v3590_v12 = vpop.f32.mrb[26].mxu1  ;;  %v11883_v21 = vld [vmem:[#allocation69_spill] sm:$0xff] }
 0x32c   : > { %6819 = vmatmul.mubr.msk.bf16.gmra.mrb[132].mxu0 %vm468_vm4, %v11878_v27  ;;  %v3641_v33 = vadd.f32 %v3590_v12, %v10305_v63  ;;  %v6559_v54 = vpop.f32.mrb[27].mxu1  ;;  %v11880_v63 = vld [vmem:[#allocation137_spill] sm:$0xff] }
 0x32d   : > { %6822 = vmatprep.mubr.msk.bf16.mxu0 %vm7037_vm1, %v11295_v2  ;;  %v4516_v54 = vrot.slane %v10382_v18, 5 }
 0x32e   : > { %6785 = vmatmul.mubr.msk.bf16.gmra.mrb[132].mxu1 %vm468_vm4, %v11879_v60 }
 0x32f   : > { %v3768_v47 = vpop.f32.mrb[28].mxu0  ;;  %6788 = vmatprep.mubr.msk.bf16.mxu1 %vm7037_vm1, %v11295_v2 }
 0x330   : > { %v10461_v58 = vadd.f32 %v3768_v47, %v3640_v8  ;;  %v6596_v37 = vpop.f32.mrb[29].mxu0 }
 0x331   : > { %v3771_v36 = vpop.f32.mrb[30].mxu0  ;;  %v3595_v53 = vpop.f32.mrb[28].mxu1  ;;  %v11884_v37 = vld [vmem:[#allocation145_spill] sm:$0xff] }
 0x332   : > { %v10465_v50 = vadd.f32 %v3771_v36, %v3641_v33  ;;  %v6597_v38 = vpop.f32.mrb[31].mxu0  ;;  %v3642_v42 = vadd.f32 %v3595_v53, %v10316_v3  ;;  %v6562_v45 = vpop.f32.mrb[29].mxu1  ;;  %v10497_v33 = vcombine.high %v10382_v18, %v10382_v18 }
 0x333   : > { %v3598_v49 = vpop.f32.mrb[30].mxu1 }
 0x334   : > { %6823 = vmatmul.mubr.msk.bf16.gmra.mrb[136].mxu0 %vm468_vm4, %v11880_v63  ;;  %v3643_v17 = vadd.f32 %v3598_v49, %v10320_v9  ;;  %v6563_v13 = vpop.f32.mrb[31].mxu1  ;;  %v11882_v9 = vld [vmem:[#allocation7_spill] sm:$0xff]  ;;  %v4518_v49 = vrot.slane %v4516_v54, 4 }
 0x335   : > { %6826 = vmatprep.mubr.msk.bf16.mxu0 %vm7037_vm1, %v11295_v2 }
 0x336   : > { %6789 = vmatmul.mubr.msk.bf16.gmra.mrb[136].mxu1 %vm468_vm4, %v11881_v46 }
 0x337   : > { %v3776_v44 = vpop.f32.mrb[32].mxu0  ;;  %6792 = vmatprep.mubr.msk.bf16.mxu1 %vm7037_vm1, %v11295_v2 }
 0x338   : > { %v10475_v19 = vadd.f32 %v3776_v44, %v3642_v42  ;;  %v6600_v28 = vpop.f32.mrb[33].mxu0  ;;  %v5674_v42 = vrot.slane %v10354_v14, 9 }
 0x339   : > { %v3779_v4 = vpop.f32.mrb[34].mxu0  ;;  %v3603_v34 = vpop.f32.mrb[32].mxu1  ;;  %v4669_v28 = vrot.slane %v10368_v20, 6 }
 0x33a   : > { %v10479_v3 = vadd.f32 %v3779_v4, %v3643_v17  ;;  %v6601_v23 = vpop.f32.mrb[35].mxu0  ;;  %v3644_v39 = vadd.f32 %v3603_v34, %v10332_v15  ;;  %v6566_v10 = vpop.f32.mrb[33].mxu1  ;;  %v4519_v17 = vrot.slane %v10497_v33, 5 }
 0x33b   : > { %v3606_v51 = vpop.f32.mrb[34].mxu1 }
 0x33c   : > { %6827 = vmatmul.mubr.msk.bf16.gmra.mrb[140].mxu0 %vm468_vm4, %v11882_v9  ;;  %v3645_v43 = vadd.f32 %v3606_v51, %v10336_v59  ;;  %v6567_v11 = vpop.f32.mrb[35].mxu1  ;;  %v4513_v59 = vrot.slane %v10368_v20, 5  ;;  %v4520_v9 = vsel %vm7124_vm5, %v4518_v49, %v4519_v17 }
 0x33d   : > { %6830 = vmatprep.mubr.msk.bf16.mxu0 %vm7037_vm1, %v11295_v2  ;;  %v11887_v11 = vld [vmem:[#allocation174_spill] sm:$0xff] }
 0x33e   : > { %6793 = vmatmul.mubr.msk.bf16.gmra.mrb[140].mxu1 %vm468_vm4, %v11883_v21  ;;  %v4515_v63 = vrot.slane %v4513_v59, 4 }
 0x33f   : > { %v3784_v52 = vpop.f32.mrb[36].mxu0  ;;  %6796 = vmatprep.mubr.msk.bf16.mxu1 %vm7037_vm1, %v11295_v2 }
 0x340   : > { %v10489_v26 = vadd.f32 %v3784_v52, %v3644_v39  ;;  %v6604_v8 = vpop.f32.mrb[37].mxu0  ;;  %v4517_v10 = vsel %vm7124_vm5, %v4515_v63, %v4516_v54  ;;  %v11888_v52 = vld [vmem:[#allocation74_spill] sm:$0xff] }
 0x341   : > { %v3787_v7 = vpop.f32.mrb[38].mxu0  ;;  %v3611_v12 = vpop.f32.mrb[36].mxu1  ;;  %v11889_v21 = vpack.c.bf16 %v11887_v11, %v11888_v52  ;;  %v5685_v8 = vrot.slane %v10354_v14, 10 }
 0x342   : > { %v10493_v15 = vadd.f32 %v3787_v7, %v3645_v43  ;;  %v6605_v27 = vpop.f32.mrb[39].mxu0  ;;  %v3646_v47 = vadd.f32 %v3611_v12, %v10347_v6  ;;  %v6570_v60 = vpop.f32.mrb[37].mxu1  ;;  %v11885_v6 = vld [vmem:[#allocation167_spill] sm:$0xff]  ;;  %v4671_v7 = vrot.slane %v4669_v28, 4  ;;  %v4675_v12 = vrot.slane %v10497_v33, 6 }
 0x343   : > { %v3614_v36 = vpop.f32.mrb[38].mxu1  ;;  %v11886_v13 = vpack.c.bf16 %v9334_v30, %v11885_v6  ;;  %v4514_v30 = vsel %vm7124_vm5, %v5674_v42, %v4513_v59  ;;  %v4523_v60 = vcombine.low %v4517_v10, %v4520_v9 }
 0x344   : > { %6831 = vmatmul.mubr.msk.bf16.gmra.mrb[144].mxu0 %vm468_vm4, %v11884_v37  ;;  %v3647_v38 = vadd.f32 %v3614_v36, %v10351_v29  ;;  %v6571_v53 = vpop.f32.mrb[39].mxu1  ;;  %v4672_v29 = vrot.slane %v10382_v18, 6  ;;  %v11890_v37 = vld [vmem:[#allocation6_spill] sm:$0xff] }
 0x345   : > { %6834 = vmatprep.mubr.msk.bf16.mxu0 %vm7037_vm1, %v11295_v2  ;;  %v4670_v53 = vsel %vm7542_vm7, %v5685_v8, %v4669_v28 }
 0x346   : > { %6797 = vmatmul.mubr.msk.bf16.gmra.mrb[144].mxu1 %vm468_vm4, %v11886_v13  ;;  %v4674_v27 = vrot.slane %v4672_v29, 4  ;;  %v4673_v42 = vsel %vm7542_vm7, %v4671_v7, %v4672_v29  ;;  %v4678_v6 = vcombine.low %v10200_v32, %v4670_v53 }
 0x347   : > { %v3792_v45 = vpop.f32.mrb[40].mxu0  ;;  %6800 = vmatprep.mubr.msk.bf16.mxu1 %vm7037_vm1, %v11295_v2 }
 0x348   : > { %v10513_v44 = vadd.f32 %v3792_v45, %v3646_v47  ;;  %v6608_v46 = vpop.f32.mrb[41].mxu0  ;;  %v4522_v47 = vcombine.low %v10027_v35, %v4514_v30 }
 0x349   : > { %v3795_v4 = vpop.f32.mrb[42].mxu0  ;;  %v3619_v39 = vpop.f32.mrb[40].mxu1 }
 0x34a   : > { %v10519_v23 = vadd.f32 %v3795_v4, %v3647_v38  ;;  %v6609_v34 = vpop.f32.mrb[43].mxu0  ;;  %v3648_v51 = vadd.f32 %v3619_v39, %v10375_v0  ;;  %v6574_v43 = vpop.f32.mrb[41].mxu1  ;;  %v4529_v17 = vpack.c.bf16 %v4523_v60, %v4522_v47  ;;  %v11891_v4 = vld [vmem:[#allocation42_spill] sm:$0xff] }
 0x34b   : > { %v3622_v59 = vpop.f32.mrb[42].mxu1 }
 0x34c   : > { %6835 = vmatmul.mubr.msk.bf16.gmra.mrb[148].mxu0 %vm468_vm4, %v11889_v21  ;;  %v3649_v61 = vadd.f32 %v3622_v59, %v10386_v55  ;;  %v6575_v54 = vpop.f32.mrb[43].mxu1  ;;  %v4676_v55 = vsel %vm7542_vm7, %v4674_v27, %v4675_v12  ;;  %v11892_v27 = vld [vmem:[#allocation38_spill] sm:$0xff] }
 0x34d   : > { %6838 = vmatprep.mubr.msk.bf16.mxu0 %vm7037_vm1, %v11295_v2  ;;  %v4679_v13 = vcombine.low %v4673_v42, %v4676_v55  ;;  %v11894_v55 = vld [vmem:[#allocation157_spill] sm:$0xff] }
 0x34e   : > { %6801 = vmatmul.mubr.msk.bf16.gmra.mrb[148].mxu1 %vm468_vm4, %v11890_v37 }
 0x34f   : > { %v3800_v0 = vpop.f32.mrb[44].mxu0  ;;  %6804 = vmatprep.mubr.msk.bf16.mxu1 %vm7037_vm1, %v11295_v2  ;;  %v4685_v30 = vpack.c.bf16 %v4679_v13, %v4678_v6 }
 0x350   : > { %v10540_v36 = vadd.f32 %v3800_v0, %v3648_v51  ;;  %v6612_v38 = vpop.f32.mrb[45].mxu0 }
 0x351   : > { %v3803_v45 = vpop.f32.mrb[46].mxu0  ;;  %v3627_v49 = vpop.f32.mrb[44].mxu1 }
 0x352   : > { %v10550_v35 = vadd.f32 %v3803_v45, %v3649_v61  ;;  %v6613_v63 = vpop.f32.mrb[47].mxu0  ;;  %v3650_v46 = vadd.f32 %v3627_v49, %v10398_v48  ;;  %v6578_v28 = vpop.f32.mrb[45].mxu1 }
 0x353   : > { %v3630_v62 = vpop.f32.mrb[46].mxu1 }
 0x354   : > { %6839 = vmatmul.mubr.msk.bf16.gmra.mrb[152].mxu0 %vm468_vm4, %v11891_v4  ;;  %v3651_v29 = vadd.f32 %v3630_v62, %v10402_v16  ;;  %v6579_v34 = vpop.f32.mrb[47].mxu1 }
 0x355   : > { %6842 = vmatprep.mubr.msk.bf16.mxu0 %vm7037_vm1, %v11295_v2  ;;  %v11896_v34 = vld [vmem:[#allocation86_spill] sm:$0xff] }
 0x356   : > { %6805 = vmatmul.mubr.msk.bf16.gmra.mrb[152].mxu1 %vm468_vm4, %v4529_v17 }
 0x357   : > { %v3808_v39 = vpop.f32.mrb[48].mxu0  ;;  %6848 = vmatprep.mubr.msk.bf16.mxu1 %vm7037_vm1, %v11295_v2 }
 0x358   : > { %v10560_v10 = vadd.f32 %v3808_v39, %v3650_v46  ;;  %v6616_v32 = vpop.f32.mrb[49].mxu0 }
 0x359   : > { %v3811_v9 = vpop.f32.mrb[50].mxu0  ;;  %v3924_v43 = vpop.f32.mrb[48].mxu1 }
 0x35a   : > { %v10564_v48 = vadd.f32 %v3811_v9, %v3651_v29  ;;  %v6617_v51 = vpop.f32.mrb[51].mxu0  ;;  %v3995_v11 = vadd.f32 %v3924_v43, %v10418_v57  ;;  %v6622_v52 = vpop.f32.mrb[49].mxu1 }
 0x35b   : > { %v3927_v16 = vpop.f32.mrb[50].mxu1 }
 0x35c   : > { %6843 = vmatmul.mubr.msk.bf16.gmra.mrb[156].mxu0 %vm468_vm4, %v4685_v30  ;;  %v3996_v21 = vadd.f32 %v3927_v16, %v10422_v1  ;;  %v6623_v8 = vpop.f32.mrb[51].mxu1  ;;  %v11893_v1 = vld [vmem:[#allocation64_spill] sm:$0xff] }
 0x35d   : > { %6886 = vmatprep.mubr.msk.bf16.mxu0 %vm7037_vm1, %v11295_v2 }
 0x35e   : > { %6849 = vmatmul.mubr.msk.bf16.vlgmr.msra.gmra.mrb[156].mxu1 %vm468_vm4, %v11892_v27 }
 0x35f   : > { %v4104_v7 = vpop.f32.mrb[52].mxu0  ;;  %6852 = vmatprep.mubr.msk.bf16.mxu1 %vm7037_vm1, %v11295_v2 }
 0x360   : > { %v10573_v12 = vadd.f32 %v4104_v7, %v3995_v11  ;;  %v6660_v59 = vpop.f32.mrb[53].mxu0  ;;  %v11898_v7 = vld [vmem:[#allocation160_spill] sm:$0xff] }
 0x361   : > { %v4107_v61 = vpop.f32.mrb[54].mxu0  ;;  %v3932_v0 = vpop.f32.mrb[52].mxu1 }
 0x362   : > { %v10577_v57 = vadd.f32 %v4107_v61, %v3996_v21  ;;  %v6661_v54 = vpop.f32.mrb[55].mxu0  ;;  %v3997_v47 = vadd.f32 %v3932_v0, %v10433_v40  ;;  %v6626_v60 = vpop.f32.mrb[53].mxu1 }
 0x363   : > { %v3935_v37 = vpop.f32.mrb[54].mxu1 }
 0x364   : > { %6887 = vmatmul.mubr.msk.bf16.vlgmr.msra.gmra.mrb[160].mxu0 %vm468_vm4, %v11893_v1  ;;  %v3998_v38 = vadd.f32 %v3935_v37, %v10437_v41  ;;  %v6627_v53 = vpop.f32.mrb[55].mxu1  ;;  %v11895_v41 = vld [vmem:[#allocation90_spill] sm:$0xff] }
 0x365   : > { %6890 = vmatprep.mubr.msk.bf16.mxu0 %vm7037_vm1, %v11295_v2 }
 0x366   : > { %6853 = vmatmul.mubr.msk.bf16.gmra.mrb[160].mxu1 %vm468_vm4, %v11894_v55 }
 0x367   : > { %v4112_v42 = vpop.f32.mrb[56].mxu0  ;;  %6856 = vmatprep.mubr.msk.bf16.mxu1 %vm7037_vm1, %v11295_v2 }
 0x368   : > { %v10587_v45 = vadd.f32 %v4112_v42, %v3997_v47  ;;  %v6664_v63 = vpop.f32.mrb[57].mxu0  ;;  %v11900_v42 = vld [vmem:[#allocation52_spill] sm:$0xff] }
 0x369   : > { %v4115_v49 = vpop.f32.mrb[58].mxu0  ;;  %v3940_v6 = vpop.f32.mrb[56].mxu1 }
 0x36a   : > { %v10591_v40 = vadd.f32 %v4115_v49, %v3998_v38  ;;  %v6665_v17 = vpop.f32.mrb[59].mxu0  ;;  %v3999_v13 = vadd.f32 %v3940_v6, %v10447_v56  ;;  %v6630_v46 = vpop.f32.mrb[57].mxu1 }
 0x36b   : > { %v3943_v28 = vpop.f32.mrb[58].mxu1 }
 0x36c   : > { %6891 = vmatmul.mubr.msk.bf16.gmra.mrb[164].mxu0 %vm468_vm4, %v11895_v41  ;;  %v4000_v4 = vadd.f32 %v3943_v28, %v10451_v24  ;;  %v6631_v62 = vpop.f32.mrb[59].mxu1  ;;  %v11897_v24 = vld [vmem:[#allocation93_spill] sm:$0xff] }
 0x36d   : > { %6894 = vmatprep.mubr.msk.bf16.mxu0 %vm7037_vm1, %v11295_v2 }
 0x36e   : > { %6857 = vmatmul.mubr.msk.bf16.gmra.mrb[164].mxu1 %vm468_vm4, %v11896_v34 }
 0x36f   : > { %v4120_v29 = vpop.f32.mrb[60].mxu0  ;;  %6860 = vmatprep.mubr.msk.bf16.mxu1 %vm7037_vm1, %v11295_v2 }
 0x370   : > { %v10601_v39 = vadd.f32 %v4120_v29, %v3999_v13  ;;  %v6668_v30 = vpop.f32.mrb[61].mxu0  ;;  %v11902_v29 = vld [vmem:[#allocation165_spill] sm:$0xff] }
 0x371   : > { %v4123_v32 = vpop.f32.mrb[62].mxu0  ;;  %v3948_v51 = vpop.f32.mrb[60].mxu1 }
 0x372   : > { %v10605_v56 = vadd.f32 %v4123_v32, %v4000_v4  ;;  %v6669_v9 = vpop.f32.mrb[63].mxu0  ;;  %v4001_v43 = vadd.f32 %v3948_v51, %v10461_v58  ;;  %v6634_v11 = vpop.f32.mrb[61].mxu1 }
 0x373   : > { %v3951_v52 = vpop.f32.mrb[62].mxu1 }
 0x374   : > { %6895 = vmatmul.mubr.msk.bf16.gmra.mrb[168].mxu0 %vm468_vm4, %v11897_v24  ;;  %v4002_v16 = vadd.f32 %v3951_v52, %v10465_v50  ;;  %v6635_v21 = vpop.f32.mrb[63].mxu1  ;;  %v11899_v50 = vld [vmem:[#allocation104_spill] sm:$0xff]  ;;  %v4825_v24 = vrot.slane %v10368_v20, 7  ;;  %v4828_v52 = vrot.slane %v10382_v18, 7 }
 0x375   : > { %6898 = vmatprep.mubr.msk.bf16.mxu0 %vm7037_vm1, %v11295_v2  ;;  %v11907_v20 = vld [vmem:[#allocation88_spill] sm:$0xff] }
 0x376   : > { %6861 = vmatmul.mubr.msk.bf16.gmra.mrb[168].mxu1 %vm468_vm4, %v11898_v7 }
 0x377   : > { %v4128_v8 = vpop.f32.mrb[64].mxu0  ;;  %6864 = vmatprep.mubr.msk.bf16.mxu1 %vm7037_vm1, %v11295_v2 }
 0x378   : > { %v10615_v27 = vadd.f32 %v4128_v8, %v4001_v43  ;;  %v6672_v59 = vpop.f32.mrb[65].mxu0 }
 0x379   : > { %v4131_v61 = vpop.f32.mrb[66].mxu0  ;;  %v3956_v0 = vpop.f32.mrb[64].mxu1  ;;  %v11904_v59 = vld [vmem:[#allocation179_spill] sm:$0xff] }
 0x37a   : > { %v10619_v58 = vadd.f32 %v4131_v61, %v4002_v16  ;;  %v6673_v54 = vpop.f32.mrb[67].mxu0  ;;  %v4003_v47 = vadd.f32 %v3956_v0, %v10475_v19  ;;  %v6638_v60 = vpop.f32.mrb[65].mxu1  ;;  %v11905_v61 = vld [vmem:[#allocation173_spill] sm:$0xff] }
 0x37b   : > { %v3959_v1 = vpop.f32.mrb[66].mxu1  ;;  %v11906_v54 = vpack.c.bf16 %v11904_v59, %v11905_v61  ;;  %v5696_v60 = vrot.slane %v10354_v14, 11 }
 0x37c   : > { %6899 = vmatmul.mubr.msk.bf16.gmra.mrb[172].mxu0 %vm468_vm4, %v11899_v50  ;;  %v4004_v37 = vadd.f32 %v3959_v1, %v10479_v3  ;;  %v6639_v38 = vpop.f32.mrb[67].mxu1  ;;  %v11901_v3 = vld [vmem:[#allocation163_spill] sm:$0xff]  ;;  %v4827_v50 = vrot.slane %v4825_v24, 4  ;;  %v4830_v1 = vrot.slane %v4828_v52, 4 }
 0x37d   : > { %6902 = vmatprep.mubr.msk.bf16.mxu0 %vm7037_vm1, %v11295_v2 }
 0x37e   : > { %6865 = vmatmul.mubr.msk.bf16.gmra.mrb[172].mxu1 %vm468_vm4, %v11900_v42 }
 0x37f   : > { %v4136_v53 = vpop.f32.mrb[68].mxu0  ;;  %6868 = vmatprep.mubr.msk.bf16.mxu1 %vm7037_vm1, %v11295_v2 }
 0x380   : > { %v10629_v55 = vadd.f32 %v4136_v53, %v4003_v47  ;;  %v6676_v63 = vpop.f32.mrb[69].mxu0  ;;  %v4983_v47 = vpack.c.bf16 %v11907_v20, %v11759_v25  ;;  %v4826_v25 = vsel %vm7862_vm10, %v5696_v60, %v4825_v24 }
 0x381   : > { %v4139_v49 = vpop.f32.mrb[70].mxu0  ;;  %v3964_v6 = vpop.f32.mrb[68].mxu1 }
 0x382   : > { %v10633_v19 = vadd.f32 %v4139_v49, %v4004_v37  ;;  %v6677_v17 = vpop.f32.mrb[71].mxu0  ;;  %v4005_v13 = vadd.f32 %v3964_v6, %v10489_v26  ;;  %v6642_v46 = vpop.f32.mrb[69].mxu1  ;;  %v4831_v37 = vrot.slane %v10497_v33, 7 }
 0x383   : > { %v3967_v41 = vpop.f32.mrb[70].mxu1  ;;  %v4829_v17 = vsel %vm7862_vm10, %v4827_v50, %v4828_v52 }
 0x384   : > { %6903 = vmatmul.mubr.msk.bf16.gmra.mrb[176].mxu0 %vm468_vm4, %v11901_v3  ;;  %v4006_v28 = vadd.f32 %v3967_v41, %v10493_v15  ;;  %v6643_v4 = vpop.f32.mrb[71].mxu1  ;;  %v11903_v15 = vld [vmem:[#allocation166_spill] sm:$0xff]  ;;  %v4832_v6 = vsel %vm7862_vm10, %v4830_v1, %v4831_v37  ;;  %v4834_v41 = vcombine.low %v10214_v22, %v4826_v25 }
 0x385   : > { %6906 = vmatprep.mubr.msk.bf16.mxu0 %vm7037_vm1, %v11295_v2  ;;  %v11908_v4 = vld [vmem:[#allocation184_spill] sm:$0xff] }
 0x386   : > { %6869 = vmatmul.mubr.msk.bf16.gmra.mrb[176].mxu1 %vm468_vm4, %v11902_v29 }
 0x387   : > { %v4144_v62 = vpop.f32.mrb[72].mxu0  ;;  %6872 = vmatprep.mubr.msk.bf16.mxu1 %vm7037_vm1, %v11295_v2 }
 0x388   : > { %v10643_v34 = vadd.f32 %v4144_v62, %v4005_v13  ;;  %v6680_v30 = vpop.f32.mrb[73].mxu0 }
 0x389   : > { %v4147_v32 = vpop.f32.mrb[74].mxu0  ;;  %v3972_v51 = vpop.f32.mrb[72].mxu1  ;;  %v4984_v30 = vpack.c.bf16 %v10021_v5, %v11909_v31  ;;  %v4980_v5 = vcombine.low %v10382_v18, %v10497_v33 }
 0x38a   : > { %v10647_v26 = vadd.f32 %v4147_v32, %v4006_v28  ;;  %v6681_v9 = vpop.f32.mrb[75].mxu0  ;;  %v4007_v43 = vadd.f32 %v3972_v51, %v10513_v44  ;;  %v6646_v11 = vpop.f32.mrb[73].mxu1  ;;  %v4835_v28 = vcombine.low %v4829_v17, %v4832_v6 }
 0x38b   : > { %v3975_v16 = vpop.f32.mrb[74].mxu1 }
 0x38c   : > { %6907 = vmatmul.mubr.msk.bf16.gmra.mrb[180].mxu0 %vm468_vm4, %v11903_v15  ;;  %v4008_v21 = vadd.f32 %v3975_v16, %v10519_v23  ;;  %v6647_v8 = vpop.f32.mrb[75].mxu1  ;;  %v7027_v15 = vld [vmem:[%s7084_s19 + $0xe8] sm:$0xff] }
 0x38d   : > { %6910 = vmatprep.mubr.msk.bf16.mxu0 %vm7037_vm1, %v11295_v2  ;;  %v5707_v24 = vcombine.high %v7027_v15, %v10354_v14 }
 0x38e   : > { %6873 = vmatmul.mubr.msk.bf16.gmra.mrb[180].mxu1 %vm468_vm4, %v11906_v54 }
 0x38f   : > { %v4152_v7 = vpop.f32.mrb[76].mxu0  ;;  %6876 = vmatprep.mubr.msk.bf16.mxu1 %vm7037_vm1, %v11295_v2  ;;  %v4985_v59 = vpack.c.bf16 %v4980_v5, %v5707_v24 }
 0x390   : > { %v10661_v44 = vadd.f32 %v4152_v7, %v4007_v43  ;;  %v6684_v0 = vpop.f32.mrb[77].mxu0  ;;  %v4841_v43 = vpack.c.bf16 %v4835_v28, %v4834_v41 }
 0x391   : > { %v4155_v23 = vpop.f32.mrb[78].mxu0  ;;  %v3980_v42 = vpop.f32.mrb[76].mxu1 }
 0x392   : > { %v10669_v38 = vadd.f32 %v4155_v23, %v4008_v21  ;;  %v6685_v53 = vpop.f32.mrb[79].mxu0  ;;  %v4009_v63 = vadd.f32 %v3980_v42, %v10540_v36  ;;  %v6650_v49 = vpop.f32.mrb[77].mxu1 }
 0x393   : > { %v3983_v13 = vpop.f32.mrb[78].mxu1 }
 0x394   : > { %6911 = vmatmul.mubr.msk.bf16.gmra.mrb[184].mxu0 %vm468_vm4, %v4983_v47  ;;  %v4010_v46 = vadd.f32 %v3983_v13, %v10550_v35  ;;  %v6651_v3 = vpop.f32.mrb[79].mxu1 }
 0x395   : > { %6914 = vmatprep.mubr.msk.bf16.mxu0 %vm7037_vm1, %v11295_v2 }
 0x396   : > { %6877 = vmatmul.mubr.msk.bf16.gmra.mrb[184].mxu1 %vm468_vm4, %v11908_v4 }
 0x397   : > { %v4160_v36 = vpop.f32.mrb[80].mxu0  ;;  %6880 = vmatprep.mubr.msk.bf16.mxu1 %vm7037_vm1, %v11295_v2 }
 0x398   : > { %v10685_v62 = vadd.f32 %v4160_v36, %v4009_v63  ;;  %v6688_v29 = vpop.f32.mrb[81].mxu0 }
 0x399   : > { %v4163_v32 = vpop.f32.mrb[82].mxu0  ;;  %v3988_v51 = vpop.f32.mrb[80].mxu1 }
 0x39a   : > { %v10691_v35 = vadd.f32 %v4163_v32, %v4010_v46  ;;  %v6689_v9 = vpop.f32.mrb[83].mxu0  ;;  %v4011_v22 = vadd.f32 %v3988_v51, %v10560_v10  ;;  %v6654_v11 = vpop.f32.mrb[81].mxu1 }
 0x39b   : > { %v3991_v52 = vpop.f32.mrb[82].mxu1 }
 0x39c   : > { %6915 = vmatmul.mubr.msk.bf16.gmra.mrb[188].mxu0 %vm468_vm4, %v4984_v30  ;;  %v4012_v16 = vadd.f32 %v3991_v52, %v10564_v48  ;;  %v6655_v21 = vpop.f32.mrb[83].mxu1 }
 0x39d   : > { %6918 = vmatprep.mubr.msk.bf16.mxu0 %vm7037_vm1, %v11295_v2 }
 0x39e   : > { %6881 = vmatmul.mubr.msk.bf16.gmra.mrb[188].mxu1 %vm468_vm4, %v4841_v43 }
 0x39f   : > { %v4168_v8 = vpop.f32.mrb[84].mxu0 }
 0x3a0   : > { %v10703_v10 = vadd.f32 %v4168_v8, %v4011_v22  ;;  %v6692_v7 = vpop.f32.mrb[85].mxu0 }
 0x3a1   : > { %v4171_v61 = vpop.f32.mrb[86].mxu0  ;;  %v4272_v0 = vpop.f32.mrb[84].mxu1 }
 0x3a2   : > { %v10705_v54 = vadd.f32 %v4171_v61, %v4012_v16  ;;  %v6693_v14 = vpop.f32.mrb[87].mxu0  ;;  %v4343_v18 = vadd.f32 %v4272_v0, %v10573_v12  ;;  %v6698_v33 = vpop.f32.mrb[85].mxu1 }
 0x3a3   : > { %v4275_v2 = vpop.f32.mrb[86].mxu1 }
 0x3a4   : > { %6919 = vmatmul.mubr.msk.bf16.gmra.mrb[192].mxu0 %vm468_vm4, %v4985_v59  ;;  %v4344_v48 = vadd.f32 %v4275_v2, %v10577_v57  ;;  %v6699_v20 = vpop.f32.mrb[87].mxu1 }
 0x3a7   : > { %v4421_v47 = vpop.f32.mrb[88].mxu0 }
 0x3a8   : > { %v10710_v60 = vadd.f32 %v4421_v47, %v4343_v18  ;;  %v6736_v50 = vpop.f32.mrb[89].mxu0 }
 0x3a9   : > { %v4424_v1 = vpop.f32.mrb[90].mxu0  ;;  %v4280_v53 = vpop.f32.mrb[88].mxu1 }
 0x3aa   : > { %v10712_v37 = vadd.f32 %v4424_v1, %v4344_v48  ;;  %v6737_v23 = vpop.f32.mrb[91].mxu0  ;;  %v4345_v42 = vadd.f32 %v4280_v53, %v10587_v45  ;;  %v6702_v63 = vpop.f32.mrb[89].mxu1 }
 0x3ab   : > { %v4283_v12 = vpop.f32.mrb[90].mxu1 }
 0x3ac   : > { %v4346_v49 = vadd.f32 %v4283_v12, %v10591_v40  ;;  %v6703_v25 = vpop.f32.mrb[91].mxu1 }
 0x3af   : > { %v4429_v17 = vpop.f32.mrb[92].mxu0 }
 0x3b0   : > { %v10716_v6 = vadd.f32 %v4429_v17, %v4345_v42  ;;  %v6740_v57 = vpop.f32.mrb[93].mxu0 }
 0x3b1   : > { %v4432_v13 = vpop.f32.mrb[94].mxu0  ;;  %v4288_v36 = vpop.f32.mrb[92].mxu1 }
 0x3b2   : > { %v10718_v46 = vadd.f32 %v4432_v13, %v4346_v49  ;;  %v6741_v3 = vpop.f32.mrb[95].mxu0  ;;  %v4347_v41 = vadd.f32 %v4288_v36, %v10601_v39  ;;  %v6706_v28 = vpop.f32.mrb[93].mxu1 }
 0x3b3   : > { %v4291_v4 = vpop.f32.mrb[94].mxu1 }
 0x3b4   : > { %v4348_v45 = vadd.f32 %v4291_v4, %v10605_v56  ;;  %v6707_v29 = vpop.f32.mrb[95].mxu1 }
 0x3b7   : > { %v4437_v31 = vpop.f32.mrb[96].mxu0 }
 0x3b8   : > { %v10722_v30 = vadd.f32 %v4437_v31, %v4347_v41  ;;  %v6744_v40 = vpop.f32.mrb[97].mxu0 }
 0x3b9   : > { %v4440_v32 = vpop.f32.mrb[98].mxu0  ;;  %v4296_v43 = vpop.f32.mrb[96].mxu1 }
 0x3ba   : > { %v10724_v9 = vadd.f32 %v4440_v32, %v4348_v45  ;;  %v6745_v51 = vpop.f32.mrb[99].mxu0  ;;  %v4349_v22 = vadd.f32 %v4296_v43, %v10615_v27  ;;  %v6710_v11 = vpop.f32.mrb[97].mxu1 }
 0x3bb   : > { %v4299_v15 = vpop.f32.mrb[98].mxu1 }
 0x3bc   : > { %v4350_v39 = vadd.f32 %v4299_v15, %v10619_v58  ;;  %v6711_v24 = vpop.f32.mrb[99].mxu1 }
 0x3bf   : > { %v4445_v5 = vpop.f32.mrb[100].mxu0 }
 0x3c0   : > { %v10728_v52 = vadd.f32 %v4445_v5, %v4349_v22  ;;  %v6748_v56 = vpop.f32.mrb[101].mxu0 }
 0x3c1   : > { %v4448_v16 = vpop.f32.mrb[102].mxu0  ;;  %v4304_v7 = vpop.f32.mrb[100].mxu1 }
 0x3c2   : > { %v10730_v21 = vadd.f32 %v4448_v16, %v4350_v39  ;;  %v6749_v8 = vpop.f32.mrb[103].mxu0  ;;  %v4351_v59 = vadd.f32 %v4304_v7, %v10629_v55  ;;  %v6714_v61 = vpop.f32.mrb[101].mxu1 }
 0x3c3   : > { %v4307_v14 = vpop.f32.mrb[102].mxu1 }
 0x3c4   : > { %v4352_v27 = vadd.f32 %v4307_v14, %v10633_v19  ;;  %v6715_v0 = vpop.f32.mrb[103].mxu1 }
 0x3c7   : > { %v4453_v18 = vpop.f32.mrb[104].mxu0 }
 0x3c8   : > { %v10734_v33 = vadd.f32 %v4453_v18, %v4351_v59  ;;  %v6752_v58 = vpop.f32.mrb[105].mxu0 }
 0x3c9   : > { %v4456_v2 = vpop.f32.mrb[106].mxu0  ;;  %v4312_v47 = vpop.f32.mrb[104].mxu1 }
 0x3ca   : > { %v10736_v48 = vadd.f32 %v4456_v2, %v4352_v27  ;;  %v6753_v20 = vpop.f32.mrb[107].mxu0  ;;  %v4353_v50 = vadd.f32 %v4312_v47, %v10643_v34  ;;  %v6718_v1 = vpop.f32.mrb[105].mxu1 }
 0x3cb   : > { %v4315_v23 = vpop.f32.mrb[106].mxu1 }
 0x3cc   : > { %v4354_v55 = vadd.f32 %v4315_v23, %v10647_v26  ;;  %v6719_v53 = vpop.f32.mrb[107].mxu1 }
 0x3cf   : > { %v4461_v42 = vpop.f32.mrb[108].mxu0 }
 0x3d0   : > { %v10740_v63 = vadd.f32 %v4461_v42, %v4353_v50  ;;  %v6756_v19 = vpop.f32.mrb[109].mxu0 }
 0x3d1   : > { %v4464_v12 = vpop.f32.mrb[110].mxu0  ;;  %v4320_v17 = vpop.f32.mrb[108].mxu1 }
 0x3d2   : > { %v10742_v49 = vadd.f32 %v4464_v12, %v4354_v55  ;;  %v6757_v25 = vpop.f32.mrb[111].mxu0  ;;  %v4355_v57 = vadd.f32 %v4320_v17, %v10661_v44  ;;  %v6722_v13 = vpop.f32.mrb[109].mxu1 }
 0x3d3   : > { %v4323_v3 = vpop.f32.mrb[110].mxu1 }
 0x3d4   : > { %v4356_v34 = vadd.f32 %v4323_v3, %v10669_v38  ;;  %v6723_v36 = vpop.f32.mrb[111].mxu1 }
 0x3d7   : > { %v4469_v41 = vpop.f32.mrb[112].mxu0 }
 0x3d8   : > { %v10746_v28 = vadd.f32 %v4469_v41, %v4355_v57  ;;  %v6760_v26 = vpop.f32.mrb[113].mxu0 }
 0x3d9   : > { %v4472_v4 = vpop.f32.mrb[114].mxu0  ;;  %v4328_v31 = vpop.f32.mrb[112].mxu1 }
 0x3da   : > { %v10748_v45 = vadd.f32 %v4472_v4, %v4356_v34  ;;  %v6761_v29 = vpop.f32.mrb[115].mxu0  ;;  %v4357_v40 = vadd.f32 %v4328_v31, %v10685_v62  ;;  %v6726_v32 = vpop.f32.mrb[113].mxu1 }
 0x3db   : > { %v4331_v51 = vpop.f32.mrb[114].mxu1 }
 0x3dc   : > { %v4358_v44 = vadd.f32 %v4331_v51, %v10691_v35  ;;  %v6727_v43 = vpop.f32.mrb[115].mxu1 }
 0x3df   : > { %v4477_v22 = vpop.f32.mrb[116].mxu0 }
 0x3e0   : > { %v10752_v11 = vadd.f32 %v4477_v22, %v4357_v40  ;;  %v6764_v38 = vpop.f32.mrb[117].mxu0 }
 0x3e1   : > { %v4480_v15 = vpop.f32.mrb[118].mxu0  ;;  %v4336_v5 = vpop.f32.mrb[116].mxu1 }
 0x3e2   : > { %v10754_v39 = vadd.f32 %v4480_v15, %v4358_v44  ;;  %v6765_v24 = vpop.f32.mrb[119].mxu0  ;;  %v4359_v56 = vadd.f32 %v4336_v5, %v10703_v10  ;;  %v6730_v16 = vpop.f32.mrb[117].mxu1 }
 0x3e3   : > { %v4339_v8 = vpop.f32.mrb[118].mxu1 }
 0x3e4   : > { %v4360_v62 = vadd.f32 %v4339_v8, %v10705_v54  ;;  %v6731_v7 = vpop.f32.mrb[119].mxu1 }
 0x3e7   : > { %v4485_v59 = vpop.f32.mrb[120].mxu0 }
 0x3e8   : > { %v10758_v61 = vadd.f32 %v4485_v59, %v4359_v56  ;;  %v6768_v35 = vpop.f32.mrb[121].mxu0 }
 0x3e9   : > { %v4488_v14 = vpop.f32.mrb[122].mxu0  ;;  %v4578_v18 = vpop.f32.mrb[120].mxu1 }
 0x3ea   : > { %v10760_v27 = vadd.f32 %v4488_v14, %v4360_v62  ;;  %v6769_v0 = vpop.f32.mrb[123].mxu0  ;;  %v4649_v58 = vadd.f32 %v4578_v18, %v10710_v60  ;;  %v6774_v2 = vpop.f32.mrb[121].mxu1 }
 0x3eb   : > { %v4581_v20 = vpop.f32.mrb[122].mxu1 }
 0x3ec   : > { %v4650_v10 = vadd.f32 %v4581_v20, %v10712_v37  ;;  %v6775_v47 = vpop.f32.mrb[123].mxu1 }
 0x3ef   : > { %v4734_v50 = vpop.f32.mrb[124].mxu0 }
 0x3f0   : > { %v10764_v1 = vadd.f32 %v4734_v50, %v4649_v58  ;;  %v6812_v54 = vpop.f32.mrb[125].mxu0 }
 0x3f1   : > { %v4737_v23 = vpop.f32.mrb[126].mxu0  ;;  %v4586_v42 = vpop.f32.mrb[124].mxu1 }
 0x3f2   : > { %v10766_v55 = vadd.f32 %v4737_v23, %v4650_v10  ;;  %v6813_v53 = vpop.f32.mrb[127].mxu0  ;;  %v4651_v19 = vadd.f32 %v4586_v42, %v10716_v6  ;;  %v6778_v12 = vpop.f32.mrb[125].mxu1 }
 0x3f3   : > { %v4589_v25 = vpop.f32.mrb[126].mxu1 }
 0x3f4   : > { %v4652_v60 = vadd.f32 %v4589_v25, %v10718_v46  ;;  %v6779_v17 = vpop.f32.mrb[127].mxu1 }
 0x3f7   : > { %v4742_v57 = vpop.f32.mrb[128].mxu0 }
 0x3f8   : > { %v10770_v13 = vadd.f32 %v4742_v57, %v4651_v19  ;;  %v6816_v37 = vpop.f32.mrb[129].mxu0 }
 0x3f9   : > { %v4745_v3 = vpop.f32.mrb[130].mxu0  ;;  %v4594_v41 = vpop.f32.mrb[128].mxu1 }
 0x3fa   : > { %v10772_v34 = vadd.f32 %v4745_v3, %v4652_v60  ;;  %v6817_v36 = vpop.f32.mrb[131].mxu0  ;;  %v4653_v26 = vadd.f32 %v4594_v41, %v10722_v30  ;;  %v6782_v4 = vpop.f32.mrb[129].mxu1 }
 0x3fb   : > { %v4597_v29 = vpop.f32.mrb[130].mxu1 }
 0x3fc   : > { %v4654_v6 = vadd.f32 %v4597_v29, %v10724_v9  ;;  %v6783_v31 = vpop.f32.mrb[131].mxu1 }
 0x3ff   : > { %v4750_v40 = vpop.f32.mrb[132].mxu0 }
 0x400   : > { %v10776_v32 = vadd.f32 %v4750_v40, %v4653_v26  ;;  %v6820_v46 = vpop.f32.mrb[133].mxu0 }
 0x401   : > { %v4753_v51 = vpop.f32.mrb[134].mxu0  ;;  %v4602_v22 = vpop.f32.mrb[132].mxu1 }
 0x402   : > { %v10778_v44 = vadd.f32 %v4753_v51, %v4654_v6  ;;  %v6821_v43 = vpop.f32.mrb[135].mxu0  ;;  %v4655_v38 = vadd.f32 %v4602_v22, %v10728_v52  ;;  %v6786_v15 = vpop.f32.mrb[133].mxu1 }
 0x403   : > { %v4605_v24 = vpop.f32.mrb[134].mxu1 }
 0x404   : > { %v4656_v30 = vadd.f32 %v4605_v24, %v10730_v21  ;;  %v6787_v5 = vpop.f32.mrb[135].mxu1 }
 0x407   : > { %v4758_v56 = vpop.f32.mrb[136].mxu0 }
 0x408   : > { %v10782_v16 = vadd.f32 %v4758_v56, %v4655_v38  ;;  %v6824_v9 = vpop.f32.mrb[137].mxu0 }
 0x409   : > { %v4761_v8 = vpop.f32.mrb[138].mxu0  ;;  %v4610_v59 = vpop.f32.mrb[136].mxu1 }
 0x40a   : > { %v10784_v62 = vadd.f32 %v4761_v8, %v4656_v30  ;;  %v6825_v7 = vpop.f32.mrb[139].mxu0  ;;  %v4657_v35 = vadd.f32 %v4610_v59, %v10734_v33  ;;  %v6790_v14 = vpop.f32.mrb[137].mxu1 }
 0x40b   : > { %v4613_v0 = vpop.f32.mrb[138].mxu1 }
 0x40c   : > { %v4658_v52 = vadd.f32 %v4613_v0, %v10736_v48  ;;  %v6791_v18 = vpop.f32.mrb[139].mxu1 }
 0x40f   : > { %v4766_v58 = vpop.f32.mrb[140].mxu0 }
 0x410   : > { %v10788_v2 = vadd.f32 %v4766_v58, %v4657_v35  ;;  %v6828_v21 = vpop.f32.mrb[141].mxu0 }
 0x411   : > { %v4769_v20 = vpop.f32.mrb[142].mxu0  ;;  %v4618_v50 = vpop.f32.mrb[140].mxu1 }
 0x412   : > { %v10790_v10 = vadd.f32 %v4769_v20, %v4658_v52  ;;  %v6829_v47 = vpop.f32.mrb[143].mxu0  ;;  %v4659_v54 = vadd.f32 %v4618_v50, %v10740_v63  ;;  %v6794_v23 = vpop.f32.mrb[141].mxu1 }
 0x413   : > { %v4621_v53 = vpop.f32.mrb[142].mxu1 }
 0x414   : > { %v4660_v33 = vadd.f32 %v4621_v53, %v10742_v49  ;;  %v6795_v42 = vpop.f32.mrb[143].mxu1 }
 0x417   : > { %v4774_v19 = vpop.f32.mrb[144].mxu0 }
 0x418   : > { %v10794_v12 = vadd.f32 %v4774_v19, %v4659_v54  ;;  %v6832_v48 = vpop.f32.mrb[145].mxu0 }
 0x419   : > { %v4777_v25 = vpop.f32.mrb[146].mxu0  ;;  %v4626_v57 = vpop.f32.mrb[144].mxu1 }
 0x41a   : > { %v10796_v60 = vadd.f32 %v4777_v25, %v4660_v33  ;;  %v6833_v17 = vpop.f32.mrb[147].mxu0  ;;  %v4661_v37 = vadd.f32 %v4626_v57, %v10746_v28  ;;  %v6798_v3 = vpop.f32.mrb[145].mxu1 }
 0x41b   : > { %v4629_v36 = vpop.f32.mrb[146].mxu1 }
 0x41c   : > { %v4662_v63 = vadd.f32 %v4629_v36, %v10748_v45  ;;  %v6799_v41 = vpop.f32.mrb[147].mxu1 }
 0x41f   : > { %v4782_v26 = vpop.f32.mrb[148].mxu0 }
 0x420   : > { %v10800_v4 = vadd.f32 %v4782_v26, %v4661_v37  ;;  %v6836_v49 = vpop.f32.mrb[149].mxu0 }
 0x421   : > { %v4785_v29 = vpop.f32.mrb[150].mxu0  ;;  %v4634_v40 = vpop.f32.mrb[148].mxu1 }
 0x422   : > { %v10802_v6 = vadd.f32 %v4785_v29, %v4662_v63  ;;  %v6837_v31 = vpop.f32.mrb[151].mxu0  ;;  %v4663_v46 = vadd.f32 %v4634_v40, %v10752_v11  ;;  %v6802_v51 = vpop.f32.mrb[149].mxu1 }
 0x423   : > { %v4637_v43 = vpop.f32.mrb[150].mxu1 }
 0x424   : > { %v4664_v28 = vadd.f32 %v4637_v43, %v10754_v39  ;;  %v6803_v22 = vpop.f32.mrb[151].mxu1 }
 0x427   : > { %v4790_v38 = vpop.f32.mrb[152].mxu0 }
 0x428   : > { %v10806_v15 = vadd.f32 %v4790_v38, %v4663_v46  ;;  %v6840_v45 = vpop.f32.mrb[153].mxu0 }
 0x429   : > { %v4793_v24 = vpop.f32.mrb[154].mxu0  ;;  %v4642_v56 = vpop.f32.mrb[152].mxu1 }
 0x42a   : > { %v10808_v30 = vadd.f32 %v4793_v24, %v4664_v28  ;;  %v6841_v5 = vpop.f32.mrb[155].mxu0  ;;  %v4665_v9 = vadd.f32 %v4642_v56, %v10758_v61  ;;  %v6806_v8 = vpop.f32.mrb[153].mxu1 }
 0x42b   : > { %v4645_v7 = vpop.f32.mrb[154].mxu1 }
 0x42c   : > { %v4666_v11 = vadd.f32 %v4645_v7, %v10760_v27  ;;  %v6807_v59 = vpop.f32.mrb[155].mxu1  ;;  %v10821_v27 = vld [vmem:[%s10916_s2] ss:$0 sm:$0xff] }
 0x42f   : > { %v4798_v35 = vpop.f32.mrb[156].mxu0 }
 0x430   : > { %v10812_v14 = vadd.f32 %v4798_v35, %v4665_v9  ;;  %v6844_v39 = vpop.f32.mrb[157].mxu0 }
 0x431   : > { %v4801_v0 = vpop.f32.mrb[158].mxu0  ;;  %v4890_v58 = vpop.f32.mrb[156].mxu1 }
 0x432   : > { %v10814_v52 = vadd.f32 %v4801_v0, %v4666_v11  ;;  %v6845_v18 = vpop.f32.mrb[159].mxu0  ;;  %v4961_v21 = vadd.f32 %v4890_v58, %v10764_v1  ;;  %v6850_v20 = vpop.f32.mrb[157].mxu1 }
 0x433   : > { %v4893_v47 = vpop.f32.mrb[158].mxu1 }
 0x434   : > { %v4962_v61 = vadd.f32 %v4893_v47, %v10766_v55  ;;  %v6851_v50 = vpop.f32.mrb[159].mxu1 }
 0x437   : > { %v5034_v54 = vpop.f32.mrb[160].mxu0 }
 0x438   : > { %v5105_v23 = vadd.f32 %v5034_v54, %v4961_v21  ;;  %v6888_v53 = vpop.f32.mrb[161].mxu0 }
 0x439   : > { %v5037_v33 = vpop.f32.mrb[162].mxu0  ;;  %v4898_v25 = vpop.f32.mrb[160].mxu1 }
 0x43a   : > { %v5130_v42 = vadd.f32 %v10821_v27, %v5105_v23  ;;  %v5106_v19 = vadd.f32 %v5037_v33, %v4962_v61  ;;  %v6889_v48 = vpop.f32.mrb[163].mxu0  ;;  %v4963_v1 = vadd.f32 %v4898_v25, %v10770_v13  ;;  %v6854_v55 = vpop.f32.mrb[161].mxu1 }
 0x43b   : > { %v4901_v37 = vpop.f32.mrb[162].mxu1 }
 0x43c   : > { %v5166_v17 = vcombine.high %v5130_v42, %v5130_v42  ;;  %v5131_v57 = vadd.f32 %v10821_v27, %v5106_v19  ;;  %v4964_v36 = vadd.f32 %v4901_v37, %v10772_v34  ;;  %v6855_v63 = vpop.f32.mrb[163].mxu1 }
 0x43e   : > { %v5190_v3 = vcombine.low %v5130_v42, %v5166_v17  ;;  %5217 = vst.msk [vmem:[#allocation2 + $0x8] sm:$0xf] %vm5216_vm11, %v5131_v57  ;;  %v5167_v31 = vcombine.high %v5131_v57, %v5131_v57 }
 0x43f   : > { %v5042_v41 = vpop.f32.mrb[164].mxu0 }
 0x440   : > { %5215 = vst.msk [vmem:[#allocation2] sm:$0xff] %vm5214_vm12, %v5190_v3  ;;  %v5107_v26 = vadd.f32 %v5042_v41, %v4963_v1  ;;  %v6892_v49 = vpop.f32.mrb[165].mxu0 }
 0x441   : > { %v5045_v29 = vpop.f32.mrb[166].mxu0  ;;  %v4906_v51 = vpop.f32.mrb[164].mxu1 }
 0x442   : > { %v5132_v13 = vadd.f32 %v10821_v27, %v5107_v26  ;;  %v5108_v40 = vadd.f32 %v5045_v29, %v4964_v36  ;;  %v6893_v46 = vpop.f32.mrb[167].mxu0  ;;  %v4965_v43 = vadd.f32 %v4906_v51, %v10776_v32  ;;  %v6858_v34 = vpop.f32.mrb[165].mxu1 }
 0x443   : > { %v4909_v45 = vpop.f32.mrb[166].mxu1 }
 0x444   : > { %v5168_v28 = vcombine.high %v5132_v13, %v5132_v13  ;;  %v5191_v22 = vcombine.low %v5167_v31, %v5132_v13  ;;  %v5133_v38 = vadd.f32 %v10821_v27, %v5108_v40  ;;  %v4966_v24 = vadd.f32 %v4909_v45, %v10778_v44  ;;  %v6859_v56 = vpop.f32.mrb[167].mxu1 }
 0x445   : > { %v5241_v18 = vld [vmem:[#allocation2 + $0x8] sm:$0xf] }
 0x446   : > { %5218 = vst.msk [vmem:[#allocation2 + $0x10] sm:$0xff] %vm5214_vm12, %v5191_v22  ;;  %v5169_v5 = vcombine.high %v5133_v38, %v5133_v38 }
 0x447   : > { %5219 = vst.msk [vmem:[#allocation2 + $0x18] sm:$0xf] %vm5216_vm11, %v5168_v28  ;;  %v5050_v9 = vpop.f32.mrb[168].mxu0  ;;  %v5240_v47 = vld [vmem:[#allocation2] sm:$0xff] }
 0x448   : > { %v5192_v8 = vcombine.low %v5133_v38, %v5169_v5  ;;  %v5109_v7 = vadd.f32 %v5050_v9, %v4965_v43  ;;  %v6896_v11 = vpop.f32.mrb[169].mxu0 }
 0x449   : > { %v5053_v59 = vpop.f32.mrb[170].mxu0  ;;  %v4914_v0 = vpop.f32.mrb[168].mxu1 }
 0x44a   : > { %5220 = vst.msk [vmem:[#allocation2 + $0x20] sm:$0xff] %vm5214_vm12, %v5192_v8  ;;  %v5134_v32 = vadd.f32 %v10821_v27, %v5109_v7  ;;  %v5110_v35 = vadd.f32 %v5053_v59, %v4966_v24  ;;  %v6897_v39 = vpop.f32.mrb[171].mxu0  ;;  %v4967_v58 = vadd.f32 %v4914_v0, %v10782_v16  ;;  %v6862_v44 = vpop.f32.mrb[169].mxu1 }
 0x44b   : > { %v4917_v54 = vpop.f32.mrb[170].mxu1 }
 0x44c   : > { %v5170_v21 = vcombine.high %v5134_v32, %v5134_v32  ;;  %5221 = vst.msk [vmem:[#allocation2 + $0x28] sm:$0xf] %vm5216_vm11, %v5134_v32  ;;  %v5135_v20 = vadd.f32 %v10821_v27, %v5110_v35  ;;  %v4968_v33 = vadd.f32 %v4917_v54, %v10784_v62  ;;  %v6863_v19 = vpop.f32.mrb[171].mxu1 }
 0x44d   : > { %v5253_v61 = vld [vmem:[#allocation2 + $0x10] sm:$0xff] }
 0x44e   : > { %v5254_v50 = vld [vmem:[#allocation2 + $0x18] sm:$0xf]  ;;  %v5265_v23 = vmax.f32 %v5240_v47, %v5253_v61  ;;  %v5171_v42 = vcombine.high %v5135_v20, %v5135_v20  ;;  %v5193_v48 = vcombine.low %v5170_v21, %v5135_v20 }
 0x44f   : > { %v5266_v53 = vmax.f32 %v5241_v18, %v5254_v50  ;;  %v5058_v25 = vpop.f32.mrb[172].mxu0 }
 0x450   : > { %5277 = vst.msk [vmem:[#allocation2] sm:$0xff] %vm5214_vm12, %v5265_v23  ;;  %v5111_v16 = vadd.f32 %v5058_v25, %v4967_v58  ;;  %v6900_v1 = vpop.f32.mrb[173].mxu0  ;;  %5222 = vst.msk [vmem:[#allocation2 + $0x30] sm:$0xff] %vm5214_vm12, %v5193_v48 }
 0x451   : > { %5278 = vst.msk [vmem:[#allocation2 + $0x8] sm:$0xf] %vm5216_vm11, %v5266_v53  ;;  %5223 = vst.msk [vmem:[#allocation2 + $0x38] sm:$0xf] %vm5216_vm11, %v5171_v42  ;;  %v5061_v17 = vpop.f32.mrb[174].mxu0  ;;  %v4922_v37 = vpop.f32.mrb[172].mxu1 }
 0x452   : > { %v5136_v55 = vadd.f32 %v10821_v27, %v5111_v16  ;;  %v5112_v57 = vadd.f32 %v5061_v17, %v4968_v33  ;;  %v6901_v62 = vpop.f32.mrb[175].mxu0  ;;  %v4969_v3 = vadd.f32 %v4922_v37, %v10788_v2  ;;  %v6866_v63 = vpop.f32.mrb[173].mxu1  ;;  %v5242_v49 = vld [vmem:[#allocation2 + $0x20] sm:$0xff] }
 0x453   : > { %v4925_v26 = vpop.f32.mrb[174].mxu1  ;;  %v5243_v43 = vld [vmem:[#allocation2 + $0x28] sm:$0xf] }
 0x454   : > { %v5172_v36 = vcombine.high %v5136_v55, %v5136_v55  ;;  %v5137_v41 = vadd.f32 %v10821_v27, %v5112_v57  ;;  %v4970_v31 = vadd.f32 %v4925_v26, %v10790_v10  ;;  %v6867_v13 = vpop.f32.mrb[175].mxu1 }
 0x456   : > { %v5194_v29 = vcombine.low %v5136_v55, %v5172_v36  ;;  %5225 = vst.msk [vmem:[#allocation2 + $0x48] sm:$0xf] %vm5216_vm11, %v5137_v41  ;;  %v5173_v56 = vcombine.high %v5137_v41, %v5137_v41 }
 0x457   : > { %v5255_v28 = vld [vmem:[#allocation2 + $0x30] sm:$0xff]  ;;  %v5066_v2 = vpop.f32.mrb[176].mxu0 }
 0x458   : > { %v5289_v40 = vld [vmem:[#allocation2] ss:$2 sm:$0x3f]  ;;  %v5301_v46 = vld [vmem:[#allocation2 + $0x1] ss:$2 sm:$0x3f]  ;;  %v5267_v34 = vmax.f32 %v5242_v49, %v5255_v28  ;;  %v5113_v45 = vadd.f32 %v5066_v2, %v4969_v3 }
 0x459   : > { %v5312_v51 = vmax.f32 %v5289_v40, %v5301_v46  ;;  %v5256_v22 = vld [vmem:[#allocation2 + $0x38] sm:$0xf]  ;;  %5224 = vst.msk [vmem:[#allocation2 + $0x40] sm:$0xff] %vm5214_vm12, %v5194_v29  ;;  %v6904_v24 = vpop.f32.mrb[177].mxu0  ;;  %v4930_v9 = vpop.f32.mrb[176].mxu1 }
 0x45a   : > { %v5268_v38 = vmax.f32 %v5243_v43, %v5256_v22  ;;  %v5069_v5 = vpop.f32.mrb[178].mxu0  ;;  %5279 = vst.msk [vmem:[#allocation2 + $0x10] sm:$0xff] %vm5214_vm12, %v5267_v34  ;;  %v5138_v8 = vadd.f32 %v10821_v27, %v5113_v45  ;;  %v4971_v32 = vadd.f32 %v4930_v9, %v10794_v12  ;;  %v6870_v35 = vpop.f32.mrb[177].mxu1 }
 0x45b   : > { %vm5318_vm13 = vcmp.gt.f32.partialorder %v5312_v51, 0.0  ;;  %v5324_v10 = vmul.f32 0.01, %v5312_v51  ;;  %v5114_v7 = vadd.f32 %v5069_v5, %v4970_v31  ;;  %v6905_v11 = vpop.f32.mrb[179].mxu0  ;;  %v4933_v18 = vpop.f32.mrb[178].mxu1 }
 0x45c   : > { %5280 = vst.msk [vmem:[#allocation2 + $0x18] sm:$0xf] %vm5216_vm11, %v5268_v38  ;;  %v5174_v39 = vcombine.high %v5138_v8, %v5138_v8  ;;  %v5195_v0 = vcombine.low %v5173_v56, %v5138_v8  ;;  %v4972_v21 = vadd.f32 %v4933_v18, %v10796_v60  ;;  %v6871_v44 = vpop.f32.mrb[179].mxu1 }
 0x45d   : > { %v5330_v59 = vsel %vm5318_vm13, %v5312_v51, %v5324_v10  ;;  %v5139_v58 = vadd.f32 %v10821_v27, %v5114_v7  ;;  %v5245_v57 = vld [vmem:[#allocation2 + $0x48] sm:$0xf] }
 0x45e   : > { %5337 = vst.msk [vmem:[%s10855_s23] sm:$0x3f] %vm5336_vm14, %v5330_v59 }
 0x45f   : > { %5226 = vst.msk [vmem:[#allocation2 + $0x50] sm:$0xff] %vm5214_vm12, %v5195_v0  ;;  %v5175_v20 = vcombine.high %v5139_v58, %v5139_v58  ;;  %v5074_v47 = vpop.f32.mrb[180].mxu0 }
 0x460   : > { %5227 = vst.msk [vmem:[#allocation2 + $0x58] sm:$0xf] %vm5216_vm11, %v5174_v39  ;;  %v5115_v61 = vadd.f32 %v5074_v47, %v4971_v32  ;;  %v6908_v50 = vpop.f32.mrb[181].mxu0  ;;  %v5244_v37 = vld [vmem:[#allocation2 + $0x40] sm:$0xff] }
 0x461   : > { %v5196_v12 = vcombine.low %v5139_v58, %v5175_v20  ;;  %v5077_v54 = vpop.f32.mrb[182].mxu0  ;;  %v4938_v60 = vpop.f32.mrb[180].mxu1 }
 0x462   : > { %v5140_v33 = vadd.f32 %v10821_v27, %v5115_v61  ;;  %v5116_v42 = vadd.f32 %v5077_v54, %v4972_v21  ;;  %v6909_v48 = vpop.f32.mrb[183].mxu0  ;;  %v4973_v25 = vadd.f32 %v4938_v60, %v10800_v4  ;;  %v6874_v1 = vpop.f32.mrb[181].mxu1 }
 0x463   : > { %v5291_v23 = vld [vmem:[#allocation2 + $0x10] ss:$2 sm:$0x3f]  ;;  %v5303_v53 = vld [vmem:[#allocation2 + $0x11] ss:$2 sm:$0x3f] }
 0x464   : > { %v5313_v19 = vmax.f32 %v5291_v23, %v5303_v53  ;;  %5228 = vst.msk [vmem:[#allocation2 + $0x60] sm:$0xff] %vm5214_vm12, %v5196_v12  ;;  %v5176_v16 = vcombine.high %v5140_v33, %v5140_v33  ;;  %v5141_v17 = vadd.f32 %v10821_v27, %v5116_v42  ;;  %v4941_v62 = vpop.f32.mrb[182].mxu1 }
 0x465   : > { %5229 = vst.msk [vmem:[#allocation2 + $0x68] sm:$0xf] %vm5216_vm11, %v5140_v33  ;;  %v4974_v63 = vadd.f32 %v4941_v62, %v10802_v6  ;;  %v6875_v49 = vpop.f32.mrb[183].mxu1 }
 0x466   : > { %vm5319_vm15 = vcmp.gt.f32.partialorder %v5313_v19, 0.0  ;;  %v5325_v55 = vmul.f32 0.01, %v5313_v19  ;;  %v5257_v3 = vld [vmem:[#allocation2 + $0x50] sm:$0xff]  ;;  %v5177_v41 = vcombine.high %v5141_v17, %v5141_v17  ;;  %v5197_v26 = vcombine.low %v5176_v16, %v5141_v17 }
 0x467   : > { %v5258_v36 = vld [vmem:[#allocation2 + $0x58] sm:$0xf]  ;;  %v5269_v29 = vmax.f32 %v5244_v37, %v5257_v3  ;;  %v5082_v13 = vpop.f32.mrb[184].mxu0 }
 0x468   : > { %v5331_v4 = vsel %vm5319_vm15, %v5313_v19, %v5325_v55  ;;  %v5270_v31 = vmax.f32 %v5245_v57, %v5258_v36  ;;  %5230 = vst.msk [vmem:[#allocation2 + $0x70] sm:$0xff] %vm5214_vm12, %v5197_v26  ;;  %v5117_v40 = vadd.f32 %v5082_v13, %v4973_v25  ;;  %v6912_v46 = vpop.f32.mrb[185].mxu0 }
 0x469   : > { %5338 = vst.msk [vmem:[%s10855_s23 + $0x8] sm:$0x3f] %vm5336_vm14, %v5331_v4  ;;  %v5085_v6 = vpop.f32.mrb[186].mxu0  ;;  %v4946_v22 = vpop.f32.mrb[184].mxu1 }
 0x46a   : > { %5231 = vst.msk [vmem:[#allocation2 + $0x78] sm:$0xf] %vm5216_vm11, %v5177_v41  ;;  %5282 = vst.msk [vmem:[#allocation2 + $0x28] sm:$0xf] %vm5216_vm11, %v5270_v31  ;;  %v5142_v51 = vadd.f32 %v10821_v27, %v5117_v40  ;;  %v5118_v43 = vadd.f32 %v5085_v6, %v4974_v63  ;;  %v6913_v28 = vpop.f32.mrb[187].mxu0  ;;  %v4975_v2 = vadd.f32 %v4946_v22, %v10806_v15  ;;  %v6878_v38 = vpop.f32.mrb[185].mxu1 }
 0x46b   : > { %5281 = vst.msk [vmem:[#allocation2 + $0x20] sm:$0xff] %vm5214_vm12, %v5269_v29  ;;  %v4949_v24 = vpop.f32.mrb[186].mxu1  ;;  %v5246_v10 = vld [vmem:[#allocation2 + $0x60] sm:$0xff] }
 0x46c   : > { %v5178_v34 = vcombine.high %v5142_v51, %v5142_v51  ;;  %v5143_v45 = vadd.f32 %v10821_v27, %v5118_v43  ;;  %v4976_v56 = vadd.f32 %v4949_v24, %v10808_v30  ;;  %v6879_v9 = vpop.f32.mrb[187].mxu1  ;;  %v5247_v8 = vld [vmem:[#allocation2 + $0x68] sm:$0xf] }
 0x46e   : > { %v5198_v5 = vcombine.low %v5142_v51, %v5178_v34  ;;  %5233 = vst.msk [vmem:[#allocation2 + $0x88] sm:$0xf] %vm5216_vm11, %v5143_v45  ;;  %v5179_v30 = vcombine.high %v5143_v45, %v5143_v45 }
 0x46f   : > { %v5259_v7 = vld [vmem:[#allocation2 + $0x70] sm:$0xff]  ;;  %v5090_v59 = vpop.f32.mrb[188].mxu0 }
 0x470   : > { %v5271_v39 = vmax.f32 %v5246_v10, %v5259_v7  ;;  %5232 = vst.msk [vmem:[#allocation2 + $0x80] sm:$0xff] %vm5214_vm12, %v5198_v5  ;;  %v5119_v0 = vadd.f32 %v5090_v59, %v4975_v2  ;;  %v6916_v58 = vpop.f32.mrb[189].mxu0 }
 0x471   : > { %v5260_v11 = vld [vmem:[#allocation2 + $0x78] sm:$0xf]  ;;  %v5093_v44 = vpop.f32.mrb[190].mxu0  ;;  %v4954_v47 = vpop.f32.mrb[188].mxu1 }
 0x472   : > { %v5293_v32 = vld [vmem:[#allocation2 + $0x20] ss:$2 sm:$0x3f]  ;;  %v5305_v35 = vld [vmem:[#allocation2 + $0x21] ss:$2 sm:$0x3f]  ;;  %v5272_v15 = vmax.f32 %v5247_v8, %v5260_v11  ;;  %v5144_v21 = vadd.f32 %v10821_v27, %v5119_v0  ;;  %v5120_v61 = vadd.f32 %v5093_v44, %v4976_v56  ;;  %v4977_v12 = vadd.f32 %v4954_v47, %v10812_v14 }
 0x473   : > { %v5314_v18 = vmax.f32 %v5293_v32, %v5305_v35  ;;  %5283 = vst.msk [vmem:[#allocation2 + $0x30] sm:$0xff] %vm5214_vm12, %v5271_v39  ;;  %v6917_v50 = vpop.f32.mrb[191].mxu0  ;;  %v6882_v53 = vpop.f32.mrb[189].mxu1 }
 0x474   : > { %5284 = vst.msk [vmem:[#allocation2 + $0x38] sm:$0xf] %vm5216_vm11, %v5272_v15  ;;  %v5180_v54 = vcombine.high %v5144_v21, %v5144_v21  ;;  %v5199_v23 = vcombine.low %v5179_v30, %v5144_v21  ;;  %v4957_v42 = vpop.f32.mrb[190].mxu1  ;;  %v5145_v19 = vadd.f32 %v10821_v27, %v5120_v61 }
 0x475   : > { %vm5320_vm0 = vcmp.gt.f32.partialorder %v5314_v18, 0.0  ;;  %v5326_v20 = vmul.f32 0.01, %v5314_v18  ;;  %v4978_v60 = vadd.f32 %v4957_v42, %v10814_v52  ;;  %v6883_v48 = vpop.f32.mrb[191].mxu1  ;;  %v5249_v52 = vld [vmem:[#allocation2 + $0x88] sm:$0xf] }
 0x476   : > { %5234 = vst.msk [vmem:[#allocation2 + $0x90] sm:$0xff] %vm5214_vm12, %v5199_v23  ;;  %v5181_v25 = vcombine.high %v5145_v19, %v5145_v19 }
 0x477   : > { %v5332_v33 = vsel %vm5320_vm0, %v5314_v18, %v5326_v20  ;;  %5235 = vst.msk [vmem:[#allocation2 + $0x98] sm:$0xf] %vm5216_vm11, %v5180_v54  ;;  %v5098_v16 = vpop.f32.mrb[192].mxu0  ;;  %v5248_v49 = vld [vmem:[#allocation2 + $0x80] sm:$0xff] }
 0x478   : > { %5339 = vst.msk [vmem:[%s10855_s23 + $0x10] sm:$0x3f] %vm5336_vm14, %v5332_v33  ;;  %v5121_v1 = vadd.f32 %v5098_v16, %v4977_v12  ;;  %v6920_v14 = vpop.f32.mrb[193].mxu0  ;;  %v5200_v57 = vcombine.low %v5145_v19, %v5181_v25 }
 0x479   : > { %v5101_v3 = vpop.f32.mrb[194].mxu0 }
 0x47a   : > { %v5146_v37 = vadd.f32 %v10821_v27, %v5121_v1  ;;  %5236 = vst.msk [vmem:[#allocation2 + $0xa0] sm:$0xff] %vm5214_vm12, %v5200_v57  ;;  %v5122_v36 = vadd.f32 %v5101_v3, %v4978_v60  ;;  %v6921_v63 = vpop.f32.mrb[195].mxu0 }
 0x47b   : > { %v5295_v17 = vld [vmem:[#allocation2 + $0x30] ss:$2 sm:$0x3f]  ;;  %v5307_v55 = vld [vmem:[#allocation2 + $0x31] ss:$2 sm:$0x3f] }
 0x47c   : > { %v5315_v62 = vmax.f32 %v5295_v17, %v5307_v55  ;;  %v5182_v26 = vcombine.high %v5146_v37, %v5146_v37  ;;  %5237 = vst.msk [vmem:[#allocation2 + $0xa8] sm:$0xf] %vm5216_vm11, %v5146_v37  ;;  %v5147_v31 = vadd.f32 %v10821_v27, %v5122_v36 }
 0x47d   : > { %v5261_v4 = vld [vmem:[#allocation2 + $0x90] sm:$0xff] }
 0x47e   : > { %vm5321_vm1 = vcmp.gt.f32.partialorder %v5315_v62, 0.0  ;;  %v5327_v41 = vmul.f32 0.01, %v5315_v62  ;;  %v5262_v29 = vld [vmem:[#allocation2 + $0x98] sm:$0xf]  ;;  %v5273_v40 = vmax.f32 %v5248_v49, %v5261_v4  ;;  %v5183_v6 = vcombine.high %v5147_v31, %v5147_v31 }
 0x47f   : > { %v5274_v46 = vmax.f32 %v5249_v52, %v5262_v29  ;;  %v5201_v51 = vcombine.low %v5182_v26, %v5147_v31 }
 0x480   : > { %v5333_v13 = vsel %vm5321_vm1, %v5315_v62, %v5327_v41  ;;  %5285 = vst.msk [vmem:[#allocation2 + $0x40] sm:$0xff] %vm5214_vm12, %v5273_v40 }
 0x481   : > { %5340 = vst.msk [vmem:[%s10855_s23 + $0x18] sm:$0x3f] %vm5336_vm14, %v5333_v13  ;;  %v5250_v43 = vld [vmem:[#allocation2 + $0xa0] sm:$0xff] }
 0x482   : > { %5286 = vst.msk [vmem:[#allocation2 + $0x48] sm:$0xf] %vm5216_vm11, %v5274_v46  ;;  %5239 = vst.msk [vmem:[#allocation2 + $0xb8] sm:$0xf] %vm5216_vm11, %v5183_v6 }
 0x483   : > { %5238 = vst.msk [vmem:[#allocation2 + $0xb0] sm:$0xff] %vm5214_vm12, %v5201_v51  ;;  %v5251_v2 = vld [vmem:[#allocation2 + $0xa8] sm:$0xf] }
 0x489   : > { %v5297_v28 = vld [vmem:[#allocation2 + $0x40] ss:$2 sm:$0x3f]  ;;  %v5309_v22 = vld [vmem:[#allocation2 + $0x41] ss:$2 sm:$0x3f] }
 0x48a   : > { %v5316_v27 = vmax.f32 %v5297_v28, %v5309_v22  ;;  %v5263_v34 = vld [vmem:[#allocation2 + $0xb0] sm:$0xff]  ;;  %v5264_v38 = vld [vmem:[#allocation2 + $0xb8] sm:$0xf] }
 0x48b   : > { %v5275_v45 = vmax.f32 %v5250_v43, %v5263_v34  ;;  %v5276_v24 = vmax.f32 %v5251_v2, %v5264_v38 }
 0x48c   : > { %vm5322_vm2 = vcmp.gt.f32.partialorder %v5316_v27, 0.0  ;;  %v5328_v10 = vmul.f32 0.01, %v5316_v27 }
 0x48d   : > { %5287 = vst.msk [vmem:[#allocation2 + $0x50] sm:$0xff] %vm5214_vm12, %v5275_v45 }
 0x48e   : > { %5288 = vst.msk [vmem:[#allocation2 + $0x58] sm:$0xf] %vm5216_vm11, %v5276_v24  ;;  %v5334_v5 = vsel %vm5322_vm2, %v5316_v27, %v5328_v10 }
 0x48f   : > { %5341 = vst.msk [vmem:[%s10855_s23 + $0x20] sm:$0x3f] %vm5336_vm14, %v5334_v5 }
 0x495   : > { %v5299_v56 = vld [vmem:[#allocation2 + $0x50] ss:$2 sm:$0x3f]  ;;  %v5311_v9 = vld [vmem:[#allocation2 + $0x51] ss:$2 sm:$0x3f] }
 0x496   : > { %v5317_v8 = vmax.f32 %v5299_v56, %v5311_v9 }
 0x498   : > { %vm5323_vm3 = vcmp.gt.f32.partialorder %v5317_v8, 0.0  ;;  %v5329_v7 = vmul.f32 0.01, %v5317_v8 }
 0x49a   : > { %v5335_v11 = vsel %vm5323_vm3, %v5317_v8, %v5329_v7 }
 0x49b   : > { %5342 = vst.msk [vmem:[%s10855_s23 + $0x28] sm:$0x3f] %vm5336_vm14, %v5335_v11 }
 0x49c PF: > { %s13_s12 = sadd.s32 1, %s7034_s12  }
 0x49d   : > { %p10_p4 = scmp.ge.s32.totalorder %s13_s12, 4  }
 0x49f   :  { %12 = sbr.rel (!%p10_p4) target bundleno = 1 (0x1), region = 98 }

</bundles_post_ra>
